<compile_context>
chip_gen: v7x
topology: tpu7x:2x2x1
jax: 0.10.0
libtpu: 0.0.40
codegen_flags: <defaults>
</compile_context>

<pallas_src>
import math

import jax
import jax.numpy as jnp
from jax.experimental import pallas as pl
from jax.experimental.pallas import tpu as pltpu


# --------------------------------------------------------------------------- kernel

def _make_kernel(H, W, C):
    HW = H * W
    GUARD = W + 1                          # 1 zero halo row + 1 wrap-guard lane
    INT = -(-GUARD // 128) * 128           # lane offset of pixel (0,0): 128-aligned
    MV = INT + HW + GUARD                  # flat padded-activation length
    BASE = INT - GUARD                     # lane read by tap (kh=0, kw=0) for m=0

    def kernel(x_ref, wconv_ref, bconv_ref,
               ccw1_ref, ccb1_ref, ccw2_ref, ccb2_ref,
               wcmp_ref, bcmp_ref,
               o_ref,
               pad_a, pad_b, qz_ref):
        # x_ref/o_ref : (1, C, H*W) f32 (lane-dense)
        # wconv       : (54, C, C) bf16  (conv_idx*9 + kh*3+kw, cout, cin; zero-padded)
        # bconv       : (6, C, 1) f32
        # ccw1/ccw2   : (8, C, Cr) f32   ccb1: (8, 1, Cr)   ccb2: (8, C, 1)
        # wcmp        : (C, 2C) bf16     bcmp: (C, 1) f32
        # pad_a/pad_b : VMEM (C, MV) bf16 -- ping-pong zero-padded conv inputs
        # qz_ref      : VMEM (C, HW) bf16 -- q1z stash (bounds live ranges)

        # Border masks: output column 0 drops the kw=0 tap group and column W-1
        # drops the kw=2 group (those taps hit row-wrapped lanes in the flat
        # layout; the true zero-padded value is 0).
        col = jax.lax.broadcasted_iota(jnp.int32, (1, HW), 1) % W
        mask_l = (col != 0).astype(jnp.float32)
        mask_r = (col != W - 1).astype(jnp.float32)

        def store_pad(dst, val):
            # dense (C, HW) f32 activation -> zero-padded flat bf16 conv input
            dst[:, 0:INT] = jnp.zeros((C, INT), jnp.bfloat16)
            dst[:, INT:INT + HW] = val.astype(jnp.bfloat16)
            dst[:, INT + HW:] = jnp.zeros((C, GUARD), jnp.bfloat16)

        def conv3x3(src, idx):
            # 3x3 conv + bias + LeakyReLU(0.05): 9 accumulating K=C bf16 MXU dots
            # reading contiguous lane-slices of the padded buffer (no im2col).
            def tap_group(kw):
                g = None
                for kh in range(3):
                    off = BASE + kh * W + kw
                    t = jnp.dot(wconv_ref[idx * 9 + kh * 3 + kw],
                                src[:, off:off + HW],
                                preferred_element_type=jnp.float32)
                    g = t if g is None else g + t
                return g

            acc = tap_group(1) + mask_l * tap_group(0) + mask_r * tap_group(2)
            y = acc + bconv_ref[idx]
            return jnp.where(y >= 0.0, y, 0.05 * y)           # (C, HW) f32

        def cc_attention(val, module):
            # CC channel attention -> (C, 1); one-pass mean / unbiased-std stats.
            s = jnp.sum(val, axis=1, keepdims=True)
            ss = jnp.sum(val * val, axis=1, keepdims=True)
            mean = s * (1.0 / HW)
            var = jnp.maximum(ss - HW * mean * mean, 0.0) * (1.0 / (HW - 1))
            std = jnp.sqrt(var)

            def mlp(feat, branch):
                i = 2 * module + branch
                h = jnp.maximum(
                    jnp.sum(ccw1_ref[i] * feat, axis=0, keepdims=True) + ccb1_ref[i],
                    0.0)                                                   # (1, Cr)
                return jax.nn.sigmoid(
                    jnp.sum(ccw2_ref[i] * h, axis=1, keepdims=True) + ccb2_ref[i])

            return (mlp(mean, 0) + mlp(std, 1)) * 0.5                      # (C, 1)

        # -------------------------------------------------- conv_block0
        store_pad(pad_a, x_ref[0])
        store_pad(pad_b, conv3x3(pad_a, 0))
        store_pad(pad_a, conv3x3(pad_b, 1))
        feat = conv3x3(pad_a, 2)                               # x_feature_shot

        # -------------------------------------------------- lattice combine 1
        x2 = x_ref[0]
        fea_ca1 = cc_attention(feat, 0)
        x_ca1 = cc_attention(x2, 1)
        p1z = x2 + fea_ca1 * feat
        q1z = feat + x_ca1 * x2
        store_pad(pad_b, p1z)                                  # conv_block1 input
        qz_ref[...] = q1z.astype(jnp.bfloat16)

        # -------------------------------------------------- conv_block1
        store_pad(pad_a, conv3x3(pad_b, 3))
        store_pad(pad_b, conv3x3(pad_a, 4))
        x_long = conv3x3(pad_b, 5)                             # x_feat_long

        # -------------------------------------------------- combine 2 + compress
        q1z = qz_ref[...].astype(jnp.float32)
        fea_ca2 = cc_attention(q1z, 2)
        p3z = x_long + fea_ca2 * q1z
        x_ca2 = cc_attention(x_long, 3)
        q3z = q1z + x_ca2 * x_long

        lhs = jnp.concatenate(
            [p3z.astype(jnp.bfloat16), q3z.astype(jnp.bfloat16)], axis=0)  # (2C, HW)
        out = jnp.dot(wcmp_ref[...], lhs,
                      preferred_element_type=jnp.float32) + bcmp_ref[...]
        o_ref[0] = out

    return kernel, MV


# --------------------------------------------------------------------------- wrapper

def lattice_block_forward(x_nchw, packed):
    # (N, nFeat, H, W) f32 -> (N, nFeat, H, W) f32.  NCHW-native: only free
    # trailing-dim reshapes on both ends, no transposes.
    N, C, H, W = x_nchw.shape
    assert C % 8 == 0, "nFeat must be a multiple of 8 for the sublane layout"
    HW = H * W
    x_flat = x_nchw.reshape(N, C, HW).astype(jnp.float32)

    names = ("wconv", "bconv", "ccw1", "ccb1", "ccw2", "ccb2", "wcmp", "bcmp")
    weight_args = [packed[k] for k in names]

    def _const_spec(a):
        nd = a.ndim
        return pl.BlockSpec(a.shape, lambda n, _nd=nd: (0,) * _nd)

    kernel, MV = _make_kernel(H, W, C)

    out = pl.pallas_call(
        kernel,
        out_shape=jax.ShapeDtypeStruct((N, C, HW), jnp.float32),
        grid=(N,),
        in_specs=[pl.BlockSpec((1, C, HW), lambda n: (n, 0, 0))]
                 + [_const_spec(a) for a in weight_args],
        out_specs=pl.BlockSpec((1, C, HW), lambda n: (n, 0, 0)),
        scratch_shapes=[
            pltpu.VMEM((C, MV), jnp.bfloat16),   # padded conv input (ping)
            pltpu.VMEM((C, MV), jnp.bfloat16),   # padded conv input (pong)
            pltpu.VMEM((C, HW), jnp.bfloat16),   # q1z stash
        ],
        compiler_params=pltpu.CompilerParams(
            dimension_semantics=("parallel",)),
    )(x_flat, *weight_args)

    return out.reshape(N, C, H, W)


# --------------------------------------------------------------------------- params

def init_params(key, nFeat, nDiff, reduction=16):
    # PyTorch-style uniform(-1/sqrt(fan_in), +1/sqrt(fan_in)) synthetic init.
    # Conv / compress weights are rounded to bf16 (the dtype the kernel uses)
    # so the f32 reference shares identical weights.
    C, D = nFeat, nFeat - nDiff
    Cr = max(C // reduction, 1)
    keys = iter(jax.random.split(key, 64))

    def uni(shape, fan_in):
        b = 1.0 / math.sqrt(fan_in)
        return jax.random.uniform(next(keys), shape, jnp.float32, -b, b)

    def conv3(cin, cout):
        w = uni((cout, cin, 3, 3), 9 * cin)                     # OIHW like torch
        w = w.astype(jnp.bfloat16).astype(jnp.float32)
        return w, uni((cout,), 9 * cin)

    convs = [conv3(C, D), conv3(D, D), conv3(D, C),
             conv3(C, D), conv3(D, D), conv3(D, C)]

    def cc_branch():
        return dict(w1=uni((Cr, C), C), b1=uni((Cr,), C),
                    w2=uni((C, Cr), Cr), b2=uni((C,), Cr))

    cc = [dict(mean=cc_branch(), std=cc_branch()) for _ in range(4)]

    wc = uni((C, 2 * C), 2 * C).astype(jnp.bfloat16).astype(jnp.float32)
    bc = uni((C,), 2 * C)
    return dict(convs=convs, cc=cc, wc=wc, bc=bc)


def pack_params(params, nFeat, nDiff, reduction=16):
    # Consolidate the 19 logical parameters into 8 kernel-friendly slabs.
    C = nFeat
    wconv = jnp.zeros((6, 9, C, C), jnp.float32)
    bconv = jnp.zeros((6, C, 1), jnp.float32)
    for i, (w, b) in enumerate(params["convs"]):
        cout, cin = w.shape[0], w.shape[1]
        taps = jnp.transpose(w, (2, 3, 0, 1)).reshape(9, cout, cin)  # tap = kh*3+kw
        wconv = wconv.at[i, :, :cout, :cin].set(taps)
        bconv = bconv.at[i, :cout, 0].set(b)

    ccw1, ccb1, ccw2, ccb2 = [], [], [], []
    for m in range(4):
        for br in ("mean", "std"):
            q = params["cc"][m][br]
            ccw1.append(q["w1"].T)             # (C, Cr)
            ccb1.append(q["b1"][None, :])      # (1, Cr)
            ccw2.append(q["w2"])               # (C, Cr)
            ccb2.append(q["b2"][:, None])      # (C, 1)

    return dict(
        wconv=wconv.reshape(54, C, C).astype(jnp.bfloat16),
        bconv=bconv,
        ccw1=jnp.stack(ccw1), ccb1=jnp.stack(ccb1),
        ccw2=jnp.stack(ccw2), ccb2=jnp.stack(ccb2),
        wcmp=params["wc"].astype(jnp.bfloat16),
        bcmp=params["bc"][:, None],
    )


# --------------------------------------------------------------------------- reference

def reference_forward(x, params):
    # Pure-JAX f32 reference of LatticeBlock.forward (same weights as the kernel).
    def conv3(v, w, b):
        y = jax.lax.conv_general_dilated(
            v, w, (1, 1), "SAME", dimension_numbers=("NCHW", "OIHW", "NCHW"))
        y = y + b[None, :, None, None]
        return jnp.where(y >= 0.0, y, 0.05 * y)

    def cc(v, m):
        n, c = v.shape[0], v.shape[1]
        mean = jnp.mean(v, axis=(2, 3))
        std = jnp.std(v.reshape(n, c, -1), axis=2, ddof=1)      # torch.std (unbiased)

        def branch(feat, q):
            h = jnp.maximum(feat @ q["w1"].T + q["b1"], 0.0)
            return jax.nn.sigmoid(h @ q["w2"].T + q["b2"])

        a = (branch(mean, params["cc"][m]["mean"])
             + branch(std, params["cc"][m]["std"])) * 0.5
        return a[:, :, None, None]

    (w0a, b0a), (w0b, b0b), (w0c, b0c), (w1a, b1a), (w1b, b1b), (w1c, b1c) = params["convs"]
    fs = conv3(conv3(conv3(x, w0a, b0a), w0b, b0b), w0c, b0c)
    fea_ca1 = cc(fs, 0)
    x_ca1 = cc(x, 1)
    p1z = x + fea_ca1 * fs
    q1z = fs + x_ca1 * x
    xl = conv3(conv3(conv3(p1z, w1a, b1a), w1b, b1b), w1c, b1c)
    fea_ca2 = cc(q1z, 2)
    p3z = xl + fea_ca2 * q1z
    x_ca2 = cc(xl, 3)
    q3z = q1z + x_ca2 * xl
    cat = jnp.concatenate([p3z, q3z], axis=1)
    return jnp.einsum("ck,nkhw->nchw", params["wc"], cat) + params["bc"][None, :, None, None]


# --------------------------------------------------------------------------- main

if __name__ == "__main__":
    nFeat, nDiff, nFeat_slice = 32, 16, 4   # nFeat_slice unused in forward (matches torch)
    N, H, W = 2, 16, 16

    root = jax.random.PRNGKey(0)
    k_params, k_x = jax.random.split(root)
    params = init_params(k_params, nFeat, nDiff)
    packed = pack_params(params, nFeat, nDiff)
    x = jax.random.normal(k_x, (N, nFeat, H, W), jnp.float32)

    fwd = jax.jit(lambda inp: lattice_block_forward(inp, packed))
    out = fwd(x)
    jax.block_until_ready(out)

    assert out.shape == (N, nFeat, H, W), out.shape
    assert bool(jnp.all(jnp.isfinite(out)))

    ref = reference_forward(x, params)
    max_err = float(jnp.max(jnp.abs(out - ref)))
    assert max_err < 1e-1, f"max abs diff vs f32 reference: {max_err}"

    print("KERNEL_OK")
</pallas_src>

<mosaic_0001>
module attributes {stable_mosaic.version = 11 : i64} {
  func.func @kernel(%arg0: i32, %arg1: memref<1x32x256xf32, #tpu.memory_space<vmem>>, %arg2: memref<54x32x32xbf16, #tpu.memory_space<vmem>>, %arg3: memref<6x32x1xf32, #tpu.memory_space<vmem>>, %arg4: memref<8x32x2xf32, #tpu.memory_space<vmem>>, %arg5: memref<8x1x2xf32, #tpu.memory_space<vmem>>, %arg6: memref<8x32x2xf32, #tpu.memory_space<vmem>>, %arg7: memref<8x32x1xf32, #tpu.memory_space<vmem>>, %arg8: memref<32x64xbf16, #tpu.memory_space<vmem>>, %arg9: memref<32x1xf32, #tpu.memory_space<vmem>>, %arg10: memref<1x32x256xf32, #tpu.memory_space<vmem>>, %arg11: memref<32x401xbf16, #tpu.memory_space<vmem>>, %arg12: memref<32x401xbf16, #tpu.memory_space<vmem>>, %arg13: memref<32x256xbf16, #tpu.memory_space<vmem>>) attributes {dimension_semantics = [#tpu.dimension_semantics<parallel>], iteration_bounds = array<i64: 2>, scalar_prefetch = 0 : i64, scratch_operands = 3 : i64, tpu.core_type = #tpu.core_type<tc>, window_params = [{transform_indices = @transform_0, window_bounds = array<i64: 1, 32, 256>}, {pipeline_mode = #tpu.pipeline_mode<synchronous>, transform_indices = @transform_1, window_bounds = array<i64: 54, 32, 32>}, {pipeline_mode = #tpu.pipeline_mode<synchronous>, transform_indices = @transform_2, window_bounds = array<i64: 6, 32, 1>}, {pipeline_mode = #tpu.pipeline_mode<synchronous>, transform_indices = @transform_3, window_bounds = array<i64: 8, 32, 2>}, {pipeline_mode = #tpu.pipeline_mode<synchronous>, transform_indices = @transform_4, window_bounds = array<i64: 8, 1, 2>}, {pipeline_mode = #tpu.pipeline_mode<synchronous>, transform_indices = @transform_5, window_bounds = array<i64: 8, 32, 2>}, {pipeline_mode = #tpu.pipeline_mode<synchronous>, transform_indices = @transform_6, window_bounds = array<i64: 8, 32, 1>}, {pipeline_mode = #tpu.pipeline_mode<synchronous>, transform_indices = @transform_7, window_bounds = array<i64: 32, 64>}, {pipeline_mode = #tpu.pipeline_mode<synchronous>, transform_indices = @transform_8, window_bounds = array<i64: 32, 1>}, {transform_indices = @transform_9, window_bounds = array<i64: 1, 32, 256>}]} {
    %0 = tpu.iota {dimensions = array<i32: 1>} : vector<1x256xi32>
    %c16_i32 = arith.constant 16 : i32
    %c0_i32 = arith.constant 0 : i32
    %1 = arith.cmpi eq, %c16_i32, %c0_i32 : i32
    %c1_i32 = arith.constant 1 : i32
    %2 = arith.select %1, %c1_i32, %c16_i32 : i32
    %3 = vector.broadcast %2 : i32 to vector<1x256xi32>
    %4 = arith.remsi %0, %3 : vector<1x256xi32>
    %c0_i32_0 = arith.constant 0 : i32
    %5 = vector.broadcast %c0_i32_0 : i32 to vector<1x256xi32>
    %6 = arith.cmpi ne, %4, %5 : vector<1x256xi32>
    %c0_i32_1 = arith.constant 0 : i32
    %7 = vector.broadcast %c0_i32_1 : i32 to vector<1x256xi32>
    %8 = arith.cmpi slt, %4, %7 : vector<1x256xi32>
    %c0_i32_2 = arith.constant 0 : i32
    %9 = arith.cmpi slt, %2, %c0_i32_2 : i32
    %10 = vector.broadcast %9 : i1 to vector<1x256xi1>
    %11 = vector.broadcast %10 : vector<1x256xi1> to vector<1x256xi1>
    %12 = arith.xori %8, %11 : vector<1x256xi1>
    %13 = arith.andi %12, %6 : vector<1x256xi1>
    %14 = vector.broadcast %2 : i32 to vector<1x256xi32>
    %15 = arith.addi %4, %14 : vector<1x256xi32>
    %16 = arith.select %13, %15, %4 : vector<1x256xi1>, vector<1x256xi32>
    %c0_i32_3 = arith.constant 0 : i32
    %17 = vector.broadcast %c0_i32_3 : i32 to vector<1x256xi32>
    %18 = arith.cmpi ne, %16, %17 : vector<1x256xi32>
    %19 = arith.extui %18 : vector<1x256xi1> to vector<1x256xi32>
    %20 = arith.sitofp %19 : vector<1x256xi32> to vector<1x256xf32>
    %c15_i32 = arith.constant 15 : i32
    %21 = vector.broadcast %c15_i32 : i32 to vector<1x256xi32>
    %22 = arith.cmpi ne, %16, %21 : vector<1x256xi32>
    %23 = arith.extui %22 : vector<1x256xi1> to vector<1x256xi32>
    %24 = arith.sitofp %23 : vector<1x256xi32> to vector<1x256xf32>
    %c0 = arith.constant 0 : index
    %c0_4 = arith.constant 0 : index
    %c0_5 = arith.constant 0 : index
    %25 = vector.load %arg1[%c0, %c0_4, %c0_5] : memref<1x32x256xf32, #tpu.memory_space<vmem>>, vector<1x32x256xf32>
    %26 = vector.shape_cast %25 : vector<1x32x256xf32> to vector<32x256xf32>
    %cst = arith.constant 0.000000e+00 : bf16
    %27 = vector.broadcast %cst : bf16 to vector<32x128xbf16>
    %c0_6 = arith.constant 0 : index
    %c0_7 = arith.constant 0 : index
    %28 = vector.load %arg11[%c0_6, %c0_7] : memref<32x401xbf16, #tpu.memory_space<vmem>>, vector<32x128xbf16>
    tpu.vector_store %arg11[%c0_6, %c0_7], %27 {strides = array<i32>} : memref<32x401xbf16, #tpu.memory_space<vmem>>, vector<32x128xbf16>,
    %29 = arith.truncf %26 : vector<32x256xf32> to vector<32x256xbf16>
    %c0_8 = arith.constant 0 : index
    %c128 = arith.constant 128 : index
    %30 = vector.load %arg11[%c0_8, %c128] : memref<32x401xbf16, #tpu.memory_space<vmem>>, vector<32x256xbf16>
    tpu.vector_store %arg11[%c0_8, %c128], %29 {strides = array<i32>} : memref<32x401xbf16, #tpu.memory_space<vmem>>, vector<32x256xbf16>,
    %cst_9 = arith.constant 0.000000e+00 : bf16
    %31 = vector.broadcast %cst_9 : bf16 to vector<32x17xbf16>
    %c0_10 = arith.constant 0 : index
    %c384 = arith.constant 384 : index
    %32 = vector.load %arg11[%c0_10, %c384] : memref<32x401xbf16, #tpu.memory_space<vmem>>, vector<32x17xbf16>
    tpu.vector_store %arg11[%c0_10, %c384], %31 {strides = array<i32>} : memref<32x401xbf16, #tpu.memory_space<vmem>>, vector<32x17xbf16>,
    %c1 = arith.constant 1 : index
    %c0_11 = arith.constant 0 : index
    %c0_12 = arith.constant 0 : index
    %33 = vector.load %arg2[%c1, %c0_11, %c0_12] : memref<54x32x32xbf16, #tpu.memory_space<vmem>>, vector<1x32x32xbf16>
    %34 = vector.shape_cast %33 : vector<1x32x32xbf16> to vector<32x32xbf16>
    %c0_13 = arith.constant 0 : index
    %c112 = arith.constant 112 : index
    %35 = vector.load %arg11[%c0_13, %c112] : memref<32x401xbf16, #tpu.memory_space<vmem>>, vector<32x256xbf16>
    %cst_14 = arith.constant dense<0.000000e+00> : vector<32x256xf32>
    %36 = tpu.matmul %34, %35, %cst_14 {dimension_numbers = #tpu.dot_dimension_numbers<[1], [0], [0], [1], [0, 0, 1, 1], [], []>} : vector<32x32xbf16>, vector<32x256xbf16>, vector<32x256xf32> -> vector<32x256xf32>
    %c4 = arith.constant 4 : index
    %c0_15 = arith.constant 0 : index
    %c0_16 = arith.constant 0 : index
    %37 = vector.load %arg2[%c4, %c0_15, %c0_16] : memref<54x32x32xbf16, #tpu.memory_space<vmem>>, vector<1x32x32xbf16>
    %38 = vector.shape_cast %37 : vector<1x32x32xbf16> to vector<32x32xbf16>
    %c0_17 = arith.constant 0 : index
    %c128_18 = arith.constant 128 : index
    %39 = vector.load %arg11[%c0_17, %c128_18] : memref<32x401xbf16, #tpu.memory_space<vmem>>, vector<32x256xbf16>
    %cst_19 = arith.constant dense<0.000000e+00> : vector<32x256xf32>
    %40 = tpu.matmul %38, %39, %cst_19 {dimension_numbers = #tpu.dot_dimension_numbers<[1], [0], [0], [1], [0, 0, 1, 1], [], []>} : vector<32x32xbf16>, vector<32x256xbf16>, vector<32x256xf32> -> vector<32x256xf32>
    %41 = arith.addf %36, %40 : vector<32x256xf32>
    %c7 = arith.constant 7 : index
    %c0_20 = arith.constant 0 : index
    %c0_21 = arith.constant 0 : index
    %42 = vector.load %arg2[%c7, %c0_20, %c0_21] : memref<54x32x32xbf16, #tpu.memory_space<vmem>>, vector<1x32x32xbf16>
    %43 = vector.shape_cast %42 : vector<1x32x32xbf16> to vector<32x32xbf16>
    %c0_22 = arith.constant 0 : index
    %c144 = arith.constant 144 : index
    %44 = vector.load %arg11[%c0_22, %c144] : memref<32x401xbf16, #tpu.memory_space<vmem>>, vector<32x256xbf16>
    %cst_23 = arith.constant dense<0.000000e+00> : vector<32x256xf32>
    %45 = tpu.matmul %43, %44, %cst_23 {dimension_numbers = #tpu.dot_dimension_numbers<[1], [0], [0], [1], [0, 0, 1, 1], [], []>} : vector<32x32xbf16>, vector<32x256xbf16>, vector<32x256xf32> -> vector<32x256xf32>
    %46 = arith.addf %41, %45 : vector<32x256xf32>
    %c0_24 = arith.constant 0 : index
    %c0_25 = arith.constant 0 : index
    %c0_26 = arith.constant 0 : index
    %47 = vector.load %arg2[%c0_24, %c0_25, %c0_26] : memref<54x32x32xbf16, #tpu.memory_space<vmem>>, vector<1x32x32xbf16>
    %48 = vector.shape_cast %47 : vector<1x32x32xbf16> to vector<32x32xbf16>
    %c0_27 = arith.constant 0 : index
    %c111 = arith.constant 111 : index
    %49 = vector.load %arg11[%c0_27, %c111] : memref<32x401xbf16, #tpu.memory_space<vmem>>, vector<32x256xbf16>
    %cst_28 = arith.constant dense<0.000000e+00> : vector<32x256xf32>
    %50 = tpu.matmul %48, %49, %cst_28 {dimension_numbers = #tpu.dot_dimension_numbers<[1], [0], [0], [1], [0, 0, 1, 1], [], []>} : vector<32x32xbf16>, vector<32x256xbf16>, vector<32x256xf32> -> vector<32x256xf32>
    %c3 = arith.constant 3 : index
    %c0_29 = arith.constant 0 : index
    %c0_30 = arith.constant 0 : index
    %51 = vector.load %arg2[%c3, %c0_29, %c0_30] : memref<54x32x32xbf16, #tpu.memory_space<vmem>>, vector<1x32x32xbf16>
    %52 = vector.shape_cast %51 : vector<1x32x32xbf16> to vector<32x32xbf16>
    %c0_31 = arith.constant 0 : index
    %c127 = arith.constant 127 : index
    %53 = vector.load %arg11[%c0_31, %c127] : memref<32x401xbf16, #tpu.memory_space<vmem>>, vector<32x256xbf16>
    %cst_32 = arith.constant dense<0.000000e+00> : vector<32x256xf32>
    %54 = tpu.matmul %52, %53, %cst_32 {dimension_numbers = #tpu.dot_dimension_numbers<[1], [0], [0], [1], [0, 0, 1, 1], [], []>} : vector<32x32xbf16>, vector<32x256xbf16>, vector<32x256xf32> -> vector<32x256xf32>
    %55 = arith.addf %50, %54 : vector<32x256xf32>
    %c6 = arith.constant 6 : index
    %c0_33 = arith.constant 0 : index
    %c0_34 = arith.constant 0 : index
    %56 = vector.load %arg2[%c6, %c0_33, %c0_34] : memref<54x32x32xbf16, #tpu.memory_space<vmem>>, vector<1x32x32xbf16>
    %57 = vector.shape_cast %56 : vector<1x32x32xbf16> to vector<32x32xbf16>
    %c0_35 = arith.constant 0 : index
    %c143 = arith.constant 143 : index
    %58 = vector.load %arg11[%c0_35, %c143] : memref<32x401xbf16, #tpu.memory_space<vmem>>, vector<32x256xbf16>
    %cst_36 = arith.constant dense<0.000000e+00> : vector<32x256xf32>
    %59 = tpu.matmul %57, %58, %cst_36 {dimension_numbers = #tpu.dot_dimension_numbers<[1], [0], [0], [1], [0, 0, 1, 1], [], []>} : vector<32x32xbf16>, vector<32x256xbf16>, vector<32x256xf32> -> vector<32x256xf32>
    %60 = arith.addf %55, %59 : vector<32x256xf32>
    %61 = vector.broadcast %20 : vector<1x256xf32> to vector<32x256xf32>
    %62 = arith.mulf %61, %60 : vector<32x256xf32>
    %63 = arith.addf %46, %62 : vector<32x256xf32>
    %c2 = arith.constant 2 : index
    %c0_37 = arith.constant 0 : index
    %c0_38 = arith.constant 0 : index
    %64 = vector.load %arg2[%c2, %c0_37, %c0_38] : memref<54x32x32xbf16, #tpu.memory_space<vmem>>, vector<1x32x32xbf16>
    %65 = vector.shape_cast %64 : vector<1x32x32xbf16> to vector<32x32xbf16>
    %c0_39 = arith.constant 0 : index
    %c113 = arith.constant 113 : index
    %66 = vector.load %arg11[%c0_39, %c113] : memref<32x401xbf16, #tpu.memory_space<vmem>>, vector<32x256xbf16>
    %cst_40 = arith.constant dense<0.000000e+00> : vector<32x256xf32>
    %67 = tpu.matmul %65, %66, %cst_40 {dimension_numbers = #tpu.dot_dimension_numbers<[1], [0], [0], [1], [0, 0, 1, 1], [], []>} : vector<32x32xbf16>, vector<32x256xbf16>, vector<32x256xf32> -> vector<32x256xf32>
    %c5 = arith.constant 5 : index
    %c0_41 = arith.constant 0 : index
    %c0_42 = arith.constant 0 : index
    %68 = vector.load %arg2[%c5, %c0_41, %c0_42] : memref<54x32x32xbf16, #tpu.memory_space<vmem>>, vector<1x32x32xbf16>
    %69 = vector.shape_cast %68 : vector<1x32x32xbf16> to vector<32x32xbf16>
    %c0_43 = arith.constant 0 : index
    %c129 = arith.constant 129 : index
    %70 = vector.load %arg11[%c0_43, %c129] : memref<32x401xbf16, #tpu.memory_space<vmem>>, vector<32x256xbf16>
    %cst_44 = arith.constant dense<0.000000e+00> : vector<32x256xf32>
    %71 = tpu.matmul %69, %70, %cst_44 {dimension_numbers = #tpu.dot_dimension_numbers<[1], [0], [0], [1], [0, 0, 1, 1], [], []>} : vector<32x32xbf16>, vector<32x256xbf16>, vector<32x256xf32> -> vector<32x256xf32>
    %72 = arith.addf %67, %71 : vector<32x256xf32>
    %c8 = arith.constant 8 : index
    %c0_45 = arith.constant 0 : index
    %c0_46 = arith.constant 0 : index
    %73 = vector.load %arg2[%c8, %c0_45, %c0_46] : memref<54x32x32xbf16, #tpu.memory_space<vmem>>, vector<1x32x32xbf16>
    %74 = vector.shape_cast %73 : vector<1x32x32xbf16> to vector<32x32xbf16>
    %c0_47 = arith.constant 0 : index
    %c145 = arith.constant 145 : index
    %75 = vector.load %arg11[%c0_47, %c145] : memref<32x401xbf16, #tpu.memory_space<vmem>>, vector<32x256xbf16>
    %cst_48 = arith.constant dense<0.000000e+00> : vector<32x256xf32>
    %76 = tpu.matmul %74, %75, %cst_48 {dimension_numbers = #tpu.dot_dimension_numbers<[1], [0], [0], [1], [0, 0, 1, 1], [], []>} : vector<32x32xbf16>, vector<32x256xbf16>, vector<32x256xf32> -> vector<32x256xf32>
    %77 = arith.addf %72, %76 : vector<32x256xf32>
    %78 = vector.broadcast %24 : vector<1x256xf32> to vector<32x256xf32>
    %79 = arith.mulf %78, %77 : vector<32x256xf32>
    %80 = arith.addf %63, %79 : vector<32x256xf32>
    %c0_49 = arith.constant 0 : index
    %c0_50 = arith.constant 0 : index
    %c0_51 = arith.constant 0 : index
    %81 = vector.load %arg3[%c0_49, %c0_50, %c0_51] : memref<6x32x1xf32, #tpu.memory_space<vmem>>, vector<1x32x1xf32>
    %82 = vector.shape_cast %81 : vector<1x32x1xf32> to vector<32x1xf32>
    %83 = vector.broadcast %82 : vector<32x1xf32> to vector<32x256xf32>
    %84 = arith.addf %80, %83 : vector<32x256xf32>
    %cst_52 = arith.constant 0.000000e+00 : f32
    %85 = vector.broadcast %cst_52 : f32 to vector<32x256xf32>
    %86 = arith.cmpf oge, %84, %85 : vector<32x256xf32>
    %cst_53 = arith.constant 5.000000e-02 : f32
    %87 = vector.broadcast %cst_53 : f32 to vector<32x256xf32>
    %88 = arith.mulf %87, %84 : vector<32x256xf32>
    %89 = arith.select %86, %84, %88 : vector<32x256xi1>, vector<32x256xf32>
    %cst_54 = arith.constant 0.000000e+00 : bf16
    %90 = vector.broadcast %cst_54 : bf16 to vector<32x128xbf16>
    %c0_55 = arith.constant 0 : index
    %c0_56 = arith.constant 0 : index
    %91 = vector.load %arg12[%c0_55, %c0_56] : memref<32x401xbf16, #tpu.memory_space<vmem>>, vector<32x128xbf16>
    tpu.vector_store %arg12[%c0_55, %c0_56], %90 {strides = array<i32>} : memref<32x401xbf16, #tpu.memory_space<vmem>>, vector<32x128xbf16>,
    %92 = arith.truncf %89 : vector<32x256xf32> to vector<32x256xbf16>
    %c0_57 = arith.constant 0 : index
    %c128_58 = arith.constant 128 : index
    %93 = vector.load %arg12[%c0_57, %c128_58] : memref<32x401xbf16, #tpu.memory_space<vmem>>, vector<32x256xbf16>
    tpu.vector_store %arg12[%c0_57, %c128_58], %92 {strides = array<i32>} : memref<32x401xbf16, #tpu.memory_space<vmem>>, vector<32x256xbf16>,
    %cst_59 = arith.constant 0.000000e+00 : bf16
    %94 = vector.broadcast %cst_59 : bf16 to vector<32x17xbf16>
    %c0_60 = arith.constant 0 : index
    %c384_61 = arith.constant 384 : index
    %95 = vector.load %arg12[%c0_60, %c384_61] : memref<32x401xbf16, #tpu.memory_space<vmem>>, vector<32x17xbf16>
    tpu.vector_store %arg12[%c0_60, %c384_61], %94 {strides = array<i32>} : memref<32x401xbf16, #tpu.memory_space<vmem>>, vector<32x17xbf16>,
    %c10 = arith.constant 10 : index
    %c0_62 = arith.constant 0 : index
    %c0_63 = arith.constant 0 : index
    %96 = vector.load %arg2[%c10, %c0_62, %c0_63] : memref<54x32x32xbf16, #tpu.memory_space<vmem>>, vector<1x32x32xbf16>
    %97 = vector.shape_cast %96 : vector<1x32x32xbf16> to vector<32x32xbf16>
    %c0_64 = arith.constant 0 : index
    %c112_65 = arith.constant 112 : index
    %98 = vector.load %arg12[%c0_64, %c112_65] : memref<32x401xbf16, #tpu.memory_space<vmem>>, vector<32x256xbf16>
    %cst_66 = arith.constant dense<0.000000e+00> : vector<32x256xf32>
    %99 = tpu.matmul %97, %98, %cst_66 {dimension_numbers = #tpu.dot_dimension_numbers<[1], [0], [0], [1], [0, 0, 1, 1], [], []>} : vector<32x32xbf16>, vector<32x256xbf16>, vector<32x256xf32> -> vector<32x256xf32>
    %c13 = arith.constant 13 : index
    %c0_67 = arith.constant 0 : index
    %c0_68 = arith.constant 0 : index
    %100 = vector.load %arg2[%c13, %c0_67, %c0_68] : memref<54x32x32xbf16, #tpu.memory_space<vmem>>, vector<1x32x32xbf16>
    %101 = vector.shape_cast %100 : vector<1x32x32xbf16> to vector<32x32xbf16>
    %c0_69 = arith.constant 0 : index
    %c128_70 = arith.constant 128 : index
    %102 = vector.load %arg12[%c0_69, %c128_70] : memref<32x401xbf16, #tpu.memory_space<vmem>>, vector<32x256xbf16>
    %cst_71 = arith.constant dense<0.000000e+00> : vector<32x256xf32>
    %103 = tpu.matmul %101, %102, %cst_71 {dimension_numbers = #tpu.dot_dimension_numbers<[1], [0], [0], [1], [0, 0, 1, 1], [], []>} : vector<32x32xbf16>, vector<32x256xbf16>, vector<32x256xf32> -> vector<32x256xf32>
    %104 = arith.addf %99, %103 : vector<32x256xf32>
    %c16 = arith.constant 16 : index
    %c0_72 = arith.constant 0 : index
    %c0_73 = arith.constant 0 : index
    %105 = vector.load %arg2[%c16, %c0_72, %c0_73] : memref<54x32x32xbf16, #tpu.memory_space<vmem>>, vector<1x32x32xbf16>
    %106 = vector.shape_cast %105 : vector<1x32x32xbf16> to vector<32x32xbf16>
    %c0_74 = arith.constant 0 : index
    %c144_75 = arith.constant 144 : index
    %107 = vector.load %arg12[%c0_74, %c144_75] : memref<32x401xbf16, #tpu.memory_space<vmem>>, vector<32x256xbf16>
    %cst_76 = arith.constant dense<0.000000e+00> : vector<32x256xf32>
    %108 = tpu.matmul %106, %107, %cst_76 {dimension_numbers = #tpu.dot_dimension_numbers<[1], [0], [0], [1], [0, 0, 1, 1], [], []>} : vector<32x32xbf16>, vector<32x256xbf16>, vector<32x256xf32> -> vector<32x256xf32>
    %109 = arith.addf %104, %108 : vector<32x256xf32>
    %c9 = arith.constant 9 : index
    %c0_77 = arith.constant 0 : index
    %c0_78 = arith.constant 0 : index
    %110 = vector.load %arg2[%c9, %c0_77, %c0_78] : memref<54x32x32xbf16, #tpu.memory_space<vmem>>, vector<1x32x32xbf16>
    %111 = vector.shape_cast %110 : vector<1x32x32xbf16> to vector<32x32xbf16>
    %c0_79 = arith.constant 0 : index
    %c111_80 = arith.constant 111 : index
    %112 = vector.load %arg12[%c0_79, %c111_80] : memref<32x401xbf16, #tpu.memory_space<vmem>>, vector<32x256xbf16>
    %cst_81 = arith.constant dense<0.000000e+00> : vector<32x256xf32>
    %113 = tpu.matmul %111, %112, %cst_81 {dimension_numbers = #tpu.dot_dimension_numbers<[1], [0], [0], [1], [0, 0, 1, 1], [], []>} : vector<32x32xbf16>, vector<32x256xbf16>, vector<32x256xf32> -> vector<32x256xf32>
    %c12 = arith.constant 12 : index
    %c0_82 = arith.constant 0 : index
    %c0_83 = arith.constant 0 : index
    %114 = vector.load %arg2[%c12, %c0_82, %c0_83] : memref<54x32x32xbf16, #tpu.memory_space<vmem>>, vector<1x32x32xbf16>
    %115 = vector.shape_cast %114 : vector<1x32x32xbf16> to vector<32x32xbf16>
    %c0_84 = arith.constant 0 : index
    %c127_85 = arith.constant 127 : index
    %116 = vector.load %arg12[%c0_84, %c127_85] : memref<32x401xbf16, #tpu.memory_space<vmem>>, vector<32x256xbf16>
    %cst_86 = arith.constant dense<0.000000e+00> : vector<32x256xf32>
    %117 = tpu.matmul %115, %116, %cst_86 {dimension_numbers = #tpu.dot_dimension_numbers<[1], [0], [0], [1], [0, 0, 1, 1], [], []>} : vector<32x32xbf16>, vector<32x256xbf16>, vector<32x256xf32> -> vector<32x256xf32>
    %118 = arith.addf %113, %117 : vector<32x256xf32>
    %c15 = arith.constant 15 : index
    %c0_87 = arith.constant 0 : index
    %c0_88 = arith.constant 0 : index
    %119 = vector.load %arg2[%c15, %c0_87, %c0_88] : memref<54x32x32xbf16, #tpu.memory_space<vmem>>, vector<1x32x32xbf16>
    %120 = vector.shape_cast %119 : vector<1x32x32xbf16> to vector<32x32xbf16>
    %c0_89 = arith.constant 0 : index
    %c143_90 = arith.constant 143 : index
    %121 = vector.load %arg12[%c0_89, %c143_90] : memref<32x401xbf16, #tpu.memory_space<vmem>>, vector<32x256xbf16>
    %cst_91 = arith.constant dense<0.000000e+00> : vector<32x256xf32>
    %122 = tpu.matmul %120, %121, %cst_91 {dimension_numbers = #tpu.dot_dimension_numbers<[1], [0], [0], [1], [0, 0, 1, 1], [], []>} : vector<32x32xbf16>, vector<32x256xbf16>, vector<32x256xf32> -> vector<32x256xf32>
    %123 = arith.addf %118, %122 : vector<32x256xf32>
    %124 = vector.broadcast %20 : vector<1x256xf32> to vector<32x256xf32>
    %125 = arith.mulf %124, %123 : vector<32x256xf32>
    %126 = arith.addf %109, %125 : vector<32x256xf32>
    %c11 = arith.constant 11 : index
    %c0_92 = arith.constant 0 : index
    %c0_93 = arith.constant 0 : index
    %127 = vector.load %arg2[%c11, %c0_92, %c0_93] : memref<54x32x32xbf16, #tpu.memory_space<vmem>>, vector<1x32x32xbf16>
    %128 = vector.shape_cast %127 : vector<1x32x32xbf16> to vector<32x32xbf16>
    %c0_94 = arith.constant 0 : index
    %c113_95 = arith.constant 113 : index
    %129 = vector.load %arg12[%c0_94, %c113_95] : memref<32x401xbf16, #tpu.memory_space<vmem>>, vector<32x256xbf16>
    %cst_96 = arith.constant dense<0.000000e+00> : vector<32x256xf32>
    %130 = tpu.matmul %128, %129, %cst_96 {dimension_numbers = #tpu.dot_dimension_numbers<[1], [0], [0], [1], [0, 0, 1, 1], [], []>} : vector<32x32xbf16>, vector<32x256xbf16>, vector<32x256xf32> -> vector<32x256xf32>
    %c14 = arith.constant 14 : index
    %c0_97 = arith.constant 0 : index
    %c0_98 = arith.constant 0 : index
    %131 = vector.load %arg2[%c14, %c0_97, %c0_98] : memref<54x32x32xbf16, #tpu.memory_space<vmem>>, vector<1x32x32xbf16>
    %132 = vector.shape_cast %131 : vector<1x32x32xbf16> to vector<32x32xbf16>
    %c0_99 = arith.constant 0 : index
    %c129_100 = arith.constant 129 : index
    %133 = vector.load %arg12[%c0_99, %c129_100] : memref<32x401xbf16, #tpu.memory_space<vmem>>, vector<32x256xbf16>
    %cst_101 = arith.constant dense<0.000000e+00> : vector<32x256xf32>
    %134 = tpu.matmul %132, %133, %cst_101 {dimension_numbers = #tpu.dot_dimension_numbers<[1], [0], [0], [1], [0, 0, 1, 1], [], []>} : vector<32x32xbf16>, vector<32x256xbf16>, vector<32x256xf32> -> vector<32x256xf32>
    %135 = arith.addf %130, %134 : vector<32x256xf32>
    %c17 = arith.constant 17 : index
    %c0_102 = arith.constant 0 : index
    %c0_103 = arith.constant 0 : index
    %136 = vector.load %arg2[%c17, %c0_102, %c0_103] : memref<54x32x32xbf16, #tpu.memory_space<vmem>>, vector<1x32x32xbf16>
    %137 = vector.shape_cast %136 : vector<1x32x32xbf16> to vector<32x32xbf16>
    %c0_104 = arith.constant 0 : index
    %c145_105 = arith.constant 145 : index
    %138 = vector.load %arg12[%c0_104, %c145_105] : memref<32x401xbf16, #tpu.memory_space<vmem>>, vector<32x256xbf16>
    %cst_106 = arith.constant dense<0.000000e+00> : vector<32x256xf32>
    %139 = tpu.matmul %137, %138, %cst_106 {dimension_numbers = #tpu.dot_dimension_numbers<[1], [0], [0], [1], [0, 0, 1, 1], [], []>} : vector<32x32xbf16>, vector<32x256xbf16>, vector<32x256xf32> -> vector<32x256xf32>
    %140 = arith.addf %135, %139 : vector<32x256xf32>
    %141 = vector.broadcast %24 : vector<1x256xf32> to vector<32x256xf32>
    %142 = arith.mulf %141, %140 : vector<32x256xf32>
    %143 = arith.addf %126, %142 : vector<32x256xf32>
    %c1_107 = arith.constant 1 : index
    %c0_108 = arith.constant 0 : index
    %c0_109 = arith.constant 0 : index
    %144 = vector.load %arg3[%c1_107, %c0_108, %c0_109] : memref<6x32x1xf32, #tpu.memory_space<vmem>>, vector<1x32x1xf32>
    %145 = vector.shape_cast %144 : vector<1x32x1xf32> to vector<32x1xf32>
    %146 = vector.broadcast %145 : vector<32x1xf32> to vector<32x256xf32>
    %147 = arith.addf %143, %146 : vector<32x256xf32>
    %cst_110 = arith.constant 0.000000e+00 : f32
    %148 = vector.broadcast %cst_110 : f32 to vector<32x256xf32>
    %149 = arith.cmpf oge, %147, %148 : vector<32x256xf32>
    %cst_111 = arith.constant 5.000000e-02 : f32
    %150 = vector.broadcast %cst_111 : f32 to vector<32x256xf32>
    %151 = arith.mulf %150, %147 : vector<32x256xf32>
    %152 = arith.select %149, %147, %151 : vector<32x256xi1>, vector<32x256xf32>
    %cst_112 = arith.constant 0.000000e+00 : bf16
    %153 = vector.broadcast %cst_112 : bf16 to vector<32x128xbf16>
    %c0_113 = arith.constant 0 : index
    %c0_114 = arith.constant 0 : index
    %154 = vector.load %arg11[%c0_113, %c0_114] : memref<32x401xbf16, #tpu.memory_space<vmem>>, vector<32x128xbf16>
    tpu.vector_store %arg11[%c0_113, %c0_114], %153 {strides = array<i32>} : memref<32x401xbf16, #tpu.memory_space<vmem>>, vector<32x128xbf16>,
    %155 = arith.truncf %152 : vector<32x256xf32> to vector<32x256xbf16>
    %c0_115 = arith.constant 0 : index
    %c128_116 = arith.constant 128 : index
    %156 = vector.load %arg11[%c0_115, %c128_116] : memref<32x401xbf16, #tpu.memory_space<vmem>>, vector<32x256xbf16>
    tpu.vector_store %arg11[%c0_115, %c128_116], %155 {strides = array<i32>} : memref<32x401xbf16, #tpu.memory_space<vmem>>, vector<32x256xbf16>,
    %cst_117 = arith.constant 0.000000e+00 : bf16
    %157 = vector.broadcast %cst_117 : bf16 to vector<32x17xbf16>
    %c0_118 = arith.constant 0 : index
    %c384_119 = arith.constant 384 : index
    %158 = vector.load %arg11[%c0_118, %c384_119] : memref<32x401xbf16, #tpu.memory_space<vmem>>, vector<32x17xbf16>
    tpu.vector_store %arg11[%c0_118, %c384_119], %157 {strides = array<i32>} : memref<32x401xbf16, #tpu.memory_space<vmem>>, vector<32x17xbf16>,
    %c19 = arith.constant 19 : index
    %c0_120 = arith.constant 0 : index
    %c0_121 = arith.constant 0 : index
    %159 = vector.load %arg2[%c19, %c0_120, %c0_121] : memref<54x32x32xbf16, #tpu.memory_space<vmem>>, vector<1x32x32xbf16>
    %160 = vector.shape_cast %159 : vector<1x32x32xbf16> to vector<32x32xbf16>
    %c0_122 = arith.constant 0 : index
    %c112_123 = arith.constant 112 : index
    %161 = vector.load %arg11[%c0_122, %c112_123] : memref<32x401xbf16, #tpu.memory_space<vmem>>, vector<32x256xbf16>
    %cst_124 = arith.constant dense<0.000000e+00> : vector<32x256xf32>
    %162 = tpu.matmul %160, %161, %cst_124 {dimension_numbers = #tpu.dot_dimension_numbers<[1], [0], [0], [1], [0, 0, 1, 1], [], []>} : vector<32x32xbf16>, vector<32x256xbf16>, vector<32x256xf32> -> vector<32x256xf32>
    %c22 = arith.constant 22 : index
    %c0_125 = arith.constant 0 : index
    %c0_126 = arith.constant 0 : index
    %163 = vector.load %arg2[%c22, %c0_125, %c0_126] : memref<54x32x32xbf16, #tpu.memory_space<vmem>>, vector<1x32x32xbf16>
    %164 = vector.shape_cast %163 : vector<1x32x32xbf16> to vector<32x32xbf16>
    %c0_127 = arith.constant 0 : index
    %c128_128 = arith.constant 128 : index
    %165 = vector.load %arg11[%c0_127, %c128_128] : memref<32x401xbf16, #tpu.memory_space<vmem>>, vector<32x256xbf16>
    %cst_129 = arith.constant dense<0.000000e+00> : vector<32x256xf32>
    %166 = tpu.matmul %164, %165, %cst_129 {dimension_numbers = #tpu.dot_dimension_numbers<[1], [0], [0], [1], [0, 0, 1, 1], [], []>} : vector<32x32xbf16>, vector<32x256xbf16>, vector<32x256xf32> -> vector<32x256xf32>
    %167 = arith.addf %162, %166 : vector<32x256xf32>
    %c25 = arith.constant 25 : index
    %c0_130 = arith.constant 0 : index
    %c0_131 = arith.constant 0 : index
    %168 = vector.load %arg2[%c25, %c0_130, %c0_131] : memref<54x32x32xbf16, #tpu.memory_space<vmem>>, vector<1x32x32xbf16>
    %169 = vector.shape_cast %168 : vector<1x32x32xbf16> to vector<32x32xbf16>
    %c0_132 = arith.constant 0 : index
    %c144_133 = arith.constant 144 : index
    %170 = vector.load %arg11[%c0_132, %c144_133] : memref<32x401xbf16, #tpu.memory_space<vmem>>, vector<32x256xbf16>
    %cst_134 = arith.constant dense<0.000000e+00> : vector<32x256xf32>
    %171 = tpu.matmul %169, %170, %cst_134 {dimension_numbers = #tpu.dot_dimension_numbers<[1], [0], [0], [1], [0, 0, 1, 1], [], []>} : vector<32x32xbf16>, vector<32x256xbf16>, vector<32x256xf32> -> vector<32x256xf32>
    %172 = arith.addf %167, %171 : vector<32x256xf32>
    %c18 = arith.constant 18 : index
    %c0_135 = arith.constant 0 : index
    %c0_136 = arith.constant 0 : index
    %173 = vector.load %arg2[%c18, %c0_135, %c0_136] : memref<54x32x32xbf16, #tpu.memory_space<vmem>>, vector<1x32x32xbf16>
    %174 = vector.shape_cast %173 : vector<1x32x32xbf16> to vector<32x32xbf16>
    %c0_137 = arith.constant 0 : index
    %c111_138 = arith.constant 111 : index
    %175 = vector.load %arg11[%c0_137, %c111_138] : memref<32x401xbf16, #tpu.memory_space<vmem>>, vector<32x256xbf16>
    %cst_139 = arith.constant dense<0.000000e+00> : vector<32x256xf32>
    %176 = tpu.matmul %174, %175, %cst_139 {dimension_numbers = #tpu.dot_dimension_numbers<[1], [0], [0], [1], [0, 0, 1, 1], [], []>} : vector<32x32xbf16>, vector<32x256xbf16>, vector<32x256xf32> -> vector<32x256xf32>
    %c21 = arith.constant 21 : index
    %c0_140 = arith.constant 0 : index
    %c0_141 = arith.constant 0 : index
    %177 = vector.load %arg2[%c21, %c0_140, %c0_141] : memref<54x32x32xbf16, #tpu.memory_space<vmem>>, vector<1x32x32xbf16>
    %178 = vector.shape_cast %177 : vector<1x32x32xbf16> to vector<32x32xbf16>
    %c0_142 = arith.constant 0 : index
    %c127_143 = arith.constant 127 : index
    %179 = vector.load %arg11[%c0_142, %c127_143] : memref<32x401xbf16, #tpu.memory_space<vmem>>, vector<32x256xbf16>
    %cst_144 = arith.constant dense<0.000000e+00> : vector<32x256xf32>
    %180 = tpu.matmul %178, %179, %cst_144 {dimension_numbers = #tpu.dot_dimension_numbers<[1], [0], [0], [1], [0, 0, 1, 1], [], []>} : vector<32x32xbf16>, vector<32x256xbf16>, vector<32x256xf32> -> vector<32x256xf32>
    %181 = arith.addf %176, %180 : vector<32x256xf32>
    %c24 = arith.constant 24 : index
    %c0_145 = arith.constant 0 : index
    %c0_146 = arith.constant 0 : index
    %182 = vector.load %arg2[%c24, %c0_145, %c0_146] : memref<54x32x32xbf16, #tpu.memory_space<vmem>>, vector<1x32x32xbf16>
    %183 = vector.shape_cast %182 : vector<1x32x32xbf16> to vector<32x32xbf16>
    %c0_147 = arith.constant 0 : index
    %c143_148 = arith.constant 143 : index
    %184 = vector.load %arg11[%c0_147, %c143_148] : memref<32x401xbf16, #tpu.memory_space<vmem>>, vector<32x256xbf16>
    %cst_149 = arith.constant dense<0.000000e+00> : vector<32x256xf32>
    %185 = tpu.matmul %183, %184, %cst_149 {dimension_numbers = #tpu.dot_dimension_numbers<[1], [0], [0], [1], [0, 0, 1, 1], [], []>} : vector<32x32xbf16>, vector<32x256xbf16>, vector<32x256xf32> -> vector<32x256xf32>
    %186 = arith.addf %181, %185 : vector<32x256xf32>
    %187 = vector.broadcast %20 : vector<1x256xf32> to vector<32x256xf32>
    %188 = arith.mulf %187, %186 : vector<32x256xf32>
    %189 = arith.addf %172, %188 : vector<32x256xf32>
    %c20 = arith.constant 20 : index
    %c0_150 = arith.constant 0 : index
    %c0_151 = arith.constant 0 : index
    %190 = vector.load %arg2[%c20, %c0_150, %c0_151] : memref<54x32x32xbf16, #tpu.memory_space<vmem>>, vector<1x32x32xbf16>
    %191 = vector.shape_cast %190 : vector<1x32x32xbf16> to vector<32x32xbf16>
    %c0_152 = arith.constant 0 : index
    %c113_153 = arith.constant 113 : index
    %192 = vector.load %arg11[%c0_152, %c113_153] : memref<32x401xbf16, #tpu.memory_space<vmem>>, vector<32x256xbf16>
    %cst_154 = arith.constant dense<0.000000e+00> : vector<32x256xf32>
    %193 = tpu.matmul %191, %192, %cst_154 {dimension_numbers = #tpu.dot_dimension_numbers<[1], [0], [0], [1], [0, 0, 1, 1], [], []>} : vector<32x32xbf16>, vector<32x256xbf16>, vector<32x256xf32> -> vector<32x256xf32>
    %c23 = arith.constant 23 : index
    %c0_155 = arith.constant 0 : index
    %c0_156 = arith.constant 0 : index
    %194 = vector.load %arg2[%c23, %c0_155, %c0_156] : memref<54x32x32xbf16, #tpu.memory_space<vmem>>, vector<1x32x32xbf16>
    %195 = vector.shape_cast %194 : vector<1x32x32xbf16> to vector<32x32xbf16>
    %c0_157 = arith.constant 0 : index
    %c129_158 = arith.constant 129 : index
    %196 = vector.load %arg11[%c0_157, %c129_158] : memref<32x401xbf16, #tpu.memory_space<vmem>>, vector<32x256xbf16>
    %cst_159 = arith.constant dense<0.000000e+00> : vector<32x256xf32>
    %197 = tpu.matmul %195, %196, %cst_159 {dimension_numbers = #tpu.dot_dimension_numbers<[1], [0], [0], [1], [0, 0, 1, 1], [], []>} : vector<32x32xbf16>, vector<32x256xbf16>, vector<32x256xf32> -> vector<32x256xf32>
    %198 = arith.addf %193, %197 : vector<32x256xf32>
    %c26 = arith.constant 26 : index
    %c0_160 = arith.constant 0 : index
    %c0_161 = arith.constant 0 : index
    %199 = vector.load %arg2[%c26, %c0_160, %c0_161] : memref<54x32x32xbf16, #tpu.memory_space<vmem>>, vector<1x32x32xbf16>
    %200 = vector.shape_cast %199 : vector<1x32x32xbf16> to vector<32x32xbf16>
    %c0_162 = arith.constant 0 : index
    %c145_163 = arith.constant 145 : index
    %201 = vector.load %arg11[%c0_162, %c145_163] : memref<32x401xbf16, #tpu.memory_space<vmem>>, vector<32x256xbf16>
    %cst_164 = arith.constant dense<0.000000e+00> : vector<32x256xf32>
    %202 = tpu.matmul %200, %201, %cst_164 {dimension_numbers = #tpu.dot_dimension_numbers<[1], [0], [0], [1], [0, 0, 1, 1], [], []>} : vector<32x32xbf16>, vector<32x256xbf16>, vector<32x256xf32> -> vector<32x256xf32>
    %203 = arith.addf %198, %202 : vector<32x256xf32>
    %204 = vector.broadcast %24 : vector<1x256xf32> to vector<32x256xf32>
    %205 = arith.mulf %204, %203 : vector<32x256xf32>
    %206 = arith.addf %189, %205 : vector<32x256xf32>
    %c2_165 = arith.constant 2 : index
    %c0_166 = arith.constant 0 : index
    %c0_167 = arith.constant 0 : index
    %207 = vector.load %arg3[%c2_165, %c0_166, %c0_167] : memref<6x32x1xf32, #tpu.memory_space<vmem>>, vector<1x32x1xf32>
    %208 = vector.shape_cast %207 : vector<1x32x1xf32> to vector<32x1xf32>
    %209 = vector.broadcast %208 : vector<32x1xf32> to vector<32x256xf32>
    %210 = arith.addf %206, %209 : vector<32x256xf32>
    %cst_168 = arith.constant 0.000000e+00 : f32
    %211 = vector.broadcast %cst_168 : f32 to vector<32x256xf32>
    %212 = arith.cmpf oge, %210, %211 : vector<32x256xf32>
    %cst_169 = arith.constant 5.000000e-02 : f32
    %213 = vector.broadcast %cst_169 : f32 to vector<32x256xf32>
    %214 = arith.mulf %213, %210 : vector<32x256xf32>
    %215 = arith.select %212, %210, %214 : vector<32x256xi1>, vector<32x256xf32>
    %c0_170 = arith.constant 0 : index
    %c0_171 = arith.constant 0 : index
    %c0_172 = arith.constant 0 : index
    %216 = vector.load %arg1[%c0_170, %c0_171, %c0_172] : memref<1x32x256xf32, #tpu.memory_space<vmem>>, vector<1x32x256xf32>
    %217 = vector.shape_cast %216 : vector<1x32x256xf32> to vector<32x256xf32>
    %cst_173 = arith.constant dense<0.000000e+00> : vector<32xf32>
    %218 = vector.multi_reduction <add>, %215, %cst_173 [1] : vector<32x256xf32> to vector<32xf32>
    %219 = vector.shape_cast %218 : vector<32xf32> to vector<32x1xf32>
    %220 = arith.mulf %215, %215 : vector<32x256xf32>
    %cst_174 = arith.constant dense<0.000000e+00> : vector<32xf32>
    %221 = vector.multi_reduction <add>, %220, %cst_174 [1] : vector<32x256xf32> to vector<32xf32>
    %222 = vector.shape_cast %221 : vector<32xf32> to vector<32x1xf32>
    %cst_175 = arith.constant 3.906250e-03 : f32
    %223 = vector.broadcast %cst_175 : f32 to vector<32x1xf32>
    %224 = arith.mulf %219, %223 : vector<32x1xf32>
    %cst_176 = arith.constant 2.560000e+02 : f32
    %225 = vector.broadcast %cst_176 : f32 to vector<32x1xf32>
    %226 = arith.mulf %225, %224 : vector<32x1xf32>
    %227 = arith.mulf %226, %224 : vector<32x1xf32>
    %228 = arith.subf %222, %227 : vector<32x1xf32>
    %cst_177 = arith.constant 0.000000e+00 : f32
    %229 = vector.broadcast %cst_177 : f32 to vector<32x1xf32>
    %230 = arith.maximumf %228, %229 : vector<32x1xf32>
    %cst_178 = arith.constant 0.00392156886 : f32
    %231 = vector.broadcast %cst_178 : f32 to vector<32x1xf32>
    %232 = arith.mulf %230, %231 : vector<32x1xf32>
    %233 = math.sqrt %232 : vector<32x1xf32>
    %c0_179 = arith.constant 0 : index
    %c0_180 = arith.constant 0 : index
    %c0_181 = arith.constant 0 : index
    %234 = vector.load %arg4[%c0_179, %c0_180, %c0_181] : memref<8x32x2xf32, #tpu.memory_space<vmem>>, vector<1x32x2xf32>
    %235 = vector.shape_cast %234 : vector<1x32x2xf32> to vector<32x2xf32>
    %236 = vector.broadcast %224 : vector<32x1xf32> to vector<32x2xf32>
    %237 = arith.mulf %235, %236 : vector<32x2xf32>
    %cst_182 = arith.constant dense<0.000000e+00> : vector<2xf32>
    %238 = vector.multi_reduction <add>, %237, %cst_182 [0] : vector<32x2xf32> to vector<2xf32>
    %239 = vector.shape_cast %238 : vector<2xf32> to vector<1x2xf32>
    %c0_183 = arith.constant 0 : index
    %c0_184 = arith.constant 0 : index
    %c0_185 = arith.constant 0 : index
    %240 = vector.load %arg5[%c0_183, %c0_184, %c0_185] : memref<8x1x2xf32, #tpu.memory_space<vmem>>, vector<1x1x2xf32>
    %241 = vector.shape_cast %240 : vector<1x1x2xf32> to vector<1x2xf32>
    %242 = arith.addf %239, %241 : vector<1x2xf32>
    %cst_186 = arith.constant 0.000000e+00 : f32
    %243 = vector.broadcast %cst_186 : f32 to vector<1x2xf32>
    %244 = arith.maximumf %242, %243 : vector<1x2xf32>
    %c0_187 = arith.constant 0 : index
    %c0_188 = arith.constant 0 : index
    %c0_189 = arith.constant 0 : index
    %245 = vector.load %arg6[%c0_187, %c0_188, %c0_189] : memref<8x32x2xf32, #tpu.memory_space<vmem>>, vector<1x32x2xf32>
    %246 = vector.shape_cast %245 : vector<1x32x2xf32> to vector<32x2xf32>
    %247 = vector.broadcast %244 : vector<1x2xf32> to vector<32x2xf32>
    %248 = arith.mulf %246, %247 : vector<32x2xf32>
    %cst_190 = arith.constant dense<0.000000e+00> : vector<32xf32>
    %249 = vector.multi_reduction <add>, %248, %cst_190 [1] : vector<32x2xf32> to vector<32xf32>
    %250 = vector.shape_cast %249 : vector<32xf32> to vector<32x1xf32>
    %c0_191 = arith.constant 0 : index
    %c0_192 = arith.constant 0 : index
    %c0_193 = arith.constant 0 : index
    %251 = vector.load %arg7[%c0_191, %c0_192, %c0_193] : memref<8x32x1xf32, #tpu.memory_space<vmem>>, vector<1x32x1xf32>
    %252 = vector.shape_cast %251 : vector<1x32x1xf32> to vector<32x1xf32>
    %253 = arith.addf %250, %252 : vector<32x1xf32>
    %254 = arith.negf %253 : vector<32x1xf32>
    %255 = math.exp %254 : vector<32x1xf32>
    %cst_194 = arith.constant 1.000000e+00 : f32
    %256 = vector.broadcast %cst_194 : f32 to vector<32x1xf32>
    %257 = arith.addf %256, %255 : vector<32x1xf32>
    %258 = arith.divf %256, %257 : vector<32x1xf32>
    %c1_195 = arith.constant 1 : index
    %c0_196 = arith.constant 0 : index
    %c0_197 = arith.constant 0 : index
    %259 = vector.load %arg4[%c1_195, %c0_196, %c0_197] : memref<8x32x2xf32, #tpu.memory_space<vmem>>, vector<1x32x2xf32>
    %260 = vector.shape_cast %259 : vector<1x32x2xf32> to vector<32x2xf32>
    %261 = vector.broadcast %233 : vector<32x1xf32> to vector<32x2xf32>
    %262 = arith.mulf %260, %261 : vector<32x2xf32>
    %cst_198 = arith.constant dense<0.000000e+00> : vector<2xf32>
    %263 = vector.multi_reduction <add>, %262, %cst_198 [0] : vector<32x2xf32> to vector<2xf32>
    %264 = vector.shape_cast %263 : vector<2xf32> to vector<1x2xf32>
    %c1_199 = arith.constant 1 : index
    %c0_200 = arith.constant 0 : index
    %c0_201 = arith.constant 0 : index
    %265 = vector.load %arg5[%c1_199, %c0_200, %c0_201] : memref<8x1x2xf32, #tpu.memory_space<vmem>>, vector<1x1x2xf32>
    %266 = vector.shape_cast %265 : vector<1x1x2xf32> to vector<1x2xf32>
    %267 = arith.addf %264, %266 : vector<1x2xf32>
    %cst_202 = arith.constant 0.000000e+00 : f32
    %268 = vector.broadcast %cst_202 : f32 to vector<1x2xf32>
    %269 = arith.maximumf %267, %268 : vector<1x2xf32>
    %c1_203 = arith.constant 1 : index
    %c0_204 = arith.constant 0 : index
    %c0_205 = arith.constant 0 : index
    %270 = vector.load %arg6[%c1_203, %c0_204, %c0_205] : memref<8x32x2xf32, #tpu.memory_space<vmem>>, vector<1x32x2xf32>
    %271 = vector.shape_cast %270 : vector<1x32x2xf32> to vector<32x2xf32>
    %272 = vector.broadcast %269 : vector<1x2xf32> to vector<32x2xf32>
    %273 = arith.mulf %271, %272 : vector<32x2xf32>
    %cst_206 = arith.constant dense<0.000000e+00> : vector<32xf32>
    %274 = vector.multi_reduction <add>, %273, %cst_206 [1] : vector<32x2xf32> to vector<32xf32>
    %275 = vector.shape_cast %274 : vector<32xf32> to vector<32x1xf32>
    %c1_207 = arith.constant 1 : index
    %c0_208 = arith.constant 0 : index
    %c0_209 = arith.constant 0 : index
    %276 = vector.load %arg7[%c1_207, %c0_208, %c0_209] : memref<8x32x1xf32, #tpu.memory_space<vmem>>, vector<1x32x1xf32>
    %277 = vector.shape_cast %276 : vector<1x32x1xf32> to vector<32x1xf32>
    %278 = arith.addf %275, %277 : vector<32x1xf32>
    %279 = arith.negf %278 : vector<32x1xf32>
    %280 = math.exp %279 : vector<32x1xf32>
    %cst_210 = arith.constant 1.000000e+00 : f32
    %281 = vector.broadcast %cst_210 : f32 to vector<32x1xf32>
    %282 = arith.addf %281, %280 : vector<32x1xf32>
    %283 = arith.divf %281, %282 : vector<32x1xf32>
    %284 = arith.addf %258, %283 : vector<32x1xf32>
    %cst_211 = arith.constant 5.000000e-01 : f32
    %285 = vector.broadcast %cst_211 : f32 to vector<32x1xf32>
    %286 = arith.mulf %284, %285 : vector<32x1xf32>
    %cst_212 = arith.constant dense<0.000000e+00> : vector<32xf32>
    %287 = vector.multi_reduction <add>, %217, %cst_212 [1] : vector<32x256xf32> to vector<32xf32>
    %288 = vector.shape_cast %287 : vector<32xf32> to vector<32x1xf32>
    %289 = arith.mulf %217, %217 : vector<32x256xf32>
    %cst_213 = arith.constant dense<0.000000e+00> : vector<32xf32>
    %290 = vector.multi_reduction <add>, %289, %cst_213 [1] : vector<32x256xf32> to vector<32xf32>
    %291 = vector.shape_cast %290 : vector<32xf32> to vector<32x1xf32>
    %cst_214 = arith.constant 3.906250e-03 : f32
    %292 = vector.broadcast %cst_214 : f32 to vector<32x1xf32>
    %293 = arith.mulf %288, %292 : vector<32x1xf32>
    %cst_215 = arith.constant 2.560000e+02 : f32
    %294 = vector.broadcast %cst_215 : f32 to vector<32x1xf32>
    %295 = arith.mulf %294, %293 : vector<32x1xf32>
    %296 = arith.mulf %295, %293 : vector<32x1xf32>
    %297 = arith.subf %291, %296 : vector<32x1xf32>
    %cst_216 = arith.constant 0.000000e+00 : f32
    %298 = vector.broadcast %cst_216 : f32 to vector<32x1xf32>
    %299 = arith.maximumf %297, %298 : vector<32x1xf32>
    %cst_217 = arith.constant 0.00392156886 : f32
    %300 = vector.broadcast %cst_217 : f32 to vector<32x1xf32>
    %301 = arith.mulf %299, %300 : vector<32x1xf32>
    %302 = math.sqrt %301 : vector<32x1xf32>
    %c2_218 = arith.constant 2 : index
    %c0_219 = arith.constant 0 : index
    %c0_220 = arith.constant 0 : index
    %303 = vector.load %arg4[%c2_218, %c0_219, %c0_220] : memref<8x32x2xf32, #tpu.memory_space<vmem>>, vector<1x32x2xf32>
    %304 = vector.shape_cast %303 : vector<1x32x2xf32> to vector<32x2xf32>
    %305 = vector.broadcast %293 : vector<32x1xf32> to vector<32x2xf32>
    %306 = arith.mulf %304, %305 : vector<32x2xf32>
    %cst_221 = arith.constant dense<0.000000e+00> : vector<2xf32>
    %307 = vector.multi_reduction <add>, %306, %cst_221 [0] : vector<32x2xf32> to vector<2xf32>
    %308 = vector.shape_cast %307 : vector<2xf32> to vector<1x2xf32>
    %c2_222 = arith.constant 2 : index
    %c0_223 = arith.constant 0 : index
    %c0_224 = arith.constant 0 : index
    %309 = vector.load %arg5[%c2_222, %c0_223, %c0_224] : memref<8x1x2xf32, #tpu.memory_space<vmem>>, vector<1x1x2xf32>
    %310 = vector.shape_cast %309 : vector<1x1x2xf32> to vector<1x2xf32>
    %311 = arith.addf %308, %310 : vector<1x2xf32>
    %cst_225 = arith.constant 0.000000e+00 : f32
    %312 = vector.broadcast %cst_225 : f32 to vector<1x2xf32>
    %313 = arith.maximumf %311, %312 : vector<1x2xf32>
    %c2_226 = arith.constant 2 : index
    %c0_227 = arith.constant 0 : index
    %c0_228 = arith.constant 0 : index
    %314 = vector.load %arg6[%c2_226, %c0_227, %c0_228] : memref<8x32x2xf32, #tpu.memory_space<vmem>>, vector<1x32x2xf32>
    %315 = vector.shape_cast %314 : vector<1x32x2xf32> to vector<32x2xf32>
    %316 = vector.broadcast %313 : vector<1x2xf32> to vector<32x2xf32>
    %317 = arith.mulf %315, %316 : vector<32x2xf32>
    %cst_229 = arith.constant dense<0.000000e+00> : vector<32xf32>
    %318 = vector.multi_reduction <add>, %317, %cst_229 [1] : vector<32x2xf32> to vector<32xf32>
    %319 = vector.shape_cast %318 : vector<32xf32> to vector<32x1xf32>
    %c2_230 = arith.constant 2 : index
    %c0_231 = arith.constant 0 : index
    %c0_232 = arith.constant 0 : index
    %320 = vector.load %arg7[%c2_230, %c0_231, %c0_232] : memref<8x32x1xf32, #tpu.memory_space<vmem>>, vector<1x32x1xf32>
    %321 = vector.shape_cast %320 : vector<1x32x1xf32> to vector<32x1xf32>
    %322 = arith.addf %319, %321 : vector<32x1xf32>
    %323 = arith.negf %322 : vector<32x1xf32>
    %324 = math.exp %323 : vector<32x1xf32>
    %cst_233 = arith.constant 1.000000e+00 : f32
    %325 = vector.broadcast %cst_233 : f32 to vector<32x1xf32>
    %326 = arith.addf %325, %324 : vector<32x1xf32>
    %327 = arith.divf %325, %326 : vector<32x1xf32>
    %c3_234 = arith.constant 3 : index
    %c0_235 = arith.constant 0 : index
    %c0_236 = arith.constant 0 : index
    %328 = vector.load %arg4[%c3_234, %c0_235, %c0_236] : memref<8x32x2xf32, #tpu.memory_space<vmem>>, vector<1x32x2xf32>
    %329 = vector.shape_cast %328 : vector<1x32x2xf32> to vector<32x2xf32>
    %330 = vector.broadcast %302 : vector<32x1xf32> to vector<32x2xf32>
    %331 = arith.mulf %329, %330 : vector<32x2xf32>
    %cst_237 = arith.constant dense<0.000000e+00> : vector<2xf32>
    %332 = vector.multi_reduction <add>, %331, %cst_237 [0] : vector<32x2xf32> to vector<2xf32>
    %333 = vector.shape_cast %332 : vector<2xf32> to vector<1x2xf32>
    %c3_238 = arith.constant 3 : index
    %c0_239 = arith.constant 0 : index
    %c0_240 = arith.constant 0 : index
    %334 = vector.load %arg5[%c3_238, %c0_239, %c0_240] : memref<8x1x2xf32, #tpu.memory_space<vmem>>, vector<1x1x2xf32>
    %335 = vector.shape_cast %334 : vector<1x1x2xf32> to vector<1x2xf32>
    %336 = arith.addf %333, %335 : vector<1x2xf32>
    %cst_241 = arith.constant 0.000000e+00 : f32
    %337 = vector.broadcast %cst_241 : f32 to vector<1x2xf32>
    %338 = arith.maximumf %336, %337 : vector<1x2xf32>
    %c3_242 = arith.constant 3 : index
    %c0_243 = arith.constant 0 : index
    %c0_244 = arith.constant 0 : index
    %339 = vector.load %arg6[%c3_242, %c0_243, %c0_244] : memref<8x32x2xf32, #tpu.memory_space<vmem>>, vector<1x32x2xf32>
    %340 = vector.shape_cast %339 : vector<1x32x2xf32> to vector<32x2xf32>
    %341 = vector.broadcast %338 : vector<1x2xf32> to vector<32x2xf32>
    %342 = arith.mulf %340, %341 : vector<32x2xf32>
    %cst_245 = arith.constant dense<0.000000e+00> : vector<32xf32>
    %343 = vector.multi_reduction <add>, %342, %cst_245 [1] : vector<32x2xf32> to vector<32xf32>
    %344 = vector.shape_cast %343 : vector<32xf32> to vector<32x1xf32>
    %c3_246 = arith.constant 3 : index
    %c0_247 = arith.constant 0 : index
    %c0_248 = arith.constant 0 : index
    %345 = vector.load %arg7[%c3_246, %c0_247, %c0_248] : memref<8x32x1xf32, #tpu.memory_space<vmem>>, vector<1x32x1xf32>
    %346 = vector.shape_cast %345 : vector<1x32x1xf32> to vector<32x1xf32>
    %347 = arith.addf %344, %346 : vector<32x1xf32>
    %348 = arith.negf %347 : vector<32x1xf32>
    %349 = math.exp %348 : vector<32x1xf32>
    %cst_249 = arith.constant 1.000000e+00 : f32
    %350 = vector.broadcast %cst_249 : f32 to vector<32x1xf32>
    %351 = arith.addf %350, %349 : vector<32x1xf32>
    %352 = arith.divf %350, %351 : vector<32x1xf32>
    %353 = arith.addf %327, %352 : vector<32x1xf32>
    %cst_250 = arith.constant 5.000000e-01 : f32
    %354 = vector.broadcast %cst_250 : f32 to vector<32x1xf32>
    %355 = arith.mulf %353, %354 : vector<32x1xf32>
    %356 = vector.broadcast %286 : vector<32x1xf32> to vector<32x256xf32>
    %357 = arith.mulf %356, %215 : vector<32x256xf32>
    %358 = arith.addf %217, %357 : vector<32x256xf32>
    %359 = vector.broadcast %355 : vector<32x1xf32> to vector<32x256xf32>
    %360 = arith.mulf %359, %217 : vector<32x256xf32>
    %361 = arith.addf %215, %360 : vector<32x256xf32>
    %cst_251 = arith.constant 0.000000e+00 : bf16
    %362 = vector.broadcast %cst_251 : bf16 to vector<32x128xbf16>
    %c0_252 = arith.constant 0 : index
    %c0_253 = arith.constant 0 : index
    %363 = vector.load %arg12[%c0_252, %c0_253] : memref<32x401xbf16, #tpu.memory_space<vmem>>, vector<32x128xbf16>
    tpu.vector_store %arg12[%c0_252, %c0_253], %362 {strides = array<i32>} : memref<32x401xbf16, #tpu.memory_space<vmem>>, vector<32x128xbf16>,
    %364 = arith.truncf %358 : vector<32x256xf32> to vector<32x256xbf16>
    %c0_254 = arith.constant 0 : index
    %c128_255 = arith.constant 128 : index
    %365 = vector.load %arg12[%c0_254, %c128_255] : memref<32x401xbf16, #tpu.memory_space<vmem>>, vector<32x256xbf16>
    tpu.vector_store %arg12[%c0_254, %c128_255], %364 {strides = array<i32>} : memref<32x401xbf16, #tpu.memory_space<vmem>>, vector<32x256xbf16>,
    %cst_256 = arith.constant 0.000000e+00 : bf16
    %366 = vector.broadcast %cst_256 : bf16 to vector<32x17xbf16>
    %c0_257 = arith.constant 0 : index
    %c384_258 = arith.constant 384 : index
    %367 = vector.load %arg12[%c0_257, %c384_258] : memref<32x401xbf16, #tpu.memory_space<vmem>>, vector<32x17xbf16>
    tpu.vector_store %arg12[%c0_257, %c384_258], %366 {strides = array<i32>} : memref<32x401xbf16, #tpu.memory_space<vmem>>, vector<32x17xbf16>,
    %368 = arith.truncf %361 : vector<32x256xf32> to vector<32x256xbf16>
    %c0_259 = arith.constant 0 : index
    %c0_260 = arith.constant 0 : index
    %369 = vector.load %arg13[%c0_259, %c0_260] : memref<32x256xbf16, #tpu.memory_space<vmem>>, vector<32x256xbf16>
    tpu.vector_store %arg13[%c0_259, %c0_260], %368 {strides = array<i32>} : memref<32x256xbf16, #tpu.memory_space<vmem>>, vector<32x256xbf16>,
    %c28 = arith.constant 28 : index
    %c0_261 = arith.constant 0 : index
    %c0_262 = arith.constant 0 : index
    %370 = vector.load %arg2[%c28, %c0_261, %c0_262] : memref<54x32x32xbf16, #tpu.memory_space<vmem>>, vector<1x32x32xbf16>
    %371 = vector.shape_cast %370 : vector<1x32x32xbf16> to vector<32x32xbf16>
    %c0_263 = arith.constant 0 : index
    %c112_264 = arith.constant 112 : index
    %372 = vector.load %arg12[%c0_263, %c112_264] : memref<32x401xbf16, #tpu.memory_space<vmem>>, vector<32x256xbf16>
    %cst_265 = arith.constant dense<0.000000e+00> : vector<32x256xf32>
    %373 = tpu.matmul %371, %372, %cst_265 {dimension_numbers = #tpu.dot_dimension_numbers<[1], [0], [0], [1], [0, 0, 1, 1], [], []>} : vector<32x32xbf16>, vector<32x256xbf16>, vector<32x256xf32> -> vector<32x256xf32>
    %c31 = arith.constant 31 : index
    %c0_266 = arith.constant 0 : index
    %c0_267 = arith.constant 0 : index
    %374 = vector.load %arg2[%c31, %c0_266, %c0_267] : memref<54x32x32xbf16, #tpu.memory_space<vmem>>, vector<1x32x32xbf16>
    %375 = vector.shape_cast %374 : vector<1x32x32xbf16> to vector<32x32xbf16>
    %c0_268 = arith.constant 0 : index
    %c128_269 = arith.constant 128 : index
    %376 = vector.load %arg12[%c0_268, %c128_269] : memref<32x401xbf16, #tpu.memory_space<vmem>>, vector<32x256xbf16>
    %cst_270 = arith.constant dense<0.000000e+00> : vector<32x256xf32>
    %377 = tpu.matmul %375, %376, %cst_270 {dimension_numbers = #tpu.dot_dimension_numbers<[1], [0], [0], [1], [0, 0, 1, 1], [], []>} : vector<32x32xbf16>, vector<32x256xbf16>, vector<32x256xf32> -> vector<32x256xf32>
    %378 = arith.addf %373, %377 : vector<32x256xf32>
    %c34 = arith.constant 34 : index
    %c0_271 = arith.constant 0 : index
    %c0_272 = arith.constant 0 : index
    %379 = vector.load %arg2[%c34, %c0_271, %c0_272] : memref<54x32x32xbf16, #tpu.memory_space<vmem>>, vector<1x32x32xbf16>
    %380 = vector.shape_cast %379 : vector<1x32x32xbf16> to vector<32x32xbf16>
    %c0_273 = arith.constant 0 : index
    %c144_274 = arith.constant 144 : index
    %381 = vector.load %arg12[%c0_273, %c144_274] : memref<32x401xbf16, #tpu.memory_space<vmem>>, vector<32x256xbf16>
    %cst_275 = arith.constant dense<0.000000e+00> : vector<32x256xf32>
    %382 = tpu.matmul %380, %381, %cst_275 {dimension_numbers = #tpu.dot_dimension_numbers<[1], [0], [0], [1], [0, 0, 1, 1], [], []>} : vector<32x32xbf16>, vector<32x256xbf16>, vector<32x256xf32> -> vector<32x256xf32>
    %383 = arith.addf %378, %382 : vector<32x256xf32>
    %c27 = arith.constant 27 : index
    %c0_276 = arith.constant 0 : index
    %c0_277 = arith.constant 0 : index
    %384 = vector.load %arg2[%c27, %c0_276, %c0_277] : memref<54x32x32xbf16, #tpu.memory_space<vmem>>, vector<1x32x32xbf16>
    %385 = vector.shape_cast %384 : vector<1x32x32xbf16> to vector<32x32xbf16>
    %c0_278 = arith.constant 0 : index
    %c111_279 = arith.constant 111 : index
    %386 = vector.load %arg12[%c0_278, %c111_279] : memref<32x401xbf16, #tpu.memory_space<vmem>>, vector<32x256xbf16>
    %cst_280 = arith.constant dense<0.000000e+00> : vector<32x256xf32>
    %387 = tpu.matmul %385, %386, %cst_280 {dimension_numbers = #tpu.dot_dimension_numbers<[1], [0], [0], [1], [0, 0, 1, 1], [], []>} : vector<32x32xbf16>, vector<32x256xbf16>, vector<32x256xf32> -> vector<32x256xf32>
    %c30 = arith.constant 30 : index
    %c0_281 = arith.constant 0 : index
    %c0_282 = arith.constant 0 : index
    %388 = vector.load %arg2[%c30, %c0_281, %c0_282] : memref<54x32x32xbf16, #tpu.memory_space<vmem>>, vector<1x32x32xbf16>
    %389 = vector.shape_cast %388 : vector<1x32x32xbf16> to vector<32x32xbf16>
    %c0_283 = arith.constant 0 : index
    %c127_284 = arith.constant 127 : index
    %390 = vector.load %arg12[%c0_283, %c127_284] : memref<32x401xbf16, #tpu.memory_space<vmem>>, vector<32x256xbf16>
    %cst_285 = arith.constant dense<0.000000e+00> : vector<32x256xf32>
    %391 = tpu.matmul %389, %390, %cst_285 {dimension_numbers = #tpu.dot_dimension_numbers<[1], [0], [0], [1], [0, 0, 1, 1], [], []>} : vector<32x32xbf16>, vector<32x256xbf16>, vector<32x256xf32> -> vector<32x256xf32>
    %392 = arith.addf %387, %391 : vector<32x256xf32>
    %c33 = arith.constant 33 : index
    %c0_286 = arith.constant 0 : index
    %c0_287 = arith.constant 0 : index
    %393 = vector.load %arg2[%c33, %c0_286, %c0_287] : memref<54x32x32xbf16, #tpu.memory_space<vmem>>, vector<1x32x32xbf16>
    %394 = vector.shape_cast %393 : vector<1x32x32xbf16> to vector<32x32xbf16>
    %c0_288 = arith.constant 0 : index
    %c143_289 = arith.constant 143 : index
    %395 = vector.load %arg12[%c0_288, %c143_289] : memref<32x401xbf16, #tpu.memory_space<vmem>>, vector<32x256xbf16>
    %cst_290 = arith.constant dense<0.000000e+00> : vector<32x256xf32>
    %396 = tpu.matmul %394, %395, %cst_290 {dimension_numbers = #tpu.dot_dimension_numbers<[1], [0], [0], [1], [0, 0, 1, 1], [], []>} : vector<32x32xbf16>, vector<32x256xbf16>, vector<32x256xf32> -> vector<32x256xf32>
    %397 = arith.addf %392, %396 : vector<32x256xf32>
    %398 = vector.broadcast %20 : vector<1x256xf32> to vector<32x256xf32>
    %399 = arith.mulf %398, %397 : vector<32x256xf32>
    %400 = arith.addf %383, %399 : vector<32x256xf32>
    %c29 = arith.constant 29 : index
    %c0_291 = arith.constant 0 : index
    %c0_292 = arith.constant 0 : index
    %401 = vector.load %arg2[%c29, %c0_291, %c0_292] : memref<54x32x32xbf16, #tpu.memory_space<vmem>>, vector<1x32x32xbf16>
    %402 = vector.shape_cast %401 : vector<1x32x32xbf16> to vector<32x32xbf16>
    %c0_293 = arith.constant 0 : index
    %c113_294 = arith.constant 113 : index
    %403 = vector.load %arg12[%c0_293, %c113_294] : memref<32x401xbf16, #tpu.memory_space<vmem>>, vector<32x256xbf16>
    %cst_295 = arith.constant dense<0.000000e+00> : vector<32x256xf32>
    %404 = tpu.matmul %402, %403, %cst_295 {dimension_numbers = #tpu.dot_dimension_numbers<[1], [0], [0], [1], [0, 0, 1, 1], [], []>} : vector<32x32xbf16>, vector<32x256xbf16>, vector<32x256xf32> -> vector<32x256xf32>
    %c32 = arith.constant 32 : index
    %c0_296 = arith.constant 0 : index
    %c0_297 = arith.constant 0 : index
    %405 = vector.load %arg2[%c32, %c0_296, %c0_297] : memref<54x32x32xbf16, #tpu.memory_space<vmem>>, vector<1x32x32xbf16>
    %406 = vector.shape_cast %405 : vector<1x32x32xbf16> to vector<32x32xbf16>
    %c0_298 = arith.constant 0 : index
    %c129_299 = arith.constant 129 : index
    %407 = vector.load %arg12[%c0_298, %c129_299] : memref<32x401xbf16, #tpu.memory_space<vmem>>, vector<32x256xbf16>
    %cst_300 = arith.constant dense<0.000000e+00> : vector<32x256xf32>
    %408 = tpu.matmul %406, %407, %cst_300 {dimension_numbers = #tpu.dot_dimension_numbers<[1], [0], [0], [1], [0, 0, 1, 1], [], []>} : vector<32x32xbf16>, vector<32x256xbf16>, vector<32x256xf32> -> vector<32x256xf32>
    %409 = arith.addf %404, %408 : vector<32x256xf32>
    %c35 = arith.constant 35 : index
    %c0_301 = arith.constant 0 : index
    %c0_302 = arith.constant 0 : index
    %410 = vector.load %arg2[%c35, %c0_301, %c0_302] : memref<54x32x32xbf16, #tpu.memory_space<vmem>>, vector<1x32x32xbf16>
    %411 = vector.shape_cast %410 : vector<1x32x32xbf16> to vector<32x32xbf16>
    %c0_303 = arith.constant 0 : index
    %c145_304 = arith.constant 145 : index
    %412 = vector.load %arg12[%c0_303, %c145_304] : memref<32x401xbf16, #tpu.memory_space<vmem>>, vector<32x256xbf16>
    %cst_305 = arith.constant dense<0.000000e+00> : vector<32x256xf32>
    %413 = tpu.matmul %411, %412, %cst_305 {dimension_numbers = #tpu.dot_dimension_numbers<[1], [0], [0], [1], [0, 0, 1, 1], [], []>} : vector<32x32xbf16>, vector<32x256xbf16>, vector<32x256xf32> -> vector<32x256xf32>
    %414 = arith.addf %409, %413 : vector<32x256xf32>
    %415 = vector.broadcast %24 : vector<1x256xf32> to vector<32x256xf32>
    %416 = arith.mulf %415, %414 : vector<32x256xf32>
    %417 = arith.addf %400, %416 : vector<32x256xf32>
    %c3_306 = arith.constant 3 : index
    %c0_307 = arith.constant 0 : index
    %c0_308 = arith.constant 0 : index
    %418 = vector.load %arg3[%c3_306, %c0_307, %c0_308] : memref<6x32x1xf32, #tpu.memory_space<vmem>>, vector<1x32x1xf32>
    %419 = vector.shape_cast %418 : vector<1x32x1xf32> to vector<32x1xf32>
    %420 = vector.broadcast %419 : vector<32x1xf32> to vector<32x256xf32>
    %421 = arith.addf %417, %420 : vector<32x256xf32>
    %cst_309 = arith.constant 0.000000e+00 : f32
    %422 = vector.broadcast %cst_309 : f32 to vector<32x256xf32>
    %423 = arith.cmpf oge, %421, %422 : vector<32x256xf32>
    %cst_310 = arith.constant 5.000000e-02 : f32
    %424 = vector.broadcast %cst_310 : f32 to vector<32x256xf32>
    %425 = arith.mulf %424, %421 : vector<32x256xf32>
    %426 = arith.select %423, %421, %425 : vector<32x256xi1>, vector<32x256xf32>
    %cst_311 = arith.constant 0.000000e+00 : bf16
    %427 = vector.broadcast %cst_311 : bf16 to vector<32x128xbf16>
    %c0_312 = arith.constant 0 : index
    %c0_313 = arith.constant 0 : index
    %428 = vector.load %arg11[%c0_312, %c0_313] : memref<32x401xbf16, #tpu.memory_space<vmem>>, vector<32x128xbf16>
    tpu.vector_store %arg11[%c0_312, %c0_313], %427 {strides = array<i32>} : memref<32x401xbf16, #tpu.memory_space<vmem>>, vector<32x128xbf16>,
    %429 = arith.truncf %426 : vector<32x256xf32> to vector<32x256xbf16>
    %c0_314 = arith.constant 0 : index
    %c128_315 = arith.constant 128 : index
    %430 = vector.load %arg11[%c0_314, %c128_315] : memref<32x401xbf16, #tpu.memory_space<vmem>>, vector<32x256xbf16>
    tpu.vector_store %arg11[%c0_314, %c128_315], %429 {strides = array<i32>} : memref<32x401xbf16, #tpu.memory_space<vmem>>, vector<32x256xbf16>,
    %cst_316 = arith.constant 0.000000e+00 : bf16
    %431 = vector.broadcast %cst_316 : bf16 to vector<32x17xbf16>
    %c0_317 = arith.constant 0 : index
    %c384_318 = arith.constant 384 : index
    %432 = vector.load %arg11[%c0_317, %c384_318] : memref<32x401xbf16, #tpu.memory_space<vmem>>, vector<32x17xbf16>
    tpu.vector_store %arg11[%c0_317, %c384_318], %431 {strides = array<i32>} : memref<32x401xbf16, #tpu.memory_space<vmem>>, vector<32x17xbf16>,
    %c37 = arith.constant 37 : index
    %c0_319 = arith.constant 0 : index
    %c0_320 = arith.constant 0 : index
    %433 = vector.load %arg2[%c37, %c0_319, %c0_320] : memref<54x32x32xbf16, #tpu.memory_space<vmem>>, vector<1x32x32xbf16>
    %434 = vector.shape_cast %433 : vector<1x32x32xbf16> to vector<32x32xbf16>
    %c0_321 = arith.constant 0 : index
    %c112_322 = arith.constant 112 : index
    %435 = vector.load %arg11[%c0_321, %c112_322] : memref<32x401xbf16, #tpu.memory_space<vmem>>, vector<32x256xbf16>
    %cst_323 = arith.constant dense<0.000000e+00> : vector<32x256xf32>
    %436 = tpu.matmul %434, %435, %cst_323 {dimension_numbers = #tpu.dot_dimension_numbers<[1], [0], [0], [1], [0, 0, 1, 1], [], []>} : vector<32x32xbf16>, vector<32x256xbf16>, vector<32x256xf32> -> vector<32x256xf32>
    %c40 = arith.constant 40 : index
    %c0_324 = arith.constant 0 : index
    %c0_325 = arith.constant 0 : index
    %437 = vector.load %arg2[%c40, %c0_324, %c0_325] : memref<54x32x32xbf16, #tpu.memory_space<vmem>>, vector<1x32x32xbf16>
    %438 = vector.shape_cast %437 : vector<1x32x32xbf16> to vector<32x32xbf16>
    %c0_326 = arith.constant 0 : index
    %c128_327 = arith.constant 128 : index
    %439 = vector.load %arg11[%c0_326, %c128_327] : memref<32x401xbf16, #tpu.memory_space<vmem>>, vector<32x256xbf16>
    %cst_328 = arith.constant dense<0.000000e+00> : vector<32x256xf32>
    %440 = tpu.matmul %438, %439, %cst_328 {dimension_numbers = #tpu.dot_dimension_numbers<[1], [0], [0], [1], [0, 0, 1, 1], [], []>} : vector<32x32xbf16>, vector<32x256xbf16>, vector<32x256xf32> -> vector<32x256xf32>
    %441 = arith.addf %436, %440 : vector<32x256xf32>
    %c43 = arith.constant 43 : index
    %c0_329 = arith.constant 0 : index
    %c0_330 = arith.constant 0 : index
    %442 = vector.load %arg2[%c43, %c0_329, %c0_330] : memref<54x32x32xbf16, #tpu.memory_space<vmem>>, vector<1x32x32xbf16>
    %443 = vector.shape_cast %442 : vector<1x32x32xbf16> to vector<32x32xbf16>
    %c0_331 = arith.constant 0 : index
    %c144_332 = arith.constant 144 : index
    %444 = vector.load %arg11[%c0_331, %c144_332] : memref<32x401xbf16, #tpu.memory_space<vmem>>, vector<32x256xbf16>
    %cst_333 = arith.constant dense<0.000000e+00> : vector<32x256xf32>
    %445 = tpu.matmul %443, %444, %cst_333 {dimension_numbers = #tpu.dot_dimension_numbers<[1], [0], [0], [1], [0, 0, 1, 1], [], []>} : vector<32x32xbf16>, vector<32x256xbf16>, vector<32x256xf32> -> vector<32x256xf32>
    %446 = arith.addf %441, %445 : vector<32x256xf32>
    %c36 = arith.constant 36 : index
    %c0_334 = arith.constant 0 : index
    %c0_335 = arith.constant 0 : index
    %447 = vector.load %arg2[%c36, %c0_334, %c0_335] : memref<54x32x32xbf16, #tpu.memory_space<vmem>>, vector<1x32x32xbf16>
    %448 = vector.shape_cast %447 : vector<1x32x32xbf16> to vector<32x32xbf16>
    %c0_336 = arith.constant 0 : index
    %c111_337 = arith.constant 111 : index
    %449 = vector.load %arg11[%c0_336, %c111_337] : memref<32x401xbf16, #tpu.memory_space<vmem>>, vector<32x256xbf16>
    %cst_338 = arith.constant dense<0.000000e+00> : vector<32x256xf32>
    %450 = tpu.matmul %448, %449, %cst_338 {dimension_numbers = #tpu.dot_dimension_numbers<[1], [0], [0], [1], [0, 0, 1, 1], [], []>} : vector<32x32xbf16>, vector<32x256xbf16>, vector<32x256xf32> -> vector<32x256xf32>
    %c39 = arith.constant 39 : index
    %c0_339 = arith.constant 0 : index
    %c0_340 = arith.constant 0 : index
    %451 = vector.load %arg2[%c39, %c0_339, %c0_340] : memref<54x32x32xbf16, #tpu.memory_space<vmem>>, vector<1x32x32xbf16>
    %452 = vector.shape_cast %451 : vector<1x32x32xbf16> to vector<32x32xbf16>
    %c0_341 = arith.constant 0 : index
    %c127_342 = arith.constant 127 : index
    %453 = vector.load %arg11[%c0_341, %c127_342] : memref<32x401xbf16, #tpu.memory_space<vmem>>, vector<32x256xbf16>
    %cst_343 = arith.constant dense<0.000000e+00> : vector<32x256xf32>
    %454 = tpu.matmul %452, %453, %cst_343 {dimension_numbers = #tpu.dot_dimension_numbers<[1], [0], [0], [1], [0, 0, 1, 1], [], []>} : vector<32x32xbf16>, vector<32x256xbf16>, vector<32x256xf32> -> vector<32x256xf32>
    %455 = arith.addf %450, %454 : vector<32x256xf32>
    %c42 = arith.constant 42 : index
    %c0_344 = arith.constant 0 : index
    %c0_345 = arith.constant 0 : index
    %456 = vector.load %arg2[%c42, %c0_344, %c0_345] : memref<54x32x32xbf16, #tpu.memory_space<vmem>>, vector<1x32x32xbf16>
    %457 = vector.shape_cast %456 : vector<1x32x32xbf16> to vector<32x32xbf16>
    %c0_346 = arith.constant 0 : index
    %c143_347 = arith.constant 143 : index
    %458 = vector.load %arg11[%c0_346, %c143_347] : memref<32x401xbf16, #tpu.memory_space<vmem>>, vector<32x256xbf16>
    %cst_348 = arith.constant dense<0.000000e+00> : vector<32x256xf32>
    %459 = tpu.matmul %457, %458, %cst_348 {dimension_numbers = #tpu.dot_dimension_numbers<[1], [0], [0], [1], [0, 0, 1, 1], [], []>} : vector<32x32xbf16>, vector<32x256xbf16>, vector<32x256xf32> -> vector<32x256xf32>
    %460 = arith.addf %455, %459 : vector<32x256xf32>
    %461 = vector.broadcast %20 : vector<1x256xf32> to vector<32x256xf32>
    %462 = arith.mulf %461, %460 : vector<32x256xf32>
    %463 = arith.addf %446, %462 : vector<32x256xf32>
    %c38 = arith.constant 38 : index
    %c0_349 = arith.constant 0 : index
    %c0_350 = arith.constant 0 : index
    %464 = vector.load %arg2[%c38, %c0_349, %c0_350] : memref<54x32x32xbf16, #tpu.memory_space<vmem>>, vector<1x32x32xbf16>
    %465 = vector.shape_cast %464 : vector<1x32x32xbf16> to vector<32x32xbf16>
    %c0_351 = arith.constant 0 : index
    %c113_352 = arith.constant 113 : index
    %466 = vector.load %arg11[%c0_351, %c113_352] : memref<32x401xbf16, #tpu.memory_space<vmem>>, vector<32x256xbf16>
    %cst_353 = arith.constant dense<0.000000e+00> : vector<32x256xf32>
    %467 = tpu.matmul %465, %466, %cst_353 {dimension_numbers = #tpu.dot_dimension_numbers<[1], [0], [0], [1], [0, 0, 1, 1], [], []>} : vector<32x32xbf16>, vector<32x256xbf16>, vector<32x256xf32> -> vector<32x256xf32>
    %c41 = arith.constant 41 : index
    %c0_354 = arith.constant 0 : index
    %c0_355 = arith.constant 0 : index
    %468 = vector.load %arg2[%c41, %c0_354, %c0_355] : memref<54x32x32xbf16, #tpu.memory_space<vmem>>, vector<1x32x32xbf16>
    %469 = vector.shape_cast %468 : vector<1x32x32xbf16> to vector<32x32xbf16>
    %c0_356 = arith.constant 0 : index
    %c129_357 = arith.constant 129 : index
    %470 = vector.load %arg11[%c0_356, %c129_357] : memref<32x401xbf16, #tpu.memory_space<vmem>>, vector<32x256xbf16>
    %cst_358 = arith.constant dense<0.000000e+00> : vector<32x256xf32>
    %471 = tpu.matmul %469, %470, %cst_358 {dimension_numbers = #tpu.dot_dimension_numbers<[1], [0], [0], [1], [0, 0, 1, 1], [], []>} : vector<32x32xbf16>, vector<32x256xbf16>, vector<32x256xf32> -> vector<32x256xf32>
    %472 = arith.addf %467, %471 : vector<32x256xf32>
    %c44 = arith.constant 44 : index
    %c0_359 = arith.constant 0 : index
    %c0_360 = arith.constant 0 : index
    %473 = vector.load %arg2[%c44, %c0_359, %c0_360] : memref<54x32x32xbf16, #tpu.memory_space<vmem>>, vector<1x32x32xbf16>
    %474 = vector.shape_cast %473 : vector<1x32x32xbf16> to vector<32x32xbf16>
    %c0_361 = arith.constant 0 : index
    %c145_362 = arith.constant 145 : index
    %475 = vector.load %arg11[%c0_361, %c145_362] : memref<32x401xbf16, #tpu.memory_space<vmem>>, vector<32x256xbf16>
    %cst_363 = arith.constant dense<0.000000e+00> : vector<32x256xf32>
    %476 = tpu.matmul %474, %475, %cst_363 {dimension_numbers = #tpu.dot_dimension_numbers<[1], [0], [0], [1], [0, 0, 1, 1], [], []>} : vector<32x32xbf16>, vector<32x256xbf16>, vector<32x256xf32> -> vector<32x256xf32>
    %477 = arith.addf %472, %476 : vector<32x256xf32>
    %478 = vector.broadcast %24 : vector<1x256xf32> to vector<32x256xf32>
    %479 = arith.mulf %478, %477 : vector<32x256xf32>
    %480 = arith.addf %463, %479 : vector<32x256xf32>
    %c4_364 = arith.constant 4 : index
    %c0_365 = arith.constant 0 : index
    %c0_366 = arith.constant 0 : index
    %481 = vector.load %arg3[%c4_364, %c0_365, %c0_366] : memref<6x32x1xf32, #tpu.memory_space<vmem>>, vector<1x32x1xf32>
    %482 = vector.shape_cast %481 : vector<1x32x1xf32> to vector<32x1xf32>
    %483 = vector.broadcast %482 : vector<32x1xf32> to vector<32x256xf32>
    %484 = arith.addf %480, %483 : vector<32x256xf32>
    %cst_367 = arith.constant 0.000000e+00 : f32
    %485 = vector.broadcast %cst_367 : f32 to vector<32x256xf32>
    %486 = arith.cmpf oge, %484, %485 : vector<32x256xf32>
    %cst_368 = arith.constant 5.000000e-02 : f32
    %487 = vector.broadcast %cst_368 : f32 to vector<32x256xf32>
    %488 = arith.mulf %487, %484 : vector<32x256xf32>
    %489 = arith.select %486, %484, %488 : vector<32x256xi1>, vector<32x256xf32>
    %cst_369 = arith.constant 0.000000e+00 : bf16
    %490 = vector.broadcast %cst_369 : bf16 to vector<32x128xbf16>
    %c0_370 = arith.constant 0 : index
    %c0_371 = arith.constant 0 : index
    %491 = vector.load %arg12[%c0_370, %c0_371] : memref<32x401xbf16, #tpu.memory_space<vmem>>, vector<32x128xbf16>
    tpu.vector_store %arg12[%c0_370, %c0_371], %490 {strides = array<i32>} : memref<32x401xbf16, #tpu.memory_space<vmem>>, vector<32x128xbf16>,
    %492 = arith.truncf %489 : vector<32x256xf32> to vector<32x256xbf16>
    %c0_372 = arith.constant 0 : index
    %c128_373 = arith.constant 128 : index
    %493 = vector.load %arg12[%c0_372, %c128_373] : memref<32x401xbf16, #tpu.memory_space<vmem>>, vector<32x256xbf16>
    tpu.vector_store %arg12[%c0_372, %c128_373], %492 {strides = array<i32>} : memref<32x401xbf16, #tpu.memory_space<vmem>>, vector<32x256xbf16>,
    %cst_374 = arith.constant 0.000000e+00 : bf16
    %494 = vector.broadcast %cst_374 : bf16 to vector<32x17xbf16>
    %c0_375 = arith.constant 0 : index
    %c384_376 = arith.constant 384 : index
    %495 = vector.load %arg12[%c0_375, %c384_376] : memref<32x401xbf16, #tpu.memory_space<vmem>>, vector<32x17xbf16>
    tpu.vector_store %arg12[%c0_375, %c384_376], %494 {strides = array<i32>} : memref<32x401xbf16, #tpu.memory_space<vmem>>, vector<32x17xbf16>,
    %c46 = arith.constant 46 : index
    %c0_377 = arith.constant 0 : index
    %c0_378 = arith.constant 0 : index
    %496 = vector.load %arg2[%c46, %c0_377, %c0_378] : memref<54x32x32xbf16, #tpu.memory_space<vmem>>, vector<1x32x32xbf16>
    %497 = vector.shape_cast %496 : vector<1x32x32xbf16> to vector<32x32xbf16>
    %c0_379 = arith.constant 0 : index
    %c112_380 = arith.constant 112 : index
    %498 = vector.load %arg12[%c0_379, %c112_380] : memref<32x401xbf16, #tpu.memory_space<vmem>>, vector<32x256xbf16>
    %cst_381 = arith.constant dense<0.000000e+00> : vector<32x256xf32>
    %499 = tpu.matmul %497, %498, %cst_381 {dimension_numbers = #tpu.dot_dimension_numbers<[1], [0], [0], [1], [0, 0, 1, 1], [], []>} : vector<32x32xbf16>, vector<32x256xbf16>, vector<32x256xf32> -> vector<32x256xf32>
    %c49 = arith.constant 49 : index
    %c0_382 = arith.constant 0 : index
    %c0_383 = arith.constant 0 : index
    %500 = vector.load %arg2[%c49, %c0_382, %c0_383] : memref<54x32x32xbf16, #tpu.memory_space<vmem>>, vector<1x32x32xbf16>
    %501 = vector.shape_cast %500 : vector<1x32x32xbf16> to vector<32x32xbf16>
    %c0_384 = arith.constant 0 : index
    %c128_385 = arith.constant 128 : index
    %502 = vector.load %arg12[%c0_384, %c128_385] : memref<32x401xbf16, #tpu.memory_space<vmem>>, vector<32x256xbf16>
    %cst_386 = arith.constant dense<0.000000e+00> : vector<32x256xf32>
    %503 = tpu.matmul %501, %502, %cst_386 {dimension_numbers = #tpu.dot_dimension_numbers<[1], [0], [0], [1], [0, 0, 1, 1], [], []>} : vector<32x32xbf16>, vector<32x256xbf16>, vector<32x256xf32> -> vector<32x256xf32>
    %504 = arith.addf %499, %503 : vector<32x256xf32>
    %c52 = arith.constant 52 : index
    %c0_387 = arith.constant 0 : index
    %c0_388 = arith.constant 0 : index
    %505 = vector.load %arg2[%c52, %c0_387, %c0_388] : memref<54x32x32xbf16, #tpu.memory_space<vmem>>, vector<1x32x32xbf16>
    %506 = vector.shape_cast %505 : vector<1x32x32xbf16> to vector<32x32xbf16>
    %c0_389 = arith.constant 0 : index
    %c144_390 = arith.constant 144 : index
    %507 = vector.load %arg12[%c0_389, %c144_390] : memref<32x401xbf16, #tpu.memory_space<vmem>>, vector<32x256xbf16>
    %cst_391 = arith.constant dense<0.000000e+00> : vector<32x256xf32>
    %508 = tpu.matmul %506, %507, %cst_391 {dimension_numbers = #tpu.dot_dimension_numbers<[1], [0], [0], [1], [0, 0, 1, 1], [], []>} : vector<32x32xbf16>, vector<32x256xbf16>, vector<32x256xf32> -> vector<32x256xf32>
    %509 = arith.addf %504, %508 : vector<32x256xf32>
    %c45 = arith.constant 45 : index
    %c0_392 = arith.constant 0 : index
    %c0_393 = arith.constant 0 : index
    %510 = vector.load %arg2[%c45, %c0_392, %c0_393] : memref<54x32x32xbf16, #tpu.memory_space<vmem>>, vector<1x32x32xbf16>
    %511 = vector.shape_cast %510 : vector<1x32x32xbf16> to vector<32x32xbf16>
    %c0_394 = arith.constant 0 : index
    %c111_395 = arith.constant 111 : index
    %512 = vector.load %arg12[%c0_394, %c111_395] : memref<32x401xbf16, #tpu.memory_space<vmem>>, vector<32x256xbf16>
    %cst_396 = arith.constant dense<0.000000e+00> : vector<32x256xf32>
    %513 = tpu.matmul %511, %512, %cst_396 {dimension_numbers = #tpu.dot_dimension_numbers<[1], [0], [0], [1], [0, 0, 1, 1], [], []>} : vector<32x32xbf16>, vector<32x256xbf16>, vector<32x256xf32> -> vector<32x256xf32>
    %c48 = arith.constant 48 : index
    %c0_397 = arith.constant 0 : index
    %c0_398 = arith.constant 0 : index
    %514 = vector.load %arg2[%c48, %c0_397, %c0_398] : memref<54x32x32xbf16, #tpu.memory_space<vmem>>, vector<1x32x32xbf16>
    %515 = vector.shape_cast %514 : vector<1x32x32xbf16> to vector<32x32xbf16>
    %c0_399 = arith.constant 0 : index
    %c127_400 = arith.constant 127 : index
    %516 = vector.load %arg12[%c0_399, %c127_400] : memref<32x401xbf16, #tpu.memory_space<vmem>>, vector<32x256xbf16>
    %cst_401 = arith.constant dense<0.000000e+00> : vector<32x256xf32>
    %517 = tpu.matmul %515, %516, %cst_401 {dimension_numbers = #tpu.dot_dimension_numbers<[1], [0], [0], [1], [0, 0, 1, 1], [], []>} : vector<32x32xbf16>, vector<32x256xbf16>, vector<32x256xf32> -> vector<32x256xf32>
    %518 = arith.addf %513, %517 : vector<32x256xf32>
    %c51 = arith.constant 51 : index
    %c0_402 = arith.constant 0 : index
    %c0_403 = arith.constant 0 : index
    %519 = vector.load %arg2[%c51, %c0_402, %c0_403] : memref<54x32x32xbf16, #tpu.memory_space<vmem>>, vector<1x32x32xbf16>
    %520 = vector.shape_cast %519 : vector<1x32x32xbf16> to vector<32x32xbf16>
    %c0_404 = arith.constant 0 : index
    %c143_405 = arith.constant 143 : index
    %521 = vector.load %arg12[%c0_404, %c143_405] : memref<32x401xbf16, #tpu.memory_space<vmem>>, vector<32x256xbf16>
    %cst_406 = arith.constant dense<0.000000e+00> : vector<32x256xf32>
    %522 = tpu.matmul %520, %521, %cst_406 {dimension_numbers = #tpu.dot_dimension_numbers<[1], [0], [0], [1], [0, 0, 1, 1], [], []>} : vector<32x32xbf16>, vector<32x256xbf16>, vector<32x256xf32> -> vector<32x256xf32>
    %523 = arith.addf %518, %522 : vector<32x256xf32>
    %524 = vector.broadcast %20 : vector<1x256xf32> to vector<32x256xf32>
    %525 = arith.mulf %524, %523 : vector<32x256xf32>
    %526 = arith.addf %509, %525 : vector<32x256xf32>
    %c47 = arith.constant 47 : index
    %c0_407 = arith.constant 0 : index
    %c0_408 = arith.constant 0 : index
    %527 = vector.load %arg2[%c47, %c0_407, %c0_408] : memref<54x32x32xbf16, #tpu.memory_space<vmem>>, vector<1x32x32xbf16>
    %528 = vector.shape_cast %527 : vector<1x32x32xbf16> to vector<32x32xbf16>
    %c0_409 = arith.constant 0 : index
    %c113_410 = arith.constant 113 : index
    %529 = vector.load %arg12[%c0_409, %c113_410] : memref<32x401xbf16, #tpu.memory_space<vmem>>, vector<32x256xbf16>
    %cst_411 = arith.constant dense<0.000000e+00> : vector<32x256xf32>
    %530 = tpu.matmul %528, %529, %cst_411 {dimension_numbers = #tpu.dot_dimension_numbers<[1], [0], [0], [1], [0, 0, 1, 1], [], []>} : vector<32x32xbf16>, vector<32x256xbf16>, vector<32x256xf32> -> vector<32x256xf32>
    %c50 = arith.constant 50 : index
    %c0_412 = arith.constant 0 : index
    %c0_413 = arith.constant 0 : index
    %531 = vector.load %arg2[%c50, %c0_412, %c0_413] : memref<54x32x32xbf16, #tpu.memory_space<vmem>>, vector<1x32x32xbf16>
    %532 = vector.shape_cast %531 : vector<1x32x32xbf16> to vector<32x32xbf16>
    %c0_414 = arith.constant 0 : index
    %c129_415 = arith.constant 129 : index
    %533 = vector.load %arg12[%c0_414, %c129_415] : memref<32x401xbf16, #tpu.memory_space<vmem>>, vector<32x256xbf16>
    %cst_416 = arith.constant dense<0.000000e+00> : vector<32x256xf32>
    %534 = tpu.matmul %532, %533, %cst_416 {dimension_numbers = #tpu.dot_dimension_numbers<[1], [0], [0], [1], [0, 0, 1, 1], [], []>} : vector<32x32xbf16>, vector<32x256xbf16>, vector<32x256xf32> -> vector<32x256xf32>
    %535 = arith.addf %530, %534 : vector<32x256xf32>
    %c53 = arith.constant 53 : index
    %c0_417 = arith.constant 0 : index
    %c0_418 = arith.constant 0 : index
    %536 = vector.load %arg2[%c53, %c0_417, %c0_418] : memref<54x32x32xbf16, #tpu.memory_space<vmem>>, vector<1x32x32xbf16>
    %537 = vector.shape_cast %536 : vector<1x32x32xbf16> to vector<32x32xbf16>
    %c0_419 = arith.constant 0 : index
    %c145_420 = arith.constant 145 : index
    %538 = vector.load %arg12[%c0_419, %c145_420] : memref<32x401xbf16, #tpu.memory_space<vmem>>, vector<32x256xbf16>
    %cst_421 = arith.constant dense<0.000000e+00> : vector<32x256xf32>
    %539 = tpu.matmul %537, %538, %cst_421 {dimension_numbers = #tpu.dot_dimension_numbers<[1], [0], [0], [1], [0, 0, 1, 1], [], []>} : vector<32x32xbf16>, vector<32x256xbf16>, vector<32x256xf32> -> vector<32x256xf32>
    %540 = arith.addf %535, %539 : vector<32x256xf32>
    %541 = vector.broadcast %24 : vector<1x256xf32> to vector<32x256xf32>
    %542 = arith.mulf %541, %540 : vector<32x256xf32>
    %543 = arith.addf %526, %542 : vector<32x256xf32>
    %c5_422 = arith.constant 5 : index
    %c0_423 = arith.constant 0 : index
    %c0_424 = arith.constant 0 : index
    %544 = vector.load %arg3[%c5_422, %c0_423, %c0_424] : memref<6x32x1xf32, #tpu.memory_space<vmem>>, vector<1x32x1xf32>
    %545 = vector.shape_cast %544 : vector<1x32x1xf32> to vector<32x1xf32>
    %546 = vector.broadcast %545 : vector<32x1xf32> to vector<32x256xf32>
    %547 = arith.addf %543, %546 : vector<32x256xf32>
    %cst_425 = arith.constant 0.000000e+00 : f32
    %548 = vector.broadcast %cst_425 : f32 to vector<32x256xf32>
    %549 = arith.cmpf oge, %547, %548 : vector<32x256xf32>
    %cst_426 = arith.constant 5.000000e-02 : f32
    %550 = vector.broadcast %cst_426 : f32 to vector<32x256xf32>
    %551 = arith.mulf %550, %547 : vector<32x256xf32>
    %552 = arith.select %549, %547, %551 : vector<32x256xi1>, vector<32x256xf32>
    %c0_427 = arith.constant 0 : index
    %c0_428 = arith.constant 0 : index
    %553 = vector.load %arg13[%c0_427, %c0_428] : memref<32x256xbf16, #tpu.memory_space<vmem>>, vector<32x256xbf16>
    %554 = arith.extf %553 : vector<32x256xbf16> to vector<32x256xf32>
    %cst_429 = arith.constant dense<0.000000e+00> : vector<32xf32>
    %555 = vector.multi_reduction <add>, %554, %cst_429 [1] : vector<32x256xf32> to vector<32xf32>
    %556 = vector.shape_cast %555 : vector<32xf32> to vector<32x1xf32>
    %557 = arith.mulf %554, %554 : vector<32x256xf32>
    %cst_430 = arith.constant dense<0.000000e+00> : vector<32xf32>
    %558 = vector.multi_reduction <add>, %557, %cst_430 [1] : vector<32x256xf32> to vector<32xf32>
    %559 = vector.shape_cast %558 : vector<32xf32> to vector<32x1xf32>
    %cst_431 = arith.constant 3.906250e-03 : f32
    %560 = vector.broadcast %cst_431 : f32 to vector<32x1xf32>
    %561 = arith.mulf %556, %560 : vector<32x1xf32>
    %cst_432 = arith.constant 2.560000e+02 : f32
    %562 = vector.broadcast %cst_432 : f32 to vector<32x1xf32>
    %563 = arith.mulf %562, %561 : vector<32x1xf32>
    %564 = arith.mulf %563, %561 : vector<32x1xf32>
    %565 = arith.subf %559, %564 : vector<32x1xf32>
    %cst_433 = arith.constant 0.000000e+00 : f32
    %566 = vector.broadcast %cst_433 : f32 to vector<32x1xf32>
    %567 = arith.maximumf %565, %566 : vector<32x1xf32>
    %cst_434 = arith.constant 0.00392156886 : f32
    %568 = vector.broadcast %cst_434 : f32 to vector<32x1xf32>
    %569 = arith.mulf %567, %568 : vector<32x1xf32>
    %570 = math.sqrt %569 : vector<32x1xf32>
    %c4_435 = arith.constant 4 : index
    %c0_436 = arith.constant 0 : index
    %c0_437 = arith.constant 0 : index
    %571 = vector.load %arg4[%c4_435, %c0_436, %c0_437] : memref<8x32x2xf32, #tpu.memory_space<vmem>>, vector<1x32x2xf32>
    %572 = vector.shape_cast %571 : vector<1x32x2xf32> to vector<32x2xf32>
    %573 = vector.broadcast %561 : vector<32x1xf32> to vector<32x2xf32>
    %574 = arith.mulf %572, %573 : vector<32x2xf32>
    %cst_438 = arith.constant dense<0.000000e+00> : vector<2xf32>
    %575 = vector.multi_reduction <add>, %574, %cst_438 [0] : vector<32x2xf32> to vector<2xf32>
    %576 = vector.shape_cast %575 : vector<2xf32> to vector<1x2xf32>
    %c4_439 = arith.constant 4 : index
    %c0_440 = arith.constant 0 : index
    %c0_441 = arith.constant 0 : index
    %577 = vector.load %arg5[%c4_439, %c0_440, %c0_441] : memref<8x1x2xf32, #tpu.memory_space<vmem>>, vector<1x1x2xf32>
    %578 = vector.shape_cast %577 : vector<1x1x2xf32> to vector<1x2xf32>
    %579 = arith.addf %576, %578 : vector<1x2xf32>
    %cst_442 = arith.constant 0.000000e+00 : f32
    %580 = vector.broadcast %cst_442 : f32 to vector<1x2xf32>
    %581 = arith.maximumf %579, %580 : vector<1x2xf32>
    %c4_443 = arith.constant 4 : index
    %c0_444 = arith.constant 0 : index
    %c0_445 = arith.constant 0 : index
    %582 = vector.load %arg6[%c4_443, %c0_444, %c0_445] : memref<8x32x2xf32, #tpu.memory_space<vmem>>, vector<1x32x2xf32>
    %583 = vector.shape_cast %582 : vector<1x32x2xf32> to vector<32x2xf32>
    %584 = vector.broadcast %581 : vector<1x2xf32> to vector<32x2xf32>
    %585 = arith.mulf %583, %584 : vector<32x2xf32>
    %cst_446 = arith.constant dense<0.000000e+00> : vector<32xf32>
    %586 = vector.multi_reduction <add>, %585, %cst_446 [1] : vector<32x2xf32> to vector<32xf32>
    %587 = vector.shape_cast %586 : vector<32xf32> to vector<32x1xf32>
    %c4_447 = arith.constant 4 : index
    %c0_448 = arith.constant 0 : index
    %c0_449 = arith.constant 0 : index
    %588 = vector.load %arg7[%c4_447, %c0_448, %c0_449] : memref<8x32x1xf32, #tpu.memory_space<vmem>>, vector<1x32x1xf32>
    %589 = vector.shape_cast %588 : vector<1x32x1xf32> to vector<32x1xf32>
    %590 = arith.addf %587, %589 : vector<32x1xf32>
    %591 = arith.negf %590 : vector<32x1xf32>
    %592 = math.exp %591 : vector<32x1xf32>
    %cst_450 = arith.constant 1.000000e+00 : f32
    %593 = vector.broadcast %cst_450 : f32 to vector<32x1xf32>
    %594 = arith.addf %593, %592 : vector<32x1xf32>
    %595 = arith.divf %593, %594 : vector<32x1xf32>
    %c5_451 = arith.constant 5 : index
    %c0_452 = arith.constant 0 : index
    %c0_453 = arith.constant 0 : index
    %596 = vector.load %arg4[%c5_451, %c0_452, %c0_453] : memref<8x32x2xf32, #tpu.memory_space<vmem>>, vector<1x32x2xf32>
    %597 = vector.shape_cast %596 : vector<1x32x2xf32> to vector<32x2xf32>
    %598 = vector.broadcast %570 : vector<32x1xf32> to vector<32x2xf32>
    %599 = arith.mulf %597, %598 : vector<32x2xf32>
    %cst_454 = arith.constant dense<0.000000e+00> : vector<2xf32>
    %600 = vector.multi_reduction <add>, %599, %cst_454 [0] : vector<32x2xf32> to vector<2xf32>
    %601 = vector.shape_cast %600 : vector<2xf32> to vector<1x2xf32>
    %c5_455 = arith.constant 5 : index
    %c0_456 = arith.constant 0 : index
    %c0_457 = arith.constant 0 : index
    %602 = vector.load %arg5[%c5_455, %c0_456, %c0_457] : memref<8x1x2xf32, #tpu.memory_space<vmem>>, vector<1x1x2xf32>
    %603 = vector.shape_cast %602 : vector<1x1x2xf32> to vector<1x2xf32>
    %604 = arith.addf %601, %603 : vector<1x2xf32>
    %cst_458 = arith.constant 0.000000e+00 : f32
    %605 = vector.broadcast %cst_458 : f32 to vector<1x2xf32>
    %606 = arith.maximumf %604, %605 : vector<1x2xf32>
    %c5_459 = arith.constant 5 : index
    %c0_460 = arith.constant 0 : index
    %c0_461 = arith.constant 0 : index
    %607 = vector.load %arg6[%c5_459, %c0_460, %c0_461] : memref<8x32x2xf32, #tpu.memory_space<vmem>>, vector<1x32x2xf32>
    %608 = vector.shape_cast %607 : vector<1x32x2xf32> to vector<32x2xf32>
    %609 = vector.broadcast %606 : vector<1x2xf32> to vector<32x2xf32>
    %610 = arith.mulf %608, %609 : vector<32x2xf32>
    %cst_462 = arith.constant dense<0.000000e+00> : vector<32xf32>
    %611 = vector.multi_reduction <add>, %610, %cst_462 [1] : vector<32x2xf32> to vector<32xf32>
    %612 = vector.shape_cast %611 : vector<32xf32> to vector<32x1xf32>
    %c5_463 = arith.constant 5 : index
    %c0_464 = arith.constant 0 : index
    %c0_465 = arith.constant 0 : index
    %613 = vector.load %arg7[%c5_463, %c0_464, %c0_465] : memref<8x32x1xf32, #tpu.memory_space<vmem>>, vector<1x32x1xf32>
    %614 = vector.shape_cast %613 : vector<1x32x1xf32> to vector<32x1xf32>
    %615 = arith.addf %612, %614 : vector<32x1xf32>
    %616 = arith.negf %615 : vector<32x1xf32>
    %617 = math.exp %616 : vector<32x1xf32>
    %cst_466 = arith.constant 1.000000e+00 : f32
    %618 = vector.broadcast %cst_466 : f32 to vector<32x1xf32>
    %619 = arith.addf %618, %617 : vector<32x1xf32>
    %620 = arith.divf %618, %619 : vector<32x1xf32>
    %621 = arith.addf %595, %620 : vector<32x1xf32>
    %cst_467 = arith.constant 5.000000e-01 : f32
    %622 = vector.broadcast %cst_467 : f32 to vector<32x1xf32>
    %623 = arith.mulf %621, %622 : vector<32x1xf32>
    %624 = vector.broadcast %623 : vector<32x1xf32> to vector<32x256xf32>
    %625 = arith.mulf %624, %554 : vector<32x256xf32>
    %626 = arith.addf %552, %625 : vector<32x256xf32>
    %cst_468 = arith.constant dense<0.000000e+00> : vector<32xf32>
    %627 = vector.multi_reduction <add>, %552, %cst_468 [1] : vector<32x256xf32> to vector<32xf32>
    %628 = vector.shape_cast %627 : vector<32xf32> to vector<32x1xf32>
    %629 = arith.mulf %552, %552 : vector<32x256xf32>
    %cst_469 = arith.constant dense<0.000000e+00> : vector<32xf32>
    %630 = vector.multi_reduction <add>, %629, %cst_469 [1] : vector<32x256xf32> to vector<32xf32>
    %631 = vector.shape_cast %630 : vector<32xf32> to vector<32x1xf32>
    %cst_470 = arith.constant 3.906250e-03 : f32
    %632 = vector.broadcast %cst_470 : f32 to vector<32x1xf32>
    %633 = arith.mulf %628, %632 : vector<32x1xf32>
    %cst_471 = arith.constant 2.560000e+02 : f32
    %634 = vector.broadcast %cst_471 : f32 to vector<32x1xf32>
    %635 = arith.mulf %634, %633 : vector<32x1xf32>
    %636 = arith.mulf %635, %633 : vector<32x1xf32>
    %637 = arith.subf %631, %636 : vector<32x1xf32>
    %cst_472 = arith.constant 0.000000e+00 : f32
    %638 = vector.broadcast %cst_472 : f32 to vector<32x1xf32>
    %639 = arith.maximumf %637, %638 : vector<32x1xf32>
    %cst_473 = arith.constant 0.00392156886 : f32
    %640 = vector.broadcast %cst_473 : f32 to vector<32x1xf32>
    %641 = arith.mulf %639, %640 : vector<32x1xf32>
    %642 = math.sqrt %641 : vector<32x1xf32>
    %c6_474 = arith.constant 6 : index
    %c0_475 = arith.constant 0 : index
    %c0_476 = arith.constant 0 : index
    %643 = vector.load %arg4[%c6_474, %c0_475, %c0_476] : memref<8x32x2xf32, #tpu.memory_space<vmem>>, vector<1x32x2xf32>
    %644 = vector.shape_cast %643 : vector<1x32x2xf32> to vector<32x2xf32>
    %645 = vector.broadcast %633 : vector<32x1xf32> to vector<32x2xf32>
    %646 = arith.mulf %644, %645 : vector<32x2xf32>
    %cst_477 = arith.constant dense<0.000000e+00> : vector<2xf32>
    %647 = vector.multi_reduction <add>, %646, %cst_477 [0] : vector<32x2xf32> to vector<2xf32>
    %648 = vector.shape_cast %647 : vector<2xf32> to vector<1x2xf32>
    %c6_478 = arith.constant 6 : index
    %c0_479 = arith.constant 0 : index
    %c0_480 = arith.constant 0 : index
    %649 = vector.load %arg5[%c6_478, %c0_479, %c0_480] : memref<8x1x2xf32, #tpu.memory_space<vmem>>, vector<1x1x2xf32>
    %650 = vector.shape_cast %649 : vector<1x1x2xf32> to vector<1x2xf32>
    %651 = arith.addf %648, %650 : vector<1x2xf32>
    %cst_481 = arith.constant 0.000000e+00 : f32
    %652 = vector.broadcast %cst_481 : f32 to vector<1x2xf32>
    %653 = arith.maximumf %651, %652 : vector<1x2xf32>
    %c6_482 = arith.constant 6 : index
    %c0_483 = arith.constant 0 : index
    %c0_484 = arith.constant 0 : index
    %654 = vector.load %arg6[%c6_482, %c0_483, %c0_484] : memref<8x32x2xf32, #tpu.memory_space<vmem>>, vector<1x32x2xf32>
    %655 = vector.shape_cast %654 : vector<1x32x2xf32> to vector<32x2xf32>
    %656 = vector.broadcast %653 : vector<1x2xf32> to vector<32x2xf32>
    %657 = arith.mulf %655, %656 : vector<32x2xf32>
    %cst_485 = arith.constant dense<0.000000e+00> : vector<32xf32>
    %658 = vector.multi_reduction <add>, %657, %cst_485 [1] : vector<32x2xf32> to vector<32xf32>
    %659 = vector.shape_cast %658 : vector<32xf32> to vector<32x1xf32>
    %c6_486 = arith.constant 6 : index
    %c0_487 = arith.constant 0 : index
    %c0_488 = arith.constant 0 : index
    %660 = vector.load %arg7[%c6_486, %c0_487, %c0_488] : memref<8x32x1xf32, #tpu.memory_space<vmem>>, vector<1x32x1xf32>
    %661 = vector.shape_cast %660 : vector<1x32x1xf32> to vector<32x1xf32>
    %662 = arith.addf %659, %661 : vector<32x1xf32>
    %663 = arith.negf %662 : vector<32x1xf32>
    %664 = math.exp %663 : vector<32x1xf32>
    %cst_489 = arith.constant 1.000000e+00 : f32
    %665 = vector.broadcast %cst_489 : f32 to vector<32x1xf32>
    %666 = arith.addf %665, %664 : vector<32x1xf32>
    %667 = arith.divf %665, %666 : vector<32x1xf32>
    %c7_490 = arith.constant 7 : index
    %c0_491 = arith.constant 0 : index
    %c0_492 = arith.constant 0 : index
    %668 = vector.load %arg4[%c7_490, %c0_491, %c0_492] : memref<8x32x2xf32, #tpu.memory_space<vmem>>, vector<1x32x2xf32>
    %669 = vector.shape_cast %668 : vector<1x32x2xf32> to vector<32x2xf32>
    %670 = vector.broadcast %642 : vector<32x1xf32> to vector<32x2xf32>
    %671 = arith.mulf %669, %670 : vector<32x2xf32>
    %cst_493 = arith.constant dense<0.000000e+00> : vector<2xf32>
    %672 = vector.multi_reduction <add>, %671, %cst_493 [0] : vector<32x2xf32> to vector<2xf32>
    %673 = vector.shape_cast %672 : vector<2xf32> to vector<1x2xf32>
    %c7_494 = arith.constant 7 : index
    %c0_495 = arith.constant 0 : index
    %c0_496 = arith.constant 0 : index
    %674 = vector.load %arg5[%c7_494, %c0_495, %c0_496] : memref<8x1x2xf32, #tpu.memory_space<vmem>>, vector<1x1x2xf32>
    %675 = vector.shape_cast %674 : vector<1x1x2xf32> to vector<1x2xf32>
    %676 = arith.addf %673, %675 : vector<1x2xf32>
    %cst_497 = arith.constant 0.000000e+00 : f32
    %677 = vector.broadcast %cst_497 : f32 to vector<1x2xf32>
    %678 = arith.maximumf %676, %677 : vector<1x2xf32>
    %c7_498 = arith.constant 7 : index
    %c0_499 = arith.constant 0 : index
    %c0_500 = arith.constant 0 : index
    %679 = vector.load %arg6[%c7_498, %c0_499, %c0_500] : memref<8x32x2xf32, #tpu.memory_space<vmem>>, vector<1x32x2xf32>
    %680 = vector.shape_cast %679 : vector<1x32x2xf32> to vector<32x2xf32>
    %681 = vector.broadcast %678 : vector<1x2xf32> to vector<32x2xf32>
    %682 = arith.mulf %680, %681 : vector<32x2xf32>
    %cst_501 = arith.constant dense<0.000000e+00> : vector<32xf32>
    %683 = vector.multi_reduction <add>, %682, %cst_501 [1] : vector<32x2xf32> to vector<32xf32>
    %684 = vector.shape_cast %683 : vector<32xf32> to vector<32x1xf32>
    %c7_502 = arith.constant 7 : index
    %c0_503 = arith.constant 0 : index
    %c0_504 = arith.constant 0 : index
    %685 = vector.load %arg7[%c7_502, %c0_503, %c0_504] : memref<8x32x1xf32, #tpu.memory_space<vmem>>, vector<1x32x1xf32>
    %686 = vector.shape_cast %685 : vector<1x32x1xf32> to vector<32x1xf32>
    %687 = arith.addf %684, %686 : vector<32x1xf32>
    %688 = arith.negf %687 : vector<32x1xf32>
    %689 = math.exp %688 : vector<32x1xf32>
    %cst_505 = arith.constant 1.000000e+00 : f32
    %690 = vector.broadcast %cst_505 : f32 to vector<32x1xf32>
    %691 = arith.addf %690, %689 : vector<32x1xf32>
    %692 = arith.divf %690, %691 : vector<32x1xf32>
    %693 = arith.addf %667, %692 : vector<32x1xf32>
    %cst_506 = arith.constant 5.000000e-01 : f32
    %694 = vector.broadcast %cst_506 : f32 to vector<32x1xf32>
    %695 = arith.mulf %693, %694 : vector<32x1xf32>
    %696 = vector.broadcast %695 : vector<32x1xf32> to vector<32x256xf32>
    %697 = arith.mulf %696, %552 : vector<32x256xf32>
    %698 = arith.addf %554, %697 : vector<32x256xf32>
    %699 = arith.truncf %626 : vector<32x256xf32> to vector<32x256xbf16>
    %700 = arith.truncf %698 : vector<32x256xf32> to vector<32x256xbf16>
    %701 = tpu.concatenate %699, %700 in 0 : vector<32x256xbf16>, vector<32x256xbf16> -> vector<64x256xbf16>
    %c0_507 = arith.constant 0 : index
    %c0_508 = arith.constant 0 : index
    %702 = vector.load %arg8[%c0_507, %c0_508] : memref<32x64xbf16, #tpu.memory_space<vmem>>, vector<32x64xbf16>
    %cst_509 = arith.constant dense<0.000000e+00> : vector<32x256xf32>
    %703 = tpu.matmul %702, %701, %cst_509 {dimension_numbers = #tpu.dot_dimension_numbers<[1], [0], [0], [1], [0, 0, 1, 1], [], []>} : vector<32x64xbf16>, vector<64x256xbf16>, vector<32x256xf32> -> vector<32x256xf32>
    %c0_510 = arith.constant 0 : index
    %c0_511 = arith.constant 0 : index
    %704 = vector.load %arg9[%c0_510, %c0_511] : memref<32x1xf32, #tpu.memory_space<vmem>>, vector<32x1xf32>
    %705 = vector.broadcast %704 : vector<32x1xf32> to vector<32x256xf32>
    %706 = arith.addf %703, %705 : vector<32x256xf32>
    %c0_512 = arith.constant 0 : index
    %c0_513 = arith.constant 0 : index
    %c0_514 = arith.constant 0 : index
    %707 = vector.load %arg10[%c0_512, %c0_513, %c0_514] : memref<1x32x256xf32, #tpu.memory_space<vmem>>, vector<1x32x256xf32>
    %708 = vector.shape_cast %707 : vector<1x32x256xf32> to vector<32x256xf32>
    %709 = vector.shape_cast %706 : vector<32x256xf32> to vector<1x32x256xf32>
    tpu.vector_store %arg10[%c0_512, %c0_513, %c0_514], %709 {strides = array<i32>} : memref<1x32x256xf32, #tpu.memory_space<vmem>>, vector<1x32x256xf32>,
    return
  }
  func.func @transform_0(%arg0: i32) -> (i32, i32, i32) {
    %c0_i32 = arith.constant 0 : i32
    %c0_i32_0 = arith.constant 0 : i32
    %c0_i32_1 = arith.constant 0 : i32
    return %arg0, %c0_i32, %c0_i32_0 : i32, i32, i32
  }
  func.func @transform_1(%arg0: i32) -> (i32, i32, i32) {
    %c0_i32 = arith.constant 0 : i32
    %c0_i32_0 = arith.constant 0 : i32
    %c0_i32_1 = arith.constant 0 : i32
    %c0_i32_2 = arith.constant 0 : i32
    return %c0_i32, %c0_i32_0, %c0_i32_1 : i32, i32, i32
  }
  func.func @transform_2(%arg0: i32) -> (i32, i32, i32) {
    %c0_i32 = arith.constant 0 : i32
    %c0_i32_0 = arith.constant 0 : i32
    %c0_i32_1 = arith.constant 0 : i32
    %c0_i32_2 = arith.constant 0 : i32
    return %c0_i32, %c0_i32_0, %c0_i32_1 : i32, i32, i32
  }
  func.func @transform_3(%arg0: i32) -> (i32, i32, i32) {
    %c0_i32 = arith.constant 0 : i32
    %c0_i32_0 = arith.constant 0 : i32
    %c0_i32_1 = arith.constant 0 : i32
    %c0_i32_2 = arith.constant 0 : i32
    return %c0_i32, %c0_i32_0, %c0_i32_1 : i32, i32, i32
  }
  func.func @transform_4(%arg0: i32) -> (i32, i32, i32) {
    %c0_i32 = arith.constant 0 : i32
    %c0_i32_0 = arith.constant 0 : i32
    %c0_i32_1 = arith.constant 0 : i32
    %c0_i32_2 = arith.constant 0 : i32
    return %c0_i32, %c0_i32_0, %c0_i32_1 : i32, i32, i32
  }
  func.func @transform_5(%arg0: i32) -> (i32, i32, i32) {
    %c0_i32 = arith.constant 0 : i32
    %c0_i32_0 = arith.constant 0 : i32
    %c0_i32_1 = arith.constant 0 : i32
    %c0_i32_2 = arith.constant 0 : i32
    return %c0_i32, %c0_i32_0, %c0_i32_1 : i32, i32, i32
  }
  func.func @transform_6(%arg0: i32) -> (i32, i32, i32) {
    %c0_i32 = arith.constant 0 : i32
    %c0_i32_0 = arith.constant 0 : i32
    %c0_i32_1 = arith.constant 0 : i32
    %c0_i32_2 = arith.constant 0 : i32
    return %c0_i32, %c0_i32_0, %c0_i32_1 : i32, i32, i32
  }
  func.func @transform_7(%arg0: i32) -> (i32, i32) {
    %c0_i32 = arith.constant 0 : i32
    %c0_i32_0 = arith.constant 0 : i32
    %c0_i32_1 = arith.constant 0 : i32
    return %c0_i32, %c0_i32_0 : i32, i32
  }
  func.func @transform_8(%arg0: i32) -> (i32, i32) {
    %c0_i32 = arith.constant 0 : i32
    %c0_i32_0 = arith.constant 0 : i32
    %c0_i32_1 = arith.constant 0 : i32
    return %c0_i32, %c0_i32_0 : i32, i32
  }
  func.func @transform_9(%arg0: i32) -> (i32, i32, i32) {
    %c0_i32 = arith.constant 0 : i32
    %c0_i32_0 = arith.constant 0 : i32
    %c0_i32_1 = arith.constant 0 : i32
    return %arg0, %c0_i32, %c0_i32_0 : i32, i32, i32
  }
}

</mosaic_0001>

<bundles_post_ra>
// kernel: _lambda_.1
= control target key start
LH: loop header
LB: loop body
LE: loop exit
PB: predicated region body
PF: predicated region fallthrough
CT: control target
= control target key end

     0   :  { %14 = vsyncpa [#allocation6], 0  ;;  %s10924_s0 = inlined_call_operand.vmem [shape: f32[2,32,256], index: 0, kind: input, shape index: {}]   ;;  %s10925_s1 = inlined_call_operand.hbm [shape: bf16[54,32,32], index: 1, kind: input, shape index: {}]   ;;  %s10926_s2 = inlined_call_operand.hbm [shape: f32[6,32,1], index: 2, kind: input, shape index: {}]   ;;  %s10927_s3 = inlined_call_operand.hbm [shape: f32[8,32,2], index: 3, kind: input, shape index: {}]   ;;  %s10928_s4 = inlined_call_operand.vmem [shape: f32[8,1,2], index: 4, kind: input, shape index: {}]   ;;  %s10929_s5 = inlined_call_operand.vmem [shape: f32[8,32,2], index: 5, kind: input, shape index: {}]   ;;  %s10930_s6 = inlined_call_operand.vmem [shape: f32[8,32,1], index: 6, kind: input, shape index: {}]   ;;  %s10931_s7 = inlined_call_operand.vmem [shape: bf16[32,64], index: 7, kind: input, shape index: {}]   ;;  %s10932_s8 = inlined_call_operand.vmem [shape: f32[32,1], index: 8, kind: input, shape index: {}]   ;;  %s10933_s9 = inlined_call_operand.vmem [shape: f32[2,32,256], index: 9, kind: output, shape index: {}]  }
   0x1   :  { %15 = vsyncpa [#allocation8], 0  ;;  %s8833_s30 = smov 0  }
   0x2 LB: > { %s8766_s10 = smov [#allocation7]   ;;  %s8839_s12 = sadd.s32 4294967295, %s8764_s30   ;;  %s8764_s30 = sphi %s8833_s30, %s21_s30  }
   0x3   : > { %s271_s11 = sshll.u32 %s8766_s10, 4  ;;  %p7694_p0 = scmp.ge.s32.totalorder %s8764_s30, 1  ;;  %s8848_s11 = int_to_ptr.vmem [resolvable:$true] %s271_s11 }
   0x4   : > { %p246_p1 = scmp.lt.s32.totalorder %s8764_s30, 3  ;;  %p10934_p2 = scmp.eq.s32.totalorder %s8839_s12, 0 }
   0x5   : > { %s8767_s14 = smov [#allocation5]   ;;  %s8768_s17 = smov [#allocation9]  }
   0x6   : > { %p8844_p3 = pnand %p7694_p0, %p246_p1  ;;  %s258_s15 = sshll.u32 %s8767_s14, 4  ;;  %s8852_s15 = int_to_ptr.vmem [resolvable:$true] %s258_s15 }
   0x7   : > { %s8860_s18 = sshll.u32 %s8768_s17, 4  ;;  %s8666_s21 = scalar_lea.hbm %s10926_s2, 3072  ;;  %s285_s18 = int_to_ptr.vmem [resolvable:$true] %s8860_s18 }
   0x8   : > { %s10936_s13 = scalar_select %p8844_p3, 1, 0 }
   0x9   : > { %p8334_p4 = pneg %p8844_p3  ;;  %p8667_p6 = scmp.ne.s32.totalorder %s10926_s2, %s8666_s21 }
   0xa   : > { %p8673_p10 = scmp.lt.u32.totalorder %s8666_s21, %s10926_s2 }
   0xb   : > { %p8856_p5 = pnand %p10934_p2, %p8334_p4 }
   0xd   : > { %p8870_p7 = pneg %p8856_p5 }
   0xf   : > { %p8669_p8 = pnand %p8870_p7, %p8667_p6 }
  0x11   : > { %p8670_p9 = pneg %p8669_p8 }
  0x13   : > { %p8675_p11 = pnand %p8673_p10, %p8670_p9 }
  0x15   : > { %8678 = shalt.err (!%p8675_p11)
}
  0x16   : > { %s8679_s27 = scalar_lea.vmem %s8848_s11, 3072  ;;  %p8687_p1 = scmp.lt.s32.totalorder %s8848_s11, %s8848_s11 }
  0x17   : > { %p8680_p12 = scmp.ne.s32.totalorder %s8848_s11, %s8679_s27  ;;  %p8688_p4 = scmp.lt.s32.totalorder %s8679_s27, %s8679_s27 }
  0x19   : > { %p8682_p13 = pnand %p8680_p12, %p8870_p7  ;;  %p8689_p6 = por %p8688_p4, %p8687_p1 }
  0x1b   : > { %p8683_p0 = pneg %p8682_p13 }
  0x1d   : > { %p8690_p8 = pnand %p8689_p6, %p8683_p0 }
  0x1f   : > { %8693 = shalt.err (!%p8690_p8)
}
  0x20   : > { %s8769_s28 = smov 128   ;;  %s8770_s29 = smov 8  }
  0x21   : > { %8340 = dma.hbm_to_vmem [thread:$0]  (!%p8856_p5), %s10926_s2, 3072, %s8848_s11, [#allocation8], %s8769_s28, %s8769_s28, %s8770_s29  }
  0x22   : > { %s8694_s20 = scalar_lea.hbm %s10925_s1, 13824 }
  0x23   : > { %p8695_p9 = scmp.ne.s32.totalorder %s10925_s1, %s8694_s20  ;;  %p8701_p12 = scmp.lt.u32.totalorder %s8694_s20, %s10925_s1 }
  0x25   : > { %p8697_p10 = pnand %p8695_p9, %p8870_p7 }
  0x27   : > { %p8698_p11 = pneg %p8697_p10 }
  0x29   : > { %p8703_p13 = pnand %p8701_p12, %p8698_p11 }
  0x2b   : > { %8706 = shalt.err (!%p8703_p13)
}
  0x2c   : > { %s8707_s11 = scalar_lea.vmem %s8852_s15, 13824  ;;  %p8715_p6 = scmp.lt.s32.totalorder %s8852_s15, %s8852_s15 }
  0x2d   : > { %p8708_p0 = scmp.ne.s32.totalorder %s8852_s15, %s8707_s11  ;;  %p8716_p8 = scmp.lt.s32.totalorder %s8707_s11, %s8707_s11 }
  0x2f   : > { %p8710_p1 = pnand %p8708_p0, %p8870_p7  ;;  %p8717_p9 = por %p8716_p8, %p8715_p6 }
  0x31   : > { %p8711_p4 = pneg %p8710_p1 }
  0x33   : > { %p8718_p10 = pnand %p8717_p9, %p8711_p4 }
  0x35   : > { %8721 = shalt.err (!%p8718_p10)
}
  0x36   : > { %s8771_s26 = smov 64   ;;  %s8772_s27 = smov 4  }
  0x37   : > { %8337 = dma.hbm_to_vmem [thread:$0]  (!%p8856_p5), %s10925_s1, 13824, %s8852_s15, [#allocation6], %s8771_s26, %s8771_s26, %s8772_s27  }
  0x38   : > { %s8722_s20 = scalar_lea.hbm %s10927_s3, 4096 }
  0x39   : > { %p8723_p11 = scmp.ne.s32.totalorder %s10927_s3, %s8722_s20  ;;  %p8729_p0 = scmp.lt.u32.totalorder %s8722_s20, %s10927_s3 }
  0x3b   : > { %p8725_p12 = pnand %p8723_p11, %p8870_p7 }
  0x3d   : > { %p8726_p13 = pneg %p8725_p12 }
  0x3f   : > { %p8731_p1 = pnand %p8729_p0, %p8726_p13 }
  0x41   : > { %8734 = shalt.err (!%p8731_p1)
}
  0x42   : > { %s8735_s11 = scalar_lea.vmem %s285_s18, 4096  ;;  %p8743_p9 = scmp.lt.s32.totalorder %s285_s18, %s285_s18 }
  0x43   : > { %p8736_p4 = scmp.ne.s32.totalorder %s285_s18, %s8735_s11  ;;  %p8744_p10 = scmp.lt.s32.totalorder %s8735_s11, %s8735_s11 }
  0x45   : > { %p8738_p6 = pnand %p8736_p4, %p8870_p7  ;;  %p8745_p2 = por %p8744_p10, %p8743_p9 }
  0x47   : > { %p8739_p8 = pneg %p8738_p6 }
  0x49   : > { %p8746_p3 = pnand %p8745_p2, %p8739_p8 }
  0x4b   : > { %8749 = shalt.err (!%p8746_p3)
}
  0x4c   : > { %8343 = dma.hbm_to_vmem [thread:$0]  (!%p8856_p5), %s10927_s3, 4096, %s285_s18, [#allocation8], %s8769_s28, %s8769_s28, %s8770_s29  }
  0x4d   : > { %p10939_p11 = scmp.ne.s32.totalorder %s10936_s13, 0 }
  0x4e   : > { %p10940_p7 = scmp.eq.s32.totalorder (!%p10939_p11), %s8839_s12, 0 }
  0x4f   : > { %323 = sbr.rel (%p10939_p11) target bundleno = 4134 (0x1026), region = 56 }
  0x56   : > { %8755 = dma.done.wait (%p10940_p7), [#allocation6], 13824   ;;  %p10941_p12 = pmov %p10940_p7 }
  0x57   : > { %p10942_p2 = pmov %p10940_p7 }
  0x58   : > { %8757 = vsyncadd (%p10941_p12), [#allocation6], 4294953472 }
  0x59   : > { %8759 = dma.done.wait (%p10942_p2), [#allocation8], 7168   ;;  %p10943_p3 = pmov %p10942_p2 }
  0x5a   : > { %p367_p13 = scmp.lt.s32.totalorder %s8839_s12, 1  ;;  %vm435_vm0 = vcmask 138240   ;;  %v8773_v0 = vmov 0   ;;  %s8774_s16 = smov 16   ;;  %v8377_v15 = vld [vmem:[#allocation5 + $0x40] sm:$0xff]   ;;  %vm464_vm1 = vcmask 261120  }
  0x5b   : > { %8761 = vsyncadd (%p10943_p3), [#allocation8], 4294960128  ;;  %540 = vrot.lane.b32.xlu1 %v8773_v0, %s8774_s16  ;;  %436 = vst.msk [vmem:[#allocation2 + $0x18] sm:$0xff] %vm435_vm0, %v8773_v0  ;;  %503 = vmatprep.mubr.bf16.mxu0 %v8773_v0  ;;  %s8775_s29 = smov 112   ;;  %v8380_v16 = vld [vmem:[#allocation5 + $0x48] sm:$0xff]   ;;  %s8776_s27 = smov 1  }
  0x5c   : > { %437 = vst.msk [vmem:[#allocation2 + $0x38] sm:$0xff] %vm435_vm0, %v8773_v0  ;;  %1418 = vst.msk [vmem:[#allocation3 + $0x18] sm:$0xff] %vm435_vm0, %v8773_v0  ;;  %s10945_s12 = smov (!%p367_p13, %s8839_s12), 1  ;;  %513 = vmatprep.mubr.bf16.mxu1 %v8773_v0  ;;  %8376 = vset.pattern.permute.xlu1 %v8773_v0  ;;  %s8777_s10 = smov 127   ;;  %v1353_v17 = vld [vmem:[#allocation7 + $0x8] sm:$0xff]  ;;  %v1352_v18 = vld [vmem:[#allocation7] sm:$0xff] }
  0x5d   : > { %1419 = vst.msk [vmem:[#allocation3 + $0x38] sm:$0xff] %vm435_vm0, %v8773_v0  ;;  %4938 = vst [vmem:[#allocation2] sm:$0xff] %v8773_v0  ;;  %8375 = vset.pattern.permute.xlu0 %v8773_v0  ;;  %s8028_s13 = sshll.u32 %s10945_s12, 6  ;;  %s8778_s14 = smov 17   ;;  %v1354_v19 = vld [vmem:[#allocation7 + $0x10] sm:$0xff]  ;;  %v1355_v20 = vld [vmem:[#allocation7 + $0x18] sm:$0xff] }
  0x5e   : > { %s8976_s28 = scalar_lea.vmem %s10924_s0, %s8028_s13  ;;  %s8779_s17 = smov 15   ;;  %vm552_vm2 = vcmask 130048   ;;  %v8378_v33 = vld [vmem:[#allocation5 + $0x10] sm:$0xff]   ;;  %vm659_vm3 = vcmask 916480   ;;  %v8379_v40 = vld [vmem:[#allocation5 + $0x18] sm:$0xff]   ;;  %vm766_vm4 = vcmask 7168  }
  0x5f   : > { %546 = vrot.lane.b32.xlu1 %v8773_v0, %s8774_s16  ;;  %v417_v1 = vld [vmem:[%s8976_s28] sm:$0xff]  ;;  %v419_v2 = vld [vmem:[%s8976_s28 + $0x10] sm:$0xff]  ;;  %v418_v3 = vld [vmem:[%s8976_s28 + $0x8] sm:$0xff]  ;;  %s8780_s19 = smov 113   ;;  %s8781_s20 = smov 111   ;;  %vm1075_vm5 = vcmask 1039360  }
  0x60   : > { %v8981_v4 = vpack.c.bf16 %v419_v2, %v417_v1  ;;  %v420_v6 = vld [vmem:[%s8976_s28 + $0x18] sm:$0xff]  ;;  %v421_v7 = vld [vmem:[%s8976_s28 + $0x20] sm:$0xff]  ;;  %v423_v9 = vld [vmem:[%s8976_s28 + $0x30] sm:$0xff]  ;;  %vm1165_vm6 = vcmask 121856   ;;  %vm951_vm7 = vcmask 924672   ;;  %vm1260_vm8 = vcmask 908288   ;;  %s376_s18 = scalar_lea.vmem %s10933_s9, %s8028_s13 }
  0x61   : > { %v8991_v8 = vpack.c.bf16 %v420_v6, %v418_v3  ;;  %v422_v10 = vld [vmem:[%s8976_s28 + $0x28] sm:$0xff]  ;;  %v424_v11 = vld [vmem:[%s8976_s28 + $0x38] sm:$0xff]  ;;  %v8998_v12 = vpack.c.bf16 %v423_v9, %v421_v7  ;;  %v8381_v48 = vld [vmem:[#allocation5 + $0x70] sm:$0xff]  }
  0x62   : > { %v8983_v5 = vld [vmem:[#allocation2 + $0x18] sm:$0xff]  ;;  %542 = vrot.lane.b32.xlu0 %v8981_v4, %s8774_s16  ;;  %v9002_v14 = vpack.c.bf16 %v424_v11, %v422_v10  ;;  %v8383_v63 = vld [vmem:[#allocation5 + $0x30] sm:$0xff]  }
  0x63   : > { %2393 = vst.msk [vmem:[#allocation2 + $0x18] sm:$0xff] %vm435_vm0, %v8773_v0  ;;  %651 = vrot.lane.b32.xlu1 %v8983_v5, %s8775_s29  ;;  %v9000_v13 = vld [vmem:[#allocation2 + $0x38] sm:$0xff]  ;;  %471 = vmatprep.subr.bf16.mxu0 %v8991_v8 }
  0x64   : > { %2394 = vst.msk [vmem:[#allocation2 + $0x38] sm:$0xff] %vm435_vm0, %v8773_v0  ;;  %8030 = vmatprep.subr.bf16.mxu1 %v8991_v8  ;;  %472 = vmatpush1.bf16.msra.mxu0 %v8981_v4  ;;  %v8382_v56 = vld [vmem:[#allocation5 + $0x78] sm:$0xff]  }
  0x65   : > { %8032 = vmatpush1.bf16.msra.mxu1 %v8981_v4  ;;  %473 = vmatprep.subr.bf16.mxu0 %v9002_v14  ;;  %v8385_v9 = vld [vmem:[#allocation5 + $0x38] sm:$0xff]  }
  0x66   : > { %544 = vrot.lane.b32.xlu0 %v8991_v8, %s8774_s16  ;;  %8031 = vmatprep.subr.bf16.mxu1 %v9002_v14 }
  0x67   : > { %548 = vrot.lane.b32.xlu1 %v8998_v12, %s8774_s16 }
  0x68   : > { %474 = vmatpush1.bf16.msra.mxu0 %v8998_v12 }
  0x69   : > { %8033 = vmatpush1.bf16.msra.mxu1 %v8998_v12 }
  0x6a   : > { %550 = vrot.lane.b32.xlu0 %v9002_v14, %s8774_s16 }
  0x6b   : > { %655 = vrot.lane.b32.xlu1 %v9002_v14, %s8775_s29  ;;  %7713 = vmatmul.mubr.msk.bf16.vlgmr.msra.gmra.mrb[0].mxu0 %vm464_vm1, %v8377_v15 }
  0x6c   : > { %599 = vmatprep.mubr.bf16.mxu0 %v8773_v0  ;;  %7714 = vmatmul.mubr.msk.bf16.vlgmr.msra.gmra.mrb[0].mxu1 %vm464_vm1, %v8380_v16 }
  0x6d   : > { %813 = vmatprep.mubr.bf16.mxu1 %v8773_v0 }
  0x6e   : > { %649 = vrot.lane.b32.xlu0 %v8991_v8, %s8775_s29 }
  0x6f   : > { %653 = vrot.lane.b32.xlu1 %v8998_v12, %s8775_s29 }
  0x72   : > { %647 = vrot.lane.b32.xlu0 %v8981_v4, %s8775_s29 }
  0x73   : > { %758 = vrot.lane.b32.xlu1 %v8991_v8, %s8776_s27 }
  0x76   : > { %657 = vrot.lane.b32.xlu0 %v9000_v13, %s8775_s29 }
  0x77   : > { %1065 = vrot.lane.b32.xlu1 %v8991_v8, %s8777_s10 }
  0x7a   : > { %756 = vrot.lane.b32.xlu0 %v8981_v4, %s8776_s27 }
  0x7b   : > { %1063 = vrot.lane.b32.xlu1 %v8981_v4, %s8777_s10 }
  0x7e   : > { %754 = vrot.lane.b32.xlu0 %v8773_v0, %s8776_s27 }
  0x7f   : > { %764 = vrot.lane.b32.xlu1 %v9002_v14, %s8776_s27 }
  0x82   : > { %1067 = vrot.lane.b32.xlu0 %v8983_v5, %s8777_s10 }
  0x83   : > { %1071 = vrot.lane.b32.xlu1 %v9002_v14, %s8777_s10 }
  0x86   : > { %762 = vrot.lane.b32.xlu0 %v8998_v12, %s8776_s27 }
  0x87   : > { %1069 = vrot.lane.b32.xlu1 %v8998_v12, %s8777_s10 }
  0x8a   : > { %760 = vrot.lane.b32.xlu0 %v8773_v0, %s8776_s27 }
  0x8b   : > { %848 = vrot.lane.b32.xlu1 %v8991_v8, %s8778_s14 }
  0x8e   : > { %1073 = vrot.lane.b32.xlu0 %v9000_v13, %s8777_s10 }
  0x8f   : > { %1155 = vrot.lane.b32.xlu1 %v8981_v4, %s8779_s17 }
  0x92   : > { %846 = vrot.lane.b32.xlu0 %v8981_v4, %s8778_s14 }
  0x93   : > { %1153 = vrot.lane.b32.xlu1 %v8773_v0, %s8779_s17 }
  0x96   : > { %844 = vrot.lane.b32.xlu0 %v8773_v0, %s8778_s14 }
  0x97   : > { %854 = vrot.lane.b32.xlu1 %v9002_v14, %s8778_s14 }
  0x9a   : > { %1157 = vrot.lane.b32.xlu0 %v8991_v8, %s8779_s17 }
  0x9b   : > { %1161 = vrot.lane.b32.xlu1 %v8998_v12, %s8779_s17 }
  0x9e   : > { %852 = vrot.lane.b32.xlu0 %v8998_v12, %s8778_s14 }
  0x9f   : > { %1159 = vrot.lane.b32.xlu1 %v8773_v0, %s8779_s17 }
  0xa2   : > { %850 = vrot.lane.b32.xlu0 %v8773_v0, %s8778_s14 }
  0xa3   : > { %943 = vrot.lane.b32.xlu1 %v8983_v5, %s8780_s19 }
  0xa6   : > { %1163 = vrot.lane.b32.xlu0 %v9002_v14, %s8779_s17 }
  0xa7   : > { %1250 = vrot.lane.b32.xlu1 %v8991_v8, %s8781_s20 }
  0xaa   : > { %941 = vrot.lane.b32.xlu0 %v8991_v8, %s8780_s19 }
  0xab   : > { %1248 = vrot.lane.b32.xlu1 %v8981_v4, %s8781_s20 }
  0xae   : > { %939 = vrot.lane.b32.xlu0 %v8981_v4, %s8780_s19 }
  0xaf   : > { %949 = vrot.lane.b32.xlu1 %v9000_v13, %s8780_s19 }
  0xb2   : > { %1252 = vrot.lane.b32.xlu0 %v8983_v5, %s8781_s20  ;;  %v8384_v5 = vld [vmem:[#allocation5 + $0x50] sm:$0xff]  }
  0xb3   : > { %1256 = vrot.lane.b32.xlu1 %v9002_v14, %s8781_s20 }
  0xb6   : > { %947 = vrot.lane.b32.xlu0 %v9002_v14, %s8780_s19 }
  0xb7   : > { %1254 = vrot.lane.b32.xlu1 %v8998_v12, %s8781_s20 }
  0xba   : > { %945 = vrot.lane.b32.xlu0 %v8998_v12, %s8780_s19 }
  0xbb   : > { %1363 = vperm.xlu1 %8376, %v1353_v17  }
  0xbe   : > { %1258 = vrot.lane.b32.xlu0 %v9000_v13, %s8781_s20  ;;  %v8386_v13 = vld [vmem:[#allocation5 + $0x58] sm:$0xff]  }
  0xbf   : > { %1368 = vperm.xlu1 %8376, %v1354_v19  }
  0xc2   : > { %1358 = vperm.xlu0 %8375, %v1352_v18  }
  0xc3   : > { %1521 = vrot.lane.b32.xlu1 %v8773_v0, %s8774_s16 }
  0xc6   : > { %1373 = vperm.xlu0 %8375, %v1355_v20  }
  0xca   : > { %1527 = vrot.lane.b32.xlu0 %v8773_v0, %s8774_s16 }
  0xcd   : > { %v541_v21 = vpop.permute.xlu1 %540 }
  0xd1   : > { %v547_v22 = vpop.permute.xlu1 %546 }
  0xd4   : > { %v543_v24 = vpop.permute.xlu0 %542 }
  0xd5   : > { %v652_v23 = vpop.permute.xlu1 %651  ;;  %v553_v28 = vsel %vm552_vm2, %v541_v21, %v543_v24 }
  0xd8   : > { %v545_v26 = vpop.permute.xlu0 %544 }
  0xd9   : > { %v549_v25 = vpop.permute.xlu1 %548  ;;  %v554_v27 = vsel %vm552_vm2, %v543_v24, %v545_v26  ;;  %v8387_v24 = vld [vmem:[#allocation5] sm:$0xff]  }
  0xda   : > { %567 = vmatprep.subr.bf16.mxu0 %v554_v27  ;;  %v555_v32 = vsel %vm552_vm2, %v547_v22, %v549_v25 }
  0xdb   : > { %568 = vmatpush1.bf16.msra.mxu0 %v553_v28 }
  0xdc   : > { %v551_v30 = vpop.permute.xlu0 %550 }
  0xdd   : > { %v656_v29 = vpop.permute.xlu1 %655  ;;  %v556_v31 = vsel %vm552_vm2, %v549_v25, %v551_v30 }
  0xde   : > { %569 = vmatprep.subr.bf16.mxu0 %v556_v31 }
  0xdf   : > { %570 = vmatpush1.bf16.msra.mxu0 %v555_v32 }
  0xe0   : > { %v650_v35 = vpop.permute.xlu0 %649 }
  0xe1   : > { %v654_v34 = vpop.permute.xlu1 %653  ;;  %v661_v36 = vsel %vm659_vm3, %v650_v35, %v652_v23 }
  0xe2   : > { %7717 = vmatmul.mubr.msk.bf16.vlgmr.msra.gmra.mrb[0].mxu0 %vm464_vm1, %v8378_v33  ;;  %674 = vmatprep.subr.bf16.mxu0 %v661_v36  ;;  %v662_v44 = vsel %vm659_vm3, %v654_v34, %v656_v29  ;;  %v8389_v33 = vld [vmem:[#allocation5 + $0x8] sm:$0xff]  }
  0xe3   : > { %609 = vmatprep.mubr.bf16.mxu0 %v8773_v0  ;;  %v8390_v36 = vld [vmem:[#allocation5 + $0x28] sm:$0xff]  }
  0xe4   : > { %v648_v38 = vpop.permute.xlu0 %647 }
  0xe5   : > { %v759_v37 = vpop.permute.xlu1 %758  ;;  %v660_v39 = vsel %vm659_vm3, %v648_v38, %v650_v35 }
  0xe6   : > { %675 = vmatpush1.bf16.msra.mxu0 %v660_v39 }
  0xe8   : > { %v658_v42 = vpop.permute.xlu0 %657 }
  0xe9   : > { %v1066_v41 = vpop.permute.xlu1 %1065  ;;  %v663_v43 = vsel %vm659_vm3, %v656_v29, %v658_v42  ;;  %v8388_v29 = vld [vmem:[#allocation5 + $0x20] sm:$0xff]  }
  0xea   : > { %7718 = vmatmul.mubr.msk.bf16.gmra.mrb[4].mxu0 %vm464_vm1, %v8379_v40  ;;  %676 = vmatprep.subr.bf16.mxu0 %v663_v43 }
  0xeb   : > { %677 = vmatpush1.bf16.msra.mxu0 %v662_v44  ;;  %706 = vmatprep.mubr.bf16.mxu0 %v8773_v0 }
  0xec   : > { %v757_v46 = vpop.permute.xlu0 %756 }
  0xed   : > { %v1064_v45 = vpop.permute.xlu1 %1063  ;;  %v768_v47 = vsel %vm766_vm4, %v757_v46, %v759_v37 }
  0xee   : > { %781 = vmatprep.subr.bf16.mxu1 %v768_v47  ;;  %v1076_v55 = vsel %vm1075_vm5, %v1064_v45, %v1066_v41 }
  0xf0   : > { %v755_v50 = vpop.permute.xlu0 %754 }
  0xf1   : > { %v765_v49 = vpop.permute.xlu1 %764  ;;  %v767_v51 = vsel %vm766_vm4, %v755_v50, %v757_v46  ;;  %v8391_v46 = vld [vmem:[#allocation5 + $0x60] sm:$0xff]  }
  0xf2   : > { %7721 = vmatmul.mubr.msk.bf16.vlgmr.msra.gmra.mrb[0].mxu0 %vm464_vm1, %v8381_v48  ;;  %782 = vmatpush1.bf16.msra.mxu1 %v767_v51  ;;  %v8392_v51 = vld [vmem:[#allocation5 + $0x80] sm:$0xff]  }
  0xf3   : > { %716 = vmatprep.mubr.bf16.mxu0 %v8773_v0 }
  0xf4   : > { %v1068_v53 = vpop.permute.xlu0 %1067 }
  0xf5   : > { %v1072_v52 = vpop.permute.xlu1 %1071  ;;  %v1077_v54 = vsel %vm1075_vm5, %v1066_v41, %v1068_v53  ;;  %v8394_v53 = vld [vmem:[#allocation5 + $0x88] sm:$0xff]  }
  0xf6   : > { %1090 = vmatprep.subr.bf16.mxu0 %v1077_v54 }
  0xf7   : > { %1091 = vmatpush1.bf16.msra.mxu0 %v1076_v55 }
  0xf8   : > { %v763_v58 = vpop.permute.xlu0 %762 }
  0xf9   : > { %v1070_v57 = vpop.permute.xlu1 %1069  ;;  %v770_v59 = vsel %vm766_vm4, %v763_v58, %v765_v49 }
  0xfa   : > { %783 = vmatprep.subr.bf16.mxu1 %v770_v59  ;;  %7722 = vmatmul.mubr.msk.bf16.gmra.mrb[4].mxu0 %vm464_vm1, %v8382_v56  ;;  %v1078_v4 = vsel %vm1075_vm5, %v1070_v57, %v1072_v52  ;;  %v9182_v59 = vld [vmem:[#allocation3 + $0x18] sm:$0xff] }
  0xfb   : > { %1122 = vmatprep.mubr.bf16.mxu0 %v8773_v0  ;;  %3965 = vst.msk [vmem:[#allocation3 + $0x18] sm:$0xff] %vm435_vm0, %v8773_v0  ;;  %1631 = vrot.lane.b32.xlu0 %v9182_v59, %s8775_s29 }
  0xfc   : > { %v761_v61 = vpop.permute.xlu0 %760 }
  0xfd   : > { %v849_v60 = vpop.permute.xlu1 %848  ;;  %v769_v62 = vsel %vm766_vm4, %v761_v61, %v763_v58  ;;  %v9174_v58 = vld [vmem:[#allocation3 + $0x38] sm:$0xff] }
  0xfe   : > { %784 = vmatpush1.bf16.msra.mxu1 %v769_v62  ;;  %3966 = vst.msk [vmem:[#allocation3 + $0x38] sm:$0xff] %vm435_vm0, %v8773_v0  ;;  %1637 = vrot.lane.b32.xlu1 %v9174_v58, %s8775_s29 }
 0x100   : > { %v1074_v2 = vpop.permute.xlu0 %1073 }
 0x101   : > { %v1156_v1 = vpop.permute.xlu1 %1155  ;;  %v1079_v3 = vsel %vm1075_vm5, %v1072_v52, %v1074_v2  ;;  %7725 = vmatmul.mubr.msk.bf16.vlgmr.msra.gmra.mrb[4].mxu1 %vm464_vm1, %v8383_v63  ;;  %v8393_v52 = vld [vmem:[#allocation5 + $0x68] sm:$0xff]  }
 0x102   : > { %1092 = vmatprep.subr.bf16.mxu0 %v1079_v3  ;;  %823 = vmatprep.mubr.bf16.mxu1 %v8773_v0 }
 0x103   : > { %1093 = vmatpush1.bf16.msra.mxu0 %v1078_v4  ;;  %1734 = vrot.lane.b32.xlu1 %v8773_v0, %s8776_s27 }
 0x104   : > { %v847_v7 = vpop.permute.xlu0 %846 }
 0x105   : > { %v1154_v6 = vpop.permute.xlu1 %1153  ;;  %v858_v8 = vsel %vm435_vm0, %v847_v7, %v849_v60 }
 0x106   : > { %871 = vmatprep.subr.bf16.mxu1 %v858_v8  ;;  %7737 = vmatmul.mubr.msk.bf16.vlgmr.msra.gmra.mrb[8].mxu0 %vm464_vm1, %v8384_v5  ;;  %v1166_v17 = vsel %vm1165_vm6, %v1154_v6, %v1156_v1 }
 0x107   : > { %1132 = vmatprep.mubr.bf16.mxu0 %v8773_v0 }
 0x108   : > { %v845_v11 = vpop.permute.xlu0 %844 }
 0x109   : > { %v855_v10 = vpop.permute.xlu1 %854  ;;  %v857_v12 = vsel %vm435_vm0, %v845_v11, %v847_v7  ;;  %7726 = vmatmul.mubr.msk.bf16.gmra.mrb[8].mxu1 %vm464_vm1, %v8385_v9  ;;  %v378_v9 = vlaneseq }
 0x10a   : > { %872 = vmatpush1.bf16.msra.mxu1 %v857_v12  ;;  %903 = vmatprep.mubr.bf16.mxu1 %v8773_v0 }
 0x10c   : > { %v1158_v15 = vpop.permute.xlu0 %1157 }
 0x10d   : > { %v1162_v14 = vpop.permute.xlu1 %1161  ;;  %v1167_v16 = vsel %vm1165_vm6, %v1156_v1, %v1158_v15 }
 0x10e   : > { %1180 = vmatprep.subr.bf16.mxu0 %v1167_v16  ;;  %7738 = vmatmul.mubr.msk.bf16.gmra.mrb[12].mxu0 %vm464_vm1, %v8386_v13  ;;  %v8782_v13 = vmov 0.0  }
 0x10f   : > { %1181 = vmatpush1.bf16.msra.mxu0 %v1166_v17  ;;  %1212 = vmatprep.mubr.bf16.mxu0 %v8773_v0 }
 0x110   : > { %v853_v19 = vpop.permute.xlu0 %852 }
 0x111   : > { %v1160_v18 = vpop.permute.xlu1 %1159  ;;  %v860_v20 = vsel %vm435_vm0, %v853_v19, %v855_v10  ;;  %v379_v10 = vand.u32 127, %v378_v9 }
 0x112   : > { %873 = vmatprep.subr.bf16.mxu1 %v860_v20  ;;  %v1168_v28 = vsel %vm1165_vm6, %v1160_v18, %v1162_v14 }
 0x113   : > { %v385_v11 = vand.u32 15, %v379_v10 }
 0x114   : > { %v851_v22 = vpop.permute.xlu0 %850 }
 0x115   : > { %v944_v21 = vpop.permute.xlu1 %943  ;;  %v859_v23 = vsel %vm435_vm0, %v851_v22, %v853_v19  ;;  %vm405_vm9 = vcmp.ne.s32.totalorder %v385_v11, 0  ;;  %vm411_vm11 = vcmp.ne.s32.totalorder %v385_v11, 15 }
 0x116   : > { %874 = vmatpush1.bf16.msra.mxu1 %v859_v23 }
 0x118   : > { %v1164_v26 = vpop.permute.xlu0 %1163 }
 0x119   : > { %v1251_v25 = vpop.permute.xlu1 %1250  ;;  %v1169_v27 = vsel %vm1165_vm6, %v1162_v14, %v1164_v26  ;;  %7729 = vmatmul.mubr.msk.bf16.vlgmr.msra.gmra.mrb[4].mxu1 %vm464_vm1, %v8387_v24  ;;  %v9191_v14 = vsel %vm405_vm9, 1.0, %v8782_v13  ;;  %v9198_v24 = vsel %vm411_vm11, 1.0, %v8782_v13 }
 0x11a   : > { %1182 = vmatprep.subr.bf16.mxu0 %v1169_v27  ;;  %913 = vmatprep.mubr.bf16.mxu1 %v8773_v0 }
 0x11b   : > { %1183 = vmatpush1.bf16.msra.mxu0 %v1168_v28 }
 0x11c   : > { %v942_v30 = vpop.permute.xlu0 %941 }
 0x11d   : > { %v953_v31 = vsel %vm951_vm7, %v942_v30, %v944_v21  ;;  %v1249_v32 = vpop.permute.xlu1 %1248 }
 0x11e   : > { %966 = vmatprep.subr.bf16.mxu1 %v953_v31  ;;  %7741 = vmatmul.mubr.msk.bf16.vlgmr.msra.gmra.mrb[8].mxu0 %vm464_vm1, %v8388_v29  ;;  %v1261_v40 = vsel %vm1260_vm8, %v1249_v32, %v1251_v25 }
 0x11f   : > { %1222 = vmatprep.mubr.bf16.mxu0 %v8773_v0 }
 0x120   : > { %v940_v34 = vpop.permute.xlu0 %939 }
 0x121   : > { %v952_v35 = vsel %vm951_vm7, %v940_v34, %v942_v30  ;;  %7730 = vmatmul.mubr.msk.bf16.gmra.mrb[8].mxu1 %vm464_vm1, %v8389_v33  ;;  %v950_v37 = vpop.permute.xlu1 %949 }
 0x122   : > { %967 = vmatpush1.bf16.msra.mxu1 %v952_v35  ;;  %998 = vmatprep.mubr.bf16.mxu1 %v8773_v0 }
 0x124   : > { %v1253_v38 = vpop.permute.xlu0 %1252 }
 0x125   : > { %v1262_v39 = vsel %vm1260_vm8, %v1251_v25, %v1253_v38  ;;  %v1257_v42 = vpop.permute.xlu1 %1256 }
 0x126   : > { %1275 = vmatprep.subr.bf16.mxu0 %v1262_v39  ;;  %7742 = vmatmul.mubr.msk.bf16.gmra.mrb[12].mxu0 %vm464_vm1, %v8390_v36 }
 0x127   : > { %1276 = vmatpush1.bf16.msra.mxu0 %v1261_v40  ;;  %1307 = vmatprep.mubr.bf16.mxu0 %v8773_v0 }
 0x128   : > { %v948_v41 = vpop.permute.xlu0 %947 }
 0x129   : > { %v955_v43 = vsel %vm951_vm7, %v948_v41, %v950_v37  ;;  %v1255_v47 = vpop.permute.xlu1 %1254 }
 0x12a   : > { %968 = vmatprep.subr.bf16.mxu1 %v955_v43  ;;  %v1263_v50 = vsel %vm1260_vm8, %v1255_v47, %v1257_v42 }
 0x12c   : > { %v946_v44 = vpop.permute.xlu0 %945 }
 0x12d   : > { %v954_v45 = vsel %vm951_vm7, %v946_v44, %v948_v41 }
 0x12e   : > { %969 = vmatpush1.bf16.msra.mxu1 %v954_v45 }
 0x130   : > { %v1259_v48 = vpop.permute.xlu0 %1258 }
 0x131   : > { %7733 = vmatmul.mubr.msk.bf16.vlgmr.msra.gmra.mrb[4].mxu1 %vm464_vm1, %v8391_v46  ;;  %v1264_v49 = vsel %vm1260_vm8, %v1257_v42, %v1259_v48 }
 0x132   : > { %1277 = vmatprep.subr.bf16.mxu0 %v1264_v49  ;;  %1008 = vmatprep.mubr.bf16.mxu1 %v8773_v0 }
 0x133   : > { %1278 = vmatpush1.bf16.msra.mxu0 %v1263_v50 }
 0x136   : > { %7745 = vmatmul.mubr.msk.bf16.vlgmr.msra.gmra.mrb[8].mxu0 %vm464_vm1, %v8392_v51 }
 0x137   : > { %1317 = vmatprep.mubr.bf16.mxu0 %v8773_v0 }
 0x139   : > { %7734 = vmatmul.mubr.msk.bf16.gmra.mrb[8].mxu1 %vm464_vm1, %v8393_v52 }
 0x13a   : > { %1484 = vmatprep.mubr.bf16.mxu1 %v8773_v0  ;;  %v1364_v48 = vpop.permute.xlu1 %1363 }
 0x13e   : > { %7746 = vmatmul.mubr.msk.bf16.gmra.mrb[12].mxu0 %vm464_vm1, %v8394_v53 }
 0x13f   : > { %1792 = vmatprep.mubr.bf16.mxu0 %v8773_v0  ;;  %v515_v54 = vpop.f32.mrb[0].mxu1  ;;  %v380_v0 = vadd.s32 128, %v379_v10 }
 0x140   : > { %v517_v55 = vpop.f32.mrb[1].mxu1 }
 0x141   : > { %v519_v56 = vpop.f32.mrb[2].mxu1  ;;  %v392_v12 = vand.u32 15, %v380_v0  ;;  %v1359_v35 = vpop.permute.xlu0 %1358 }
 0x142   : > { %v521_v57 = vpop.f32.mrb[3].mxu1 }
 0x143   : > { %vm406_vm10 = vcmp.ne.s32.totalorder %v392_v12, 0  ;;  %vm412_vm12 = vcmp.ne.s32.totalorder %v392_v12, 15 }
 0x144   : > { %v9193_v15 = vsel %vm406_vm10, 1.0, %v8782_v13  ;;  %v9201_v27 = vsel %vm412_vm12, 1.0, %v8782_v13 }
 0x1c5   : > { %v708_v60 = vpop.f32.mrb[0].mxu0 }
 0x1c6   : > { %v710_v61 = vpop.f32.mrb[1].mxu0 }
 0x1c7   : > { %v712_v62 = vpop.f32.mrb[2].mxu0 }
 0x1c8   : > { %v714_v63 = vpop.f32.mrb[3].mxu0 }
 0x1cd   : > { %v718_v1 = vpop.f32.mrb[4].mxu0 }
 0x1ce   : > { %v8034_v2 = vadd.f32 %v718_v1, %v515_v54  ;;  %v720_v3 = vpop.f32.mrb[5].mxu0 }
 0x1cf   : > { %v8035_v4 = vadd.f32 %v720_v3, %v517_v55  ;;  %v722_v5 = vpop.f32.mrb[6].mxu0 }
 0x1d0   : > { %v8036_v6 = vadd.f32 %v722_v5, %v519_v56  ;;  %v724_v7 = vpop.f32.mrb[7].mxu0 }
 0x1d1   : > { %v9188_v8 = vadd.f32 %v724_v7, %v521_v57 }
 0x204   : > { %v1000_v16 = vpop.f32.mrb[4].mxu1 }
 0x205   : > { %v1027_v17 = vmul.f32 %v9191_v14, %v1000_v16  ;;  %v1002_v18 = vpop.f32.mrb[5].mxu1 }
 0x206   : > { %v1028_v19 = vmul.f32 %v9193_v15, %v1002_v18  ;;  %v1004_v20 = vpop.f32.mrb[6].mxu1 }
 0x207   : > { %v1035_v21 = vadd.f32 %v1027_v17, %v708_v60  ;;  %v1029_v22 = vmul.f32 %v9191_v14, %v1004_v20  ;;  %v1006_v23 = vpop.f32.mrb[7].mxu1 }
 0x208   : > { %v1036_v25 = vadd.f32 %v1028_v19, %v710_v61  ;;  %v1030_v26 = vmul.f32 %v9193_v15, %v1006_v23 }
 0x209   : > { %v1037_v28 = vadd.f32 %v1029_v22, %v712_v62  ;;  %v1309_v29 = vpop.f32.mrb[8].mxu0 }
 0x20a   : > { %v1038_v30 = vadd.f32 %v1030_v26, %v714_v63  ;;  %v1336_v31 = vmul.f32 %v9198_v24, %v1309_v29  ;;  %v1311_v32 = vpop.f32.mrb[9].mxu0 }
 0x20b   : > { %v1337_v33 = vmul.f32 %v9201_v27, %v1311_v32  ;;  %v1313_v34 = vpop.f32.mrb[10].mxu0 }
 0x20c   : > { %v1344_v36 = vadd.f32 %v1336_v31, %v1035_v21  ;;  %v1338_v37 = vmul.f32 %v9198_v24, %v1313_v34  ;;  %v1010_v38 = vpop.f32.mrb[8].mxu1  ;;  %v1315_v39 = vpop.f32.mrb[11].mxu0 }
 0x20d   : > { %v1345_v40 = vadd.f32 %v1337_v33, %v1036_v25  ;;  %v1031_v41 = vmul.f32 %v9191_v14, %v1010_v38  ;;  %v1339_v42 = vmul.f32 %v9201_v27, %v1315_v39  ;;  %v1012_v43 = vpop.f32.mrb[9].mxu1  ;;  %v1369_v21 = vpop.permute.xlu1 %1368 }
 0x20e   : > { %v1346_v44 = vadd.f32 %v1338_v37, %v1037_v28  ;;  %v1376_v45 = vadd.f32 %v1359_v35, %v1344_v36  ;;  %v1032_v46 = vmul.f32 %v9193_v15, %v1012_v43  ;;  %v1014_v47 = vpop.f32.mrb[10].mxu1  ;;  %v1374_v25 = vpop.permute.xlu0 %1373  ;;  %v8396_v43 = vld [vmem:[#allocation5 + $0xd8] sm:$0xff]  }
 0x20f   : > { %v1377_v49 = vadd.f32 %v1359_v35, %v1345_v40  ;;  %v1039_v50 = vadd.f32 %v8034_v2, %v1031_v41  ;;  %v1347_v51 = vadd.f32 %v1339_v42, %v1038_v30  ;;  %v1033_v52 = vmul.f32 %v9191_v14, %v1014_v47  ;;  %v1016_v53 = vpop.f32.mrb[11].mxu1  ;;  %v8395_v41 = vld [vmem:[#allocation5 + $0xd0] sm:$0xff]   ;;  %v9238_v42 = vld [vmem:[#allocation2] sm:$0xff] }
 0x210   : > { %v1378_v54 = vadd.f32 %v1364_v48, %v1346_v44  ;;  %vm1384_vm13 = vcmp.ge.f32.partialorder %v1376_v45, 0.0  ;;  %v1392_v55 = vmul.f32 0.05, %v1376_v45  ;;  %v1040_v56 = vadd.f32 %v8035_v4, %v1032_v46  ;;  %v2327_v44 = vld [vmem:[#allocation7 + $0x20] sm:$0xff]  ;;  %v2330_v46 = vld [vmem:[#allocation7 + $0x38] sm:$0xff] }
 0x211   : > { %vm1385_vm14 = vcmp.ge.f32.partialorder %v1377_v49, 0.0  ;;  %v1393_v57 = vmul.f32 0.05, %v1377_v49  ;;  %v1379_v60 = vadd.f32 %v1364_v48, %v1347_v51  ;;  %v1041_v61 = vadd.f32 %v8036_v6, %v1033_v52  ;;  %v1319_v62 = vpop.f32.mrb[12].mxu0  ;;  %v1522_v47 = vpop.permute.xlu1 %1521 }
 0x212   : > { %vm1386_vm15 = vcmp.ge.f32.partialorder %v1378_v54, 0.0  ;;  %v1394_v63 = vmul.f32 0.05, %v1378_v54  ;;  %v1400_v1 = vsel %vm1384_vm13, %v1376_v45, %v1392_v55  ;;  %v1034_v3 = vmul.f32 %v9193_v15, %v1016_v53  ;;  %v1321_v5 = vpop.f32.mrb[13].mxu0  ;;  %v2328_v45 = vld [vmem:[#allocation7 + $0x28] sm:$0xff]  ;;  %v1528_v48 = vpop.permute.xlu0 %1527 }
 0x213   : > { %v1401_v2 = vsel %vm1385_vm14, %v1377_v49, %v1393_v57  ;;  %vm1387_vm9 = vcmp.ge.f32.partialorder %v1379_v60, 0.0  ;;  %v1395_v7 = vmul.f32 0.05, %v1379_v60  ;;  %v1340_v10 = vmul.f32 %v9198_v24, %v1319_v62  ;;  %v1323_v0 = vpop.f32.mrb[14].mxu0 }
 0x214   : > { %v1402_v11 = vsel %vm1386_vm15, %v1378_v54, %v1394_v63  ;;  %v1042_v4 = vadd.f32 %v9188_v8, %v1034_v3  ;;  %v1341_v12 = vmul.f32 %v9201_v27, %v1321_v5  ;;  %v1342_v6 = vmul.f32 %v9198_v24, %v1323_v0  ;;  %v1325_v13 = vpop.f32.mrb[15].mxu0 }
 0x215   : > { %v9215_v16 = vpack.c.bf16 %v1402_v11, %v1400_v1  ;;  %v1403_v17 = vsel %vm1387_vm9, %v1379_v60, %v1395_v7  ;;  %v1348_v18 = vadd.f32 %v1340_v10, %v1039_v50  ;;  %v1343_v19 = vmul.f32 %v9201_v27, %v1325_v13  ;;  %v8397_v10 = vld [vmem:[#allocation5 + $0xa0] sm:$0xff]  }
 0x216   : > { %v9218_v20 = vpack.c.bf16 %v1403_v17, %v1401_v2  ;;  %v1349_v22 = vadd.f32 %v1341_v12, %v1040_v56  ;;  %v1350_v23 = vadd.f32 %v1342_v6, %v1041_v61  ;;  %v1632_v50 = vpop.permute.xlu0 %1631 }
 0x217   : > { %v1380_v26 = vadd.f32 %v1369_v21, %v1348_v18  ;;  %v1351_v28 = vadd.f32 %v1343_v19, %v1042_v4  ;;  %1523 = vrot.lane.b32.xlu1 %v9215_v16, %s8774_s16 }
 0x218   : > { %v1381_v8 = vadd.f32 %v1369_v21, %v1349_v22  ;;  %v1382_v29 = vadd.f32 %v1374_v25, %v1350_v23  ;;  %1525 = vrot.lane.b32.xlu0 %v9218_v20, %s8774_s16  ;;  %1452 = vmatprep.subr.bf16.mxu1 %v9218_v20  ;;  %v8399_v23 = vld [vmem:[#allocation5 + $0x100] sm:$0xff]  }
 0x219   : > { %vm1388_vm10 = vcmp.ge.f32.partialorder %v1380_v26, 0.0  ;;  %v1396_v30 = vmul.f32 0.05, %v1380_v26  ;;  %v1383_v31 = vadd.f32 %v1374_v25, %v1351_v28  ;;  %1453 = vmatpush1.bf16.msra.mxu1 %v9215_v16 }
 0x21a   : > { %vm1389_vm11 = vcmp.ge.f32.partialorder %v1381_v8, 0.0  ;;  %v1397_v32 = vmul.f32 0.05, %v1381_v8  ;;  %vm1390_vm12 = vcmp.ge.f32.partialorder %v1382_v29, 0.0  ;;  %v1398_v33 = vmul.f32 0.05, %v1382_v29 }
 0x21b   : > { %vm1391_vm13 = vcmp.ge.f32.partialorder %v1383_v31, 0.0  ;;  %v1399_v34 = vmul.f32 0.05, %v1383_v31  ;;  %1627 = vrot.lane.b32.xlu1 %v9215_v16, %s8775_s29  ;;  %v1404_v35 = vsel %vm1388_vm10, %v1380_v26, %v1396_v30 }
 0x21c   : > { %v1406_v36 = vsel %vm1390_vm12, %v1382_v29, %v1398_v33  ;;  %1738 = vrot.lane.b32.xlu0 %v9218_v20, %s8776_s27  ;;  %v1405_v37 = vsel %vm1389_vm11, %v1381_v8, %v1397_v32 }
 0x21d   : > { %v1412_v38 = vpack.c.bf16 %v1406_v36, %v1404_v35  ;;  %v1407_v39 = vsel %vm1391_vm13, %v1383_v31, %v1399_v34  ;;  %v8400_v31 = vld [vmem:[#allocation5 + $0x108] sm:$0xff]   ;;  %v8401_v36 = vld [vmem:[#allocation5 + $0xc0] sm:$0xff]  }
 0x21e   : > { %v1413_v40 = vpack.c.bf16 %v1407_v39, %v1405_v37 }
 0x21f   : > { %1736 = vrot.lane.b32.xlu1 %v9215_v16, %s8776_s27 }
 0x220   : > { %2042 = vrot.lane.b32.xlu0 %v9218_v20, %s8777_s10  ;;  %1454 = vmatprep.subr.bf16.mxu1 %v1413_v40 }
 0x221   : > { %1455 = vmatpush1.bf16.msra.mxu1 %v1412_v38 }
 0x223   : > { %1629 = vrot.lane.b32.xlu1 %v9218_v20, %s8775_s29 }
 0x224   : > { %1529 = vrot.lane.b32.xlu0 %v1412_v38, %s8774_s16  ;;  %7749 = vmatmul.mubr.msk.bf16.vlgmr.msra.gmra.mrb[12].mxu1 %vm464_vm1, %v8395_v41 }
 0x225   : > { %1494 = vmatprep.mubr.bf16.mxu1 %v9238_v42 }
 0x227   : > { %1531 = vrot.lane.b32.xlu1 %v1413_v40, %s8774_s16 }
 0x228   : > { %1633 = vrot.lane.b32.xlu0 %v1412_v38, %s8775_s29 }
 0x22b   : > { %2044 = vrot.lane.b32.xlu1 %v9182_v59, %s8777_s10 }
 0x22c   : > { %2040 = vrot.lane.b32.xlu0 %v9215_v16, %s8777_s10  ;;  %7750 = vmatmul.mubr.msk.bf16.gmra.mrb[16].mxu1 %vm464_vm1, %v8396_v43 }
 0x22d   : > { %1579 = vmatprep.mubr.bf16.mxu1 %v9238_v42 }
 0x22f   : > { %1742 = vrot.lane.b32.xlu1 %v1412_v38, %s8776_s27 }
 0x230   : > { %2046 = vrot.lane.b32.xlu0 %v1412_v38, %s8777_s10 }
 0x233   : > { %1740 = vrot.lane.b32.xlu1 %v9238_v42, %s8776_s27 }
 0x234   : > { %1827 = vrot.lane.b32.xlu0 %v9218_v20, %s8778_s14 }
 0x237   : > { %2050 = vrot.lane.b32.xlu1 %v9174_v58, %s8777_s10 }
 0x238   : > { %1635 = vrot.lane.b32.xlu0 %v1413_v40, %s8775_s29 }
 0x23b   : > { %1825 = vrot.lane.b32.xlu1 %v9215_v16, %s8778_s14 }
 0x23c   : > { %2131 = vrot.lane.b32.xlu0 %v9215_v16, %s8779_s17 }
 0x23f   : > { %1823 = vrot.lane.b32.xlu1 %v9238_v42, %s8778_s14 }
 0x240   : > { %2129 = vrot.lane.b32.xlu0 %v9238_v42, %s8779_s17 }
 0x243   : > { %2133 = vrot.lane.b32.xlu1 %v9218_v20, %s8779_s17 }
 0x244   : > { %1744 = vrot.lane.b32.xlu0 %v1413_v40, %s8776_s27 }
 0x247   : > { %1831 = vrot.lane.b32.xlu1 %v1412_v38, %s8778_s14 }
 0x248   : > { %2048 = vrot.lane.b32.xlu0 %v1413_v40, %s8777_s10 }
 0x24b   : > { %1829 = vrot.lane.b32.xlu1 %v9238_v42, %s8778_s14 }
 0x24c   : > { %2137 = vrot.lane.b32.xlu0 %v1412_v38, %s8779_s17 }
 0x24f   : > { %1919 = vrot.lane.b32.xlu1 %v9218_v20, %s8780_s19 }
 0x250   : > { %2135 = vrot.lane.b32.xlu0 %v9238_v42, %s8779_s17 }
 0x253   : > { %1917 = vrot.lane.b32.xlu1 %v9215_v16, %s8780_s19 }
 0x254   : > { %1921 = vrot.lane.b32.xlu0 %v9182_v59, %s8780_s19 }
 0x257   : > { %2139 = vrot.lane.b32.xlu1 %v1413_v40, %s8779_s17 }
 0x258   : > { %1833 = vrot.lane.b32.xlu0 %v1413_v40, %s8778_s14 }
 0x25b   : > { %2227 = vrot.lane.b32.xlu1 %v9182_v59, %s8781_s20  ;;  %v2329_v59 = vld [vmem:[#allocation7 + $0x30] sm:$0xff] }
 0x25c   : > { %2225 = vrot.lane.b32.xlu0 %v9218_v20, %s8781_s20 }
 0x25f   : > { %1923 = vrot.lane.b32.xlu1 %v1412_v38, %s8780_s19 }
 0x260   : > { %2223 = vrot.lane.b32.xlu0 %v9215_v16, %s8781_s20  ;;  %v8398_v16 = vld [vmem:[#allocation5 + $0xa8] sm:$0xff]  }
 0x263   : > { %1925 = vrot.lane.b32.xlu1 %v1413_v40, %s8780_s19 }
 0x264   : > { %1927 = vrot.lane.b32.xlu0 %v9174_v58, %s8780_s19 }
 0x267   : > { %2233 = vrot.lane.b32.xlu1 %v9174_v58, %s8781_s20  ;;  %v1638_v58 = vpop.permute.xlu1 %1637 }
 0x268   : > { %2231 = vrot.lane.b32.xlu0 %v1413_v40, %s8781_s20 }
 0x26b   : > { %2333 = vperm.xlu1 %8376, %v2327_v44   ;;  %v1735_v49 = vpop.permute.xlu1 %1734  ;;  %v8402_v44 = vld [vmem:[#allocation5 + $0xe0] sm:$0xff]  }
 0x26c   : > { %2229 = vrot.lane.b32.xlu0 %v1412_v38, %s8781_s20 }
 0x26f   : > { %2343 = vperm.xlu1 %8376, %v2329_v59  }
 0x270   : > { %2338 = vperm.xlu0 %8375, %v2328_v45  }
 0x273   : > { %2496 = vrot.lane.b32.xlu1 %v9238_v42, %s8774_s16 }
 0x274   : > { %2348 = vperm.xlu0 %8375, %v2330_v46  }
 0x278   : > { %2502 = vrot.lane.b32.xlu0 %v9238_v42, %s8774_s16 }
 0x289   : > { %v1524_v51 = vpop.permute.xlu1 %1523 }
 0x28a   : > { %v1526_v52 = vpop.permute.xlu0 %1525  ;;  %v1533_v54 = vsel %vm552_vm2, %v1522_v47, %v1524_v51 }
 0x28b   : > { %v1534_v53 = vsel %vm552_vm2, %v1524_v51, %v1526_v52 }
 0x28c   : > { %1547 = vmatprep.subr.bf16.mxu1 %v1534_v53 }
 0x28d   : > { %v1628_v55 = vpop.permute.xlu1 %1627  ;;  %1548 = vmatpush1.bf16.msra.mxu1 %v1533_v54 }
 0x28e   : > { %v1739_v56 = vpop.permute.xlu0 %1738 }
 0x291   : > { %v1737_v57 = vpop.permute.xlu1 %1736 }
 0x292   : > { %v2043_v60 = vpop.permute.xlu0 %2042  ;;  %v1747_v61 = vsel %vm766_vm4, %v1737_v57, %v1739_v56  ;;  %v1746_v62 = vsel %vm766_vm4, %v1735_v49, %v1737_v57 }
 0x293   : > { %1760 = vmatprep.subr.bf16.mxu0 %v1747_v61  ;;  %v8405_v61 = vld [vmem:[#allocation5 + $0x90] sm:$0xff]  }
 0x294   : > { %1761 = vmatpush1.bf16.msra.mxu0 %v1746_v62 }
 0x295   : > { %v1630_v63 = vpop.permute.xlu1 %1629 }
 0x296   : > { %v1530_v1 = vpop.permute.xlu0 %1529  ;;  %v1640_v0 = vsel %vm659_vm3, %v1630_v63, %v1632_v50  ;;  %v1639_v12 = vsel %vm659_vm3, %v1628_v55, %v1630_v63  ;;  %v8404_v50 = vld [vmem:[#allocation5 + $0xe8] sm:$0xff]  }
 0x297   : > { %v1535_v7 = vsel %vm552_vm2, %v1528_v48, %v1530_v1 }
 0x299   : > { %v1532_v3 = vpop.permute.xlu1 %1531 }
 0x29a   : > { %v1634_v5 = vpop.permute.xlu0 %1633  ;;  %v1536_v2 = vsel %vm552_vm2, %v1530_v1, %v1532_v3  ;;  %v8406_v1 = vld [vmem:[#allocation5 + $0xb0] sm:$0xff]  }
 0x29b   : > { %1549 = vmatprep.subr.bf16.mxu1 %v1536_v2 }
 0x29c   : > { %1550 = vmatpush1.bf16.msra.mxu1 %v1535_v7 }
 0x29d   : > { %v2045_v11 = vpop.permute.xlu1 %2044  ;;  %1653 = vmatprep.subr.bf16.mxu1 %v1640_v0 }
 0x29e   : > { %v2041_v4 = vpop.permute.xlu0 %2040  ;;  %v2053_v26 = vsel %vm1075_vm5, %v2043_v60, %v2045_v11  ;;  %v8407_v11 = vld [vmem:[#allocation5 + $0x98] sm:$0xff]  }
 0x29f   : > { %7753 = vmatmul.mubr.msk.bf16.vlgmr.msra.gmra.mrb[12].mxu1 %vm464_vm1, %v8397_v10  ;;  %v2052_v8 = vsel %vm1075_vm5, %v2041_v4, %v2043_v60 }
 0x2a0   : > { %1654 = vmatpush1.bf16.msra.mxu1 %v1639_v12  ;;  %1589 = vmatprep.mubr.bf16.mxu1 %v9238_v42  ;;  %v8408_v12 = vld [vmem:[#allocation5 + $0xb8] sm:$0xff]  }
 0x2a1   : > { %v1743_v6 = vpop.permute.xlu1 %1742 }
 0x2a2   : > { %v2047_v13 = vpop.permute.xlu0 %2046 }
 0x2a5   : > { %v1741_v17 = vpop.permute.xlu1 %1740 }
 0x2a6   : > { %v1828_v18 = vpop.permute.xlu0 %1827  ;;  %v1748_v35 = vsel %vm766_vm4, %v1741_v17, %v1743_v6 }
 0x2a7   : > { %7754 = vmatmul.mubr.msk.bf16.gmra.mrb[16].mxu1 %vm464_vm1, %v8398_v16 }
 0x2a8   : > { %1685 = vmatprep.mubr.bf16.mxu1 %v9238_v42 }
 0x2a9   : > { %v2051_v19 = vpop.permute.xlu1 %2050 }
 0x2aa   : > { %v1636_v20 = vpop.permute.xlu0 %1635 }
 0x2ab   : > { %v1642_v21 = vsel %vm659_vm3, %v1636_v20, %v1638_v58  ;;  %v1641_v22 = vsel %vm659_vm3, %v1634_v5, %v1636_v20  ;;  %v8403_v58 = vld [vmem:[#allocation5 + $0xc8] sm:$0xff]   ;;  %v8409_v20 = vld [vmem:[#allocation5 + $0xf0] sm:$0xff]  }
 0x2ac   : > { %1655 = vmatprep.subr.bf16.mxu1 %v1642_v21 }
 0x2ad   : > { %v1826_v25 = vpop.permute.xlu1 %1825  ;;  %1656 = vmatpush1.bf16.msra.mxu1 %v1641_v22 }
 0x2ae   : > { %v2132_v28 = vpop.permute.xlu0 %2131  ;;  %2066 = vmatprep.subr.bf16.mxu1 %v2053_v26  ;;  %v1836_v38 = vsel %vm435_vm0, %v1826_v25, %v1828_v18  ;;  %v8412_v26 = vld [vmem:[#allocation5 + $0x118] sm:$0xff]  }
 0x2b0   : > { %7757 = vmatmul.mubr.msk.bf16.vlgmr.msra.gmra.mrb[12].mxu1 %vm464_vm1, %v8399_v23  ;;  %v8410_v23 = vld [vmem:[#allocation5 + $0x110] sm:$0xff]  }
 0x2b1   : > { %v1824_v29 = vpop.permute.xlu1 %1823  ;;  %2067 = vmatpush1.bf16.msra.mxu1 %v2052_v8  ;;  %1695 = vmatprep.mubr.bf16.mxu1 %v9238_v42  ;;  %v9374_v8 = vld [vmem:[#allocation2 + $0x18] sm:$0xff] }
 0x2b2   : > { %v2130_v30 = vpop.permute.xlu0 %2129  ;;  %v1835_v43 = vsel %vm435_vm0, %v1824_v29, %v1826_v25  ;;  %v8411_v25 = vld [vmem:[#allocation5 + $0xf8] sm:$0xff]   ;;  %4948 = vst.msk [vmem:[#allocation2 + $0x18] sm:$0xff] %vm435_vm0, %v9238_v42  ;;  %2606 = vrot.lane.b32.xlu0 %v9374_v8, %s8775_s29 }
 0x2b3   : > { %v2141_v47 = vsel %vm1165_vm6, %v2130_v30, %v2132_v28 }
 0x2b5   : > { %v2134_v32 = vpop.permute.xlu1 %2133 }
 0x2b6   : > { %v1745_v33 = vpop.permute.xlu0 %1744  ;;  %v2142_v45 = vsel %vm1165_vm6, %v2132_v28, %v2134_v32  ;;  %v9366_v28 = vld [vmem:[#allocation2 + $0x38] sm:$0xff] }
 0x2b7   : > { %v1749_v34 = vsel %vm766_vm4, %v1743_v6, %v1745_v33  ;;  %4949 = vst.msk [vmem:[#allocation2 + $0x38] sm:$0xff] %vm435_vm0, %v9238_v42  ;;  %2612 = vrot.lane.b32.xlu1 %v9366_v28, %s8775_s29 }
 0x2b8   : > { %7758 = vmatmul.mubr.msk.bf16.gmra.mrb[16].mxu1 %vm464_vm1, %v8400_v31  ;;  %1762 = vmatprep.subr.bf16.mxu0 %v1749_v34 }
 0x2b9   : > { %1763 = vmatpush1.bf16.msra.mxu0 %v1748_v35  ;;  %v1832_v37 = vpop.permute.xlu1 %1831  ;;  %2098 = vmatprep.mubr.bf16.mxu1 %v9238_v42 }
 0x2ba   : > { %v2049_v39 = vpop.permute.xlu0 %2048  ;;  %1849 = vmatprep.subr.bf16.mxu0 %v1836_v38 }
 0x2bb   : > { %v2055_v40 = vsel %vm1075_vm5, %v2049_v39, %v2051_v19  ;;  %v2054_v41 = vsel %vm1075_vm5, %v2047_v13, %v2049_v39  ;;  %2709 = vrot.lane.b32.xlu1 %v9238_v42, %s8776_s27 }
 0x2bc   : > { %2068 = vmatprep.subr.bf16.mxu1 %v2055_v40  ;;  %7761 = vmatmul.mubr.msk.bf16.vlgmr.msra.gmra.mrb[16].mxu0 %vm464_vm1, %v8401_v36 }
 0x2bd   : > { %1850 = vmatpush1.bf16.msra.mxu0 %v1835_v43  ;;  %v1830_v59 = vpop.permute.xlu1 %1829  ;;  %2069 = vmatpush1.bf16.msra.mxu1 %v2054_v41 }
 0x2be   : > { %v2138_v46 = vpop.permute.xlu0 %2137  ;;  %2155 = vmatprep.subr.bf16.mxu1 %v2142_v45  ;;  %1802 = vmatprep.mubr.bf16.mxu0 %v9238_v42  ;;  %v1837_v60 = vsel %vm435_vm0, %v1830_v59, %v1832_v37 }
 0x2c0   : > { %7773 = vmatmul.mubr.msk.bf16.vlgmr.msra.gmra.mrb[20].mxu1 %vm464_vm1, %v8402_v44 }
 0x2c1   : > { %v1920_v48 = vpop.permute.xlu1 %1919  ;;  %2156 = vmatpush1.bf16.msra.mxu1 %v2141_v47  ;;  %2108 = vmatprep.mubr.bf16.mxu1 %v9238_v42 }
 0x2c2   : > { %v2136_v49 = vpop.permute.xlu0 %2135 }
 0x2c3   : > { %v2143_v56 = vsel %vm1165_vm6, %v2136_v49, %v2138_v46 }
 0x2c4   : > { %7762 = vmatmul.mubr.msk.bf16.gmra.mrb[20].mxu0 %vm464_vm1, %v8403_v58 }
 0x2c5   : > { %v1918_v51 = vpop.permute.xlu1 %1917  ;;  %1881 = vmatprep.mubr.bf16.mxu0 %v9238_v42 }
 0x2c6   : > { %v1922_v52 = vpop.permute.xlu0 %1921  ;;  %v1929_v2 = vsel %vm951_vm7, %v1918_v51, %v1920_v48 }
 0x2c7   : > { %v1930_v63 = vsel %vm951_vm7, %v1920_v48, %v1922_v52 }
 0x2c8   : > { %7774 = vmatmul.mubr.msk.bf16.gmra.mrb[24].mxu1 %vm464_vm1, %v8404_v50 }
 0x2c9   : > { %v2140_v53 = vpop.permute.xlu1 %2139  ;;  %2187 = vmatprep.mubr.bf16.mxu1 %v9238_v42 }
 0x2ca   : > { %v1834_v54 = vpop.permute.xlu0 %1833  ;;  %v2144_v55 = vsel %vm1165_vm6, %v2138_v46, %v2140_v53 }
 0x2cb   : > { %2157 = vmatprep.subr.bf16.mxu1 %v2144_v55  ;;  %v1838_v57 = vsel %vm435_vm0, %v1832_v37, %v1834_v54 }
 0x2cc   : > { %1851 = vmatprep.subr.bf16.mxu0 %v1838_v57  ;;  %2158 = vmatpush1.bf16.msra.mxu1 %v2143_v56 }
 0x2cd   : > { %1852 = vmatpush1.bf16.msra.mxu0 %v1837_v60  ;;  %v2228_v62 = vpop.permute.xlu1 %2227 }
 0x2ce   : > { %v2226_v3 = vpop.permute.xlu0 %2225  ;;  %1943 = vmatprep.subr.bf16.mxu0 %v1930_v63 }
 0x2cf   : > { %v2236_v5 = vsel %vm1260_vm8, %v2226_v3, %v2228_v62 }
 0x2d0   : > { %7765 = vmatmul.mubr.msk.bf16.vlgmr.msra.gmra.mrb[16].mxu0 %vm464_vm1, %v8405_v61  ;;  %2249 = vmatprep.subr.bf16.mxu1 %v2236_v5 }
 0x2d1   : > { %1944 = vmatpush1.bf16.msra.mxu0 %v1929_v2  ;;  %v1924_v7 = vpop.permute.xlu1 %1923  ;;  %7777 = vmatmul.mubr.msk.bf16.vlgmr.msra.gmra.mrb[20].mxu1 %vm464_vm1, %v8406_v1 }
 0x2d2   : > { %v2224_v10 = vpop.permute.xlu0 %2223  ;;  %1891 = vmatprep.mubr.bf16.mxu0 %v9238_v42  ;;  %2197 = vmatprep.mubr.bf16.mxu1 %v9238_v42 }
 0x2d3   : > { %v2235_v0 = vsel %vm1260_vm8, %v2224_v10, %v2226_v3 }
 0x2d4   : > { %2250 = vmatpush1.bf16.msra.mxu1 %v2235_v0 }
 0x2d5   : > { %v1926_v4 = vpop.permute.xlu1 %1925 }
 0x2d6   : > { %v1928_v6 = vpop.permute.xlu0 %1927  ;;  %v1931_v16 = vsel %vm951_vm7, %v1924_v7, %v1926_v4 }
 0x2d7   : > { %v1932_v13 = vsel %vm951_vm7, %v1926_v4, %v1928_v6 }
 0x2d8   : > { %7766 = vmatmul.mubr.msk.bf16.gmra.mrb[20].mxu0 %vm464_vm1, %v8407_v11  ;;  %1945 = vmatprep.subr.bf16.mxu0 %v1932_v13 }
 0x2d9   : > { %1946 = vmatpush1.bf16.msra.mxu0 %v1931_v16  ;;  %v2234_v17 = vpop.permute.xlu1 %2233  ;;  %7778 = vmatmul.mubr.msk.bf16.gmra.mrb[24].mxu1 %vm464_vm1, %v8408_v12 }
 0x2da   : > { %v2232_v18 = vpop.permute.xlu0 %2231  ;;  %1975 = vmatprep.mubr.bf16.mxu0 %v9238_v42  ;;  %2281 = vmatprep.mubr.bf16.mxu1 %v9238_v42 }
 0x2db   : > { %v2238_v19 = vsel %vm1260_vm8, %v2232_v18, %v2234_v17 }
 0x2dc   : > { %2251 = vmatprep.subr.bf16.mxu1 %v2238_v19 }
 0x2de   : > { %v2230_v21 = vpop.permute.xlu0 %2229 }
 0x2df   : > { %v2237_v22 = vsel %vm1260_vm8, %v2230_v21, %v2232_v18 }
 0x2e0   : > { %7769 = vmatmul.mubr.msk.bf16.vlgmr.msra.gmra.mrb[16].mxu0 %vm464_vm1, %v8409_v20  ;;  %2252 = vmatpush1.bf16.msra.mxu1 %v2237_v22 }
 0x2e1   : > { %1985 = vmatprep.mubr.bf16.mxu0 %v9238_v42 }
 0x2e3   : > { %7781 = vmatmul.mubr.msk.bf16.vlgmr.msra.gmra.mrb[20].mxu1 %vm464_vm1, %v8410_v23 }
 0x2e4   : > { %2291 = vmatprep.mubr.bf16.mxu1 %v9238_v42 }
 0x2e8   : > { %7770 = vmatmul.mubr.msk.bf16.gmra.mrb[20].mxu0 %vm464_vm1, %v8411_v25 }
 0x2e9   : > { %2459 = vmatprep.mubr.bf16.mxu0 %v9238_v42 }
 0x2ea   : > { %v2334_v56 = vpop.permute.xlu1 %2333 }
 0x2eb   : > { %7782 = vmatmul.mubr.msk.bf16.gmra.mrb[24].mxu1 %vm464_vm1, %v8412_v26 }
 0x2ec   : > { %2767 = vmatprep.mubr.bf16.mxu1 %v9238_v42 }
 0x2ef   : > { %v2339_v1 = vpop.permute.xlu0 %2338 }
 0x383   : > { %v1687_v29 = vpop.f32.mrb[12].mxu1 }
 0x384   : > { %v1689_v30 = vpop.f32.mrb[13].mxu1 }
 0x385   : > { %v1691_v31 = vpop.f32.mrb[14].mxu1 }
 0x386   : > { %v1693_v32 = vpop.f32.mrb[15].mxu1 }
 0x38b   : > { %v1697_v33 = vpop.f32.mrb[16].mxu1 }
 0x38c   : > { %v1699_v34 = vpop.f32.mrb[17].mxu1 }
 0x38d   : > { %v1701_v35 = vpop.f32.mrb[18].mxu1 }
 0x38e   : > { %v9380_v36 = vpop.f32.mrb[19].mxu1 }
 0x3b3   : > { %v1977_v37 = vpop.f32.mrb[16].mxu0 }
 0x3b4   : > { %v2004_v38 = vmul.f32 %v9191_v14, %v1977_v37  ;;  %v1979_v39 = vpop.f32.mrb[17].mxu0 }
 0x3b5   : > { %v2005_v40 = vmul.f32 %v9193_v15, %v1979_v39  ;;  %v1981_v41 = vpop.f32.mrb[18].mxu0 }
 0x3b6   : > { %v2012_v43 = vadd.f32 %v2004_v38, %v1687_v29  ;;  %v2006_v44 = vmul.f32 %v9191_v14, %v1981_v41  ;;  %v1983_v59 = vpop.f32.mrb[19].mxu0  ;;  %v2283_v45 = vpop.f32.mrb[20].mxu1 }
 0x3b7   : > { %v2013_v46 = vadd.f32 %v2005_v40, %v1689_v30  ;;  %v2007_v47 = vmul.f32 %v9193_v15, %v1983_v59  ;;  %v2310_v58 = vmul.f32 %v9198_v24, %v2283_v45  ;;  %v2285_v48 = vpop.f32.mrb[21].mxu1  ;;  %v2344_v59 = vpop.permute.xlu1 %2343 }
 0x3b8   : > { %v2014_v49 = vadd.f32 %v2006_v44, %v1691_v31  ;;  %v2311_v50 = vmul.f32 %v9201_v27, %v2285_v48  ;;  %v2287_v51 = vpop.f32.mrb[22].mxu1 }
 0x3b9   : > { %v2015_v52 = vadd.f32 %v2007_v47, %v1693_v32  ;;  %v2318_v53 = vadd.f32 %v2310_v58, %v2012_v43  ;;  %v2312_v54 = vmul.f32 %v9198_v24, %v2287_v51  ;;  %v2289_v55 = vpop.f32.mrb[23].mxu1  ;;  %v2349_v47 = vpop.permute.xlu0 %2348 }
 0x3ba   : > { %v2319_v57 = vadd.f32 %v2311_v50, %v2013_v46  ;;  %v2313_v60 = vmul.f32 %v9201_v27, %v2289_v55 }
 0x3bb   : > { %v2351_v61 = vadd.f32 %v2334_v56, %v2318_v53  ;;  %v2320_v62 = vadd.f32 %v2312_v54, %v2014_v49  ;;  %v1987_v63 = vpop.f32.mrb[20].mxu0 }
 0x3bc   : > { %v2352_v3 = vadd.f32 %v2334_v56, %v2319_v57  ;;  %v2321_v5 = vadd.f32 %v2313_v60, %v2015_v52  ;;  %v2008_v2 = vmul.f32 %v9191_v14, %v1987_v63  ;;  %v1989_v7 = vpop.f32.mrb[21].mxu0  ;;  %v8414_v63 = vld [vmem:[#allocation5 + $0x168] sm:$0xff]  }
 0x3bd   : > { %vm2359_vm14 = vcmp.ge.f32.partialorder %v2351_v61, 0.0  ;;  %v2367_v10 = vmul.f32 0.05, %v2351_v61  ;;  %v2353_v0 = vadd.f32 %v2339_v1, %v2320_v62  ;;  %v2009_v11 = vmul.f32 %v9193_v15, %v1989_v7  ;;  %v1991_v4 = vpop.f32.mrb[22].mxu0  ;;  %v8413_v62 = vld [vmem:[#allocation5 + $0x160] sm:$0xff]  }
 0x3be   : > { %vm2360_vm15 = vcmp.ge.f32.partialorder %v2352_v3, 0.0  ;;  %v2368_v12 = vmul.f32 0.05, %v2352_v3  ;;  %v2354_v6 = vadd.f32 %v2339_v1, %v2321_v5  ;;  %v2016_v13 = vadd.f32 %v2008_v2, %v1697_v33  ;;  %v1993_v16 = vpop.f32.mrb[23].mxu0  ;;  %v2293_v17 = vpop.f32.mrb[24].mxu1  ;;  %v3302_v1 = vld [vmem:[#allocation7 + $0x40] sm:$0xff] }
 0x3bf   : > { %v2375_v18 = vsel %vm2359_vm14, %v2351_v61, %v2367_v10  ;;  %vm2361_vm9 = vcmp.ge.f32.partialorder %v2353_v0, 0.0  ;;  %v2369_v19 = vmul.f32 0.05, %v2353_v0  ;;  %v2017_v20 = vadd.f32 %v2009_v11, %v1699_v34  ;;  %v2295_v21 = vpop.f32.mrb[25].mxu1  ;;  %v3305_v5 = vld [vmem:[#allocation7 + $0x58] sm:$0xff]  ;;  %v2497_v2 = vpop.permute.xlu1 %2496 }
 0x3c0   : > { %v2376_v22 = vsel %vm2360_vm15, %v2352_v3, %v2368_v12  ;;  %vm2362_vm10 = vcmp.ge.f32.partialorder %v2354_v6, 0.0  ;;  %v2370_v23 = vmul.f32 0.05, %v2354_v6  ;;  %v2010_v25 = vmul.f32 %v9191_v14, %v1991_v4  ;;  %v2297_v26 = vpop.f32.mrb[26].mxu1  ;;  %v3303_v3 = vld [vmem:[#allocation7 + $0x48] sm:$0xff]  ;;  %v2503_v10 = vpop.permute.xlu0 %2502 }
 0x3c1   : > { %v2377_v29 = vsel %vm2361_vm9, %v2353_v0, %v2369_v19  ;;  %v2011_v30 = vmul.f32 %v9193_v15, %v1993_v16  ;;  %v2314_v31 = vmul.f32 %v9198_v24, %v2293_v17  ;;  %v2315_v32 = vmul.f32 %v9201_v27, %v2295_v21  ;;  %v2299_v33 = vpop.f32.mrb[27].mxu1 }
 0x3c2   : > { %v9396_v37 = vpack.c.bf16 %v2377_v29, %v2375_v18  ;;  %v2378_v38 = vsel %vm2362_vm10, %v2354_v6, %v2370_v23  ;;  %v2018_v39 = vadd.f32 %v2010_v25, %v1701_v35  ;;  %v2316_v34 = vmul.f32 %v9198_v24, %v2297_v26 }
 0x3c3   : > { %v9399_v40 = vpack.c.bf16 %v2378_v38, %v2376_v22  ;;  %v2019_v41 = vadd.f32 %v2011_v30, %v9380_v36  ;;  %v2322_v43 = vadd.f32 %v2314_v31, %v2016_v13  ;;  %v2323_v44 = vadd.f32 %v2315_v32, %v2017_v20  ;;  %v2613_v7 = vpop.permute.xlu1 %2612  ;;  %v8415_v30 = vld [vmem:[#allocation5 + $0x130] sm:$0xff]  }
 0x3c4   : > { %v2324_v45 = vadd.f32 %v2316_v34, %v2018_v39  ;;  %v2317_v46 = vmul.f32 %v9201_v27, %v2299_v33  ;;  %2498 = vrot.lane.b32.xlu1 %v9396_v37, %s8774_s16  ;;  %v2607_v11 = vpop.permute.xlu0 %2606  ;;  %v8416_v34 = vld [vmem:[#allocation5 + $0x138] sm:$0xff]  }
 0x3c5   : > { %v2355_v58 = vadd.f32 %v2344_v59, %v2322_v43  ;;  %v2356_v48 = vadd.f32 %v2344_v59, %v2323_v44  ;;  %2500 = vrot.lane.b32.xlu0 %v9399_v40, %s8774_s16  ;;  %2427 = vmatprep.subr.bf16.mxu0 %v9399_v40 }
 0x3c6   : > { %v2357_v35 = vadd.f32 %v2349_v47, %v2324_v45  ;;  %v2325_v49 = vadd.f32 %v2317_v46, %v2019_v41  ;;  %2428 = vmatpush1.bf16.msra.mxu0 %v9396_v37  ;;  %v8417_v46 = vld [vmem:[#allocation5 + $0x190] sm:$0xff]  }
 0x3c7   : > { %vm2363_vm11 = vcmp.ge.f32.partialorder %v2355_v58, 0.0  ;;  %v2371_v36 = vmul.f32 0.05, %v2355_v58  ;;  %v2372_v50 = vmul.f32 0.05, %v2356_v48  ;;  %vm2364_vm13 = vcmp.ge.f32.partialorder %v2356_v48, 0.0  ;;  %v2710_v0 = vpop.permute.xlu1 %2709 }
 0x3c8   : > { %vm2365_vm12 = vcmp.ge.f32.partialorder %v2357_v35, 0.0  ;;  %v2373_v51 = vmul.f32 0.05, %v2357_v35  ;;  %v2358_v52 = vadd.f32 %v2349_v47, %v2325_v49  ;;  %2602 = vrot.lane.b32.xlu1 %v9396_v37, %s8775_s29 }
 0x3c9   : > { %2713 = vrot.lane.b32.xlu0 %v9399_v40, %s8776_s27  ;;  %v2379_v53 = vsel %vm2363_vm11, %v2355_v58, %v2371_v36  ;;  %v2380_v57 = vsel %vm2364_vm13, %v2356_v48, %v2372_v50  ;;  %v8418_v50 = vld [vmem:[#allocation5 + $0x198] sm:$0xff]  }
 0x3ca   : > { %v2381_v54 = vsel %vm2365_vm12, %v2357_v35, %v2373_v51  ;;  %vm2366_vm14 = vcmp.ge.f32.partialorder %v2358_v52, 0.0  ;;  %v2374_v55 = vmul.f32 0.05, %v2358_v52 }
 0x3cb   : > { %v2387_v56 = vpack.c.bf16 %v2381_v54, %v2379_v53 }
 0x3cc   : > { %v2382_v60 = vsel %vm2366_vm14, %v2358_v52, %v2374_v55  ;;  %2711 = vrot.lane.b32.xlu1 %v9396_v37, %s8776_s27  ;;  %v8419_v55 = vld [vmem:[#allocation5 + $0x150] sm:$0xff]  }
 0x3cd   : > { %v2388_v61 = vpack.c.bf16 %v2382_v60, %v2380_v57  ;;  %3017 = vrot.lane.b32.xlu0 %v9399_v40, %s8777_s10 }
 0x3cf   : > { %2429 = vmatprep.subr.bf16.mxu0 %v2388_v61 }
 0x3d0   : > { %2430 = vmatpush1.bf16.msra.mxu0 %v2387_v56  ;;  %2604 = vrot.lane.b32.xlu1 %v9399_v40, %s8775_s29 }
 0x3d1   : > { %2504 = vrot.lane.b32.xlu0 %v2387_v56, %s8774_s16 }
 0x3d3   : > { %7785 = vmatmul.mubr.msk.bf16.vlgmr.msra.gmra.mrb[24].mxu0 %vm464_vm1, %v8413_v62 }
 0x3d4   : > { %2506 = vrot.lane.b32.xlu1 %v2388_v61, %s8774_s16  ;;  %2469 = vmatprep.mubr.bf16.mxu0 %v9238_v42 }
 0x3d5   : > { %2608 = vrot.lane.b32.xlu0 %v2387_v56, %s8775_s29 }
 0x3d8   : > { %3019 = vrot.lane.b32.xlu1 %v9374_v8, %s8777_s10 }
 0x3d9   : > { %3015 = vrot.lane.b32.xlu0 %v9396_v37, %s8777_s10 }
 0x3db   : > { %7786 = vmatmul.mubr.msk.bf16.gmra.mrb[28].mxu0 %vm464_vm1, %v8414_v63 }
 0x3dc   : > { %2717 = vrot.lane.b32.xlu1 %v2387_v56, %s8776_s27  ;;  %2554 = vmatprep.mubr.bf16.mxu0 %v9238_v42 }
 0x3dd   : > { %3021 = vrot.lane.b32.xlu0 %v2387_v56, %s8777_s10 }
 0x3e0   : > { %2715 = vrot.lane.b32.xlu1 %v9238_v42, %s8776_s27 }
 0x3e1   : > { %2802 = vrot.lane.b32.xlu0 %v9399_v40, %s8778_s14 }
 0x3e4   : > { %3025 = vrot.lane.b32.xlu1 %v9366_v28, %s8777_s10 }
 0x3e5   : > { %2610 = vrot.lane.b32.xlu0 %v2388_v61, %s8775_s29 }
 0x3e8   : > { %2800 = vrot.lane.b32.xlu1 %v9396_v37, %s8778_s14 }
 0x3e9   : > { %3106 = vrot.lane.b32.xlu0 %v9396_v37, %s8779_s17 }
 0x3ec   : > { %2798 = vrot.lane.b32.xlu1 %v9238_v42, %s8778_s14 }
 0x3ed   : > { %3104 = vrot.lane.b32.xlu0 %v9238_v42, %s8779_s17 }
 0x3f0   : > { %3108 = vrot.lane.b32.xlu1 %v9399_v40, %s8779_s17 }
 0x3f1   : > { %2719 = vrot.lane.b32.xlu0 %v2388_v61, %s8776_s27 }
 0x3f4   : > { %2806 = vrot.lane.b32.xlu1 %v2387_v56, %s8778_s14 }
 0x3f5   : > { %3023 = vrot.lane.b32.xlu0 %v2388_v61, %s8777_s10 }
 0x3f8   : > { %2804 = vrot.lane.b32.xlu1 %v9238_v42, %s8778_s14 }
 0x3f9   : > { %3112 = vrot.lane.b32.xlu0 %v2387_v56, %s8779_s17 }
 0x3fc   : > { %2894 = vrot.lane.b32.xlu1 %v9399_v40, %s8780_s19 }
 0x3fd   : > { %3110 = vrot.lane.b32.xlu0 %v9238_v42, %s8779_s17 }
 0x400   : > { %2892 = vrot.lane.b32.xlu1 %v9396_v37, %s8780_s19 }
 0x401   : > { %2896 = vrot.lane.b32.xlu0 %v9374_v8, %s8780_s19 }
 0x404   : > { %3114 = vrot.lane.b32.xlu1 %v2388_v61, %s8779_s17 }
 0x405   : > { %2808 = vrot.lane.b32.xlu0 %v2388_v61, %s8778_s14 }
 0x408   : > { %3202 = vrot.lane.b32.xlu1 %v9374_v8, %s8781_s20  ;;  %v3304_v8 = vld [vmem:[#allocation7 + $0x50] sm:$0xff] }
 0x409   : > { %3200 = vrot.lane.b32.xlu0 %v9399_v40, %s8781_s20 }
 0x40c   : > { %2898 = vrot.lane.b32.xlu1 %v2387_v56, %s8780_s19 }
 0x40d   : > { %3198 = vrot.lane.b32.xlu0 %v9396_v37, %s8781_s20 }
 0x410   : > { %2900 = vrot.lane.b32.xlu1 %v2388_v61, %s8780_s19 }
 0x411   : > { %2902 = vrot.lane.b32.xlu0 %v9366_v28, %s8780_s19 }
 0x414   : > { %3208 = vrot.lane.b32.xlu1 %v9366_v28, %s8781_s20 }
 0x415   : > { %3206 = vrot.lane.b32.xlu0 %v2388_v61, %s8781_s20 }
 0x418   : > { %3308 = vperm.xlu1 %8376, %v3302_v1   ;;  %v8420_v1 = vld [vmem:[#allocation5 + $0x170] sm:$0xff]  }
 0x419   : > { %3204 = vrot.lane.b32.xlu0 %v2387_v56, %s8781_s20 }
 0x41c   : > { %3318 = vperm.xlu1 %8376, %v3304_v8  }
 0x41d   : > { %3313 = vperm.xlu0 %8375, %v3303_v3  }
 0x421   : > { %3323 = vperm.xlu0 %8375, %v3305_v5  }
 0x436   : > { %v2499_v4 = vpop.permute.xlu1 %2498 }
 0x437   : > { %v2501_v12 = vpop.permute.xlu0 %2500  ;;  %v2508_v6 = vsel %vm552_vm2, %v2497_v2, %v2499_v4 }
 0x438   : > { %v2509_v28 = vsel %vm552_vm2, %v2499_v4, %v2501_v12 }
 0x439   : > { %2522 = vmatprep.subr.bf16.mxu0 %v2509_v28 }
 0x43a   : > { %v2603_v13 = vpop.permute.xlu1 %2602  ;;  %2523 = vmatpush1.bf16.msra.mxu0 %v2508_v6 }
 0x43b   : > { %v2714_v16 = vpop.permute.xlu0 %2713 }
 0x43e   : > { %v2712_v17 = vpop.permute.xlu1 %2711 }
 0x43f   : > { %v3018_v18 = vpop.permute.xlu0 %3017  ;;  %v2722_v19 = vsel %vm766_vm4, %v2712_v17, %v2714_v16  ;;  %v2721_v20 = vsel %vm766_vm4, %v2710_v0, %v2712_v17 }
 0x440   : > { %2735 = vmatprep.subr.bf16.mxu1 %v2722_v19  ;;  %v8423_v19 = vld [vmem:[#allocation5 + $0x120] sm:$0xff]  }
 0x441   : > { %2736 = vmatpush1.bf16.msra.mxu1 %v2721_v20 }
 0x442   : > { %v2605_v21 = vpop.permute.xlu1 %2604 }
 0x443   : > { %v2505_v22 = vpop.permute.xlu0 %2504  ;;  %v2615_v31 = vsel %vm659_vm3, %v2605_v21, %v2607_v11  ;;  %v2614_v37 = vsel %vm659_vm3, %v2603_v13, %v2605_v21  ;;  %v8422_v11 = vld [vmem:[#allocation5 + $0x178] sm:$0xff]  }
 0x444   : > { %v2510_v29 = vsel %vm552_vm2, %v2503_v10, %v2505_v22 }
 0x446   : > { %v2507_v23 = vpop.permute.xlu1 %2506 }
 0x447   : > { %v2609_v25 = vpop.permute.xlu0 %2608  ;;  %v2511_v26 = vsel %vm552_vm2, %v2505_v22, %v2507_v23  ;;  %v8424_v22 = vld [vmem:[#allocation5 + $0x140] sm:$0xff]  }
 0x448   : > { %2524 = vmatprep.subr.bf16.mxu0 %v2511_v26 }
 0x449   : > { %2525 = vmatpush1.bf16.msra.mxu0 %v2510_v29 }
 0x44a   : > { %v3020_v32 = vpop.permute.xlu1 %3019  ;;  %2628 = vmatprep.subr.bf16.mxu0 %v2615_v31 }
 0x44b   : > { %v3016_v33 = vpop.permute.xlu0 %3015  ;;  %v3028_v58 = vsel %vm1075_vm5, %v3018_v18, %v3020_v32  ;;  %v8425_v32 = vld [vmem:[#allocation5 + $0x128] sm:$0xff]  }
 0x44c   : > { %7789 = vmatmul.mubr.msk.bf16.vlgmr.msra.gmra.mrb[24].mxu0 %vm464_vm1, %v8415_v30  ;;  %v3027_v35 = vsel %vm1075_vm5, %v3016_v33, %v3018_v18 }
 0x44d   : > { %2629 = vmatpush1.bf16.msra.mxu0 %v2614_v37  ;;  %2564 = vmatprep.mubr.bf16.mxu0 %v9238_v42  ;;  %v8426_v37 = vld [vmem:[#allocation5 + $0x148] sm:$0xff]  }
 0x44e   : > { %v2718_v38 = vpop.permute.xlu1 %2717 }
 0x44f   : > { %v3022_v39 = vpop.permute.xlu0 %3021 }
 0x452   : > { %v2716_v40 = vpop.permute.xlu1 %2715 }
 0x453   : > { %v2803_v41 = vpop.permute.xlu0 %2802  ;;  %v2723_v54 = vsel %vm766_vm4, %v2716_v40, %v2718_v38 }
 0x454   : > { %7790 = vmatmul.mubr.msk.bf16.gmra.mrb[28].mxu0 %vm464_vm1, %v8416_v34 }
 0x455   : > { %2660 = vmatprep.mubr.bf16.mxu0 %v9238_v42 }
 0x456   : > { %v3026_v43 = vpop.permute.xlu1 %3025 }
 0x457   : > { %v2611_v44 = vpop.permute.xlu0 %2610 }
 0x458   : > { %v2617_v59 = vsel %vm659_vm3, %v2611_v44, %v2613_v7  ;;  %v2616_v45 = vsel %vm659_vm3, %v2609_v25, %v2611_v44  ;;  %v8421_v7 = vld [vmem:[#allocation5 + $0x158] sm:$0xff]   ;;  %v8427_v44 = vld [vmem:[#allocation5 + $0x180] sm:$0xff]  }
 0x459   : > { %2630 = vmatprep.subr.bf16.mxu0 %v2617_v59 }
 0x45a   : > { %v2801_v47 = vpop.permute.xlu1 %2800  ;;  %2631 = vmatpush1.bf16.msra.mxu0 %v2616_v45 }
 0x45b   : > { %v3107_v48 = vpop.permute.xlu0 %3106  ;;  %3041 = vmatprep.subr.bf16.mxu0 %v3028_v58  ;;  %v2811_v57 = vsel %vm435_vm0, %v2801_v47, %v2803_v41  ;;  %v8430_v58 = vld [vmem:[#allocation5 + $0x1a8] sm:$0xff]  }
 0x45d   : > { %7793 = vmatmul.mubr.msk.bf16.vlgmr.msra.gmra.mrb[24].mxu0 %vm464_vm1, %v8417_v46  ;;  %v8428_v46 = vld [vmem:[#allocation5 + $0x1a0] sm:$0xff]  }
 0x45e   : > { %v2799_v49 = vpop.permute.xlu1 %2798  ;;  %3042 = vmatpush1.bf16.msra.mxu0 %v3027_v35  ;;  %2670 = vmatprep.mubr.bf16.mxu0 %v9238_v42 }
 0x45f   : > { %v3105_v36 = vpop.permute.xlu0 %3104  ;;  %v2810_v63 = vsel %vm435_vm0, %v2799_v49, %v2801_v47  ;;  %v8429_v47 = vld [vmem:[#allocation5 + $0x188] sm:$0xff]  }
 0x460   : > { %v3116_v2 = vsel %vm1165_vm6, %v3105_v36, %v3107_v48 }
 0x462   : > { %v3109_v51 = vpop.permute.xlu1 %3108 }
 0x463   : > { %v2720_v52 = vpop.permute.xlu0 %2719  ;;  %v3117_v3 = vsel %vm1165_vm6, %v3107_v48, %v3109_v51 }
 0x464   : > { %v2724_v53 = vsel %vm766_vm4, %v2718_v38, %v2720_v52 }
 0x465   : > { %7794 = vmatmul.mubr.msk.bf16.gmra.mrb[28].mxu0 %vm464_vm1, %v8418_v50  ;;  %2737 = vmatprep.subr.bf16.mxu1 %v2724_v53 }
 0x466   : > { %2738 = vmatpush1.bf16.msra.mxu1 %v2723_v54  ;;  %v2807_v56 = vpop.permute.xlu1 %2806  ;;  %3073 = vmatprep.mubr.bf16.mxu0 %v9238_v42 }
 0x467   : > { %v3024_v60 = vpop.permute.xlu0 %3023  ;;  %2824 = vmatprep.subr.bf16.mxu1 %v2811_v57 }
 0x468   : > { %v3030_v61 = vsel %vm1075_vm5, %v3024_v60, %v3026_v43  ;;  %v3029_v62 = vsel %vm1075_vm5, %v3022_v39, %v3024_v60 }
 0x469   : > { %3043 = vmatprep.subr.bf16.mxu0 %v3030_v61  ;;  %7797 = vmatmul.mubr.msk.bf16.vlgmr.msra.gmra.mrb[28].mxu1 %vm464_vm1, %v8419_v55 }
 0x46a   : > { %2825 = vmatpush1.bf16.msra.mxu1 %v2810_v63  ;;  %v2805_v8 = vpop.permute.xlu1 %2804  ;;  %3044 = vmatpush1.bf16.msra.mxu0 %v3029_v62 }
 0x46b   : > { %v3113_v5 = vpop.permute.xlu0 %3112  ;;  %3130 = vmatprep.subr.bf16.mxu0 %v3117_v3  ;;  %2777 = vmatprep.mubr.bf16.mxu1 %v9238_v42  ;;  %v2812_v18 = vsel %vm435_vm0, %v2805_v8, %v2807_v56 }
 0x46d   : > { %7809 = vmatmul.mubr.msk.bf16.vlgmr.msra.gmra.mrb[32].mxu0 %vm464_vm1, %v8420_v1 }
 0x46e   : > { %v2895_v10 = vpop.permute.xlu1 %2894  ;;  %3131 = vmatpush1.bf16.msra.mxu0 %v3116_v2  ;;  %3083 = vmatprep.mubr.bf16.mxu0 %v9238_v42 }
 0x46f   : > { %v3111_v0 = vpop.permute.xlu0 %3110 }
 0x470   : > { %v3118_v16 = vsel %vm1165_vm6, %v3111_v0, %v3113_v5 }
 0x471   : > { %7798 = vmatmul.mubr.msk.bf16.gmra.mrb[32].mxu1 %vm464_vm1, %v8421_v7 }
 0x472   : > { %v2893_v4 = vpop.permute.xlu1 %2892  ;;  %2856 = vmatprep.mubr.bf16.mxu1 %v9238_v42 }
 0x473   : > { %v2897_v12 = vpop.permute.xlu0 %2896  ;;  %v2904_v26 = vsel %vm951_vm7, %v2893_v4, %v2895_v10 }
 0x474   : > { %v2905_v21 = vsel %vm951_vm7, %v2895_v10, %v2897_v12 }
 0x475   : > { %7810 = vmatmul.mubr.msk.bf16.gmra.mrb[36].mxu0 %vm464_vm1, %v8422_v11 }
 0x476   : > { %v3115_v28 = vpop.permute.xlu1 %3114  ;;  %3162 = vmatprep.mubr.bf16.mxu0 %v9238_v42 }
 0x477   : > { %v2809_v6 = vpop.permute.xlu0 %2808  ;;  %v3119_v13 = vsel %vm1165_vm6, %v3113_v5, %v3115_v28 }
 0x478   : > { %3132 = vmatprep.subr.bf16.mxu0 %v3119_v13  ;;  %v2813_v17 = vsel %vm435_vm0, %v2807_v56, %v2809_v6 }
 0x479   : > { %2826 = vmatprep.subr.bf16.mxu1 %v2813_v17  ;;  %3133 = vmatpush1.bf16.msra.mxu0 %v3118_v16 }
 0x47a   : > { %2827 = vmatpush1.bf16.msra.mxu1 %v2812_v18  ;;  %v3203_v20 = vpop.permute.xlu1 %3202 }
 0x47b   : > { %v3201_v23 = vpop.permute.xlu0 %3200  ;;  %2918 = vmatprep.subr.bf16.mxu1 %v2905_v21 }
 0x47c   : > { %v3211_v25 = vsel %vm1260_vm8, %v3201_v23, %v3203_v20 }
 0x47d   : > { %7801 = vmatmul.mubr.msk.bf16.vlgmr.msra.gmra.mrb[28].mxu1 %vm464_vm1, %v8423_v19  ;;  %3224 = vmatprep.subr.bf16.mxu0 %v3211_v25 }
 0x47e   : > { %2919 = vmatpush1.bf16.msra.mxu1 %v2904_v26  ;;  %v2899_v29 = vpop.permute.xlu1 %2898  ;;  %7813 = vmatmul.mubr.msk.bf16.vlgmr.msra.gmra.mrb[32].mxu0 %vm464_vm1, %v8424_v22 }
 0x47f   : > { %v3199_v30 = vpop.permute.xlu0 %3198  ;;  %2866 = vmatprep.mubr.bf16.mxu1 %v9238_v42  ;;  %3172 = vmatprep.mubr.bf16.mxu0 %v9238_v42  ;;  %v9531_v42 = vld [vmem:[#allocation2] sm:$0xff] }
 0x480   : > { %v3210_v31 = vsel %vm1260_vm8, %v3199_v30, %v3201_v23 }
 0x481   : > { %3225 = vmatpush1.bf16.msra.mxu0 %v3210_v31 }
 0x482   : > { %v2901_v33 = vpop.permute.xlu1 %2900 }
 0x483   : > { %v2903_v38 = vpop.permute.xlu0 %2902  ;;  %v2906_v34 = vsel %vm951_vm7, %v2899_v29, %v2901_v33 }
 0x484   : > { %v2907_v39 = vsel %vm951_vm7, %v2901_v33, %v2903_v38 }
 0x485   : > { %7802 = vmatmul.mubr.msk.bf16.gmra.mrb[32].mxu1 %vm464_vm1, %v8425_v32  ;;  %2920 = vmatprep.subr.bf16.mxu1 %v2907_v39 }
 0x486   : > { %2921 = vmatpush1.bf16.msra.mxu1 %v2906_v34  ;;  %v3209_v40 = vpop.permute.xlu1 %3208  ;;  %7814 = vmatmul.mubr.msk.bf16.gmra.mrb[36].mxu0 %vm464_vm1, %v8426_v37 }
 0x487   : > { %v3207_v41 = vpop.permute.xlu0 %3206  ;;  %2950 = vmatprep.mubr.bf16.mxu1 %v9531_v42  ;;  %3256 = vmatprep.mubr.bf16.mxu0 %v9531_v42 }
 0x488   : > { %v3213_v43 = vsel %vm1260_vm8, %v3207_v41, %v3209_v40 }
 0x489   : > { %3226 = vmatprep.subr.bf16.mxu0 %v3213_v43 }
 0x48b   : > { %v3205_v59 = vpop.permute.xlu0 %3204 }
 0x48c   : > { %v3212_v45 = vsel %vm1260_vm8, %v3205_v59, %v3207_v41 }
 0x48d   : > { %7805 = vmatmul.mubr.msk.bf16.vlgmr.msra.gmra.mrb[28].mxu1 %vm464_vm1, %v8427_v44  ;;  %3227 = vmatpush1.bf16.msra.mxu0 %v3212_v45 }
 0x48e   : > { %2960 = vmatprep.mubr.bf16.mxu1 %v9531_v42 }
 0x490   : > { %7817 = vmatmul.mubr.msk.bf16.vlgmr.msra.gmra.mrb[32].mxu0 %vm464_vm1, %v8428_v46 }
 0x491   : > { %3266 = vmatprep.mubr.bf16.mxu0 %v9531_v42 }
 0x495   : > { %7806 = vmatmul.mubr.msk.bf16.gmra.mrb[32].mxu1 %vm464_vm1, %v8429_v47 }
 0x496   : > { %4039 = vmatprep.mubr.bf16.mxu1 %v9531_v42 }
 0x497   : > { %v3309_v6 = vpop.permute.xlu1 %3308 }
 0x498   : > { %7818 = vmatmul.mubr.msk.bf16.gmra.mrb[36].mxu0 %vm464_vm1, %v8430_v58 }
 0x499   : > { %4347 = vmatprep.mubr.bf16.mxu0 %v9531_v42 }
 0x49c   : > { %v3314_v20 = vpop.permute.xlu0 %3313 }
 0x530   : > { %v2662_v48 = vpop.f32.mrb[24].mxu0 }
 0x531   : > { %v2664_v35 = vpop.f32.mrb[25].mxu0 }
 0x532   : > { %v2666_v49 = vpop.f32.mrb[26].mxu0 }
 0x533   : > { %v2668_v36 = vpop.f32.mrb[27].mxu0 }
 0x538   : > { %v2672_v50 = vpop.f32.mrb[28].mxu0 }
 0x539   : > { %v2674_v51 = vpop.f32.mrb[29].mxu0 }
 0x53a   : > { %v2676_v52 = vpop.f32.mrb[30].mxu0 }
 0x53b   : > { %v2678_v53 = vpop.f32.mrb[31].mxu0 }
 0x560   : > { %v2952_v54 = vpop.f32.mrb[28].mxu1 }
 0x561   : > { %v2979_v55 = vmul.f32 %v9191_v14, %v2952_v54  ;;  %v2954_v56 = vpop.f32.mrb[29].mxu1 }
 0x562   : > { %v2980_v57 = vmul.f32 %v9193_v15, %v2954_v56  ;;  %v2956_v60 = vpop.f32.mrb[30].mxu1 }
 0x563   : > { %v2987_v61 = vadd.f32 %v2979_v55, %v2662_v48  ;;  %v2981_v62 = vmul.f32 %v9191_v14, %v2956_v60  ;;  %v2958_v63 = vpop.f32.mrb[31].mxu1  ;;  %v3258_v1 = vpop.f32.mrb[32].mxu0 }
 0x564   : > { %v2988_v8 = vadd.f32 %v2980_v57, %v2664_v35  ;;  %v2982_v3 = vmul.f32 %v9193_v15, %v2958_v63  ;;  %v3285_v5 = vmul.f32 %v9198_v24, %v3258_v1  ;;  %v3260_v2 = vpop.f32.mrb[33].mxu0  ;;  %v3319_v55 = vpop.permute.xlu1 %3318 }
 0x565   : > { %v2989_v7 = vadd.f32 %v2981_v62, %v2666_v49  ;;  %v3286_v10 = vmul.f32 %v9201_v27, %v3260_v2  ;;  %v3262_v0 = vpop.f32.mrb[34].mxu0 }
 0x566   : > { %v2990_v11 = vadd.f32 %v2982_v3, %v2668_v36  ;;  %v3293_v4 = vadd.f32 %v3285_v5, %v2987_v61  ;;  %v3287_v12 = vmul.f32 %v9198_v24, %v3262_v0  ;;  %v3264_v28 = vpop.f32.mrb[35].mxu0  ;;  %v3324_v61 = vpop.permute.xlu0 %3323 }
 0x567   : > { %v3294_v13 = vadd.f32 %v3286_v10, %v2988_v8  ;;  %v3288_v16 = vmul.f32 %v9201_v27, %v3264_v28 }
 0x568   : > { %v3326_v17 = vadd.f32 %v3309_v6, %v3293_v4  ;;  %v3295_v18 = vadd.f32 %v3287_v12, %v2989_v7  ;;  %v2962_v19 = vpop.f32.mrb[32].mxu1 }
 0x569   : > { %v3327_v21 = vadd.f32 %v3309_v6, %v3294_v13  ;;  %v3296_v22 = vadd.f32 %v3288_v16, %v2990_v11  ;;  %v2983_v23 = vmul.f32 %v9191_v14, %v2962_v19  ;;  %v2964_v25 = vpop.f32.mrb[33].mxu1 }
 0x56a   : > { %vm3334_vm15 = vcmp.ge.f32.partialorder %v3326_v17, 0.0  ;;  %v3342_v26 = vmul.f32 0.05, %v3326_v17  ;;  %v3328_v29 = vadd.f32 %v3314_v20, %v3295_v18  ;;  %v2984_v30 = vmul.f32 %v9193_v15, %v2964_v25  ;;  %v2966_v31 = vpop.f32.mrb[34].mxu1 }
 0x56b   : > { %vm3335_vm9 = vcmp.ge.f32.partialorder %v3327_v21, 0.0  ;;  %v3343_v32 = vmul.f32 0.05, %v3327_v21  ;;  %v3329_v33 = vadd.f32 %v3314_v20, %v3296_v22  ;;  %v2991_v37 = vadd.f32 %v2983_v23, %v2672_v50  ;;  %v2968_v38 = vpop.f32.mrb[35].mxu1  ;;  %v3268_v39 = vpop.f32.mrb[36].mxu0 }
 0x56c   : > { %vm3336_vm10 = vcmp.ge.f32.partialorder %v3328_v29, 0.0  ;;  %v3344_v34 = vmul.f32 0.05, %v3328_v29  ;;  %v2992_v40 = vadd.f32 %v2984_v30, %v2674_v51  ;;  %v2985_v41 = vmul.f32 %v9191_v14, %v2966_v31  ;;  %v3270_v43 = vpop.f32.mrb[37].mxu0 }
 0x56d   : > { %vm3337_vm11 = vcmp.ge.f32.partialorder %v3329_v33, 0.0  ;;  %v3345_v44 = vmul.f32 0.05, %v3329_v33  ;;  %v2986_v59 = vmul.f32 %v9193_v15, %v2968_v38  ;;  %v3289_v45 = vmul.f32 %v9198_v24, %v3268_v39  ;;  %v3272_v46 = vpop.f32.mrb[38].mxu0  ;;  %v3450_v38 = vld [vmem:[#allocation9] sm:$0xff] }
 0x56e   : > { %v2993_v47 = vadd.f32 %v2985_v41, %v2676_v52  ;;  %v3290_v58 = vmul.f32 %v9201_v27, %v3270_v43  ;;  %v3291_v48 = vmul.f32 %v9198_v24, %v3272_v46  ;;  %v3274_v35 = vpop.f32.mrb[39].mxu0  ;;  %v9561_v49 = vsel %vm3334_vm15, %v3326_v17, %v3342_v26  ;;  %v3452_v43 = vld [vmem:[#allocation9 + $0x10] sm:$0xff] }
 0x56f   : > { %v2994_v36 = vadd.f32 %v2986_v59, %v2678_v53  ;;  %v3297_v50 = vadd.f32 %v3289_v45, %v2991_v37  ;;  %v3292_v51 = vmul.f32 %v9201_v27, %v3274_v35  ;;  %v9565_v54 = vsel %vm3335_vm9, %v3327_v21, %v3343_v32 }
 0x570   : > { %v3298_v56 = vadd.f32 %v3290_v58, %v2992_v40  ;;  %v3299_v57 = vadd.f32 %v3291_v48, %v2993_v47  ;;  %v3366_v52 = vadd.f32 %v9565_v54, %v9561_v49  ;;  %v9570_v60 = vsel %vm3336_vm10, %v3328_v29, %v3344_v34  ;;  %v3453_v47 = vld [vmem:[#allocation9 + $0x18] sm:$0xff] }
 0x571   : > { %v3330_v62 = vadd.f32 %v3319_v55, %v3297_v50  ;;  %v3300_v63 = vadd.f32 %v3292_v51, %v2994_v36  ;;  %v9573_v53 = vsel %vm3337_vm11, %v3329_v33, %v3345_v44  ;;  %v3378_v13 = vmul.f32 %v9561_v49, %v9561_v49  ;;  %v3451_v33 = vld [vmem:[#allocation9 + $0x8] sm:$0xff] }
 0x572   : > { %v3331_v1 = vadd.f32 %v3319_v55, %v3298_v56  ;;  %v3332_v8 = vadd.f32 %v3324_v61, %v3299_v57  ;;  %3367 = vadd.xlane.f32.xlu1 %v3366_v52  ;;  %v3369_v3 = vadd.f32 %v9573_v53, %v9570_v60  ;;  %v3379_v16 = vmul.f32 %v9565_v54, %v9565_v54 }
 0x573   : > { %vm3338_vm12 = vcmp.ge.f32.partialorder %v3330_v62, 0.0  ;;  %v3346_v5 = vmul.f32 0.05, %v3330_v62  ;;  %v3333_v2 = vadd.f32 %v3324_v61, %v3300_v63  ;;  %v3380_v18 = vmul.f32 %v9570_v60, %v9570_v60 }
 0x574   : > { %vm3339_vm13 = vcmp.ge.f32.partialorder %v3331_v1, 0.0  ;;  %v3347_v7 = vmul.f32 0.05, %v3331_v1  ;;  %vm3340_vm14 = vcmp.ge.f32.partialorder %v3332_v8, 0.0  ;;  %v3348_v10 = vmul.f32 0.05, %v3332_v8  ;;  %3370 = vadd.xlane.f32.xlu0 %v3369_v3 }
 0x575   : > { %vm3341_vm15 = vcmp.ge.f32.partialorder %v3333_v2, 0.0  ;;  %v3349_v0 = vmul.f32 0.05, %v3333_v2  ;;  %v9577_v11 = vsel %vm3338_vm12, %v3330_v62, %v3346_v5  ;;  %v3381_v19 = vmul.f32 %v9573_v53, %v9573_v53 }
 0x576   : > { %v9579_v4 = vsel %vm3339_vm13, %v3331_v1, %v3347_v7  ;;  %v9581_v12 = vsel %vm3340_vm14, %v3332_v8, %v3348_v10  ;;  %v3386_v20 = vadd.f32 %v3379_v16, %v3378_v13  ;;  %v3382_v21 = vmul.f32 %v9577_v11, %v9577_v11 }
 0x577   : > { %v3372_v28 = vadd.f32 %v9579_v4, %v9577_v11  ;;  %v9585_v6 = vsel %vm3341_vm15, %v3333_v2, %v3349_v0  ;;  %v3383_v22 = vmul.f32 %v9579_v4, %v9579_v4  ;;  %v3389_v23 = vadd.f32 %v3381_v19, %v3380_v18 }
 0x578   : > { %v3375_v17 = vadd.f32 %v9585_v6, %v9581_v12  ;;  %v3384_v25 = vmul.f32 %v9581_v12, %v9581_v12  ;;  %v3385_v26 = vmul.f32 %v9585_v6, %v9585_v6  ;;  %vm3458_vm9 = vcmask 15360  }
 0x579   : > { %3373 = vadd.xlane.f32.xlu0 %v3372_v28  ;;  %v3392_v29 = vadd.f32 %v3383_v22, %v3382_v21 }
 0x57a   : > { %3376 = vadd.xlane.f32.xlu1 %v3375_v17  ;;  %v3395_v30 = vadd.f32 %v3385_v26, %v3384_v25 }
 0x57d   : > { %3387 = vadd.xlane.f32.xlu0 %v3386_v20 }
 0x57e   : > { %3390 = vadd.xlane.f32.xlu1 %v3389_v23 }
 0x581   : > { %3393 = vadd.xlane.f32.xlu0 %v3392_v29 }
 0x582   : > { %3396 = vadd.xlane.f32.xlu1 %v3395_v30 }
 0x5ff   : > { %v3368_v31 = vpop.xlane.xlu1 %3367 }
 0x600   : > { %v3398_v32 = vmul.f32 0.00390625, %v3368_v31 }
 0x601   : > { %v3371_v37 = vpop.xlane.xlu0 %3370 }
 0x602   : > { %v3399_v39 = vmul.f32 0.00390625, %v3371_v37  ;;  %v3454_v40 = vmul.f32 %v3450_v38, %v3398_v32  ;;  %v3402_v41 = vmul.f32 256.0, %v3398_v32  ;;  %v3472_v37 = vld [vmem:[%s10928_s4] sm:$0x1] }
 0x604   : > { %v3455_v34 = vmul.f32 %v3451_v33, %v3399_v39  ;;  %v3403_v59 = vmul.f32 256.0, %v3399_v39  ;;  %v3459_v35 = vsel %vm3458_vm9, %v3454_v40, 0.0  ;;  %v3406_v50 = vmul.f32 %v3402_v41, %v3398_v32 }
 0x605   : > { %v3480_v33 = vshrl.u32 %v378_v9, 7 }
 0x606   : > { %v3374_v44 = vpop.xlane.xlu0 %3373  ;;  %v3460_v45 = vsel %vm3458_vm9, %v3455_v34, 0.0  ;;  %v3407_v52 = vmul.f32 %v3403_v59, %v3399_v39 }
 0x607   : > { %v3400_v46 = vmul.f32 0.00390625, %v3374_v44  ;;  %v3377_v58 = vpop.xlane.xlu1 %3376  ;;  %v3461_v55 = vadd.f32 %v3460_v45, %v3459_v35  ;;  %v3532_v44 = vld [vmem:[#allocation9 + $0x20] sm:$0xff] }
 0x608   : > { %v3401_v48 = vmul.f32 0.00390625, %v3377_v58 }
 0x609   : > { %v3456_v36 = vmul.f32 %v3452_v43, %v3400_v46  ;;  %v3404_v51 = vmul.f32 256.0, %v3400_v46  ;;  %v9616_v43 = vsub.s32 0, %v3480_v33 }
 0x60a   : > { %v3457_v56 = vmul.f32 %v3453_v47, %v3401_v48  ;;  %v3388_v57 = vpop.xlane.xlu0 %3387  ;;  %v3405_v61 = vmul.f32 256.0, %v3401_v48  ;;  %v3533_v47 = vld [vmem:[#allocation9 + $0x28] sm:$0xff] }
 0x60b   : > { %v3462_v62 = vsel %vm3458_vm9, %v3456_v36, 0.0  ;;  %v3410_v63 = vsub.f32 %v3388_v57, %v3406_v50  ;;  %v3391_v1 = vpop.xlane.xlu1 %3390  ;;  %v3408_v7 = vmul.f32 %v3404_v51, %v3400_v46  ;;  %v3476_v36 = vld [vmem:[%s10929_s5 + $0x8] sm:$0xff]  ;;  %v3475_v50 = vld [vmem:[%s10929_s5] sm:$0xff]  ;;  %v3478_v57 = vld [vmem:[%s10929_s5 + $0x18] sm:$0xff] }
 0x60c   : > { %v3463_v8 = vadd.f32 %v3462_v62, %v3461_v55  ;;  %v3464_v3 = vsel %vm3458_vm9, %v3457_v56, 0.0  ;;  %v3411_v5 = vsub.f32 %v3391_v1, %v3407_v52  ;;  %v3409_v13 = vmul.f32 %v3405_v61, %v3401_v48 }
 0x60d   : > { %v3414_v2 = vmax.f32 %v3410_v63, 0.0  ;;  %v3477_v63 = vld [vmem:[%s10929_s5 + $0x10] sm:$0xff] }
 0x60e   : > { %v3465_v10 = vadd.f32 %v3464_v3, %v3463_v8  ;;  %v3415_v0 = vmax.f32 %v3411_v5, 0.0  ;;  %v3394_v28 = vpop.xlane.xlu0 %3393 }
 0x60f   : > { %v3418_v16 = vmul.f32 0.003921569, %v3414_v2  ;;  %v3412_v17 = vsub.f32 %v3394_v28, %v3408_v7  ;;  %v3397_v18 = vpop.xlane.xlu1 %3396 }
 0x610   : > { %v3466_v19 = vrot.slane %v3465_v10, 4  ;;  %v3419_v20 = vmul.f32 0.003921569, %v3415_v0  ;;  %v3413_v21 = vsub.f32 %v3397_v18, %v3409_v13  ;;  %v3534_v0 = vld [vmem:[#allocation9 + $0x30] sm:$0xff] }
 0x611   : > { %8487 = vrsqrt.f32 %v3418_v16  ;;  %v3416_v23 = vmax.f32 %v3412_v17, 0.0  ;;  %vm3424_vm10 = vcmp.eq.f32.partialorder %v3418_v16, inf  ;;  %vm3426_vm11 = vcmp.eq.f32.partialorder %v3418_v16, 0.0  ;;  %v3535_v17 = vld [vmem:[#allocation9 + $0x38] sm:$0xff] }
 0x612   : > { %v3467_v22 = vadd.f32 %v3466_v19, %v3465_v10  ;;  %8489 = vrsqrt.f32 %v3419_v20  ;;  %v3417_v25 = vmax.f32 %v3413_v21, 0.0  ;;  %v3427_v59 = vand.u32 2147483648, %v3418_v16 }
 0x613   : > { %v3420_v29 = vmul.f32 0.003921569, %v3416_v23  ;;  %vm3431_vm12 = vcmp.eq.f32.partialorder %v3419_v20, inf  ;;  %v3434_v9 = vand.u32 2147483648, %v3419_v20  ;;  %vm3433_vm13 = vcmp.eq.f32.partialorder %v3419_v20, 0.0 }
 0x614   : > { %v3468_v26 = vrot.slane %v3467_v22, 2  ;;  %v9609_v30 = vmul.f32 0.003921569, %v3417_v25 }
 0x615   : > { %8491 = vrsqrt.f32 %v3420_v29  ;;  %vm3438_vm14 = vcmp.eq.f32.partialorder %v3420_v29, inf  ;;  %vm3440_vm15 = vcmp.eq.f32.partialorder %v3420_v29, 0.0  ;;  %v3441_v62 = vand.u32 2147483648, %v3420_v29 }
 0x616   : > { %v3469_v31 = vadd.f32 %v3468_v26, %v3467_v22  ;;  %8493 = vrsqrt.f32 %v9609_v30  ;;  %v3448_v3 = vand.u32 2147483648, %v9609_v30 }
 0x618   : > { %v3470_v32 = vrot.slane %v3469_v31, 1 }
 0x61a   : > { %v3471_v38 = vadd.f32 %v3470_v32, %v3469_v31 }
 0x61b   : > { %v8488_v39 = vpop.eup %8487 }
 0x61c   : > { %v8490_v34 = vpop.eup %8489  ;;  %v3423_v40 = vmul.f32 %v8488_v39, %v3418_v16  ;;  %v3473_v41 = vadd.f32 %v3472_v37, %v3471_v38 }
 0x61d   : > { %v3430_v45 = vmul.f32 %v8490_v34, %v3419_v20 }
 0x61e   : > { %v3425_v46 = vsel %vm3424_vm10, %v3418_v16, %v3423_v40  ;;  %v3474_v58 = vmax.f32 %v3473_v41, 0.0  ;;  %vm3445_vm10 = vcmp.eq.f32.partialorder %v9609_v30, inf }
 0x61f   : > { %v3428_v48 = vsel %vm3426_vm11, %v3427_v59, %v3425_v46  ;;  %v3432_v35 = vsel %vm3431_vm12, %v3419_v20, %v3430_v45  ;;  %v8492_v52 = vpop.eup %8491  ;;  %vm3447_vm11 = vcmp.eq.f32.partialorder %v9609_v30, 0.0  ;;  %v7823_v59 = vld [vmem:[%s10928_s4 + $0x1] sm:$0x1] }
 0x620   : > { %v3536_v51 = vmul.f32 %v3532_v44, %v3428_v48  ;;  %v3435_v55 = vsel %vm3433_vm13, %v3434_v9, %v3432_v35  ;;  %v3482_v56 = vrot.slane %v3474_v58, %v9616_v43  ;;  %v8494_v1 = vpop.eup %8493  ;;  %v3437_v8 = vmul.f32 %v8492_v52, %v3420_v29  ;;  %v7825_v9 = vld [vmem:[%s10929_s5 + $0x28] sm:$0xff]  ;;  %v7824_v58 = vld [vmem:[%s10929_s5 + $0x20] sm:$0xff]  ;;  %v7827_v35 = vld [vmem:[%s10929_s5 + $0x38] sm:$0xff] }
 0x621   : > { %v3537_v61 = vmul.f32 %v3533_v47, %v3435_v55  ;;  %v3444_v28 = vmul.f32 %v8494_v1, %v9609_v30 }
 0x622   : > { %v3484_v5 = vmul.f32 %v3482_v56, %v3476_v36  ;;  %v3483_v2 = vmul.f32 %v3482_v56, %v3475_v50  ;;  %v3540_v7 = vsel %vm3458_vm9, %v3536_v51, 0.0  ;;  %v3486_v13 = vmul.f32 %v3482_v56, %v3478_v57  ;;  %v7826_v36 = vld [vmem:[%s10929_s5 + $0x30] sm:$0xff] }
 0x623   : > { %v3541_v10 = vsel %vm3458_vm9, %v3537_v61, 0.0  ;;  %v3439_v16 = vsel %vm3438_vm14, %v3420_v29, %v3437_v8  ;;  %v3485_v20 = vmul.f32 %v3482_v56, %v3477_v63  ;;  %v3446_v22 = vsel %vm3445_vm10, %v9609_v30, %v3444_v28  ;;  %v9668_v63 = vld [vmem:[#allocation3 + $0x38] sm:$0xff] }
 0x624   : > { %v3490_v18 = vsel %vm3458_vm9, %v3484_v5, 0.0  ;;  %v3487_v19 = vsel %vm3458_vm9, %v3483_v2, 0.0  ;;  %v3442_v21 = vsel %vm3440_vm15, %v3441_v62, %v3439_v16  ;;  %v3542_v23 = vadd.f32 %v3541_v10, %v3540_v7  ;;  %5924 = vst.msk [vmem:[#allocation3 + $0x38] sm:$0xff] %vm435_vm0, %v9531_v42  ;;  %v3500_v5 = vld [vmem:[%s10930_s6 + $0x8] sm:$0xff]  ;;  %v3501_v10 = vld [vmem:[%s10930_s6 + $0x10] sm:$0xff]  ;;  %v3502_v28 = vld [vmem:[%s10930_s6 + $0x18] sm:$0xff] }
 0x625   : > { %3491 = vadd.xlane.f32.xlu1 %v3490_v18  ;;  %3488 = vadd.xlane.f32.xlu0 %v3487_v19  ;;  %v3538_v25 = vmul.f32 %v3534_v0, %v3442_v21  ;;  %v3449_v26 = vsel %vm3447_vm11, %v3448_v3, %v3446_v22  ;;  %v3496_v32 = vsel %vm3458_vm9, %v3486_v13, 0.0  ;;  %v3493_v33 = vsel %vm3458_vm9, %v3485_v20, 0.0  ;;  %v3499_v3 = vld [vmem:[%s10930_s6] sm:$0xff]  ;;  %v7829_v21 = vld [vmem:[%s10930_s6 + $0x28] sm:$0xff] }
 0x626   : > { %v3539_v31 = vmul.f32 %v3535_v17, %v3449_v26  ;;  %v7828_v20 = vld [vmem:[%s10930_s6 + $0x20] sm:$0xff] }
 0x627   : > { %v3543_v37 = vsel %vm3458_vm9, %v3538_v25, 0.0 }
 0x628   : > { %v3544_v29 = vadd.f32 %v3543_v37, %v3542_v23  ;;  %v3545_v38 = vsel %vm3458_vm9, %v3539_v31, 0.0  ;;  %v7831_v37 = vld [vmem:[%s10930_s6 + $0x38] sm:$0xff] }
 0x629   : > { %3497 = vadd.xlane.f32.xlu1 %v3496_v32  ;;  %3494 = vadd.xlane.f32.xlu0 %v3493_v33  ;;  %v7830_v33 = vld [vmem:[%s10930_s6 + $0x30] sm:$0xff] }
 0x62a   : > { %v3546_v39 = vadd.f32 %v3545_v38, %v3544_v29 }
 0x62c   : > { %v3547_v34 = vrot.slane %v3546_v39, 4 }
 0x62e   : > { %v3548_v30 = vadd.f32 %v3547_v34, %v3546_v39 }
 0x630   : > { %v3549_v40 = vrot.slane %v3548_v30, 2 }
 0x632   : > { %v3550_v41 = vadd.f32 %v3549_v40, %v3548_v30 }
 0x634   : > { %v3551_v44 = vrot.slane %v3550_v41, 1 }
 0x636   : > { %v3552_v45 = vadd.f32 %v3551_v44, %v3550_v41 }
 0x638   : > { %v3555_v46 = vadd.f32 %v7823_v59, %v3552_v45 }
 0x63a   : > { %v3556_v47 = vmax.f32 %v3555_v46, 0.0 }
 0x63c   : > { %v3565_v48 = vrot.slane %v3556_v47, %v9616_v43 }
 0x63e   : > { %v3567_v50 = vmul.f32 %v7825_v9, %v3565_v48  ;;  %v3566_v51 = vmul.f32 %v7824_v58, %v3565_v48  ;;  %v3569_v57 = vmul.f32 %v7827_v35, %v3565_v48  ;;  %v3568_v52 = vmul.f32 %v7826_v36, %v3565_v48 }
 0x640   : > { %v3573_v55 = vsel %vm3458_vm9, %v3567_v50, 0.0  ;;  %v3570_v56 = vsel %vm3458_vm9, %v3566_v51, 0.0  ;;  %v3579_v61 = vsel %vm3458_vm9, %v3569_v57, 0.0  ;;  %v3576_v62 = vsel %vm3458_vm9, %v3568_v52, 0.0 }
 0x641   : > { %3574 = vadd.xlane.f32.xlu1 %v3573_v55  ;;  %3571 = vadd.xlane.f32.xlu0 %v3570_v56 }
 0x645   : > { %3580 = vadd.xlane.f32.xlu1 %v3579_v61  ;;  %3577 = vadd.xlane.f32.xlu0 %v3576_v62 }
 0x6b2   : > { %v3489_v1 = vpop.xlane.xlu0 %3488  ;;  %v3492_v8 = vpop.xlane.xlu1 %3491 }
 0x6b3   : > { %v3503_v2 = vadd.f32 %v3499_v3, %v3489_v1  ;;  %v3504_v7 = vadd.f32 %v3500_v5, %v3492_v8 }
 0x6b5   : > { %v7819_v16 = vmul.f32 -1.442695, %v3503_v2  ;;  %v7820_v18 = vmul.f32 -1.442695, %v3504_v7  ;;  %v9696_v2 = vld [vmem:[#allocation3 + $0x18] sm:$0xff] }
 0x6b6   : > { %v3495_v0 = vpop.xlane.xlu0 %3494  ;;  %v3498_v13 = vpop.xlane.xlu1 %3497  ;;  %5923 = vst.msk [vmem:[#allocation3 + $0x18] sm:$0xff] %vm435_vm0, %v9531_v42 }
 0x6b7   : > { %v3505_v17 = vadd.f32 %v3501_v10, %v3495_v0  ;;  %v3506_v19 = vadd.f32 %v3502_v28, %v3498_v13  ;;  %8495 = vpow2.f32 %v7819_v16 }
 0x6b8   : > { %8497 = vpow2.f32 %v7820_v18 }
 0x6b9   : > { %v7821_v22 = vmul.f32 -1.442695, %v3505_v17  ;;  %v7822_v23 = vmul.f32 -1.442695, %v3506_v19 }
 0x6bb   : > { %8499 = vpow2.f32 %v7821_v22  ;;  %v9717_v22 = vld [vmem:[%s8976_s28] sm:$0xff] }
 0x6bc   : > { %8501 = vpow2.f32 %v7822_v23  ;;  %v9720_v23 = vld [vmem:[%s8976_s28 + $0x8] sm:$0xff] }
 0x6c1   : > { %v8496_v59 = vpop.eup %8495 }
 0x6c2   : > { %v8498_v45 = vpop.eup %8497  ;;  %v3519_v46 = vadd.f32 1.0, %v8496_v59 }
 0x6c3   : > { %v3520_v9 = vadd.f32 1.0, %v8498_v45 }
 0x6c5   : > { %v8500_v47 = vpop.eup %8499 }
 0x6c6   : > { %v8502_v58 = vpop.eup %8501  ;;  %v3521_v36 = vadd.f32 1.0, %v8500_v47 }
 0x6c7   : > { %v3522_v51 = vadd.f32 1.0, %v8502_v58 }
 0x6ce   : > { %v3572_v25 = vpop.xlane.xlu0 %3571  ;;  %v3575_v26 = vpop.xlane.xlu1 %3574 }
 0x6cf   : > { %v3587_v31 = vadd.f32 %v7828_v20, %v3572_v25  ;;  %v3588_v32 = vadd.f32 %v7829_v21, %v3575_v26 }
 0x6d1   : > { %v7832_v29 = vmul.f32 -1.442695, %v3587_v31  ;;  %v7833_v38 = vmul.f32 -1.442695, %v3588_v32  ;;  %v9725_v32 = vld [vmem:[%s8976_s28 + $0x10] sm:$0xff] }
 0x6d2   : > { %v3578_v39 = vpop.xlane.xlu0 %3577  ;;  %v3581_v34 = vpop.xlane.xlu1 %3580 }
 0x6d3   : > { %8503 = vpow2.f32 %v7832_v29  ;;  %v3589_v30 = vadd.f32 %v7830_v33, %v3578_v39  ;;  %v3590_v40 = vadd.f32 %v7831_v37, %v3581_v34  ;;  %v9728_v33 = vld [vmem:[%s8976_s28 + $0x18] sm:$0xff] }
 0x6d4   : > { %8505 = vpow2.f32 %v7833_v38 }
 0x6d5   : > { %v7834_v41 = vmul.f32 -1.442695, %v3589_v30  ;;  %v7835_v44 = vmul.f32 -1.442695, %v3590_v40 }
 0x6d7   : > { %8507 = vpow2.f32 %v7834_v41  ;;  %v3364_v41 = vld [vmem:[%s8976_s28 + $0x30] sm:$0xff] }
 0x6d8   : > { %8509 = vpow2.f32 %v7835_v44  ;;  %v3365_v44 = vld [vmem:[%s8976_s28 + $0x38] sm:$0xff] }
 0x6d9   : > { %8511 = vrcp.f32 %v3519_v46 }
 0x6da   : > { %8513 = vrcp.f32 %v3520_v9 }
 0x6dd   : > { %v8504_v48 = vpop.eup %8503 }
 0x6de   : > { %v8506_v35 = vpop.eup %8505  ;;  %v3603_v50 = vadd.f32 1.0, %v8504_v48  ;;  %v9743_v48 = vld [vmem:[%s8976_s28 + $0x20] sm:$0xff] }
 0x6df   : > { %v3604_v55 = vadd.f32 1.0, %v8506_v35  ;;  %v9746_v35 = vld [vmem:[%s8976_s28 + $0x28] sm:$0xff] }
 0x6e0   : > { %8515 = vrcp.f32 %v3603_v50 }
 0x6e1   : > { %v8508_v56 = vpop.eup %8507  ;;  %8517 = vrcp.f32 %v3604_v55 }
 0x6e2   : > { %v8510_v57 = vpop.eup %8509  ;;  %8519 = vrcp.f32 %v3521_v36  ;;  %v3605_v52 = vadd.f32 1.0, %v8508_v56 }
 0x6e3   : > { %8521 = vrcp.f32 %v3522_v51  ;;  %v3606_v61 = vadd.f32 1.0, %v8510_v57  ;;  %v8512_v62 = vpop.eup %8511 }
 0x6e4   : > { %8523 = vrcp.f32 %v3605_v52  ;;  %v8514_v1 = vpop.eup %8513 }
 0x6e5   : > { %8525 = vrcp.f32 %v3606_v61 }
 0x6ea   : > { %v8516_v8 = vpop.eup %8515 }
 0x6eb   : > { %v8518_v3 = vpop.eup %8517  ;;  %v3615_v5 = vadd.f32 %v8516_v8, %v8512_v62  ;;  %v8431_v62 = vld [vmem:[#allocation5 + $0x1f0] sm:$0xff]   ;;  %v4882_v8 = vld [vmem:[#allocation7 + $0x60] sm:$0xff] }
 0x6ec   : > { %v8520_v7 = vpop.eup %8519  ;;  %v3616_v10 = vadd.f32 %v8518_v3, %v8514_v1  ;;  %v8432_v1 = vld [vmem:[#allocation5 + $0x1f8] sm:$0xff]   ;;  %v4884_v3 = vld [vmem:[#allocation7 + $0x70] sm:$0xff] }
 0x6ed   : > { %v8522_v0 = vpop.eup %8521  ;;  %v3619_v28 = vmul.f32 0.5, %v3615_v5 }
 0x6ee   : > { %v8524_v13 = vpop.eup %8523  ;;  %v3620_v16 = vmul.f32 0.5, %v3616_v10 }
 0x6ef   : > { %v8526_v17 = vpop.eup %8525  ;;  %3885 = vperm.xlu0 %8375, %v3619_v28   ;;  %v3617_v18 = vadd.f32 %v8524_v13, %v8520_v7  ;;  %v4883_v7 = vld [vmem:[#allocation7 + $0x68] sm:$0xff] }
 0x6f0   : > { %3890 = vperm.xlu1 %8376, %v3620_v16   ;;  %v3618_v19 = vadd.f32 %v8526_v17, %v8522_v0 }
 0x6f1   : > { %v3621_v20 = vmul.f32 0.5, %v3617_v18 }
 0x6f2   : > { %v3622_v21 = vmul.f32 0.5, %v3618_v19 }
 0x6f4   : > { %3895 = vperm.xlu1 %8376, %v3621_v20   ;;  %3900 = vperm.xlu0 %8375, %v3622_v21  }
 0x6f8   : > { %4076 = vrot.lane.b32.xlu1 %v9531_v42, %s8774_s16  ;;  %4082 = vrot.lane.b32.xlu0 %v9531_v42, %s8774_s16 }
 0x6fc   : > { %4192 = vrot.lane.b32.xlu1 %v9668_v63, %s8775_s29  ;;  %4186 = vrot.lane.b32.xlu0 %v9696_v2, %s8775_s29 }
 0x700   : > { %4289 = vrot.lane.b32.xlu1 %v9531_v42, %s8776_s27 }
 0x704   : > { %4599 = vrot.lane.b32.xlu1 %v9696_v2, %s8777_s10 }
 0x708   : > { %4295 = vrot.lane.b32.xlu1 %v9531_v42, %s8776_s27 }
 0x70c   : > { %4605 = vrot.lane.b32.xlu1 %v9668_v63, %s8777_s10 }
 0x76e   : > { %v3886_v25 = vpop.permute.xlu0 %3885 }
 0x76f   : > { %v3903_v26 = vmul.f32 %v3886_v25, %v9561_v49  ;;  %v3904_v31 = vmul.f32 %v3886_v25, %v9565_v54  ;;  %v3891_v37 = vpop.permute.xlu1 %3890 }
 0x770   : > { %v3905_v29 = vmul.f32 %v3891_v37, %v9570_v60  ;;  %v3906_v38 = vmul.f32 %v3891_v37, %v9573_v53 }
 0x771   : > { %v3911_v39 = vadd.f32 %v3903_v26, %v9717_v22  ;;  %v3912_v34 = vadd.f32 %v3904_v31, %v9720_v23 }
 0x772   : > { %v3913_v30 = vadd.f32 %v3905_v29, %v9725_v32  ;;  %v3914_v40 = vadd.f32 %v3906_v38, %v9728_v33  ;;  %v8433_v29 = vld [vmem:[#allocation5 + $0x1c0] sm:$0xff]  }
 0x773   : > { %v3901_v59 = vpop.permute.xlu0 %3900  ;;  %v3896_v45 = vpop.permute.xlu1 %3895 }
 0x774   : > { %v9738_v46 = vpack.c.bf16 %v3913_v30, %v3911_v39  ;;  %v3958_v47 = vpack.c.bf16 %v3914_v40, %v3912_v34  ;;  %v3909_v9 = vmul.f32 %v3901_v59, %v9581_v12  ;;  %v3910_v58 = vmul.f32 %v3901_v59, %v9585_v6 }
 0x775   : > { %v3907_v36 = vmul.f32 %v3896_v45, %v9577_v11  ;;  %v3908_v50 = vmul.f32 %v3896_v45, %v9579_v4 }
 0x776   : > { %v3917_v51 = vadd.f32 %v3909_v9, %v3364_v41  ;;  %v3918_v55 = vadd.f32 %v3910_v58, %v3365_v44  ;;  %4080 = vrot.lane.b32.xlu0 %v3958_v47, %s8774_s16  ;;  %4007 = vmatprep.subr.bf16.mxu1 %v3958_v47  ;;  %v8434_v41 = vld [vmem:[#allocation5 + $0x1c8] sm:$0xff]  }
 0x777   : > { %v3915_v56 = vadd.f32 %v3907_v36, %v9743_v48  ;;  %v3916_v57 = vadd.f32 %v3908_v50, %v9746_v35  ;;  %4078 = vrot.lane.b32.xlu1 %v9738_v46, %s8774_s16  ;;  %4008 = vmatpush1.bf16.msra.mxu1 %v9738_v46  ;;  %v4077_v5 = vpop.permute.xlu1 %4076  ;;  %v4083_v28 = vpop.permute.xlu0 %4082 }
 0x779   : > { %v3959_v52 = vpack.c.bf16 %v3917_v51, %v3915_v56  ;;  %v3960_v61 = vpack.c.bf16 %v3918_v55, %v3916_v57  ;;  %v8435_v51 = vld [vmem:[#allocation5 + $0x220] sm:$0xff]  }
 0x77b   : > { %4086 = vrot.lane.b32.xlu1 %v3960_v61, %s8774_s16  ;;  %4009 = vmatprep.subr.bf16.mxu1 %v3960_v61  ;;  %v4187_v16 = vpop.permute.xlu0 %4186 }
 0x77c   : > { %4084 = vrot.lane.b32.xlu0 %v3959_v52, %s8774_s16  ;;  %4010 = vmatpush1.bf16.msra.mxu1 %v3959_v52 }
 0x77f   : > { %4378 = vrot.lane.b32.xlu1 %v9531_v42, %s8778_s14  ;;  %7864 = vmatmul.mubr.msk.bf16.vlgmr.msra.gmra.mrb[36].mxu1 %vm464_vm1, %v8431_v62 }
 0x780   : > { %4684 = vrot.lane.b32.xlu0 %v9531_v42, %s8779_s17  ;;  %4049 = vmatprep.mubr.bf16.mxu1 %v9531_v42 }
 0x783   : > { %4184 = vrot.lane.b32.xlu1 %v3958_v47, %s8775_s29 }
 0x784   : > { %4690 = vrot.lane.b32.xlu0 %v9531_v42, %s8779_s17 }
 0x787   : > { %4182 = vrot.lane.b32.xlu1 %v9738_v46, %s8775_s29  ;;  %7865 = vmatmul.mubr.msk.bf16.gmra.mrb[40].mxu1 %vm464_vm1, %v8432_v1 }
 0x788   : > { %4476 = vrot.lane.b32.xlu0 %v9696_v2, %s8780_s19  ;;  %4134 = vmatprep.mubr.bf16.mxu1 %v9531_v42 }
 0x78b   : > { %4384 = vrot.lane.b32.xlu1 %v9531_v42, %s8778_s14 }
 0x78c   : > { %4190 = vrot.lane.b32.xlu0 %v3960_v61, %s8775_s29 }
 0x78f   : > { %4782 = vrot.lane.b32.xlu1 %v9696_v2, %s8781_s20  ;;  %v4193_v2 = vpop.permute.xlu1 %4192 }
 0x790   : > { %4188 = vrot.lane.b32.xlu0 %v3959_v52, %s8775_s29 }
 0x793   : > { %4291 = vrot.lane.b32.xlu1 %v9738_v46, %s8776_s27  ;;  %v4290_v10 = vpop.permute.xlu1 %4289 }
 0x794   : > { %4293 = vrot.lane.b32.xlu0 %v3958_v47, %s8776_s27 }
 0x797   : > { %4297 = vrot.lane.b32.xlu1 %v3959_v52, %s8776_s27  ;;  %v4600_v0 = vpop.permute.xlu1 %4599 }
 0x798   : > { %4597 = vrot.lane.b32.xlu0 %v3958_v47, %s8777_s10 }
 0x79b   : > { %4380 = vrot.lane.b32.xlu1 %v9738_v46, %s8778_s14  ;;  %v9817_v13 = vpop.permute.xlu1 %4295 }
 0x79c   : > { %4595 = vrot.lane.b32.xlu0 %v9738_v46, %s8777_s10 }
 0x79f   : > { %4688 = vrot.lane.b32.xlu1 %v3958_v47, %s8779_s17  ;;  %v9819_v17 = vpop.permute.xlu1 %4605 }
 0x7a0   : > { %4299 = vrot.lane.b32.xlu0 %v3960_v61, %s8776_s27 }
 0x7a3   : > { %4386 = vrot.lane.b32.xlu1 %v3959_v52, %s8778_s14 }
 0x7a4   : > { %4603 = vrot.lane.b32.xlu0 %v3960_v61, %s8777_s10 }
 0x7a7   : > { %4694 = vrot.lane.b32.xlu1 %v3960_v61, %s8779_s17 }
 0x7a8   : > { %4601 = vrot.lane.b32.xlu0 %v3959_v52, %s8777_s10 }
 0x7ab   : > { %4474 = vrot.lane.b32.xlu1 %v3958_v47, %s8780_s19 }
 0x7ac   : > { %4382 = vrot.lane.b32.xlu0 %v3958_v47, %s8778_s14 }
 0x7af   : > { %4472 = vrot.lane.b32.xlu1 %v9738_v46, %s8780_s19 }
 0x7b0   : > { %4686 = vrot.lane.b32.xlu0 %v9738_v46, %s8779_s17 }
 0x7b3   : > { %4480 = vrot.lane.b32.xlu1 %v3960_v61, %s8780_s19 }
 0x7b4   : > { %4388 = vrot.lane.b32.xlu0 %v3960_v61, %s8778_s14 }
 0x7b7   : > { %4478 = vrot.lane.b32.xlu1 %v3959_v52, %s8780_s19 }
 0x7b8   : > { %4692 = vrot.lane.b32.xlu0 %v3959_v52, %s8779_s17 }
 0x7bb   : > { %4788 = vrot.lane.b32.xlu1 %v9668_v63, %s8781_s20 }
 0x7bc   : > { %4482 = vrot.lane.b32.xlu0 %v9668_v63, %s8780_s19  ;;  %v4885_v63 = vld [vmem:[#allocation7 + $0x78] sm:$0xff] }
 0x7bf   : > { %4888 = vperm.xlu1 %8376, %v4882_v8   ;;  %v8436_v8 = vld [vmem:[#allocation5 + $0x228] sm:$0xff]  }
 0x7c0   : > { %4780 = vrot.lane.b32.xlu0 %v3958_v47, %s8781_s20 }
 0x7c3   : > { %4898 = vperm.xlu1 %8376, %v4884_v3  }
 0x7c4   : > { %4778 = vrot.lane.b32.xlu0 %v9738_v46, %s8781_s20 }
 0x7c7   : > { %5051 = vrot.lane.b32.xlu1 %v9531_v42, %s8774_s16 }
 0x7c8   : > { %4786 = vrot.lane.b32.xlu0 %v3960_v61, %s8781_s20 }
 0x7cc   : > { %4784 = vrot.lane.b32.xlu0 %v3959_v52, %s8781_s20 }
 0x7d0   : > { %4893 = vperm.xlu0 %8375, %v4883_v7  }
 0x7d4   : > { %4903 = vperm.xlu0 %8375, %v4885_v63  }
 0x7d8   : > { %5057 = vrot.lane.b32.xlu0 %v9531_v42, %s8774_s16 }
 0x7e8   : > { %v4081_v18 = vpop.permute.xlu0 %4080 }
 0x7e9   : > { %v4079_v19 = vpop.permute.xlu1 %4078 }
 0x7ea   : > { %v4089_v20 = vsel %vm552_vm2, %v4079_v19, %v4081_v18  ;;  %v4088_v21 = vsel %vm552_vm2, %v4077_v5, %v4079_v19 }
 0x7eb   : > { %4102 = vmatprep.subr.bf16.mxu1 %v4089_v20 }
 0x7ec   : > { %4103 = vmatpush1.bf16.msra.mxu1 %v4088_v21 }
 0x7ed   : > { %v4087_v25 = vpop.permute.xlu1 %4086 }
 0x7ee   : > { %v4085_v26 = vpop.permute.xlu0 %4084 }
 0x7ef   : > { %v4091_v31 = vsel %vm552_vm2, %v4085_v26, %v4087_v25  ;;  %v4090_v37 = vsel %vm552_vm2, %v4083_v28, %v4085_v26  ;;  %v8438_v26 = vld [vmem:[#allocation5 + $0x200] sm:$0xff]  }
 0x7f0   : > { %4104 = vmatprep.subr.bf16.mxu1 %v4091_v31  ;;  %v8439_v31 = vld [vmem:[#allocation5 + $0x1e8] sm:$0xff]  }
 0x7f1   : > { %4105 = vmatpush1.bf16.msra.mxu1 %v4090_v37  ;;  %v9825_v38 = vpop.permute.xlu1 %4378 }
 0x7f2   : > { %v9827_v39 = vpop.permute.xlu0 %4684 }
 0x7f4   : > { %7868 = vmatmul.mubr.msk.bf16.vlgmr.msra.gmra.mrb[36].mxu1 %vm464_vm1, %v8433_v29 }
 0x7f5   : > { %v4185_v34 = vpop.permute.xlu1 %4184  ;;  %4144 = vmatprep.mubr.bf16.mxu1 %v9531_v42 }
 0x7f6   : > { %v9831_v30 = vpop.permute.xlu0 %4690  ;;  %v4195_v40 = vsel %vm659_vm3, %v4185_v34, %v4187_v16 }
 0x7f7   : > { %4208 = vmatprep.subr.bf16.mxu1 %v4195_v40 }
 0x7f9   : > { %v4183_v44 = vpop.permute.xlu1 %4182 }
 0x7fa   : > { %v9834_v59 = vpop.permute.xlu0 %4476  ;;  %v4194_v45 = vsel %vm659_vm3, %v4183_v44, %v4185_v34 }
 0x7fb   : > { %4209 = vmatpush1.bf16.msra.mxu1 %v4194_v45  ;;  %v8440_v45 = vld [vmem:[#allocation5 + $0x208] sm:$0xff]  }
 0x7fc   : > { %7869 = vmatmul.mubr.msk.bf16.gmra.mrb[40].mxu1 %vm464_vm1, %v8434_v41 }
 0x7fd   : > { %v9838_v46 = vpop.permute.xlu1 %4384  ;;  %4240 = vmatprep.mubr.bf16.mxu1 %v9531_v42  ;;  %v9848_v42 = vld [vmem:[#allocation2] sm:$0xff] }
 0x7fe   : > { %v4191_v47 = vpop.permute.xlu0 %4190 }
 0x7ff   : > { %v4197_v9 = vsel %vm659_vm3, %v4191_v47, %v4193_v2 }
 0x800   : > { %4210 = vmatprep.subr.bf16.mxu1 %v4197_v9 }
 0x801   : > { %v9842_v58 = vpop.permute.xlu1 %4782 }
 0x802   : > { %v4189_v36 = vpop.permute.xlu0 %4188 }
 0x803   : > { %v4196_v50 = vsel %vm659_vm3, %v4189_v36, %v4191_v47 }
 0x804   : > { %4211 = vmatpush1.bf16.msra.mxu1 %v4196_v50  ;;  %v8441_v50 = vld [vmem:[#allocation5 + $0x1b0] sm:$0xff]  }
 0x805   : > { %v4292_v55 = vpop.permute.xlu1 %4291 }
 0x806   : > { %v4294_v56 = vpop.permute.xlu0 %4293  ;;  %v4301_v57 = vsel %vm766_vm4, %v4290_v10, %v4292_v55 }
 0x807   : > { %7872 = vmatmul.mubr.msk.bf16.vlgmr.msra.gmra.mrb[36].mxu1 %vm464_vm1, %v8435_v51  ;;  %v4302_v52 = vsel %vm766_vm4, %v4292_v55, %v4294_v56 }
 0x808   : > { %4315 = vmatprep.subr.bf16.mxu0 %v4302_v52  ;;  %4250 = vmatprep.mubr.bf16.mxu1 %v9848_v42 }
 0x809   : > { %4316 = vmatpush1.bf16.msra.mxu0 %v4301_v57  ;;  %v4298_v61 = vpop.permute.xlu1 %4297 }
 0x80a   : > { %v4598_v62 = vpop.permute.xlu0 %4597  ;;  %v4303_v28 = vsel %vm766_vm4, %v9817_v13, %v4298_v61 }
 0x80b   : > { %v4608_v1 = vsel %vm1075_vm5, %v4598_v62, %v4600_v0  ;;  %v8437_v0 = vld [vmem:[#allocation5 + $0x1e0] sm:$0xff]  }
 0x80c   : > { %4621 = vmatprep.subr.bf16.mxu1 %v4608_v1 }
 0x80d   : > { %v4381_v3 = vpop.permute.xlu1 %4380 }
 0x80e   : > { %v4596_v5 = vpop.permute.xlu0 %4595 }
 0x80f   : > { %v4607_v2 = vsel %vm1075_vm5, %v4596_v5, %v4598_v62  ;;  %7873 = vmatmul.mubr.msk.bf16.gmra.mrb[40].mxu1 %vm464_vm1, %v8436_v8 }
 0x810   : > { %4622 = vmatpush1.bf16.msra.mxu1 %v4607_v2  ;;  %4653 = vmatprep.mubr.bf16.mxu1 %v9848_v42 }
 0x811   : > { %v4689_v7 = vpop.permute.xlu1 %4688 }
 0x812   : > { %v4300_v63 = vpop.permute.xlu0 %4299 }
 0x813   : > { %v4304_v10 = vsel %vm766_vm4, %v4298_v61, %v4300_v63  ;;  %v8445_v63 = vld [vmem:[#allocation5 + $0x210] sm:$0xff]  }
 0x814   : > { %4317 = vmatprep.subr.bf16.mxu0 %v4304_v10 }
 0x815   : > { %4318 = vmatpush1.bf16.msra.mxu0 %v4303_v28  ;;  %v4387_v16 = vpop.permute.xlu1 %4386 }
 0x816   : > { %v4604_v18 = vpop.permute.xlu0 %4603  ;;  %v4392_v36 = vsel %vm435_vm0, %v9838_v46, %v4387_v16  ;;  %v8442_v46 = vld [vmem:[#allocation5 + $0x1d0] sm:$0xff]  }
 0x817   : > { %v4610_v19 = vsel %vm1075_vm5, %v4604_v18, %v9819_v17  ;;  %v4390_v17 = vsel %vm435_vm0, %v9825_v38, %v4381_v3 }
 0x818   : > { %4623 = vmatprep.subr.bf16.mxu1 %v4610_v19  ;;  %7876 = vmatmul.mubr.msk.bf16.vlgmr.msra.gmra.mrb[40].mxu0 %vm464_vm1, %v8437_v0  ;;  %v8448_v19 = vld [vmem:[#allocation5 + $0x238] sm:$0xff]  }
 0x819   : > { %v4695_v20 = vpop.permute.xlu1 %4694  ;;  %4357 = vmatprep.mubr.bf16.mxu0 %v9848_v42 }
 0x81a   : > { %v4602_v21 = vpop.permute.xlu0 %4601 }
 0x81b   : > { %v4609_v25 = vsel %vm1075_vm5, %v4602_v21, %v4604_v18  ;;  %v8447_v18 = vld [vmem:[#allocation5 + $0x218] sm:$0xff]  }
 0x81c   : > { %4624 = vmatpush1.bf16.msra.mxu1 %v4609_v25  ;;  %v9913_v21 = vld [vmem:[#allocation2 + $0x18] sm:$0xff] }
 0x81d   : > { %v4475_v13 = vpop.permute.xlu1 %4474  ;;  %5161 = vrot.lane.b32.xlu0 %v9913_v21, %s8775_s29 }
 0x81e   : > { %v4383_v37 = vpop.permute.xlu0 %4382 }
 0x81f   : > { %v4391_v29 = vsel %vm435_vm0, %v4381_v3, %v4383_v37  ;;  %7888 = vmatmul.mubr.msk.bf16.vlgmr.msra.gmra.mrb[44].mxu1 %vm464_vm1, %v8438_v26  ;;  %v8444_v3 = vld [vmem:[#allocation5 + $0x1d8] sm:$0xff]  }
 0x820   : > { %4404 = vmatprep.subr.bf16.mxu0 %v4391_v29  ;;  %7877 = vmatmul.mubr.msk.bf16.gmra.mrb[44].mxu0 %vm464_vm1, %v8439_v31 }
 0x821   : > { %4405 = vmatpush1.bf16.msra.mxu0 %v4390_v17  ;;  %v4473_v34 = vpop.permute.xlu1 %4472  ;;  %4663 = vmatprep.mubr.bf16.mxu1 %v9848_v42 }
 0x822   : > { %v4687_v40 = vpop.permute.xlu0 %4686  ;;  %4436 = vmatprep.mubr.bf16.mxu0 %v9848_v42  ;;  %v4484_v57 = vsel %vm951_vm7, %v4473_v34, %v4475_v13 }
 0x823   : > { %v4697_v41 = vsel %vm1165_vm6, %v4687_v40, %v4689_v7  ;;  %v4696_v44 = vsel %vm1165_vm6, %v9827_v39, %v4687_v40  ;;  %v4485_v39 = vsel %vm951_vm7, %v4475_v13, %v9834_v59 }
 0x824   : > { %4710 = vmatprep.subr.bf16.mxu1 %v4697_v41 }
 0x825   : > { %4711 = vmatpush1.bf16.msra.mxu1 %v4696_v44  ;;  %v4481_v9 = vpop.permute.xlu1 %4480 }
 0x826   : > { %v4389_v47 = vpop.permute.xlu0 %4388 }
 0x827   : > { %v4393_v38 = vsel %vm435_vm0, %v4387_v16, %v4389_v47  ;;  %7889 = vmatmul.mubr.msk.bf16.gmra.mrb[48].mxu1 %vm464_vm1, %v8440_v45  ;;  %v8446_v16 = vld [vmem:[#allocation5 + $0x230] sm:$0xff]  }
 0x828   : > { %4406 = vmatprep.subr.bf16.mxu0 %v4393_v38  ;;  %4742 = vmatprep.mubr.bf16.mxu1 %v9848_v42 }
 0x829   : > { %4407 = vmatpush1.bf16.msra.mxu0 %v4392_v36  ;;  %v4479_v52 = vpop.permute.xlu1 %4478 }
 0x82a   : > { %v4693_v51 = vpop.permute.xlu0 %4692  ;;  %4498 = vmatprep.subr.bf16.mxu0 %v4485_v39  ;;  %v4486_v62 = vsel %vm951_vm7, %v4479_v52, %v4481_v9 }
 0x82b   : > { %v4699_v55 = vsel %vm1165_vm6, %v4693_v51, %v4695_v20  ;;  %v4698_v56 = vsel %vm1165_vm6, %v9831_v30, %v4693_v51  ;;  %v8443_v30 = vld [vmem:[#allocation5 + $0x1b8] sm:$0xff]  }
 0x82c   : > { %7880 = vmatmul.mubr.msk.bf16.vlgmr.msra.gmra.mrb[40].mxu0 %vm464_vm1, %v8441_v50  ;;  %4712 = vmatprep.subr.bf16.mxu1 %v4699_v55  ;;  %v9907_v20 = vld [vmem:[#allocation2 + $0x38] sm:$0xff] }
 0x82d   : > { %4499 = vmatpush1.bf16.msra.mxu0 %v4484_v57  ;;  %4713 = vmatpush1.bf16.msra.mxu1 %v4698_v56  ;;  %v4789_v7 = vpop.permute.xlu1 %4788 }
 0x82e   : > { %v4483_v61 = vpop.permute.xlu0 %4482  ;;  %4446 = vmatprep.mubr.bf16.mxu0 %v9848_v42  ;;  %5167 = vrot.lane.b32.xlu1 %v9907_v20, %s8775_s29 }
 0x82f   : > { %v4487_v59 = vsel %vm951_vm7, %v4481_v9, %v4483_v61 }
 0x830   : > { %4500 = vmatprep.subr.bf16.mxu0 %v4487_v59  ;;  %7892 = vmatmul.mubr.msk.bf16.vlgmr.msra.gmra.mrb[44].mxu1 %vm464_vm1, %v8442_v46 }
 0x831   : > { %4501 = vmatpush1.bf16.msra.mxu0 %v4486_v62  ;;  %4752 = vmatprep.mubr.bf16.mxu1 %v9848_v42 }
 0x832   : > { %v4781_v1 = vpop.permute.xlu0 %4780  ;;  %5264 = vrot.lane.b32.xlu1 %v9848_v42, %s8776_s27 }
 0x833   : > { %v4791_v8 = vsel %vm1260_vm8, %v4781_v1, %v9842_v58 }
 0x834   : > { %7881 = vmatmul.mubr.msk.bf16.gmra.mrb[44].mxu0 %vm464_vm1, %v8443_v30  ;;  %4804 = vmatprep.subr.bf16.mxu1 %v4791_v8 }
 0x835   : > { %4530 = vmatprep.mubr.bf16.mxu0 %v9848_v42 }
 0x836   : > { %v4779_v5 = vpop.permute.xlu0 %4778 }
 0x837   : > { %v4790_v2 = vsel %vm1260_vm8, %v4779_v5, %v4781_v1 }
 0x838   : > { %4805 = vmatpush1.bf16.msra.mxu1 %v4790_v2 }
 0x839   : > { %7893 = vmatmul.mubr.msk.bf16.gmra.mrb[48].mxu1 %vm464_vm1, %v8444_v3 }
 0x83a   : > { %v4787_v10 = vpop.permute.xlu0 %4786  ;;  %4836 = vmatprep.mubr.bf16.mxu1 %v9848_v42 }
 0x83b   : > { %v4793_v28 = vsel %vm1260_vm8, %v4787_v10, %v4789_v7 }
 0x83c   : > { %7884 = vmatmul.mubr.msk.bf16.vlgmr.msra.gmra.mrb[40].mxu0 %vm464_vm1, %v8445_v63  ;;  %4806 = vmatprep.subr.bf16.mxu1 %v4793_v28 }
 0x83d   : > { %4540 = vmatprep.mubr.bf16.mxu0 %v9848_v42 }
 0x83e   : > { %v4785_v58 = vpop.permute.xlu0 %4784  ;;  %v4889_v7 = vpop.permute.xlu1 %4888 }
 0x83f   : > { %v4792_v0 = vsel %vm1260_vm8, %v4785_v58, %v4787_v10 }
 0x840   : > { %4807 = vmatpush1.bf16.msra.mxu1 %v4792_v0 }
 0x843   : > { %7896 = vmatmul.mubr.msk.bf16.vlgmr.msra.gmra.mrb[44].mxu1 %vm464_vm1, %v8446_v16 }
 0x844   : > { %7885 = vmatmul.mubr.msk.bf16.gmra.mrb[44].mxu0 %vm464_vm1, %v8447_v18  ;;  %4846 = vmatprep.mubr.bf16.mxu1 %v9848_v42 }
 0x845   : > { %5014 = vmatprep.mubr.bf16.mxu0 %v9848_v42 }
 0x84b   : > { %7897 = vmatmul.mubr.msk.bf16.gmra.mrb[48].mxu1 %vm464_vm1, %v8448_v19 }
 0x84c   : > { %5322 = vmatprep.mubr.bf16.mxu1 %v9848_v42 }
 0x8da   : > { %v4242_v25 = vpop.f32.mrb[36].mxu1 }
 0x8db   : > { %v4244_v26 = vpop.f32.mrb[37].mxu1 }
 0x8dc   : > { %v4246_v31 = vpop.f32.mrb[38].mxu1 }
 0x8dd   : > { %v4248_v13 = vpop.f32.mrb[39].mxu1 }
 0x8e2   : > { %v4252_v37 = vpop.f32.mrb[40].mxu1 }
 0x8e3   : > { %v4254_v29 = vpop.f32.mrb[41].mxu1 }
 0x8e4   : > { %v4256_v17 = vpop.f32.mrb[42].mxu1 }
 0x8e5   : > { %v4258_v34 = vpop.f32.mrb[43].mxu1 }
 0x90f   : > { %v4532_v40 = vpop.f32.mrb[40].mxu0 }
 0x910   : > { %v4559_v41 = vmul.f32 %v9191_v14, %v4532_v40  ;;  %v4534_v44 = vpop.f32.mrb[41].mxu0 }
 0x911   : > { %v4560_v45 = vmul.f32 %v9193_v15, %v4534_v44  ;;  %v4536_v47 = vpop.f32.mrb[42].mxu0 }
 0x912   : > { %v4567_v9 = vadd.f32 %v4559_v41, %v4242_v25  ;;  %v4561_v38 = vmul.f32 %v9191_v14, %v4536_v47  ;;  %v4538_v36 = vpop.f32.mrb[43].mxu0 }
 0x913   : > { %v4568_v50 = vadd.f32 %v4560_v45, %v4244_v26  ;;  %v4562_v39 = vmul.f32 %v9193_v15, %v4538_v36  ;;  %v4894_v26 = vpop.permute.xlu0 %4893 }
 0x914   : > { %v4569_v51 = vadd.f32 %v4561_v38, %v4246_v31 }
 0x915   : > { %v4570_v55 = vadd.f32 %v4562_v39, %v4248_v13 }
 0x916   : > { %v4838_v56 = vpop.f32.mrb[44].mxu1 }
 0x917   : > { %v4865_v57 = vmul.f32 %v9198_v24, %v4838_v56  ;;  %v4542_v46 = vpop.f32.mrb[44].mxu0  ;;  %v4840_v52 = vpop.f32.mrb[45].mxu1 }
 0x918   : > { %v4563_v61 = vmul.f32 %v9191_v14, %v4542_v46  ;;  %v4866_v59 = vmul.f32 %v9201_v27, %v4840_v52  ;;  %v4544_v62 = vpop.f32.mrb[45].mxu0  ;;  %v4842_v30 = vpop.f32.mrb[46].mxu1 }
 0x919   : > { %v4873_v1 = vadd.f32 %v4865_v57, %v4567_v9  ;;  %v4564_v8 = vmul.f32 %v9193_v15, %v4544_v62  ;;  %v4867_v3 = vmul.f32 %v9198_v24, %v4842_v30  ;;  %v4546_v5 = vpop.f32.mrb[46].mxu0  ;;  %v4844_v2 = vpop.f32.mrb[47].mxu1 }
 0x91a   : > { %v4571_v63 = vadd.f32 %v4563_v61, %v4252_v37  ;;  %v4874_v10 = vadd.f32 %v4866_v59, %v4568_v50  ;;  %v4565_v28 = vmul.f32 %v9191_v14, %v4546_v5  ;;  %v4868_v58 = vmul.f32 %v9201_v27, %v4844_v2  ;;  %v4548_v0 = vpop.f32.mrb[47].mxu0  ;;  %v4899_v52 = vpop.permute.xlu1 %4898 }
 0x91b   : > { %v4906_v16 = vadd.f32 %v4889_v7, %v4873_v1  ;;  %v4572_v18 = vadd.f32 %v4564_v8, %v4254_v29  ;;  %v4875_v19 = vadd.f32 %v4867_v3, %v4569_v51  ;;  %v4566_v25 = vmul.f32 %v9193_v15, %v4548_v0  ;;  %v4904_v5 = vpop.permute.xlu0 %4903 }
 0x91c   : > { %v4907_v31 = vadd.f32 %v4889_v7, %v4874_v10  ;;  %v4573_v13 = vadd.f32 %v4565_v28, %v4256_v17  ;;  %v4876_v40 = vadd.f32 %v4868_v58, %v4570_v55 }
 0x91d   : > { %vm4914_vm12 = vcmp.ge.f32.partialorder %v4906_v16, 0.0  ;;  %v4922_v41 = vmul.f32 0.05, %v4906_v16  ;;  %v4908_v44 = vadd.f32 %v4894_v26, %v4875_v19  ;;  %v4574_v45 = vadd.f32 %v4566_v25, %v4258_v34 }
 0x91e   : > { %vm4915_vm13 = vcmp.ge.f32.partialorder %v4907_v31, 0.0  ;;  %v4923_v37 = vmul.f32 0.05, %v4907_v31  ;;  %v4909_v47 = vadd.f32 %v4894_v26, %v4876_v40  ;;  %v4848_v9 = vpop.f32.mrb[48].mxu1  ;;  %v8449_v40 = vld [vmem:[#allocation5 + $0x280] sm:$0xff]  }
 0x91f   : > { %vm4916_vm14 = vcmp.ge.f32.partialorder %v4908_v44, 0.0  ;;  %v4924_v38 = vmul.f32 0.05, %v4908_v44  ;;  %v4869_v36 = vmul.f32 %v9198_v24, %v4848_v9  ;;  %v4850_v29 = vpop.f32.mrb[49].mxu1  ;;  %v4930_v50 = vsel %vm4914_vm12, %v4906_v16, %v4922_v41  ;;  %v8450_v41 = vld [vmem:[#allocation5 + $0x288] sm:$0xff]  }
 0x920   : > { %vm4917_vm15 = vcmp.ge.f32.partialorder %v4909_v47, 0.0  ;;  %v4925_v39 = vmul.f32 0.05, %v4909_v47  ;;  %v4870_v51 = vmul.f32 %v9201_v27, %v4850_v29  ;;  %v4852_v17 = vpop.f32.mrb[50].mxu1  ;;  %v4931_v55 = vsel %vm4915_vm13, %v4907_v31, %v4923_v37  ;;  %v5058_v37 = vpop.permute.xlu0 %5057 }
 0x921   : > { %v4932_v56 = vsel %vm4916_vm14, %v4908_v44, %v4924_v38  ;;  %v4877_v57 = vadd.f32 %v4869_v36, %v4571_v63  ;;  %v4871_v34 = vmul.f32 %v9198_v24, %v4852_v17  ;;  %v4854_v46 = vpop.f32.mrb[51].mxu1  ;;  %v10021_v44 = vld [vmem:[#allocation3 + $0x18] sm:$0xff]  ;;  %v3626_v17 = vadd.f32 %v9728_v33, %v9725_v32 }
 0x922   : > { %v9932_v61 = vpack.c.bf16 %v4932_v56, %v4930_v50  ;;  %v4933_v59 = vsel %vm4917_vm15, %v4909_v47, %v4925_v39  ;;  %v4878_v62 = vadd.f32 %v4870_v51, %v4572_v18  ;;  %v4872_v30 = vmul.f32 %v9201_v27, %v4854_v46 }
 0x923   : > { %v9935_v1 = vpack.c.bf16 %v4933_v59, %v4931_v55  ;;  %v4910_v8 = vadd.f32 %v4899_v52, %v4877_v57  ;;  %v4879_v3 = vadd.f32 %v4871_v34, %v4573_v13 }
 0x924   : > { %v4911_v2 = vadd.f32 %v4899_v52, %v4878_v62  ;;  %v4880_v7 = vadd.f32 %v4872_v30, %v4574_v45  ;;  %5053 = vrot.lane.b32.xlu1 %v9932_v61, %s8774_s16  ;;  %v5162_v9 = vpop.permute.xlu0 %5161 }
 0x925   : > { %v4926_v63 = vmul.f32 0.05, %v4910_v8  ;;  %v4912_v10 = vadd.f32 %v4904_v5, %v4879_v3  ;;  %5055 = vrot.lane.b32.xlu0 %v9935_v1, %s8774_s16  ;;  %4982 = vmatprep.subr.bf16.mxu0 %v9935_v1  ;;  %vm4918_vm10 = vcmp.ge.f32.partialorder %v4910_v8, 0.0 }
 0x926   : > { %v4927_v28 = vmul.f32 0.05, %v4911_v2  ;;  %v4913_v58 = vadd.f32 %v4904_v5, %v4880_v7  ;;  %4983 = vmatpush1.bf16.msra.mxu0 %v9932_v61  ;;  %vm4919_vm11 = vcmp.ge.f32.partialorder %v4911_v2, 0.0  ;;  %v3623_v5 = vadd.f32 %v9720_v23, %v9717_v22 }
 0x927   : > { %vm4920_vm12 = vcmp.ge.f32.partialorder %v4912_v10, 0.0  ;;  %v4928_v0 = vmul.f32 0.05, %v4912_v10  ;;  %v4934_v18 = vsel %vm4918_vm10, %v4910_v8, %v4926_v63  ;;  %v3629_v63 = vadd.f32 %v9746_v35, %v9743_v48 }
 0x928   : > { %vm4921_vm13 = vcmp.ge.f32.partialorder %v4913_v58, 0.0  ;;  %v4929_v16 = vmul.f32 0.05, %v4913_v58  ;;  %5157 = vrot.lane.b32.xlu1 %v9932_v61, %s8775_s29  ;;  %v4935_v25 = vsel %vm4919_vm11, %v4911_v2, %v4927_v28 }
 0x929   : > { %v4936_v19 = vsel %vm4920_vm12, %v4912_v10, %v4928_v0  ;;  %5268 = vrot.lane.b32.xlu0 %v9935_v1, %s8776_s27  ;;  %v8452_v10 = vld [vmem:[#allocation5 + $0x258] sm:$0xff]   ;;  %v5858_v0 = vld [vmem:[#allocation7 + $0x88] sm:$0xff] }
 0x92a   : > { %v4942_v26 = vpack.c.bf16 %v4936_v19, %v4934_v18  ;;  %v4937_v31 = vsel %vm4921_vm13, %v4913_v58, %v4929_v16  ;;  %v5860_v16 = vld [vmem:[#allocation7 + $0x98] sm:$0xff] }
 0x92b   : > { %v4943_v13 = vpack.c.bf16 %v4937_v31, %v4935_v25  ;;  %v8453_v25 = vld [vmem:[#allocation5 + $0x2b0] sm:$0xff]  }
 0x92c   : > { %5266 = vrot.lane.b32.xlu1 %v9932_v61, %s8776_s27 }
 0x92d   : > { %5572 = vrot.lane.b32.xlu0 %v9935_v1, %s8777_s10  ;;  %4984 = vmatprep.subr.bf16.mxu0 %v4943_v13 }
 0x92e   : > { %4985 = vmatpush1.bf16.msra.mxu0 %v4942_v26 }
 0x930   : > { %5159 = vrot.lane.b32.xlu1 %v9935_v1, %s8775_s29 }
 0x931   : > { %5059 = vrot.lane.b32.xlu0 %v4942_v26, %s8774_s16  ;;  %7900 = vmatmul.mubr.msk.bf16.vlgmr.msra.gmra.mrb[48].mxu0 %vm464_vm1, %v8449_v40 }
 0x932   : > { %5024 = vmatprep.mubr.bf16.mxu0 %v9848_v42 }
 0x934   : > { %5061 = vrot.lane.b32.xlu1 %v4943_v13, %s8774_s16 }
 0x935   : > { %5163 = vrot.lane.b32.xlu0 %v4942_v26, %s8775_s29 }
 0x938   : > { %5574 = vrot.lane.b32.xlu1 %v9913_v21, %s8777_s10 }
 0x939   : > { %5570 = vrot.lane.b32.xlu0 %v9932_v61, %s8777_s10  ;;  %7901 = vmatmul.mubr.msk.bf16.gmra.mrb[52].mxu0 %vm464_vm1, %v8450_v41  ;;  %v8454_v41 = vld [vmem:[#allocation5 + $0x2b8] sm:$0xff]  }
 0x93a   : > { %5109 = vmatprep.mubr.bf16.mxu0 %v9848_v42 }
 0x93c   : > { %5272 = vrot.lane.b32.xlu1 %v4942_v26, %s8776_s27 }
 0x93d   : > { %5576 = vrot.lane.b32.xlu0 %v4942_v26, %s8777_s10 }
 0x940   : > { %5270 = vrot.lane.b32.xlu1 %v9848_v42, %s8776_s27 }
 0x941   : > { %5357 = vrot.lane.b32.xlu0 %v9935_v1, %s8778_s14 }
 0x944   : > { %5580 = vrot.lane.b32.xlu1 %v9907_v20, %s8777_s10 }
 0x945   : > { %5165 = vrot.lane.b32.xlu0 %v4943_v13, %s8775_s29 }
 0x948   : > { %5355 = vrot.lane.b32.xlu1 %v9932_v61, %s8778_s14 }
 0x949   : > { %5661 = vrot.lane.b32.xlu0 %v9932_v61, %s8779_s17 }
 0x94c   : > { %5353 = vrot.lane.b32.xlu1 %v9848_v42, %s8778_s14 }
 0x94d   : > { %5659 = vrot.lane.b32.xlu0 %v9848_v42, %s8779_s17 }
 0x950   : > { %5663 = vrot.lane.b32.xlu1 %v9935_v1, %s8779_s17 }
 0x951   : > { %5274 = vrot.lane.b32.xlu0 %v4943_v13, %s8776_s27 }
 0x954   : > { %5361 = vrot.lane.b32.xlu1 %v4942_v26, %s8778_s14 }
 0x955   : > { %5578 = vrot.lane.b32.xlu0 %v4943_v13, %s8777_s10 }
 0x958   : > { %5359 = vrot.lane.b32.xlu1 %v9848_v42, %s8778_s14 }
 0x959   : > { %5667 = vrot.lane.b32.xlu0 %v4942_v26, %s8779_s17 }
 0x95c   : > { %5449 = vrot.lane.b32.xlu1 %v9935_v1, %s8780_s19 }
 0x95d   : > { %5665 = vrot.lane.b32.xlu0 %v9848_v42, %s8779_s17 }
 0x960   : > { %5447 = vrot.lane.b32.xlu1 %v9932_v61, %s8780_s19 }
 0x961   : > { %5451 = vrot.lane.b32.xlu0 %v9913_v21, %s8780_s19 }
 0x964   : > { %5669 = vrot.lane.b32.xlu1 %v4943_v13, %s8779_s17 }
 0x965   : > { %5363 = vrot.lane.b32.xlu0 %v4943_v13, %s8778_s14 }
 0x968   : > { %5757 = vrot.lane.b32.xlu1 %v9913_v21, %s8781_s20  ;;  %v10015_v21 = vld [vmem:[#allocation3 + $0x38] sm:$0xff] }
 0x969   : > { %5755 = vrot.lane.b32.xlu0 %v9935_v1, %s8781_s20  ;;  %v8451_v1 = vld [vmem:[#allocation5 + $0x250] sm:$0xff]  }
 0x96c   : > { %5453 = vrot.lane.b32.xlu1 %v4942_v26, %s8780_s19 }
 0x96d   : > { %5753 = vrot.lane.b32.xlu0 %v9932_v61, %s8781_s20 }
 0x970   : > { %5455 = vrot.lane.b32.xlu1 %v4943_v13, %s8780_s19 }
 0x971   : > { %5457 = vrot.lane.b32.xlu0 %v9907_v20, %s8780_s19 }
 0x974   : > { %5763 = vrot.lane.b32.xlu1 %v9907_v20, %s8781_s20  ;;  %v5052_v20 = vpop.permute.xlu1 %5051 }
 0x975   : > { %5761 = vrot.lane.b32.xlu0 %v4943_v13, %s8781_s20 }
 0x978   : > { %6026 = vrot.lane.b32.xlu1 %v9848_v42, %s8774_s16  ;;  %v5168_v45 = vpop.permute.xlu1 %5167 }
 0x979   : > { %5759 = vrot.lane.b32.xlu0 %v4942_v26, %s8781_s20 }
 0x97c   : > { %6142 = vrot.lane.b32.xlu1 %v10015_v21, %s8775_s29  ;;  %v5265_v47 = vpop.permute.xlu1 %5264 }
 0x97d   : > { %6032 = vrot.lane.b32.xlu0 %v9848_v42, %s8774_s16 }
 0x980   : > { %6239 = vrot.lane.b32.xlu1 %v9848_v42, %s8776_s27 }
 0x981   : > { %6136 = vrot.lane.b32.xlu0 %v10021_v44, %s8775_s29 }
 0x984   : > { %6549 = vrot.lane.b32.xlu1 %v10021_v44, %s8777_s10 }
 0x988   : > { %6245 = vrot.lane.b32.xlu1 %v9848_v42, %s8776_s27 }
 0x98c   : > { %6555 = vrot.lane.b32.xlu1 %v10015_v21, %s8777_s10 }
 0x996   : > { %v5054_v38 = vpop.permute.xlu1 %5053 }
 0x997   : > { %v5056_v36 = vpop.permute.xlu0 %5055  ;;  %v5063_v50 = vsel %vm552_vm2, %v5052_v20, %v5054_v38 }
 0x998   : > { %v5064_v29 = vsel %vm552_vm2, %v5054_v38, %v5056_v36  ;;  %v5859_v36 = vld [vmem:[#allocation7 + $0x90] sm:$0xff] }
 0x999   : > { %5077 = vmatprep.subr.bf16.mxu0 %v5064_v29  ;;  %v8455_v29 = vld [vmem:[#allocation5 + $0x270] sm:$0xff]  }
 0x99a   : > { %5078 = vmatpush1.bf16.msra.mxu0 %v5063_v50  ;;  %v5158_v39 = vpop.permute.xlu1 %5157 }
 0x99b   : > { %v5269_v51 = vpop.permute.xlu0 %5268 }
 0x99e   : > { %v5267_v55 = vpop.permute.xlu1 %5266 }
 0x99f   : > { %v5573_v56 = vpop.permute.xlu0 %5572  ;;  %v5277_v57 = vsel %vm766_vm4, %v5267_v55, %v5269_v51  ;;  %v5276_v34 = vsel %vm766_vm4, %v5265_v47, %v5267_v55  ;;  %v8456_v55 = vld [vmem:[#allocation5 + $0x290] sm:$0xff]  }
 0x9a0   : > { %3627 = vadd.xlane.f32.xlu0 %v3626_v17  ;;  %5290 = vmatprep.subr.bf16.mxu1 %v5277_v57 }
 0x9a1   : > { %5291 = vmatpush1.bf16.msra.mxu1 %v5276_v34 }
 0x9a2   : > { %v5160_v46 = vpop.permute.xlu1 %5159 }
 0x9a3   : > { %v5060_v52 = vpop.permute.xlu0 %5059  ;;  %v5170_v32 = vsel %vm659_vm3, %v5160_v46, %v5162_v9  ;;  %v5169_v3 = vsel %vm659_vm3, %v5158_v39, %v5160_v46 }
 0x9a4   : > { %v5065_v30 = vsel %vm552_vm2, %v5058_v37, %v5060_v52 }
 0x9a6   : > { %v5062_v61 = vpop.permute.xlu1 %5061 }
 0x9a7   : > { %v5164_v59 = vpop.permute.xlu0 %5163  ;;  %v5066_v62 = vsel %vm552_vm2, %v5060_v52, %v5062_v61 }
 0x9a8   : > { %5079 = vmatprep.subr.bf16.mxu0 %v5066_v62 }
 0x9a9   : > { %5080 = vmatpush1.bf16.msra.mxu0 %v5065_v30  ;;  %v8458_v30 = vld [vmem:[#allocation5 + $0x298] sm:$0xff]  }
 0x9aa   : > { %5183 = vmatprep.subr.bf16.mxu0 %v5170_v32  ;;  %v5575_v33 = vpop.permute.xlu1 %5574 }
 0x9ab   : > { %v5571_v8 = vpop.permute.xlu0 %5570  ;;  %v5583_v35 = vsel %vm1075_vm5, %v5573_v56, %v5575_v33 }
 0x9ac   : > { %7904 = vmatmul.mubr.msk.bf16.vlgmr.msra.gmra.mrb[48].mxu0 %vm464_vm1, %v8451_v1  ;;  %v5582_v31 = vsel %vm1075_vm5, %v5571_v8, %v5573_v56 }
 0x9ad   : > { %5184 = vmatpush1.bf16.msra.mxu0 %v5169_v3  ;;  %5119 = vmatprep.mubr.bf16.mxu0 %v9848_v42 }
 0x9ae   : > { %v5273_v2 = vpop.permute.xlu1 %5272 }
 0x9af   : > { %v5577_v7 = vpop.permute.xlu0 %5576 }
 0x9b0   : > { %3624 = vadd.xlane.f32.xlu1 %v3623_v5 }
 0x9b2   : > { %v5271_v28 = vpop.permute.xlu1 %5270 }
 0x9b3   : > { %v5358_v58 = vpop.permute.xlu0 %5357  ;;  %v5278_v9 = vsel %vm766_vm4, %v5271_v28, %v5273_v2 }
 0x9b4   : > { %3630 = vadd.xlane.f32.xlu1 %v3629_v63  ;;  %7905 = vmatmul.mubr.msk.bf16.gmra.mrb[52].mxu0 %vm464_vm1, %v8452_v10  ;;  %v8459_v63 = vld [vmem:[#allocation5 + $0x240] sm:$0xff]  }
 0x9b5   : > { %5215 = vmatprep.mubr.bf16.mxu0 %v9848_v42 }
 0x9b6   : > { %5868 = vperm.xlu0 %8375, %v5858_v0   ;;  %v5581_v22 = vpop.permute.xlu1 %5580 }
 0x9b7   : > { %v5166_v23 = vpop.permute.xlu0 %5165 }
 0x9b8   : > { %v5172_v18 = vsel %vm659_vm3, %v5166_v23, %v5168_v45  ;;  %v5171_v19 = vsel %vm659_vm3, %v5164_v59, %v5166_v23  ;;  %v5857_v45 = vld [vmem:[#allocation7 + $0x80] sm:$0xff]  ;;  %v8457_v59 = vld [vmem:[#allocation5 + $0x278] sm:$0xff]   ;;  %v10086_v23 = vld [vmem:[%s8976_s28 + $0x30] sm:$0xff] }
 0x9b9   : > { %5185 = vmatprep.subr.bf16.mxu0 %v5172_v18 }
 0x9ba   : > { %5878 = vperm.xlu0 %8375, %v5860_v16   ;;  %5186 = vmatpush1.bf16.msra.mxu0 %v5171_v19  ;;  %v5356_v48 = vpop.permute.xlu1 %5355  ;;  %v10089_v16 = vld [vmem:[%s8976_s28 + $0x38] sm:$0xff]  ;;  %v8652_v19 = vld [vmem:[%s8976_s28 + $0x10] sm:$0xff] }
 0x9bb   : > { %v5662_v26 = vpop.permute.xlu0 %5661  ;;  %5596 = vmatprep.subr.bf16.mxu0 %v5583_v35  ;;  %v5366_v39 = vsel %vm435_vm0, %v5356_v48, %v5358_v58  ;;  %v8460_v58 = vld [vmem:[#allocation5 + $0x260] sm:$0xff]   ;;  %v3632_v18 = vadd.f32 %v10089_v16, %v10086_v23 }
 0x9bd   : > { %7908 = vmatmul.mubr.msk.bf16.vlgmr.msra.gmra.mrb[48].mxu0 %vm464_vm1, %v8453_v25  ;;  %v3637_v25 = vmul.f32 %v8652_v19, %v8652_v19 }
 0x9be   : > { %5597 = vmatpush1.bf16.msra.mxu0 %v5582_v31  ;;  %v5354_v13 = vpop.permute.xlu1 %5353  ;;  %5225 = vmatprep.mubr.bf16.mxu0 %v9848_v42 }
 0x9bf   : > { %v5660_v40 = vpop.permute.xlu0 %5659  ;;  %6328 = vrot.lane.b32.xlu0 %v9848_v42, %s8778_s14  ;;  %v5365_v56 = vsel %vm435_vm0, %v5354_v13, %v5356_v48  ;;  %v8653_v48 = vld [vmem:[%s8976_s28 + $0x18] sm:$0xff] }
 0x9c0   : > { %v5671_v52 = vsel %vm1165_vm6, %v5660_v40, %v5662_v26  ;;  %v3638_v35 = vmul.f32 %v8653_v48, %v8653_v48 }
 0x9c2   : > { %v5664_v20 = vpop.permute.xlu1 %5663 }
 0x9c3   : > { %v5275_v37 = vpop.permute.xlu0 %5274  ;;  %v5672_v34 = vsel %vm1165_vm6, %v5662_v26, %v5664_v20  ;;  %v8461_v20 = vld [vmem:[#allocation5 + $0x248] sm:$0xff]  }
 0x9c4   : > { %v5279_v47 = vsel %vm766_vm4, %v5273_v2, %v5275_v37  ;;  %v8462_v37 = vld [vmem:[#allocation5 + $0x268] sm:$0xff]  }
 0x9c5   : > { %5863 = vperm.xlu1 %8376, %v5857_v45   ;;  %7909 = vmatmul.mubr.msk.bf16.gmra.mrb[52].mxu0 %vm464_vm1, %v8454_v41  ;;  %v3646_v41 = vadd.f32 %v3638_v35, %v3637_v25 }
 0x9c6   : > { %5292 = vmatprep.subr.bf16.mxu1 %v5279_v47  ;;  %v5362_v38 = vpop.permute.xlu1 %5361  ;;  %5628 = vmatprep.mubr.bf16.mxu0 %v9848_v42 }
 0x9c7   : > { %5293 = vmatpush1.bf16.msra.mxu1 %v5278_v9  ;;  %v5579_v50 = vpop.permute.xlu0 %5578 }
 0x9c8   : > { %5379 = vmatprep.subr.bf16.mxu1 %v5366_v39  ;;  %v5585_v51 = vsel %vm1075_vm5, %v5579_v50, %v5581_v22  ;;  %v5584_v17 = vsel %vm1075_vm5, %v5577_v7, %v5579_v50  ;;  %v8463_v39 = vld [vmem:[#allocation5 + $0x2a0] sm:$0xff]  }
 0x9c9   : > { %5873 = vperm.xlu1 %8376, %v5859_v36   ;;  %5598 = vmatprep.subr.bf16.mxu0 %v5585_v51  ;;  %v8654_v51 = vld [vmem:[%s8976_s28] sm:$0xff] }
 0x9ca   : > { %7912 = vmatmul.mubr.msk.bf16.vlgmr.msra.gmra.mrb[52].mxu1 %vm464_vm1, %v8455_v29  ;;  %5599 = vmatpush1.bf16.msra.mxu0 %v5584_v17  ;;  %v5360_v57 = vpop.permute.xlu1 %5359  ;;  %v3635_v17 = vmul.f32 %v8654_v51, %v8654_v51 }
 0x9cb   : > { %5380 = vmatpush1.bf16.msra.mxu1 %v5365_v56  ;;  %v5668_v46 = vpop.permute.xlu0 %5667  ;;  %5685 = vmatprep.subr.bf16.mxu0 %v5672_v34  ;;  %v5367_v7 = vsel %vm435_vm0, %v5360_v57, %v5362_v38 }
 0x9cc   : > { %5332 = vmatprep.mubr.bf16.mxu1 %v9848_v42 }
 0x9cd   : > { %7924 = vmatmul.mubr.msk.bf16.vlgmr.msra.gmra.mrb[56].mxu0 %vm464_vm1, %v8456_v55  ;;  %6634 = vrot.lane.b32.xlu1 %v9848_v42, %s8779_s17  ;;  %v8655_v55 = vld [vmem:[%s8976_s28 + $0x8] sm:$0xff] }
 0x9ce   : > { %5686 = vmatpush1.bf16.msra.mxu0 %v5671_v52  ;;  %v5450_v61 = vpop.permute.xlu1 %5449  ;;  %5638 = vmatprep.mubr.bf16.mxu0 %v9848_v42  ;;  %v3636_v56 = vmul.f32 %v8655_v55, %v8655_v55 }
 0x9cf   : > { %v5666_v62 = vpop.permute.xlu0 %5665 }
 0x9d0   : > { %v5673_v5 = vsel %vm1165_vm6, %v5666_v62, %v5668_v46  ;;  %v3643_v52 = vadd.f32 %v3636_v56, %v3635_v17 }
 0x9d2   : > { %v5448_v1 = vpop.permute.xlu1 %5447  ;;  %7913 = vmatmul.mubr.msk.bf16.gmra.mrb[56].mxu1 %vm464_vm1, %v8457_v59  ;;  %v8466_v59 = vld [vmem:[#allocation5 + $0x2c8] sm:$0xff]  }
 0x9d3   : > { %v5452_v32 = vpop.permute.xlu0 %5451  ;;  %5411 = vmatprep.mubr.bf16.mxu1 %v9848_v42  ;;  %v5459_v26 = vsel %vm951_vm7, %v5448_v1, %v5450_v61 }
 0x9d4   : > { %v5460_v28 = vsel %vm951_vm7, %v5450_v61, %v5452_v32  ;;  %v8465_v61 = vld [vmem:[#allocation5 + $0x2a8] sm:$0xff]  }
 0x9d5   : > { %7925 = vmatmul.mubr.msk.bf16.gmra.mrb[60].mxu0 %vm464_vm1, %v8458_v30 }
 0x9d6   : > { %v5670_v33 = vpop.permute.xlu1 %5669  ;;  %5717 = vmatprep.mubr.bf16.mxu0 %v9848_v42 }
 0x9d7   : > { %v5364_v8 = vpop.permute.xlu0 %5363  ;;  %v5674_v3 = vsel %vm1165_vm6, %v5668_v46, %v5670_v33  ;;  %v8464_v46 = vld [vmem:[#allocation5 + $0x2c0] sm:$0xff]  }
 0x9d8   : > { %5687 = vmatprep.subr.bf16.mxu0 %v5674_v3  ;;  %v5368_v2 = vsel %vm435_vm0, %v5362_v38, %v5364_v8 }
 0x9d9   : > { %5381 = vmatprep.subr.bf16.mxu1 %v5368_v2  ;;  %5688 = vmatpush1.bf16.msra.mxu0 %v5673_v5 }
 0x9da   : > { %5382 = vmatpush1.bf16.msra.mxu1 %v5367_v7  ;;  %v5758_v10 = vpop.permute.xlu1 %5757 }
 0x9db   : > { %v5756_v0 = vpop.permute.xlu0 %5755  ;;  %5473 = vmatprep.subr.bf16.mxu1 %v5460_v28 }
 0x9dc   : > { %v5766_v22 = vsel %vm1260_vm8, %v5756_v0, %v5758_v10 }
 0x9dd   : > { %7916 = vmatmul.mubr.msk.bf16.vlgmr.msra.gmra.mrb[52].mxu1 %vm464_vm1, %v8459_v63  ;;  %5779 = vmatprep.subr.bf16.mxu0 %v5766_v22 }
 0x9de   : > { %5474 = vmatpush1.bf16.msra.mxu1 %v5459_v26  ;;  %v5454_v31 = vpop.permute.xlu1 %5453  ;;  %7928 = vmatmul.mubr.msk.bf16.vlgmr.msra.gmra.mrb[56].mxu0 %vm464_vm1, %v8460_v58 }
 0x9df   : > { %v5754_v13 = vpop.permute.xlu0 %5753  ;;  %5421 = vmatprep.mubr.bf16.mxu1 %v9848_v42  ;;  %5727 = vmatprep.mubr.bf16.mxu0 %v9848_v42 }
 0x9e0   : > { %v5765_v40 = vsel %vm1260_vm8, %v5754_v13, %v5756_v0  ;;  %3633 = vadd.xlane.f32.xlu0 %v3632_v18 }
 0x9e1   : > { %5780 = vmatpush1.bf16.msra.mxu0 %v5765_v40 }
 0x9e2   : > { %v5456_v45 = vpop.permute.xlu1 %5455 }
 0x9e3   : > { %v5458_v47 = vpop.permute.xlu0 %5457  ;;  %v5461_v38 = vsel %vm951_vm7, %v5454_v31, %v5456_v45 }
 0x9e4   : > { %v5462_v9 = vsel %vm951_vm7, %v5456_v45, %v5458_v47  ;;  %3647 = vadd.xlane.f32.xlu0 %v3646_v41 }
 0x9e5   : > { %7917 = vmatmul.mubr.msk.bf16.gmra.mrb[56].mxu1 %vm464_vm1, %v8461_v20  ;;  %5475 = vmatprep.subr.bf16.mxu1 %v5462_v9 }
 0x9e6   : > { %5476 = vmatpush1.bf16.msra.mxu1 %v5461_v38  ;;  %v5764_v36 = vpop.permute.xlu1 %5763  ;;  %7929 = vmatmul.mubr.msk.bf16.gmra.mrb[60].mxu0 %vm464_vm1, %v8462_v37 }
 0x9e7   : > { %v5762_v29 = vpop.permute.xlu0 %5761  ;;  %5505 = vmatprep.mubr.bf16.mxu1 %v9848_v42  ;;  %5811 = vmatprep.mubr.bf16.mxu0 %v9848_v42 }
 0x9e8   : > { %v5768_v50 = vsel %vm1260_vm8, %v5762_v29, %v5764_v36 }
 0x9e9   : > { %5781 = vmatprep.subr.bf16.mxu0 %v5768_v50 }
 0x9ea   : > { %v10121_v62 = vpop.permute.xlu1 %6026 }
 0x9eb   : > { %v5760_v57 = vpop.permute.xlu0 %5759 }
 0x9ec   : > { %v5767_v34 = vsel %vm1260_vm8, %v5760_v57, %v5762_v29 }
 0x9ed   : > { %7920 = vmatmul.mubr.msk.bf16.vlgmr.msra.gmra.mrb[52].mxu1 %vm464_vm1, %v8463_v39  ;;  %5782 = vmatpush1.bf16.msra.mxu0 %v5767_v34  ;;  %v3793_v39 = vld [vmem:[#allocation9 + $0x68] sm:$0xff] }
 0x9ee   : > { %5515 = vmatprep.mubr.bf16.mxu1 %v9848_v42  ;;  %v10123_v30 = vpop.permute.xlu1 %6142 }
 0x9ef   : > { %v10127_v32 = vpop.permute.xlu0 %6032 }
 0x9f0   : > { %7932 = vmatmul.mubr.msk.bf16.vlgmr.msra.gmra.mrb[56].mxu0 %vm464_vm1, %v8464_v46 }
 0x9f1   : > { %5821 = vmatprep.mubr.bf16.mxu0 %v9848_v42  ;;  %3644 = vadd.xlane.f32.xlu1 %v3643_v52  ;;  %v3792_v52 = vld [vmem:[#allocation9 + $0x60] sm:$0xff] }
 0x9f2   : > { %v10125_v1 = vpop.permute.xlu1 %6239 }
 0x9f3   : > { %v10131_v8 = vpop.permute.xlu0 %6136 }
 0x9f5   : > { %7921 = vmatmul.mubr.msk.bf16.gmra.mrb[56].mxu1 %vm464_vm1, %v8465_v61 }
 0x9f6   : > { %5989 = vmatprep.mubr.bf16.mxu1 %v9848_v42  ;;  %v10129_v33 = vpop.permute.xlu1 %6549 }
 0x9f8   : > { %7933 = vmatmul.mubr.msk.bf16.gmra.mrb[60].mxu0 %vm464_vm1, %v8466_v59 }
 0x9f9   : > { %6297 = vmatprep.mubr.bf16.mxu0 %v9848_v42 }
 0x9fa   : > { %v10133_v3 = vpop.permute.xlu1 %6245 }
 0x9fe   : > { %v10135_v2 = vpop.permute.xlu1 %6555 }
 0xa02   : > { %6334 = vrot.lane.b32.xlu1 %v9848_v42, %s8778_s14 }
 0xa2d   : > { %v3628_v5 = vpop.xlane.xlu0 %3627 }
 0xa2e   : > { %v10141_v10 = vmul.f32 0.00390625, %v3628_v5 }
 0xa30   : > { %v3660_v0 = vmul.f32 256.0, %v10141_v10 }
 0xa32   : > { %v3664_v19 = vmul.f32 %v3660_v0, %v10141_v10 }
 0xa35   : > { %v10137_v7 = vpop.permute.xlu0 %5868 }
 0xa39   : > { %v10139_v63 = vpop.permute.xlu0 %5878 }
 0xa3d   : > { %v3625_v42 = vpop.xlane.xlu1 %3624  ;;  %v10143_v28 = vpop.permute.xlu0 %6328 }
 0xa3e   : > { %v10153_v35 = vmul.f32 0.00390625, %v3625_v42 }
 0xa40   : > { %v3659_v40 = vmul.f32 256.0, %v10153_v35 }
 0xa41   : > { %v10145_v58 = vpop.xlane.xlu1 %3630 }
 0xa42   : > { %v3663_v20 = vmul.f32 %v3659_v40, %v10153_v35 }
 0xa45   : > { %v10150_v18 = vpop.permute.xlu1 %5863 }
 0xa49   : > { %v10155_v26 = vpop.permute.xlu1 %5873 }
 0xa4d   : > { %v10158_v41 = vpop.permute.xlu1 %6634 }
 0xa6d   : > { %v10148_v22 = vpop.xlane.xlu0 %3633 }
 0xa71   : > { %v3648_v25 = vpop.xlane.xlu0 %3647 }
 0xa72   : > { %v3668_v48 = vsub.f32 %v3648_v25, %v3664_v19 }
 0xa74   : > { %v3672_v31 = vmax.f32 %v3668_v48, 0.0 }
 0xa76   : > { %v3676_v13 = vmul.f32 0.003921569, %v3672_v31 }
 0xa78   : > { %8527 = vrsqrt.f32 %v3676_v13  ;;  %vm3688_vm14 = vcmp.eq.f32.partialorder %v3676_v13, inf  ;;  %v3691_v29 = vand.u32 2147483648, %v3676_v13  ;;  %vm3690_vm15 = vcmp.eq.f32.partialorder %v3676_v13, 0.0 }
 0xa7e   : > { %v3645_v45 = vpop.xlane.xlu1 %3644 }
 0xa7f   : > { %v3667_v37 = vsub.f32 %v3645_v45, %v3663_v20 }
 0xa81   : > { %v3671_v47 = vmax.f32 %v3667_v37, 0.0 }
 0xa82   : > { %v8528_v9 = vpop.eup %8527 }
 0xa83   : > { %v3675_v38 = vmul.f32 0.003921569, %v3671_v47  ;;  %v3687_v36 = vmul.f32 %v8528_v9, %v3676_v13 }
 0xa85   : > { %8529 = vrsqrt.f32 %v3675_v38  ;;  %v3689_v50 = vsel %vm3688_vm14, %v3676_v13, %v3687_v36  ;;  %vm3681_vm10 = vcmp.eq.f32.partialorder %v3675_v38, inf  ;;  %v3684_v55 = vand.u32 2147483648, %v3675_v38 }
 0xa86   : > { %v3692_v51 = vsel %vm3690_vm15, %v3691_v29, %v3689_v50  ;;  %vm3683_vm11 = vcmp.eq.f32.partialorder %v3675_v38, 0.0 }
 0xa87   : > { %v3797_v57 = vmul.f32 %v3793_v39, %v3692_v51 }
 0xa89   : > { %v3801_v0 = vsel %vm3458_vm9, %v3797_v57, 0.0 }
 0xa8f   : > { %v8530_v17 = vpop.eup %8529 }
 0xa90   : > { %v5217_v56 = vpop.f32.mrb[48].mxu0  ;;  %v3680_v34 = vmul.f32 %v8530_v17, %v3675_v38 }
 0xa91   : > { %v5219_v46 = vpop.f32.mrb[49].mxu0 }
 0xa92   : > { %v5221_v61 = vpop.f32.mrb[50].mxu0  ;;  %v3682_v59 = vsel %vm3681_vm10, %v3675_v38, %v3680_v34 }
 0xa93   : > { %v5223_v5 = vpop.f32.mrb[51].mxu0  ;;  %v3685_v42 = vsel %vm3683_vm11, %v3684_v55, %v3682_v59 }
 0xa94   : > { %v3796_v19 = vmul.f32 %v3792_v52, %v3685_v42 }
 0xa96   : > { %v3800_v25 = vsel %vm3458_vm9, %v3796_v19, 0.0 }
 0xa97   : > { %v10163_v48 = vadd.f32 %v3801_v0, %v3800_v25 }
 0xa98   : > { %v5227_v31 = vpop.f32.mrb[52].mxu0 }
 0xa99   : > { %v5229_v13 = vpop.f32.mrb[53].mxu0 }
 0xa9a   : > { %v5231_v40 = vpop.f32.mrb[54].mxu0 }
 0xa9b   : > { %v5233_v20 = vpop.f32.mrb[55].mxu0 }
 0xac0   : > { %v5507_v45 = vpop.f32.mrb[52].mxu1 }
 0xac1   : > { %v5534_v37 = vmul.f32 %v9191_v14, %v5507_v45  ;;  %v5509_v47 = vpop.f32.mrb[53].mxu1 }
 0xac2   : > { %v5535_v9 = vmul.f32 %v9193_v15, %v5509_v47  ;;  %v5511_v38 = vpop.f32.mrb[54].mxu1 }
 0xac3   : > { %v5542_v36 = vadd.f32 %v5534_v37, %v5217_v56  ;;  %v5536_v29 = vmul.f32 %v9191_v14, %v5511_v38  ;;  %v5513_v50 = vpop.f32.mrb[55].mxu1  ;;  %v5813_v39 = vpop.f32.mrb[56].mxu0 }
 0xac4   : > { %v5543_v51 = vadd.f32 %v5535_v9, %v5219_v46  ;;  %v5537_v17 = vmul.f32 %v9193_v15, %v5513_v50  ;;  %v5840_v55 = vmul.f32 %v9198_v24, %v5813_v39  ;;  %v5815_v57 = vpop.f32.mrb[57].mxu0 }
 0xac5   : > { %v5544_v34 = vadd.f32 %v5536_v29, %v5221_v61  ;;  %v5841_v52 = vmul.f32 %v9201_v27, %v5815_v57  ;;  %v5817_v59 = vpop.f32.mrb[58].mxu0 }
 0xac6   : > { %v5545_v42 = vadd.f32 %v5537_v17, %v5223_v5  ;;  %v5848_v0 = vadd.f32 %v5840_v55, %v5542_v36  ;;  %v5842_v19 = vmul.f32 %v9198_v24, %v5817_v59  ;;  %v5819_v25 = vpop.f32.mrb[59].mxu0 }
 0xac7   : > { %v5849_v56 = vadd.f32 %v5841_v52, %v5543_v51  ;;  %v5843_v45 = vmul.f32 %v9201_v27, %v5819_v25 }
 0xac8   : > { %v5881_v37 = vadd.f32 %v10150_v18, %v5848_v0  ;;  %v5850_v46 = vadd.f32 %v5842_v19, %v5544_v34  ;;  %v5517_v47 = vpop.f32.mrb[56].mxu1 }
 0xac9   : > { %v5882_v9 = vadd.f32 %v10150_v18, %v5849_v56  ;;  %v5851_v38 = vadd.f32 %v5843_v45, %v5545_v42  ;;  %v5538_v61 = vmul.f32 %v9191_v14, %v5517_v47  ;;  %v5519_v29 = vpop.f32.mrb[57].mxu1 }
 0xaca   : > { %vm5889_vm12 = vcmp.ge.f32.partialorder %v5881_v37, 0.0  ;;  %v5897_v50 = vmul.f32 0.05, %v5881_v37  ;;  %v5883_v5 = vadd.f32 %v10137_v7, %v5850_v46  ;;  %v5539_v36 = vmul.f32 %v9193_v15, %v5519_v29  ;;  %v5521_v39 = vpop.f32.mrb[58].mxu1 }
 0xacb   : > { %vm5890_vm13 = vcmp.ge.f32.partialorder %v5882_v9, 0.0  ;;  %v5898_v51 = vmul.f32 0.05, %v5882_v9  ;;  %v5884_v17 = vadd.f32 %v10137_v7, %v5851_v38  ;;  %v5546_v55 = vadd.f32 %v5538_v61, %v5227_v31  ;;  %v5523_v57 = vpop.f32.mrb[59].mxu1  ;;  %v5823_v34 = vpop.f32.mrb[60].mxu0 }
 0xacc   : > { %v5905_v52 = vsel %vm5889_vm12, %v5881_v37, %v5897_v50  ;;  %vm5891_vm14 = vcmp.ge.f32.partialorder %v5883_v5, 0.0  ;;  %v5899_v18 = vmul.f32 0.05, %v5883_v5  ;;  %v5547_v59 = vadd.f32 %v5539_v36, %v5229_v13  ;;  %v5825_v42 = vpop.f32.mrb[61].mxu0 }
 0xacd   : > { %v5906_v0 = vsel %vm5890_vm13, %v5882_v9, %v5898_v51  ;;  %vm5892_vm15 = vcmp.ge.f32.partialorder %v5884_v17, 0.0  ;;  %v5900_v19 = vmul.f32 0.05, %v5884_v17  ;;  %v5540_v25 = vmul.f32 %v9191_v14, %v5521_v39  ;;  %v5827_v56 = vpop.f32.mrb[62].mxu0 }
 0xace   : > { %v5907_v45 = vsel %vm5891_vm14, %v5883_v5, %v5899_v18  ;;  %v5541_v46 = vmul.f32 %v9193_v15, %v5523_v57  ;;  %v5844_v47 = vmul.f32 %v9198_v24, %v5823_v34  ;;  %v5845_v7 = vmul.f32 %v9201_v27, %v5825_v42  ;;  %v5829_v31 = vpop.f32.mrb[63].mxu0 }
 0xacf   : > { %v10183_v38 = vpack.c.bf16 %v5907_v45, %v5905_v52  ;;  %v5908_v37 = vsel %vm5892_vm15, %v5884_v17, %v5900_v19  ;;  %v5548_v61 = vadd.f32 %v5540_v25, %v5231_v40  ;;  %v5846_v13 = vmul.f32 %v9198_v24, %v5827_v56  ;;  %v8467_v25 = vld [vmem:[#allocation5 + $0x310] sm:$0xff]   ;;  %v10220_v56 = vld [vmem:[#allocation2] sm:$0xff]  ;;  %v8468_v45 = vld [vmem:[#allocation5 + $0x318] sm:$0xff]  }
 0xad0   : > { %v10186_v9 = vpack.c.bf16 %v5908_v37, %v5906_v0  ;;  %v5549_v29 = vadd.f32 %v5541_v46, %v5233_v20  ;;  %v5852_v50 = vadd.f32 %v5844_v47, %v5546_v55  ;;  %v5853_v36 = vadd.f32 %v5845_v7, %v5547_v59  ;;  %v10250_v46 = vld [vmem:[%s8976_s28 + $0x20] sm:$0xff]  ;;  %v10255_v7 = vld [vmem:[%s8976_s28 + $0x28] sm:$0xff] }
 0xad1   : > { %v5854_v39 = vadd.f32 %v5846_v13, %v5548_v61  ;;  %v5847_v5 = vmul.f32 %v9201_v27, %v5829_v31  ;;  %6545 = vrot.lane.b32.xlu0 %v10183_v38, %s8777_s10  ;;  %6028 = vrot.lane.b32.xlu1 %v10183_v38, %s8774_s16  ;;  %v3639_v47 = vmul.f32 %v10250_v46, %v10250_v46  ;;  %v3709_v61 = vld [vmem:[#allocation9 + $0x48] sm:$0xff]  ;;  %v3708_v13 = vld [vmem:[#allocation9 + $0x40] sm:$0xff] }
 0xad2   : > { %v5885_v51 = vadd.f32 %v10155_v26, %v5852_v50  ;;  %v5886_v40 = vadd.f32 %v10155_v26, %v5853_v36  ;;  %5957 = vmatprep.subr.bf16.mxu1 %v10186_v9  ;;  %v3640_v31 = vmul.f32 %v10255_v7, %v10255_v7  ;;  %v3642_v50 = vmul.f32 %v10089_v16, %v10089_v16 }
 0xad3   : > { %v5887_v17 = vadd.f32 %v10139_v63, %v5854_v39  ;;  %v5855_v20 = vadd.f32 %v5847_v5, %v5549_v29  ;;  %5958 = vmatpush1.bf16.msra.mxu1 %v10183_v38  ;;  %v3641_v29 = vmul.f32 %v10086_v23, %v10086_v23  ;;  %v3713_v36 = vmul.f32 %v3709_v61, %v10141_v10  ;;  %v3711_v10 = vld [vmem:[#allocation9 + $0x58] sm:$0xff] }
 0xad4   : > { %vm5893_vm10 = vcmp.ge.f32.partialorder %v5885_v51, 0.0  ;;  %v5901_v55 = vmul.f32 0.05, %v5885_v51  ;;  %v5902_v57 = vmul.f32 0.05, %v5886_v40  ;;  %vm5894_vm12 = vcmp.ge.f32.partialorder %v5886_v40, 0.0 }
 0xad5   : > { %vm5895_vm11 = vcmp.ge.f32.partialorder %v5887_v17, 0.0  ;;  %v5903_v34 = vmul.f32 0.05, %v5887_v17  ;;  %v5888_v52 = vadd.f32 %v10139_v63, %v5855_v20  ;;  %6330 = vrot.lane.b32.xlu0 %v10183_v38, %s8778_s14  ;;  %6132 = vrot.lane.b32.xlu1 %v10183_v38, %s8775_s29  ;;  %v3649_v37 = vadd.f32 %v3640_v31, %v3639_v47 }
 0xad6   : > { %v5909_v26 = vsel %vm5893_vm10, %v5885_v51, %v5901_v55  ;;  %v5910_v0 = vsel %vm5894_vm12, %v5886_v40, %v5902_v57  ;;  %v3712_v39 = vmul.f32 %v3708_v13, %v10153_v35  ;;  %v10274_v5 = vmul.f32 0.00390625, %v10145_v58  ;;  %v3710_v51 = vld [vmem:[#allocation9 + $0x50] sm:$0xff]  ;;  %v7836_v13 = vld [vmem:[%s10928_s4 + $0x2] sm:$0x1] }
 0xad7   : > { %v5911_v18 = vsel %vm5895_vm11, %v5887_v17, %v5903_v34  ;;  %vm5896_vm13 = vcmp.ge.f32.partialorder %v5888_v52, 0.0  ;;  %v5904_v59 = vmul.f32 0.05, %v5888_v52  ;;  %v3652_v40 = vadd.f32 %v3642_v50, %v3641_v29 }
 0xad8   : > { %v10203_v42 = vpack.c.bf16 %v5911_v18, %v5909_v26  ;;  %v3717_v17 = vsel %vm3458_vm9, %v3713_v36, 0.0  ;;  %v3716_v20 = vsel %vm3458_vm9, %v3712_v39, 0.0  ;;  %v3714_v23 = vmul.f32 %v3710_v51, %v10274_v5 }
 0xad9   : > { %v5912_v19 = vsel %vm5896_vm13, %v5888_v52, %v5904_v59  ;;  %6636 = vrot.lane.b32.xlu0 %v10183_v38, %s8779_s17  ;;  %6241 = vrot.lane.b32.xlu1 %v10183_v38, %s8776_s27  ;;  %v10282_v16 = vmul.f32 0.00390625, %v10148_v22  ;;  %v3718_v58 = vadd.f32 %v3717_v17, %v3716_v20  ;;  %v6335_v52 = vpop.permute.xlu1 %6334 }
 0xada   : > { %v10209_v63 = vpack.c.bf16 %v5912_v19, %v5910_v0  ;;  %v3719_v35 = vsel %vm3458_vm9, %v3714_v23, 0.0 }
 0xadb   : > { %v3720_v55 = vadd.f32 %v3719_v35, %v3718_v58 }
 0xadc   : > { %5959 = vmatprep.subr.bf16.mxu1 %v10209_v63 }
 0xadd   : > { %5960 = vmatpush1.bf16.msra.mxu1 %v10203_v42  ;;  %6030 = vrot.lane.b32.xlu0 %v10186_v9, %s8774_s16 }
 0xade   : > { %6134 = vrot.lane.b32.xlu1 %v10186_v9, %s8775_s29 }
 0xae0   : > { %7936 = vmatmul.mubr.msk.bf16.vlgmr.msra.gmra.mrb[60].mxu1 %vm464_vm1, %v8467_v25 }
 0xae1   : > { %6243 = vrot.lane.b32.xlu0 %v10186_v9, %s8776_s27  ;;  %5999 = vmatprep.mubr.bf16.mxu1 %v10220_v56 }
 0xae2   : > { %6332 = vrot.lane.b32.xlu1 %v10186_v9, %s8778_s14 }
 0xae5   : > { %6547 = vrot.lane.b32.xlu0 %v10186_v9, %s8777_s10 }
 0xae6   : > { %6247 = vrot.lane.b32.xlu1 %v10203_v42, %s8776_s27 }
 0xae8   : > { %7937 = vmatmul.mubr.msk.bf16.gmra.mrb[64].mxu1 %vm464_vm1, %v8468_v45 }
 0xae9   : > { %6638 = vrot.lane.b32.xlu0 %v10186_v9, %s8779_s17  ;;  %6084 = vmatprep.mubr.bf16.mxu1 %v10220_v56 }
 0xaea   : > { %6036 = vrot.lane.b32.xlu1 %v10209_v63, %s8774_s16 }
 0xaed   : > { %6034 = vrot.lane.b32.xlu0 %v10203_v42, %s8774_s16 }
 0xaf1   : > { %6138 = vrot.lane.b32.xlu0 %v10203_v42, %s8775_s29 }
 0xaf5   : > { %6551 = vrot.lane.b32.xlu0 %v10203_v42, %s8777_s10 }
 0xaf9   : > { %6336 = vrot.lane.b32.xlu0 %v10203_v42, %s8778_s14 }
 0xafd   : > { %6642 = vrot.lane.b32.xlu0 %v10203_v42, %s8779_s17 }
 0xb01   : > { %6640 = vrot.lane.b32.xlu0 %v10220_v56, %s8779_s17 }
 0xb05   : > { %6140 = vrot.lane.b32.xlu0 %v10209_v63, %s8775_s29 }
 0xb09   : > { %6249 = vrot.lane.b32.xlu0 %v10209_v63, %s8776_s27 }
 0xb0d   : > { %6553 = vrot.lane.b32.xlu0 %v10209_v63, %s8777_s10 }
 0xb0e   : > { %3650 = vadd.xlane.f32.xlu1 %v3649_v37 }
 0xb1f   : > { %6424 = vrot.lane.b32.xlu1 %v10186_v9, %s8780_s19 }
 0xb23   : > { %6422 = vrot.lane.b32.xlu1 %v10183_v38, %s8780_s19 }
 0xb27   : > { %6730 = vrot.lane.b32.xlu1 %v10186_v9, %s8781_s20  ;;  %v3715_v9 = vmul.f32 %v3711_v10, %v10282_v16 }
 0xb29   : > { %v3721_v57 = vsel %vm3458_vm9, %v3715_v9, 0.0 }
 0xb2a   : > { %v3722_v22 = vadd.f32 %v3721_v57, %v3720_v55  ;;  %v8469_v55 = vld [vmem:[#allocation5 + $0x2e0] sm:$0xff]  }
 0xb2b   : > { %6338 = vrot.lane.b32.xlu1 %v10209_v63, %s8778_s14 }
 0xb2c   : > { %3653 = vadd.xlane.f32.xlu0 %v3652_v40  ;;  %v3723_v34 = vrot.slane %v3722_v22, 4 }
 0xb2e   : > { %v3724_v26 = vadd.f32 %v3723_v34, %v3722_v22 }
 0xb2f   : > { %6644 = vrot.lane.b32.xlu1 %v10209_v63, %s8779_s17 }
 0xb30   : > { %v3725_v18 = vrot.slane %v3724_v26, 2 }
 0xb32   : > { %v3726_v19 = vadd.f32 %v3725_v18, %v3724_v26  ;;  %v7838_v18 = vld [vmem:[%s10929_s5 + $0x48] sm:$0xff] }
 0xb33   : > { %6732 = vrot.lane.b32.xlu1 %v10021_v44, %s8781_s20 }
 0xb34   : > { %v3727_v47 = vrot.slane %v3726_v19, 1 }
 0xb36   : > { %v3728_v61 = vadd.f32 %v3727_v47, %v3726_v19 }
 0xb37   : > { %6428 = vrot.lane.b32.xlu1 %v10203_v42, %s8780_s19 }
 0xb3b   : > { %6430 = vrot.lane.b32.xlu1 %v10209_v63, %s8780_s19 }
 0xb3f   : > { %6738 = vrot.lane.b32.xlu1 %v10015_v21, %s8781_s20 }
 0xb42   : > { %6426 = vrot.lane.b32.xlu0 %v10021_v44, %s8780_s19 }
 0xb43   : > { %v10301_v59 = vpop.permute.xlu0 %6545  ;;  %v6029_v0 = vpop.permute.xlu1 %6028 }
 0xb44   : > { %v6038_v50 = vsel %vm552_vm2, %v10121_v62, %v6029_v0 }
 0xb46   : > { %6728 = vrot.lane.b32.xlu0 %v10183_v38, %s8781_s20 }
 0xb47   : > { %v10305_v25 = vpop.permute.xlu0 %6330  ;;  %v6133_v45 = vpop.permute.xlu1 %6132 }
 0xb4a   : > { %6432 = vrot.lane.b32.xlu0 %v10015_v21, %s8780_s19  ;;  %v3731_v21 = vadd.f32 %v7836_v13, %v3728_v61 }
 0xb4b   : > { %v10309_v31 = vpop.permute.xlu0 %6636  ;;  %v6242_v37 = vpop.permute.xlu1 %6241 }
 0xb4c   : > { %v6251_v51 = vsel %vm766_vm4, %v10125_v1, %v6242_v37  ;;  %v3732_v40 = vmax.f32 %v3731_v21, 0.0 }
 0xb4e   : > { %6736 = vrot.lane.b32.xlu0 %v10209_v63, %s8781_s20  ;;  %v10325_v62 = vrot.slane %v3732_v40, %v9616_v43 }
 0xb4f   : > { %v6031_v44 = vpop.permute.xlu0 %6030 }
 0xb50   : > { %v6135_v38 = vpop.permute.xlu1 %6134  ;;  %v6039_v29 = vsel %vm552_vm2, %v6029_v0, %v6031_v44  ;;  %v8470_v0 = vld [vmem:[#allocation5 + $0x2e8] sm:$0xff]   ;;  %v3743_v47 = vmul.f32 %v7838_v18, %v10325_v62 }
 0xb51   : > { %6052 = vmatprep.subr.bf16.mxu1 %v6039_v29  ;;  %v6145_v22 = vsel %vm659_vm3, %v6135_v38, %v10131_v8  ;;  %v6144_v26 = vsel %vm659_vm3, %v6133_v45, %v6135_v38  ;;  %v8471_v38 = vld [vmem:[#allocation5 + $0x340] sm:$0xff]  }
 0xb52   : > { %6734 = vrot.lane.b32.xlu0 %v10203_v42, %s8781_s20  ;;  %6053 = vmatpush1.bf16.msra.mxu1 %v6038_v50  ;;  %v7837_v42 = vld [vmem:[%s10929_s5 + $0x40] sm:$0xff] }
 0xb53   : > { %v6244_v36 = vpop.permute.xlu0 %6243  ;;  %v3742_v10 = vmul.f32 %v7837_v42, %v10325_v62 }
 0xb54   : > { %v6333_v39 = vpop.permute.xlu1 %6332  ;;  %v6252_v63 = vsel %vm766_vm4, %v6242_v37, %v6244_v36  ;;  %v3749_v37 = vsel %vm3458_vm9, %v3743_v47, 0.0 }
 0xb55   : > { %6265 = vmatprep.subr.bf16.mxu0 %v6252_v63  ;;  %v3746_v57 = vsel %vm3458_vm9, %v3742_v10, 0.0 }
 0xb56   : > { %6266 = vmatpush1.bf16.msra.mxu0 %v6251_v51  ;;  %v6341_v51 = vsel %vm435_vm0, %v10305_v25, %v6333_v39 }
 0xb57   : > { %v6548_v17 = vpop.permute.xlu0 %6547 }
 0xb58   : > { %v6248_v20 = vpop.permute.xlu1 %6247  ;;  %v6558_v29 = vsel %vm1075_vm5, %v6548_v17, %v10129_v33  ;;  %v6557_v36 = vsel %vm1075_vm5, %v10301_v59, %v6548_v17  ;;  %v8473_v17 = vld [vmem:[#allocation5 + $0x348] sm:$0xff]  }
 0xb59   : > { %v6253_v63 = vsel %vm766_vm4, %v10133_v3, %v6248_v20  ;;  %v6340_v3 = vsel %vm435_vm0, %v10143_v28, %v10305_v25  ;;  %v6646_v28 = vsel %vm1165_vm6, %v10158_v41, %v10309_v31  ;;  %v8476_v25 = vld [vmem:[#allocation5 + $0x328] sm:$0xff]  }
 0xb5b   : > { %v6639_v23 = vpop.permute.xlu0 %6638 }
 0xb5c   : > { %v6037_v58 = vpop.permute.xlu1 %6036  ;;  %v6647_v39 = vsel %vm1165_vm6, %v10309_v31, %v6639_v23  ;;  %v3661_v23 = vmul.f32 256.0, %v10274_v5 }
 0xb5e   : > { %v3665_v42 = vmul.f32 %v3661_v23, %v10274_v5 }
 0xb5f   : > { %v6035_v35 = vpop.permute.xlu0 %6034 }
 0xb60   : > { %v6040_v1 = vsel %vm552_vm2, %v10127_v32, %v6035_v35  ;;  %v6041_v9 = vsel %vm552_vm2, %v6035_v35, %v6037_v58 }
 0xb61   : > { %6054 = vmatprep.subr.bf16.mxu1 %v6041_v9 }
 0xb62   : > { %6055 = vmatpush1.bf16.msra.mxu1 %v6040_v1 }
 0xb63   : > { %3747 = vadd.xlane.f32.xlu1 %v3746_v57  ;;  %v6139_v34 = vpop.permute.xlu0 %6138  ;;  %6158 = vmatprep.subr.bf16.mxu1 %v6145_v22 }
 0xb65   : > { %7940 = vmatmul.mubr.msk.bf16.vlgmr.msra.gmra.mrb[60].mxu1 %vm464_vm1, %v8469_v55 }
 0xb66   : > { %6159 = vmatpush1.bf16.msra.mxu1 %v6144_v26  ;;  %6094 = vmatprep.mubr.bf16.mxu1 %v10220_v56  ;;  %v8477_v26 = vld [vmem:[#allocation5 + $0x2d0] sm:$0xff]  }
 0xb67   : > { %v6552_v32 = vpop.permute.xlu0 %6551 }
 0xb6b   : > { %v10343_v19 = vpop.permute.xlu0 %6336 }
 0xb6c   : > { %v10347_v8 = vsel %vm435_vm0, %v6335_v52, %v10343_v19 }
 0xb6d   : > { %7941 = vmatmul.mubr.msk.bf16.gmra.mrb[64].mxu1 %vm464_vm1, %v8470_v0 }
 0xb6e   : > { %6190 = vmatprep.mubr.bf16.mxu1 %v10220_v56 }
 0xb6f   : > { %v10352_v45 = vpop.permute.xlu0 %6642 }
 0xb71   : > { %3750 = vadd.xlane.f32.xlu0 %v3749_v37 }
 0xb73   : > { %v10355_v61 = vpop.permute.xlu0 %6640 }
 0xb77   : > { %v6141_v44 = vpop.permute.xlu0 %6140 }
 0xb78   : > { %v6146_v13 = vsel %vm659_vm3, %v6139_v34, %v6141_v44  ;;  %v6147_v52 = vsel %vm659_vm3, %v6141_v44, %v10123_v30  ;;  %v8472_v30 = vld [vmem:[#allocation5 + $0x300] sm:$0xff]   ;;  %v6648_v44 = vsel %vm1165_vm6, %v10355_v61, %v10352_v45 }
 0xb79   : > { %6160 = vmatprep.subr.bf16.mxu1 %v6147_v52 }
 0xb7a   : > { %6161 = vmatpush1.bf16.msra.mxu1 %v6146_v13  ;;  %v8478_v13 = vld [vmem:[#allocation5 + $0x2f0] sm:$0xff]  }
 0xb7b   : > { %v6250_v50 = vpop.permute.xlu0 %6249  ;;  %6571 = vmatprep.subr.bf16.mxu1 %v6558_v29  ;;  %v3662_v29 = vmul.f32 256.0, %v10282_v16 }
 0xb7c   : > { %v6254_v21 = vsel %vm766_vm4, %v6248_v20, %v6250_v50  ;;  %v8475_v20 = vld [vmem:[#allocation5 + $0x308] sm:$0xff]  }
 0xb7d   : > { %7944 = vmatmul.mubr.msk.bf16.vlgmr.msra.gmra.mrb[60].mxu1 %vm464_vm1, %v8471_v38  ;;  %6267 = vmatprep.subr.bf16.mxu0 %v6254_v21  ;;  %v3666_v61 = vmul.f32 %v3662_v29, %v10282_v16 }
 0xb7e   : > { %6268 = vmatpush1.bf16.msra.mxu0 %v6253_v63  ;;  %6572 = vmatpush1.bf16.msra.mxu1 %v6557_v36  ;;  %v8480_v36 = vld [vmem:[#allocation5 + $0x2f8] sm:$0xff]  }
 0xb7f   : > { %v6554_v33 = vpop.permute.xlu0 %6553  ;;  %6354 = vmatprep.subr.bf16.mxu0 %v6341_v51  ;;  %6200 = vmatprep.mubr.bf16.mxu1 %v10220_v56 }
 0xb80   : > { %v6559_v40 = vsel %vm1075_vm5, %v6552_v32, %v6554_v33  ;;  %v6560_v59 = vsel %vm1075_vm5, %v6554_v33, %v10135_v2  ;;  %v8474_v2 = vld [vmem:[#allocation5 + $0x320] sm:$0xff]   ;;  %v3794_v32 = vld [vmem:[#allocation9 + $0x70] sm:$0xff] }
 0xb81   : > { %6573 = vmatprep.subr.bf16.mxu1 %v6560_v59  ;;  %7948 = vmatmul.mubr.msk.bf16.vlgmr.msra.gmra.mrb[64].mxu0 %vm464_vm1, %v8472_v30 }
 0xb82   : > { %6355 = vmatpush1.bf16.msra.mxu0 %v6340_v3  ;;  %6574 = vmatpush1.bf16.msra.mxu1 %v6559_v40 }
 0xb83   : > { %6660 = vmatprep.subr.bf16.mxu1 %v6647_v39  ;;  %6307 = vmatprep.mubr.bf16.mxu0 %v10220_v56 }
 0xb85   : > { %7945 = vmatmul.mubr.msk.bf16.gmra.mrb[64].mxu1 %vm464_vm1, %v8473_v17 }
 0xb86   : > { %6603 = vmatprep.mubr.bf16.mxu1 %v10220_v56 }
 0xb89   : > { %7949 = vmatmul.mubr.msk.bf16.gmra.mrb[68].mxu0 %vm464_vm1, %v8475_v20 }
 0xb8a   : > { %6386 = vmatprep.mubr.bf16.mxu0 %v10220_v56 }
 0xb8d   : > { %7960 = vmatmul.mubr.msk.bf16.vlgmr.msra.gmra.mrb[68].mxu1 %vm464_vm1, %v8474_v2 }
 0xb8e   : > { %6661 = vmatpush1.bf16.msra.mxu1 %v6646_v28  ;;  %6613 = vmatprep.mubr.bf16.mxu1 %v10220_v56 }
 0xb95   : > { %7961 = vmatmul.mubr.msk.bf16.gmra.mrb[72].mxu1 %vm464_vm1, %v8476_v25  ;;  %v8481_v25 = vld [vmem:[#allocation5 + $0x330] sm:$0xff]  }
 0xb96   : > { %6692 = vmatprep.mubr.bf16.mxu1 %v10220_v56 }
 0xb9b   : > { %v3651_v10 = vpop.xlane.xlu1 %3650 }
 0xb9c   : > { %v3669_v58 = vsub.f32 %v3651_v10, %v3665_v42 }
 0xb9e   : > { %v3673_v35 = vmax.f32 %v3669_v58, 0.0 }
 0xb9f   : > { %v6425_v1 = vpop.permute.xlu1 %6424 }
 0xba0   : > { %v3677_v9 = vmul.f32 0.003921569, %v3673_v35  ;;  %v3795_v35 = vld [vmem:[#allocation9 + $0x78] sm:$0xff] }
 0xba2   : > { %8531 = vrsqrt.f32 %v3677_v9  ;;  %vm3695_vm2 = vcmp.eq.f32.partialorder %v3677_v9, inf  ;;  %v3698_v18 = vand.u32 2147483648, %v3677_v9  ;;  %vm3697_vm3 = vcmp.eq.f32.partialorder %v3677_v9, 0.0 }
 0xba3   : > { %v6423_v55 = vpop.permute.xlu1 %6422 }
 0xba4   : > { %v6434_v59 = vsel %vm951_vm7, %v6423_v55, %v6425_v1 }
 0xba7   : > { %v6731_v41 = vpop.permute.xlu1 %6730 }
 0xbab   : > { %v6339_v31 = vpop.permute.xlu1 %6338 }
 0xbac   : > { %v8532_v57 = vpop.eup %8531  ;;  %v6343_v22 = vsel %vm435_vm0, %v10343_v19, %v6339_v31 }
 0xbad   : > { %v3694_v34 = vmul.f32 %v8532_v57, %v3677_v9  ;;  %6356 = vmatprep.subr.bf16.mxu0 %v6343_v22  ;;  %v8482_v57 = vld [vmem:[#allocation5 + $0x350] sm:$0xff]  }
 0xbae   : > { %6357 = vmatpush1.bf16.msra.mxu0 %v10347_v8 }
 0xbaf   : > { %v3696_v5 = vsel %vm3695_vm2, %v3677_v9, %v3694_v34  ;;  %v6645_v0 = vpop.permute.xlu1 %6644  ;;  %v8483_v34 = vld [vmem:[#allocation5 + $0x338] sm:$0xff]  }
 0xbb0   : > { %v3699_v47 = vsel %vm3697_vm3, %v3698_v18, %v3696_v5  ;;  %v6649_v37 = vsel %vm1165_vm6, %v10352_v45, %v6645_v0  ;;  %v8479_v45 = vld [vmem:[#allocation5 + $0x2d8] sm:$0xff]  }
 0xbb1   : > { %v3798_v19 = vmul.f32 %v3794_v32, %v3699_v47  ;;  %6662 = vmatprep.subr.bf16.mxu1 %v6649_v37  ;;  %7952 = vmatmul.mubr.msk.bf16.vlgmr.msra.gmra.mrb[64].mxu0 %vm464_vm1, %v8477_v26  ;;  %v8484_v0 = vld [vmem:[#allocation5 + $0x358] sm:$0xff]  }
 0xbb2   : > { %6663 = vmatpush1.bf16.msra.mxu1 %v6648_v44  ;;  %6396 = vmatprep.mubr.bf16.mxu0 %v10220_v56 }
 0xbb3   : > { %v3803_v8 = vsel %vm3458_vm9, %v3798_v19, 0.0  ;;  %v6733_v52 = vpop.permute.xlu1 %6732  ;;  %v7849_v19 = vld [vmem:[%s10928_s4 + $0x3] sm:$0x1] }
 0xbb4   : > { %v6741_v38 = vsel %vm1260_vm8, %v6731_v41, %v6733_v52  ;;  %v3804_v50 = vadd.f32 %v3803_v8, %v10163_v48 }
 0xbb5   : > { %6754 = vmatprep.subr.bf16.mxu1 %v6741_v38  ;;  %7964 = vmatmul.mubr.msk.bf16.vlgmr.msra.gmra.mrb[68].mxu1 %vm464_vm1, %v8478_v13  ;;  %v7851_v38 = vld [vmem:[%s10929_s5 + $0x68] sm:$0xff] }
 0xbb6   : > { %6702 = vmatprep.mubr.bf16.mxu1 %v10220_v56 }
 0xbb7   : > { %v6429_v51 = vpop.permute.xlu1 %6428 }
 0xbb9   : > { %v3654_v21 = vpop.xlane.xlu0 %3653  ;;  %7953 = vmatmul.mubr.msk.bf16.gmra.mrb[68].mxu0 %vm464_vm1, %v8479_v45  ;;  %v7839_v45 = vld [vmem:[%s10929_s5 + $0x50] sm:$0xff] }
 0xbba   : > { %v3670_v63 = vsub.f32 %v3654_v21, %v3666_v61  ;;  %6480 = vmatprep.mubr.bf16.mxu0 %v10220_v56 }
 0xbbb   : > { %v6431_v17 = vpop.permute.xlu1 %6430 }
 0xbbc   : > { %v3674_v30 = vmax.f32 %v3670_v63, 0.0  ;;  %v6436_v2 = vsel %vm951_vm7, %v6429_v51, %v6431_v17  ;;  %v3744_v51 = vmul.f32 %v7839_v45, %v10325_v62 }
 0xbbd   : > { %v6427_v33 = vpop.permute.xlu0 %6426  ;;  %7965 = vmatmul.mubr.msk.bf16.gmra.mrb[72].mxu1 %vm464_vm1, %v8480_v36 }
 0xbbe   : > { %v3678_v48 = vmul.f32 0.003921569, %v3674_v30  ;;  %v6435_v40 = vsel %vm951_vm7, %v6425_v1, %v6427_v33  ;;  %6786 = vmatprep.mubr.bf16.mxu1 %v10220_v56  ;;  %v7853_v33 = vld [vmem:[%s10929_s5 + $0x78] sm:$0xff] }
 0xbbf   : > { %6448 = vmatprep.subr.bf16.mxu0 %v6435_v40  ;;  %v6739_v28 = vpop.permute.xlu1 %6738 }
 0xbc0   : > { %8533 = vrsqrt.f32 %v3678_v48  ;;  %6449 = vmatpush1.bf16.msra.mxu0 %v6434_v59  ;;  %vm3702_vm0 = vcmp.eq.f32.partialorder %v3678_v48, inf  ;;  %v3705_v1 = vand.u32 2147483648, %v3678_v48  ;;  %vm3704_vm4 = vcmp.eq.f32.partialorder %v3678_v48, 0.0 }
 0xbc1   : > { %v6729_v16 = vpop.permute.xlu0 %6728  ;;  %v3752_v59 = vsel %vm3458_vm9, %v3744_v51, 0.0 }
 0xbc2   : > { %v6740_v3 = vsel %vm1260_vm8, %v6729_v16, %v6731_v41 }
 0xbc3   : > { %6755 = vmatpush1.bf16.msra.mxu1 %v6740_v3 }
 0xbc5   : > { %v6433_v39 = vpop.permute.xlu0 %6432 }
 0xbc6   : > { %v6437_v20 = vsel %vm951_vm7, %v6431_v17, %v6433_v39 }
 0xbc7   : > { %6450 = vmatprep.subr.bf16.mxu0 %v6437_v20 }
 0xbc8   : > { %6451 = vmatpush1.bf16.msra.mxu0 %v6436_v2 }
 0xbc9   : > { %v6737_v23 = vpop.permute.xlu0 %6736 }
 0xbca   : > { %v8534_v42 = vpop.eup %8533  ;;  %v6743_v10 = vsel %vm1260_vm8, %v6737_v23, %v6739_v28 }
 0xbcb   : > { %v3701_v58 = vmul.f32 %v8534_v42, %v3678_v48  ;;  %6756 = vmatprep.subr.bf16.mxu1 %v6743_v10  ;;  %7956 = vmatmul.mubr.msk.bf16.vlgmr.msra.gmra.mrb[64].mxu0 %vm464_vm1, %v8481_v25 }
 0xbcc   : > { %6490 = vmatprep.mubr.bf16.mxu0 %v10220_v56 }
 0xbcd   : > { %v3703_v9 = vsel %vm3702_vm0, %v3678_v48, %v3701_v58  ;;  %v6735_v55 = vpop.permute.xlu0 %6734  ;;  %v7852_v48 = vld [vmem:[%s10929_s5 + $0x70] sm:$0xff]  ;;  %v7841_v58 = vld [vmem:[%s10930_s6 + $0x40] sm:$0xff] }
 0xbce   : > { %v3706_v41 = vsel %vm3704_vm4, %v3705_v1, %v3703_v9  ;;  %v6742_v31 = vsel %vm1260_vm8, %v6735_v55, %v6737_v23  ;;  %v7842_v1 = vld [vmem:[%s10930_s6 + $0x48] sm:$0xff] }
 0xbcf   : > { %v3799_v22 = vmul.f32 %v3795_v35, %v3706_v41  ;;  %6757 = vmatpush1.bf16.msra.mxu1 %v6742_v31 }
 0xbd1   : > { %v3805_v26 = vsel %vm3458_vm9, %v3799_v22, 0.0  ;;  %v7854_v22 = vld [vmem:[%s10930_s6 + $0x60] sm:$0xff] }
 0xbd2   : > { %v3806_v32 = vadd.f32 %v3805_v26, %v3804_v50  ;;  %7968 = vmatmul.mubr.msk.bf16.vlgmr.msra.gmra.mrb[68].mxu1 %vm464_vm1, %v8482_v57  ;;  %v7840_v50 = vld [vmem:[%s10929_s5 + $0x58] sm:$0xff] }
 0xbd3   : > { %7957 = vmatmul.mubr.msk.bf16.gmra.mrb[68].mxu0 %vm464_vm1, %v8483_v34  ;;  %6796 = vmatprep.mubr.bf16.mxu1 %v10220_v56  ;;  %v3745_v30 = vmul.f32 %v7840_v50, %v10325_v62  ;;  %v7855_v34 = vld [vmem:[%s10930_s6 + $0x68] sm:$0xff] }
 0xbd4   : > { %v3807_v18 = vrot.slane %v3806_v32, 4  ;;  %7577 = vmatprep.mubr.bf16.mxu0 %v10220_v56  ;;  %v7850_v56 = vld [vmem:[%s10929_s5 + $0x60] sm:$0xff] }
 0xbd5   : > { %v3755_v40 = vsel %vm3458_vm9, %v3745_v30, 0.0 }
 0xbd6   : > { %v3808_v5 = vadd.f32 %v3807_v18, %v3806_v32 }
 0xbd8   : > { %v3809_v47 = vrot.slane %v3808_v5, 2 }
 0xbda   : > { %v3810_v37 = vadd.f32 %v3809_v47, %v3808_v5  ;;  %7969 = vmatmul.mubr.msk.bf16.gmra.mrb[72].mxu1 %vm464_vm1, %v8484_v0  ;;  %v7843_v0 = vld [vmem:[%s10930_s6 + $0x50] sm:$0xff]  ;;  %v7844_v47 = vld [vmem:[%s10930_s6 + $0x58] sm:$0xff] }
 0xbdc   : > { %v3811_v44 = vrot.slane %v3810_v37, 1 }
 0xbde   : > { %v3812_v13 = vadd.f32 %v3811_v44, %v3810_v37 }
 0xbe0   : > { %v3815_v8 = vadd.f32 %v7849_v19, %v3812_v13 }
 0xbe2   : > { %v3816_v52 = vmax.f32 %v3815_v8, 0.0 }
 0xbe4   : > { %v3825_v29 = vrot.slane %v3816_v52, %v9616_v43 }
 0xbe6   : > { %v3827_v61 = vmul.f32 %v7851_v38, %v3825_v29  ;;  %v3826_v21 = vmul.f32 %v7850_v56, %v3825_v29  ;;  %v3829_v16 = vmul.f32 %v7853_v33, %v3825_v29  ;;  %v3828_v3 = vmul.f32 %v7852_v48, %v3825_v29  ;;  %v7856_v38 = vld [vmem:[%s10930_s6 + $0x70] sm:$0xff]  ;;  %v7857_v56 = vld [vmem:[%s10930_s6 + $0x78] sm:$0xff] }
 0xbe8   : > { %v3833_v36 = vsel %vm3458_vm9, %v3827_v61, 0.0  ;;  %v3830_v63 = vsel %vm3458_vm9, %v3826_v21, 0.0  ;;  %v3839_v62 = vsel %vm3458_vm9, %v3829_v16, 0.0  ;;  %v3836_v17 = vsel %vm3458_vm9, %v3828_v3, 0.0 }
 0xbe9   : > { %3834 = vadd.xlane.f32.xlu1 %v3833_v36  ;;  %3831 = vadd.xlane.f32.xlu0 %v3830_v63 }
 0xbed   : > { %3756 = vadd.xlane.f32.xlu1 %v3755_v40  ;;  %3753 = vadd.xlane.f32.xlu0 %v3752_v59 }
 0xbf0   : > { %v3748_v35 = vpop.xlane.xlu1 %3747 }
 0xbf1   : > { %3840 = vadd.xlane.f32.xlu1 %v3839_v62  ;;  %3837 = vadd.xlane.f32.xlu0 %v3836_v17  ;;  %v3763_v55 = vadd.f32 %v7841_v58, %v3748_v35 }
 0xbf3   : > { %v7845_v31 = vmul.f32 -1.442695, %v3763_v55 }
 0xbf5   : > { %8535 = vpow2.f32 %v7845_v31 }
 0xbfe   : > { %v3751_v9 = vpop.xlane.xlu0 %3750 }
 0xbff   : > { %v3764_v41 = vadd.f32 %v7842_v1, %v3751_v9  ;;  %v8536_v21 = vpop.eup %8535 }
 0xc00   : > { %v3779_v48 = vadd.f32 1.0, %v8536_v21 }
 0xc01   : > { %v7846_v57 = vmul.f32 -1.442695, %v3764_v41 }
 0xc03   : > { %8537 = vpow2.f32 %v7846_v57 }
 0xc0d   : > { %v8538_v30 = vpop.eup %8537 }
 0xc0e   : > { %v3780_v40 = vadd.f32 1.0, %v8538_v30 }
 0xc50   : > { %v10460_v39 = vpop.f32.mrb[60].mxu1 }
 0xc51   : > { %v10462_v20 = vpop.f32.mrb[61].mxu1 }
 0xc52   : > { %v10464_v2 = vpop.f32.mrb[62].mxu1 }
 0xc53   : > { %v10466_v28 = vpop.f32.mrb[63].mxu1 }
 0xc58   : > { %v10468_v25 = vpop.f32.mrb[64].mxu1 }
 0xc59   : > { %v10470_v23 = vpop.f32.mrb[65].mxu1 }
 0xc5a   : > { %v10472_v42 = vpop.f32.mrb[66].mxu1 }
 0xc5b   : > { %v10474_v10 = vpop.f32.mrb[67].mxu1 }
 0xc76   : > { %v3832_v26 = vpop.xlane.xlu0 %3831  ;;  %v3835_v32 = vpop.xlane.xlu1 %3834 }
 0xc77   : > { %v3847_v18 = vadd.f32 %v7854_v22, %v3832_v26  ;;  %v3848_v5 = vadd.f32 %v7855_v34, %v3835_v32 }
 0xc79   : > { %v7858_v37 = vmul.f32 -1.442695, %v3847_v18  ;;  %v7859_v44 = vmul.f32 -1.442695, %v3848_v5 }
 0xc7a   : > { %v3754_v19 = vpop.xlane.xlu0 %3753  ;;  %v3757_v13 = vpop.xlane.xlu1 %3756 }
 0xc7b   : > { %8539 = vpow2.f32 %v7858_v37  ;;  %v3765_v8 = vadd.f32 %v7843_v0, %v3754_v19  ;;  %v3766_v52 = vadd.f32 %v7844_v47, %v3757_v13 }
 0xc7c   : > { %8541 = vpow2.f32 %v7859_v44 }
 0xc7d   : > { %v7847_v29 = vmul.f32 -1.442695, %v3765_v8  ;;  %v7848_v50 = vmul.f32 -1.442695, %v3766_v52 }
 0xc7e   : > { %v3838_v45 = vpop.xlane.xlu0 %3837  ;;  %v3841_v61 = vpop.xlane.xlu1 %3840 }
 0xc7f   : > { %8543 = vpow2.f32 %v7847_v29  ;;  %v3849_v36 = vadd.f32 %v7856_v38, %v3838_v45  ;;  %v3850_v63 = vadd.f32 %v7857_v56, %v3841_v61  ;;  %v6832_v45 = vld [vmem:[#allocation7 + $0xa0] sm:$0xff] }
 0xc80   : > { %8545 = vpow2.f32 %v7848_v50 }
 0xc81   : > { %v7860_v51 = vmul.f32 -1.442695, %v3849_v36  ;;  %v7861_v33 = vmul.f32 -1.442695, %v3850_v63  ;;  %v6833_v36 = vld [vmem:[#allocation7 + $0xa8] sm:$0xff] }
 0xc83   : > { %8547 = vpow2.f32 %v7860_v51 }
 0xc84   : > { %8549 = vpow2.f32 %v7861_v33 }
 0xc85   : > { %v8540_v59 = vpop.eup %8539  ;;  %8551 = vrcp.f32 %v3779_v48 }
 0xc86   : > { %v8542_v16 = vpop.eup %8541  ;;  %v3863_v3 = vadd.f32 1.0, %v8540_v59  ;;  %8553 = vrcp.f32 %v3780_v40  ;;  %v6834_v59 = vld [vmem:[#allocation7 + $0xb0] sm:$0xff] }
 0xc87   : > { %v3864_v62 = vadd.f32 1.0, %v8542_v16 }
 0xc88   : > { %8555 = vrcp.f32 %v3863_v3  ;;  %v6835_v3 = vld [vmem:[#allocation7 + $0xb8] sm:$0xff] }
 0xc89   : > { %v8544_v17 = vpop.eup %8543  ;;  %8557 = vrcp.f32 %v3864_v62 }
 0xc8a   : > { %v8546_v58 = vpop.eup %8545  ;;  %v3781_v35 = vadd.f32 1.0, %v8544_v17 }
 0xc8b   : > { %v3782_v1 = vadd.f32 1.0, %v8546_v58 }
 0xc8c   : > { %8559 = vrcp.f32 %v3781_v35 }
 0xc8d   : > { %v8548_v9 = vpop.eup %8547  ;;  %8561 = vrcp.f32 %v3782_v1 }
 0xc8e   : > { %v8550_v55 = vpop.eup %8549  ;;  %v3865_v41 = vadd.f32 1.0, %v8548_v9 }
 0xc8f   : > { %v3866_v31 = vadd.f32 1.0, %v8550_v55  ;;  %v8552_v57 = vpop.eup %8551 }
 0xc90   : > { %8563 = vrcp.f32 %v3865_v41  ;;  %v8554_v22 = vpop.eup %8553 }
 0xc91   : > { %8565 = vrcp.f32 %v3866_v31 }
 0xc92   : > { %v8556_v34 = vpop.eup %8555 }
 0xc93   : > { %v8558_v26 = vpop.eup %8557  ;;  %v3875_v32 = vadd.f32 %v8556_v34, %v8552_v57 }
 0xc94   : > { %v3876_v18 = vadd.f32 %v8558_v26, %v8554_v22 }
 0xc95   : > { %v3879_v5 = vmul.f32 0.5, %v3875_v32 }
 0xc96   : > { %v3880_v0 = vmul.f32 0.5, %v3876_v18  ;;  %v8560_v47 = vpop.eup %8559 }
 0xc97   : > { %3921 = vperm.xlu0 %8375, %v3879_v5   ;;  %v8562_v37 = vpop.eup %8561 }
 0xc98   : > { %3926 = vperm.xlu1 %8376, %v3880_v0  }
 0xc9a   : > { %v8564_v44 = vpop.eup %8563 }
 0xc9b   : > { %v8566_v19 = vpop.eup %8565  ;;  %v3877_v13 = vadd.f32 %v8564_v44, %v8560_v47 }
 0xc9c   : > { %v3878_v8 = vadd.f32 %v8566_v19, %v8562_v37 }
 0xc9d   : > { %v3881_v52 = vmul.f32 0.5, %v3877_v13 }
 0xc9e   : > { %v3882_v38 = vmul.f32 0.5, %v3878_v8  ;;  %v6482_v56 = vpop.f32.mrb[64].mxu0 }
 0xc9f   : > { %3931 = vperm.xlu1 %8376, %v3881_v52   ;;  %v6509_v29 = vmul.f32 %v9191_v14, %v6482_v56  ;;  %v6484_v50 = vpop.f32.mrb[65].mxu0 }
 0xca0   : > { %3936 = vperm.xlu0 %8375, %v3882_v38   ;;  %v6510_v61 = vmul.f32 %v9193_v15, %v6484_v50  ;;  %v6486_v21 = vpop.f32.mrb[66].mxu0  ;;  %v8659_v50 = vld [vmem:[%s8976_s28] sm:$0xff] }
 0xca1   : > { %v6517_v63 = vadd.f32 %v6509_v29, %v10460_v39  ;;  %v6511_v30 = vmul.f32 %v9191_v14, %v6486_v21  ;;  %v6488_v51 = vpop.f32.mrb[67].mxu0 }
 0xca2   : > { %v6518_v33 = vadd.f32 %v6510_v61, %v10462_v20  ;;  %v6512_v48 = vmul.f32 %v9193_v15, %v6488_v51  ;;  %v8660_v61 = vld [vmem:[%s8976_s28 + $0x8] sm:$0xff]  ;;  %v8662_v51 = vld [vmem:[%s8976_s28 + $0x18] sm:$0xff] }
 0xca3   : > { %6838 = vperm.xlu1 %8376, %v6832_v45   ;;  %v6519_v40 = vadd.f32 %v6511_v30, %v10464_v2 }
 0xca4   : > { %6843 = vperm.xlu0 %8375, %v6833_v36   ;;  %v6520_v16 = vadd.f32 %v6512_v48, %v10466_v28 }
 0xca5   : > { %v6788_v62 = vpop.f32.mrb[68].mxu1 }
 0xca6   : > { %v6815_v17 = vmul.f32 %v9198_v24, %v6788_v62  ;;  %v6790_v58 = vpop.f32.mrb[69].mxu1  ;;  %v6492_v39 = vpop.f32.mrb[68].mxu0 }
 0xca7   : > { %6848 = vperm.xlu1 %8376, %v6834_v59   ;;  %v6816_v35 = vmul.f32 %v9201_v27, %v6790_v58  ;;  %v6792_v1 = vpop.f32.mrb[70].mxu1  ;;  %v6513_v20 = vmul.f32 %v9191_v14, %v6492_v39  ;;  %v6494_v9 = vpop.f32.mrb[69].mxu0 }
 0xca8   : > { %6853 = vperm.xlu0 %8375, %v6835_v3   ;;  %v10511_v55 = vadd.f32 %v6815_v17, %v6517_v63  ;;  %v6817_v2 = vmul.f32 %v9198_v24, %v6792_v1  ;;  %v6794_v41 = vpop.f32.mrb[71].mxu1  ;;  %v6514_v28 = vmul.f32 %v9193_v15, %v6494_v9  ;;  %v6496_v31 = vpop.f32.mrb[70].mxu0  ;;  %v8661_v63 = vld [vmem:[%s8976_s28 + $0x10] sm:$0xff] }
 0xca9   : > { %v10515_v57 = vadd.f32 %v6816_v35, %v6518_v33  ;;  %v6818_v22 = vmul.f32 %v9201_v27, %v6794_v41  ;;  %v6521_v34 = vadd.f32 %v6513_v20, %v10468_v25  ;;  %v6515_v26 = vmul.f32 %v9191_v14, %v6496_v31  ;;  %v6498_v32 = vpop.f32.mrb[71].mxu0  ;;  %v8663_v1 = vld [vmem:[%s8976_s28 + $0x30] sm:$0xff]  ;;  %v8664_v20 = vld [vmem:[%s8976_s28 + $0x38] sm:$0xff] }
 0xcaa   : > { %v10520_v18 = vadd.f32 %v6817_v2, %v6519_v40  ;;  %v6522_v5 = vadd.f32 %v6514_v28, %v10470_v23  ;;  %v6516_v0 = vmul.f32 %v9193_v15, %v6498_v32 }
 0xcab   : > { %v10524_v47 = vadd.f32 %v6818_v22, %v6520_v16  ;;  %v6523_v37 = vadd.f32 %v6515_v26, %v10472_v42 }
 0xcac   : > { %v6524_v44 = vadd.f32 %v6516_v0, %v10474_v10 }
 0xcad   : > { %v6798_v19 = vpop.f32.mrb[72].mxu1 }
 0xcae   : > { %v6819_v25 = vmul.f32 %v9198_v24, %v6798_v19  ;;  %v6800_v13 = vpop.f32.mrb[73].mxu1 }
 0xcaf   : > { %v6820_v14 = vmul.f32 %v9201_v27, %v6800_v13  ;;  %v6802_v8 = vpop.f32.mrb[74].mxu1 }
 0xcb0   : > { %v10530_v23 = vadd.f32 %v6819_v25, %v6521_v34  ;;  %v6821_v15 = vmul.f32 %v9198_v24, %v6802_v8  ;;  %v6804_v52 = vpop.f32.mrb[75].mxu1 }
 0xcb1   : > { %v10533_v38 = vadd.f32 %v6820_v14, %v6522_v5  ;;  %v6822_v42 = vmul.f32 %v9201_v27, %v6804_v52 }
 0xcb2   : > { %v10536_v10 = vadd.f32 %v6821_v15, %v6523_v37 }
 0xcb3   : > { %v10538_v56 = vadd.f32 %v6822_v42, %v6524_v44 }
 0xd16   : > { %v3922_v29 = vpop.permute.xlu0 %3921 }
 0xd17   : > { %v3939_v45 = vmul.f32 %v8659_v50, %v3922_v29  ;;  %v3940_v21 = vmul.f32 %v8660_v61, %v3922_v29  ;;  %v3927_v36 = vpop.permute.xlu1 %3926 }
 0xd18   : > { %v3941_v30 = vmul.f32 %v8661_v63, %v3927_v36  ;;  %v3942_v24 = vmul.f32 %v8662_v51, %v3927_v36 }
 0xd19   : > { %v3947_v33 = vadd.f32 %v3939_v45, %v9561_v49  ;;  %v3948_v27 = vadd.f32 %v3940_v21, %v9565_v54 }
 0xd1a   : > { %v3949_v48 = vadd.f32 %v3941_v30, %v9570_v60  ;;  %v3950_v40 = vadd.f32 %v3942_v24, %v9573_v53 }
 0xd1c   : > { %v3967_v59 = vpack.c.bf16 %v3949_v48, %v3947_v33  ;;  %v3968_v16 = vpack.c.bf16 %v3950_v40, %v3948_v27 }
 0xd1e   : > { %v10548_v3 = vunpack.c.l.bf16 %v3967_v59  ;;  %v10550_v62 = vunpack.c.l.bf16 %v3968_v16  ;;  %v10552_v17 = vunpack.c.h.bf16 %v3967_v59  ;;  %v10554_v58 = vunpack.c.h.bf16 %v3968_v16  ;;  %v3932_v39 = vpop.permute.xlu1 %3931 }
 0xd1f   : > { %v3937_v35 = vpop.permute.xlu0 %3936  ;;  %v3943_v49 = vmul.f32 %v10250_v46, %v3932_v39  ;;  %v3944_v54 = vmul.f32 %v10255_v7, %v3932_v39 }
 0xd20   : > { %v3945_v60 = vmul.f32 %v8663_v1, %v3937_v35  ;;  %v3946_v53 = vmul.f32 %v8664_v20, %v3937_v35  ;;  %v6903_v9 = vadd.f32 %v10554_v58, %v10552_v17  ;;  %v6900_v2 = vadd.f32 %v10550_v62, %v10548_v3 }
 0xd21   : > { %v3951_v41 = vadd.f32 %v3943_v49, %v9577_v11  ;;  %v3952_v28 = vadd.f32 %v3944_v54, %v9579_v4  ;;  %v6914_v4 = vmul.f32 %v10552_v17, %v10552_v17  ;;  %v6912_v19 = vmul.f32 %v10548_v3, %v10548_v3 }
 0xd22   : > { %v3953_v31 = vadd.f32 %v3945_v60, %v9581_v12  ;;  %v3954_v46 = vadd.f32 %v3946_v53, %v9585_v6  ;;  %6904 = vadd.xlane.f32.xlu0 %v6903_v9  ;;  %6901 = vadd.xlane.f32.xlu1 %v6900_v2  ;;  %v6839_v26 = vpop.permute.xlu1 %6838  ;;  %v6915_v12 = vmul.f32 %v10554_v58, %v10554_v58 }
 0xd23   : > { %v6844_v34 = vpop.permute.xlu0 %6843  ;;  %v6856_v11 = vadd.f32 %v6839_v26, %v10511_v55  ;;  %v6857_v6 = vadd.f32 %v6839_v26, %v10515_v57  ;;  %v6913_v25 = vmul.f32 %v10550_v62, %v10550_v62 }
 0xd24   : > { %v3969_v7 = vpack.c.bf16 %v3953_v31, %v3951_v41  ;;  %v3970_v22 = vpack.c.bf16 %v3954_v46, %v3952_v28  ;;  %v6858_v8 = vadd.f32 %v6844_v34, %v10520_v18  ;;  %v6859_v15 = vadd.f32 %v6844_v34, %v10524_v47 }
 0xd25   : > { %vm6864_vm1 = vcmp.ge.f32.partialorder %v6856_v11, 0.0  ;;  %v6923_v57 = vadd.f32 %v6915_v12, %v6914_v4  ;;  %vm6865_vm5 = vcmp.ge.f32.partialorder %v6857_v6, 0.0  ;;  %v6872_v52 = vmul.f32 0.05, %v6856_v11 }
 0xd26   : > { %v10568_v32 = vunpack.c.l.bf16 %v3969_v7  ;;  %v10570_v5 = vunpack.c.l.bf16 %v3970_v22  ;;  %v10572_v0 = vunpack.c.h.bf16 %v3969_v7  ;;  %v10574_v37 = vunpack.c.h.bf16 %v3970_v22  ;;  %v6849_v13 = vpop.permute.xlu1 %6848 }
 0xd27   : > { %v6854_v44 = vpop.permute.xlu0 %6853  ;;  %v6873_v42 = vmul.f32 0.05, %v6857_v6  ;;  %v6860_v45 = vadd.f32 %v6849_v13, %v10530_v23  ;;  %v6861_v61 = vadd.f32 %v6849_v13, %v10533_v38  ;;  %v6920_v21 = vadd.f32 %v6913_v25, %v6912_v19  ;;  %v6986_v19 = vld [vmem:[#allocation9 + $0x88] sm:$0xff]  ;;  %v6985_v25 = vld [vmem:[#allocation9 + $0x80] sm:$0xff] }
 0xd28   : > { %v6909_v14 = vadd.f32 %v10574_v37, %v10572_v0  ;;  %v6906_v55 = vadd.f32 %v10570_v5, %v10568_v32  ;;  %v6862_v29 = vadd.f32 %v6854_v44, %v10536_v10  ;;  %v6863_v50 = vadd.f32 %v6854_v44, %v10538_v56 }
 0xd29   : > { %v6918_v18 = vmul.f32 %v10572_v0, %v10572_v0  ;;  %v6919_v47 = vmul.f32 %v10574_v37, %v10574_v37  ;;  %v6916_v36 = vmul.f32 %v10568_v32, %v10568_v32  ;;  %v6917_v10 = vmul.f32 %v10570_v5, %v10570_v5 }
 0xd2a   : > { %6910 = vadd.xlane.f32.xlu1 %v6909_v14  ;;  %6907 = vadd.xlane.f32.xlu0 %v6906_v55  ;;  %v6874_v63 = vmul.f32 0.05, %v6858_v8  ;;  %v6875_v30 = vmul.f32 0.05, %v6859_v15  ;;  %vm6866_vm6 = vcmp.ge.f32.partialorder %v6858_v8, 0.0  ;;  %vm6867_vm7 = vcmp.ge.f32.partialorder %v6859_v15, 0.0 }
 0xd2b   : > { %v10605_v23 = vsel %vm6864_vm1, %v6856_v11, %v6872_v52  ;;  %v10608_v38 = vsel %vm6865_vm5, %v6857_v6, %v6873_v42  ;;  %vm6870_vm8 = vcmp.ge.f32.partialorder %v6862_v29, 0.0  ;;  %vm6871_vm14 = vcmp.ge.f32.partialorder %v6863_v50, 0.0  ;;  %v6988_v52 = vld [vmem:[#allocation9 + $0x98] sm:$0xff] }
 0xd2c   : > { %v6878_v56 = vmul.f32 0.05, %v6862_v29  ;;  %v6879_v51 = vmul.f32 0.05, %v6863_v50  ;;  %v6876_v24 = vmul.f32 0.05, %v6860_v45  ;;  %v6929_v27 = vadd.f32 %v6919_v47, %v6918_v18 }
 0xd2d   : > { %v6877_v33 = vmul.f32 0.05, %v6861_v61  ;;  %v6926_v48 = vadd.f32 %v6917_v10, %v6916_v36  ;;  %v10610_v40 = vsel %vm6866_vm6, %v6858_v8, %v6874_v63  ;;  %v10612_v59 = vsel %vm6867_vm7, %v6859_v15, %v6875_v30  ;;  %v6987_v15 = vld [vmem:[#allocation9 + $0x90] sm:$0xff] }
 0xd2e   : > { %6924 = vadd.xlane.f32.xlu1 %v6923_v57  ;;  %6921 = vadd.xlane.f32.xlu0 %v6920_v21  ;;  %vm6868_vm15 = vcmp.ge.f32.partialorder %v6860_v45, 0.0  ;;  %vm6869_vm10 = vcmp.ge.f32.partialorder %v6861_v61, 0.0  ;;  %v10614_v16 = vsel %vm6870_vm8, %v6862_v29, %v6878_v56  ;;  %v10616_v39 = vsel %vm6871_vm14, %v6863_v50, %v6879_v51 }
 0xd2f   : > { %v10618_v35 = vsel %vm6868_vm15, %v6860_v45, %v6876_v24  ;;  %v10620_v49 = vsel %vm6869_vm10, %v6861_v61, %v6877_v33  ;;  %v7199_v54 = vadd.f32 %v10612_v59, %v10610_v40  ;;  %v7196_v1 = vadd.f32 %v10608_v38, %v10605_v23 }
 0xd30   : > { %v7205_v60 = vadd.f32 %v10616_v39, %v10614_v16  ;;  %v7202_v20 = vadd.f32 %v10620_v49, %v10618_v35  ;;  %v7210_v53 = vmul.f32 %v10610_v40, %v10610_v40  ;;  %v7211_v9 = vmul.f32 %v10612_v59, %v10612_v59 }
 0xd31   : > { %v7208_v2 = vmul.f32 %v10605_v23, %v10605_v23  ;;  %v7209_v41 = vmul.f32 %v10608_v38, %v10608_v38  ;;  %v7214_v28 = vmul.f32 %v10614_v16, %v10614_v16  ;;  %v7215_v31 = vmul.f32 %v10616_v39, %v10616_v39 }
 0xd32   : > { %6930 = vadd.xlane.f32.xlu1 %v6929_v27  ;;  %6927 = vadd.xlane.f32.xlu0 %v6926_v48  ;;  %v7219_v46 = vadd.f32 %v7211_v9, %v7210_v53  ;;  %v7212_v22 = vmul.f32 %v10618_v35, %v10618_v35  ;;  %v7213_v34 = vmul.f32 %v10620_v49, %v10620_v49 }
 0xd33   : > { %v7216_v7 = vadd.f32 %v7209_v41, %v7208_v2  ;;  %v7225_v26 = vadd.f32 %v7215_v31, %v7214_v28 }
 0xd34   : > { %v7222_v11 = vadd.f32 %v7213_v34, %v7212_v22 }
 0xd36   : > { %7200 = vadd.xlane.f32.xlu0 %v7199_v54  ;;  %7197 = vadd.xlane.f32.xlu1 %v7196_v1 }
 0xd3a   : > { %7206 = vadd.xlane.f32.xlu1 %v7205_v60  ;;  %7203 = vadd.xlane.f32.xlu0 %v7202_v20 }
 0xd3e   : > { %7220 = vadd.xlane.f32.xlu1 %v7219_v46  ;;  %7217 = vadd.xlane.f32.xlu0 %v7216_v7 }
 0xd42   : > { %7226 = vadd.xlane.f32.xlu1 %v7225_v26  ;;  %7223 = vadd.xlane.f32.xlu0 %v7222_v11  ;;  %v7282_v26 = vld [vmem:[#allocation9 + $0xc8] sm:$0xff] }
 0xdaf   : > { %v6905_v4 = vpop.xlane.xlu0 %6904  ;;  %v6902_v12 = vpop.xlane.xlu1 %6901 }
 0xdb0   : > { %v6933_v6 = vmul.f32 0.00390625, %v6905_v4  ;;  %v6932_v44 = vmul.f32 0.00390625, %v6902_v12 }
 0xdb2   : > { %v6990_v13 = vmul.f32 %v6986_v19, %v6933_v6  ;;  %v6989_v14 = vmul.f32 %v6985_v25, %v6932_v44  ;;  %v6936_v55 = vmul.f32 256.0, %v6932_v44  ;;  %v6937_v8 = vmul.f32 256.0, %v6933_v6  ;;  %v7281_v19 = vld [vmem:[#allocation9 + $0xc0] sm:$0xff] }
 0xdb4   : > { %v6994_v29 = vsel %vm3458_vm9, %v6990_v13, 0.0  ;;  %v6993_v50 = vsel %vm3458_vm9, %v6989_v14, 0.0  ;;  %v6940_v21 = vmul.f32 %v6936_v55, %v6932_v44  ;;  %v6941_v18 = vmul.f32 %v6937_v8, %v6933_v6 }
 0xdb5   : > { %v6995_v30 = vadd.f32 %v6994_v29, %v6993_v50 }
 0xdb7   : > { %v6908_v57 = vpop.xlane.xlu0 %6907  ;;  %v6911_v42 = vpop.xlane.xlu1 %6910 }
 0xdb8   : > { %v6934_v45 = vmul.f32 0.00390625, %v6908_v57  ;;  %v6935_v61 = vmul.f32 0.00390625, %v6911_v42 }
 0xdba   : > { %v6991_v47 = vmul.f32 %v6987_v15, %v6934_v45  ;;  %v6992_v36 = vmul.f32 %v6988_v52, %v6935_v61  ;;  %v6938_v10 = vmul.f32 256.0, %v6934_v45  ;;  %v6939_v63 = vmul.f32 256.0, %v6935_v61 }
 0xdbb   : > { %v6922_v56 = vpop.xlane.xlu0 %6921  ;;  %v6925_v51 = vpop.xlane.xlu1 %6924 }
 0xdbc   : > { %v6996_v24 = vsel %vm3458_vm9, %v6991_v47, 0.0  ;;  %v6944_v33 = vsub.f32 %v6922_v56, %v6940_v21  ;;  %v6945_v27 = vsub.f32 %v6925_v51, %v6941_v18  ;;  %v6998_v54 = vsel %vm3458_vm9, %v6992_v36, 0.0  ;;  %v7284_v47 = vld [vmem:[#allocation9 + $0xd8] sm:$0xff] }
 0xdbd   : > { %v6997_v48 = vadd.f32 %v6996_v24, %v6995_v30  ;;  %v6942_v20 = vmul.f32 %v6938_v10, %v6934_v45  ;;  %v6943_v53 = vmul.f32 %v6939_v63, %v6935_v61  ;;  %v7283_v45 = vld [vmem:[#allocation9 + $0xd0] sm:$0xff] }
 0xdbe   : > { %v6948_v1 = vmax.f32 %v6944_v33, 0.0  ;;  %v6949_v60 = vmax.f32 %v6945_v27, 0.0 }
 0xdbf   : > { %v6999_v9 = vadd.f32 %v6998_v54, %v6997_v48  ;;  %v6928_v2 = vpop.xlane.xlu0 %6927  ;;  %v6931_v41 = vpop.xlane.xlu1 %6930 }
 0xdc0   : > { %v10650_v28 = vmul.f32 0.003921569, %v6948_v1  ;;  %v10652_v31 = vmul.f32 0.003921569, %v6949_v60  ;;  %v6946_v46 = vsub.f32 %v6928_v2, %v6942_v20  ;;  %v6947_v7 = vsub.f32 %v6931_v41, %v6943_v53 }
 0xdc1   : > { %v7000_v22 = vrot.slane %v6999_v9, 4 }
 0xdc2   : > { %8567 = vrsqrt.f32 %v10650_v28  ;;  %v6950_v12 = vmax.f32 %v6946_v46, 0.0  ;;  %v6951_v6 = vmax.f32 %v6947_v7, 0.0  ;;  %vm6958_vm11 = vcmp.eq.f32.partialorder %v10650_v28, inf }
 0xdc3   : > { %v7001_v34 = vadd.f32 %v7000_v22, %v6999_v9  ;;  %8569 = vrsqrt.f32 %v10652_v31  ;;  %v7201_v11 = vpop.xlane.xlu0 %7200  ;;  %v7198_v4 = vpop.xlane.xlu1 %7197  ;;  %vm6960_vm12 = vcmp.eq.f32.partialorder %v10650_v28, 0.0  ;;  %v6961_v50 = vand.u32 2147483648, %v10650_v28  ;;  %v7069_v9 = vld [vmem:[#allocation9 + $0xa0] sm:$0xff] }
 0xdc4   : > { %v7229_v44 = vmul.f32 0.00390625, %v7201_v11  ;;  %v7228_v25 = vmul.f32 0.00390625, %v7198_v4  ;;  %v10656_v13 = vmul.f32 0.003921569, %v6950_v12  ;;  %v10658_v14 = vmul.f32 0.003921569, %v6951_v6 }
 0xdc5   : > { %v7002_v8 = vrot.slane %v7001_v34, 2  ;;  %vm6965_vm13 = vcmp.eq.f32.partialorder %v10652_v31, inf  ;;  %vm6967_vm2 = vcmp.eq.f32.partialorder %v10652_v31, 0.0  ;;  %v6968_v10 = vand.u32 2147483648, %v10652_v31 }
 0xdc6   : > { %v7286_v55 = vmul.f32 %v7282_v26, %v7229_v44  ;;  %v7285_v15 = vmul.f32 %v7281_v19, %v7228_v25  ;;  %v7232_v42 = vmul.f32 256.0, %v7228_v25  ;;  %8571 = vrsqrt.f32 %v10656_v13  ;;  %v7070_v26 = vld [vmem:[#allocation9 + $0xa8] sm:$0xff] }
 0xdc7   : > { %v7204_v57 = vpop.xlane.xlu0 %7203  ;;  %v7207_v52 = vpop.xlane.xlu1 %7206  ;;  %v7233_v29 = vmul.f32 256.0, %v7229_v44  ;;  %8573 = vrsqrt.f32 %v10658_v14  ;;  %v7003_v36 = vadd.f32 %v7002_v8, %v7001_v34  ;;  %vm6972_vm3 = vcmp.eq.f32.partialorder %v10656_v13, inf }
 0xdc8   : > { %v7290_v61 = vsel %vm3458_vm9, %v7286_v55, 0.0  ;;  %v7289_v21 = vsel %vm3458_vm9, %v7285_v15, 0.0  ;;  %v7230_v18 = vmul.f32 0.00390625, %v7204_v57  ;;  %v7231_v63 = vmul.f32 0.00390625, %v7207_v52 }
 0xdc9   : > { %v7236_v56 = vmul.f32 %v7232_v42, %v7228_v25  ;;  %v7237_v27 = vmul.f32 %v7233_v29, %v7229_v44  ;;  %vm6974_vm0 = vcmp.eq.f32.partialorder %v10656_v13, 0.0  ;;  %v7291_v60 = vadd.f32 %v7290_v61, %v7289_v21 }
 0xdca   : > { %v7287_v33 = vmul.f32 %v7283_v45, %v7230_v18  ;;  %v7234_v48 = vmul.f32 256.0, %v7230_v18  ;;  %v7288_v20 = vmul.f32 %v7284_v47, %v7231_v63  ;;  %v7004_v22 = vrot.slane %v7003_v36, 1 }
 0xdcb   : > { %v7218_v30 = vpop.xlane.xlu0 %7217  ;;  %v7221_v51 = vpop.xlane.xlu1 %7220  ;;  %v7235_v57 = vmul.f32 256.0, %v7231_v63  ;;  %v6975_v29 = vand.u32 2147483648, %v10656_v13  ;;  %vm6979_vm4 = vcmp.eq.f32.partialorder %v10658_v14, inf  ;;  %vm6981_vm1 = vcmp.eq.f32.partialorder %v10658_v14, 0.0 }
 0xdcc   : > { %v8568_v24 = vpop.eup %8567  ;;  %v7240_v53 = vsub.f32 %v7218_v30, %v7236_v56  ;;  %v7292_v41 = vsel %vm3458_vm9, %v7287_v33, 0.0  ;;  %v7241_v46 = vsub.f32 %v7221_v51, %v7237_v27  ;;  %v7238_v7 = vmul.f32 %v7234_v48, %v7230_v18 }
 0xdcd   : > { %v8570_v54 = vpop.eup %8569  ;;  %v6957_v1 = vmul.f32 %v8568_v24, %v10650_v28  ;;  %v7293_v11 = vadd.f32 %v7292_v41, %v7291_v60  ;;  %v6982_v47 = vand.u32 2147483648, %v10658_v14  ;;  %v7005_v30 = vadd.f32 %v7004_v22, %v7003_v36  ;;  %v7072_v24 = vld [vmem:[#allocation9 + $0xb8] sm:$0xff]  ;;  %v7970_v36 = vld [vmem:[%s10928_s4 + $0x4] sm:$0x1] }
 0xdce   : > { %v6964_v2 = vmul.f32 %v8570_v54, %v10652_v31  ;;  %v7244_v4 = vmax.f32 %v7240_v53, 0.0  ;;  %v7245_v19 = vmax.f32 %v7241_v46, 0.0  ;;  %v7239_v33 = vmul.f32 %v7235_v57, %v7231_v63 }
 0xdcf   : > { %v6959_v34 = vsel %vm6958_vm11, %v10650_v28, %v6957_v1  ;;  %v7224_v12 = vpop.xlane.xlu0 %7223  ;;  %v7294_v28 = vsel %vm3458_vm9, %v7288_v20, 0.0  ;;  %v7227_v27 = vpop.xlane.xlu1 %7226  ;;  %v7008_v46 = vadd.f32 %v7970_v36, %v7005_v30 }
 0xdd0   : > { %v6962_v6 = vsel %vm6960_vm12, %v6961_v50, %v6959_v34  ;;  %v6966_v44 = vsel %vm6965_vm13, %v10652_v31, %v6964_v2  ;;  %v7242_v25 = vsub.f32 %v7224_v12, %v7238_v7  ;;  %v10685_v15 = vmul.f32 0.003921569, %v7244_v4  ;;  %v8572_v52 = vpop.eup %8571  ;;  %v7071_v31 = vld [vmem:[#allocation9 + $0xb0] sm:$0xff]  ;;  %v7972_v12 = vld [vmem:[%s10929_s5 + $0x88] sm:$0xff] }
 0xdd1   : > { %v7073_v55 = vmul.f32 %v7069_v9, %v6962_v6  ;;  %v6969_v8 = vsel %vm6967_vm2, %v6968_v10, %v6966_v44  ;;  %v10689_v50 = vmul.f32 0.003921569, %v7245_v19  ;;  %v8574_v45 = vpop.eup %8573  ;;  %v6971_v61 = vmul.f32 %v8572_v52, %v10656_v13  ;;  %v7971_v44 = vld [vmem:[%s10929_s5 + $0x80] sm:$0xff] }
 0xdd2   : > { %v7074_v42 = vmul.f32 %v7070_v26, %v6969_v8  ;;  %v7295_v21 = vadd.f32 %v7294_v28, %v7293_v11  ;;  %8575 = vrsqrt.f32 %v10685_v15  ;;  %v6978_v18 = vmul.f32 %v8574_v45, %v10658_v14  ;;  %v7365_v45 = vld [vmem:[#allocation9 + $0xe0] sm:$0xff] }
 0xdd3   : > { %v7246_v10 = vmax.f32 %v7242_v25, 0.0  ;;  %v7077_v56 = vsel %vm3458_vm9, %v7073_v55, 0.0  ;;  %v6973_v51 = vsel %vm6972_vm3, %v10656_v13, %v6971_v61  ;;  %8577 = vrsqrt.f32 %v10689_v50 }
 0xdd4   : > { %v7078_v48 = vsel %vm3458_vm9, %v7074_v42, 0.0  ;;  %v6976_v54 = vsel %vm6974_vm0, %v6975_v29, %v6973_v51  ;;  %v6980_v1 = vsel %vm6979_vm4, %v10658_v14, %v6978_v18  ;;  %v7296_v53 = vrot.slane %v7295_v21, 4 }
 0xdd5   : > { %v7075_v60 = vmul.f32 %v7071_v31, %v6976_v54  ;;  %v6983_v20 = vsel %vm6981_vm1, %v6982_v47, %v6980_v1  ;;  %v7250_v9 = vmul.f32 0.003921569, %v7246_v10  ;;  %v7243_v2 = vsub.f32 %v7227_v27, %v7239_v33  ;;  %v7366_v31 = vld [vmem:[#allocation9 + $0xe8] sm:$0xff]  ;;  %v7367_v1 = vld [vmem:[#allocation9 + $0xf0] sm:$0xff] }
 0xdd6   : > { %v7076_v63 = vmul.f32 %v7072_v24, %v6983_v20  ;;  %v7079_v41 = vadd.f32 %v7078_v48, %v7077_v56  ;;  %v7297_v7 = vadd.f32 %v7296_v53, %v7295_v21  ;;  %v7009_v14 = vmax.f32 %v7008_v46, 0.0 }
 0xdd7   : > { %v7080_v13 = vsel %vm3458_vm9, %v7075_v60, 0.0  ;;  %8579 = vrsqrt.f32 %v7250_v9  ;;  %v7247_v22 = vmax.f32 %v7243_v2, 0.0  ;;  %vm7254_vm5 = vcmp.eq.f32.partialorder %v10685_v15, inf }
 0xdd8   : > { %v7081_v34 = vadd.f32 %v7080_v13, %v7079_v41  ;;  %v7082_v26 = vsel %vm3458_vm9, %v7076_v63, 0.0  ;;  %v10719_v6 = vrot.slane %v7009_v14, %v9616_v43  ;;  %v7298_v55 = vrot.slane %v7297_v7, 2 }
 0xdd9   : > { %v10713_v4 = vmul.f32 0.003921569, %v7247_v22  ;;  %vm7256_vm6 = vcmp.eq.f32.partialorder %v10685_v15, 0.0  ;;  %v7257_v8 = vand.u32 2147483648, %v10685_v15  ;;  %vm7261_vm7 = vcmp.eq.f32.partialorder %v10689_v50, inf }
 0xdda   : > { %v7083_v19 = vadd.f32 %v7082_v26, %v7081_v34  ;;  %v7020_v42 = vmul.f32 %v7972_v12, %v10719_v6  ;;  %v7019_v29 = vmul.f32 %v7971_v44, %v10719_v6  ;;  %v7264_v18 = vand.u32 2147483648, %v10689_v50 }
 0xddb   : > { %8581 = vrsqrt.f32 %v10713_v4  ;;  %vm7263_vm8 = vcmp.eq.f32.partialorder %v10689_v50, 0.0  ;;  %vm7268_vm14 = vcmp.eq.f32.partialorder %v7250_v9, inf  ;;  %v7271_v36 = vand.u32 2147483648, %v7250_v9 }
 0xddc   : > { %v8576_v11 = vpop.eup %8575  ;;  %v7084_v28 = vrot.slane %v7083_v19, 4  ;;  %v7026_v47 = vsel %vm3458_vm9, %v7020_v42, 0.0  ;;  %v7023_v10 = vsel %vm3458_vm9, %v7019_v29, 0.0  ;;  %vm7270_vm15 = vcmp.eq.f32.partialorder %v7250_v9, 0.0  ;;  %v7985_v42 = vld [vmem:[%s10929_s5 + $0xa8] sm:$0xff]  ;;  %v7984_v29 = vld [vmem:[%s10929_s5 + $0xa0] sm:$0xff] }
 0xddd   : > { %v7253_v25 = vmul.f32 %v8576_v11, %v10685_v15  ;;  %v8578_v57 = vpop.eup %8577  ;;  %7027 = vadd.xlane.f32.xlu1 %v7026_v47  ;;  %7024 = vadd.xlane.f32.xlu0 %v7023_v10  ;;  %v7368_v11 = vld [vmem:[#allocation9 + $0xf8] sm:$0xff]  ;;  %vm7275_vm10 = vcmp.eq.f32.partialorder %v10713_v4, inf  ;;  %vm7277_vm11 = vcmp.eq.f32.partialorder %v10713_v4, 0.0 }
 0xdde   : > { %v7260_v21 = vmul.f32 %v8578_v57, %v10689_v50  ;;  %v7085_v30 = vadd.f32 %v7084_v28, %v7083_v19 }
 0xddf   : > { %v7255_v52 = vsel %vm7254_vm5, %v10685_v15, %v7253_v25  ;;  %v7299_v15 = vadd.f32 %v7298_v55, %v7297_v7  ;;  %v7983_v7 = vld [vmem:[%s10928_s4 + $0x5] sm:$0x1]  ;;  %v7996_v55 = vld [vmem:[%s10928_s4 + $0x6] sm:$0x1] }
 0xde0   : > { %v7258_v61 = vsel %vm7256_vm6, %v7257_v8, %v7255_v52  ;;  %v7262_v56 = vsel %vm7261_vm7, %v10689_v50, %v7260_v21  ;;  %v7086_v27 = vrot.slane %v7085_v30, 2  ;;  %v7973_v21 = vld [vmem:[%s10929_s5 + $0x90] sm:$0xff] }
 0xde1   : > { %v8580_v51 = vpop.eup %8579  ;;  %v7369_v24 = vmul.f32 %v7365_v45, %v7258_v61  ;;  %v7265_v33 = vsel %vm7263_vm8, %v7264_v18, %v7262_v56  ;;  %v7300_v20 = vrot.slane %v7299_v15, 1 }
 0xde2   : > { %v7370_v48 = vmul.f32 %v7366_v31, %v7265_v33  ;;  %v7267_v54 = vmul.f32 %v8580_v51, %v7250_v9  ;;  %v7087_v60 = vadd.f32 %v7086_v27, %v7085_v30  ;;  %v7021_v51 = vmul.f32 %v7973_v21, %v10719_v6  ;;  %v7987_v33 = vld [vmem:[%s10929_s5 + $0xb8] sm:$0xff]  ;;  %v7986_v27 = vld [vmem:[%s10929_s5 + $0xb0] sm:$0xff] }
 0xde3   : > { %v7373_v63 = vsel %vm3458_vm9, %v7369_v24, 0.0  ;;  %v7301_v12 = vadd.f32 %v7300_v20, %v7299_v15 }
 0xde4   : > { %v7269_v53 = vsel %vm7268_vm14, %v7250_v9, %v7267_v54  ;;  %v7374_v2 = vsel %vm3458_vm9, %v7370_v48, 0.0  ;;  %v7088_v41 = vrot.slane %v7087_v60, 1  ;;  %v7278_v9 = vand.u32 2147483648, %v10713_v4 }
 0xde5   : > { %v7272_v50 = vsel %vm7270_vm15, %v7271_v36, %v7269_v53  ;;  %v8582_v13 = vpop.eup %8581  ;;  %v7375_v34 = vadd.f32 %v7374_v2, %v7373_v63  ;;  %v7304_v45 = vadd.f32 %v7996_v55, %v7301_v12  ;;  %v7029_v36 = vsel %vm3458_vm9, %v7021_v51, 0.0  ;;  %v7998_v53 = vld [vmem:[%s10929_s5 + $0xc8] sm:$0xff]  ;;  %v7997_v63 = vld [vmem:[%s10929_s5 + $0xc0] sm:$0xff] }
 0xde6   : > { %v7371_v46 = vmul.f32 %v7367_v1, %v7272_v50  ;;  %v7274_v22 = vmul.f32 %v8582_v13, %v10713_v4  ;;  %v7089_v14 = vadd.f32 %v7088_v41, %v7087_v60  ;;  %v8011_v55 = vld [vmem:[%s10929_s5 + $0xe8] sm:$0xff] }
 0xde7   : > { %v7305_v24 = vmax.f32 %v7304_v45, 0.0  ;;  %v8012_v45 = vld [vmem:[%s10929_s5 + $0xf0] sm:$0xff] }
 0xde8   : > { %v7376_v26 = vsel %vm3458_vm9, %v7371_v46, 0.0  ;;  %v7276_v44 = vsel %vm7275_vm10, %v10713_v4, %v7274_v22  ;;  %v7092_v19 = vadd.f32 %v7983_v7, %v7089_v14  ;;  %v7974_v4 = vld [vmem:[%s10929_s5 + $0x98] sm:$0xff]  ;;  %v8009_v22 = vld [vmem:[%s10928_s4 + $0x7] sm:$0x1] }
 0xde9   : > { %v7279_v25 = vsel %vm7277_vm11, %v7278_v9, %v7276_v44  ;;  %v7377_v8 = vadd.f32 %v7376_v26, %v7375_v34  ;;  %v7022_v10 = vmul.f32 %v7974_v4, %v10719_v6  ;;  %v7314_v6 = vrot.slane %v7305_v24, %v9616_v43  ;;  %v8000_v14 = vld [vmem:[%s10929_s5 + $0xd8] sm:$0xff]  ;;  %v7999_v34 = vld [vmem:[%s10929_s5 + $0xd0] sm:$0xff] }
 0xdea   : > { %v7372_v57 = vmul.f32 %v7368_v11, %v7279_v25  ;;  %v7093_v52 = vmax.f32 %v7092_v19, 0.0  ;;  %v8013_v4 = vld [vmem:[%s10929_s5 + $0xf8] sm:$0xff] }
 0xdeb   : > { %v7032_v54 = vsel %vm3458_vm9, %v7022_v10, 0.0  ;;  %v7316_v46 = vmul.f32 %v7998_v53, %v7314_v6  ;;  %v7315_v7 = vmul.f32 %v7997_v63, %v7314_v6  ;;  %v7318_v44 = vmul.f32 %v8000_v14, %v7314_v6  ;;  %v7975_v10 = vld [vmem:[%s10930_s6 + $0x80] sm:$0xff]  ;;  %v7978_v53 = vld [vmem:[%s10930_s6 + $0x98] sm:$0xff] }
 0xdec   : > { %v7102_v28 = vrot.slane %v7093_v52, %v9616_v43  ;;  %v7378_v61 = vsel %vm3458_vm9, %v7372_v57, 0.0  ;;  %v7317_v19 = vmul.f32 %v7999_v34, %v7314_v6  ;;  %v7977_v6 = vld [vmem:[%s10930_s6 + $0x90] sm:$0xff] }
 0xded   : > { %v7379_v31 = vadd.f32 %v7378_v61, %v7377_v8  ;;  %v7322_v9 = vsel %vm3458_vm9, %v7316_v46, 0.0  ;;  %v7319_v12 = vsel %vm3458_vm9, %v7315_v7, 0.0  ;;  %v8010_v8 = vld [vmem:[%s10929_s5 + $0xe0] sm:$0xff]  ;;  %v7328_v52 = vsel %vm3458_vm9, %v7318_v44, 0.0  ;;  %v7990_v7 = vld [vmem:[%s10930_s6 + $0xb0] sm:$0xff] }
 0xdee   : > { %v7104_v18 = vmul.f32 %v7985_v42, %v7102_v28  ;;  %v7103_v47 = vmul.f32 %v7984_v29, %v7102_v28  ;;  %v7106_v60 = vmul.f32 %v7987_v33, %v7102_v28  ;;  %v7105_v20 = vmul.f32 %v7986_v27, %v7102_v28 }
 0xdef   : > { %v7380_v30 = vrot.slane %v7379_v31, 4  ;;  %v7325_v42 = vsel %vm3458_vm9, %v7317_v19, 0.0 }
 0xdf0   : > { %v7110_v15 = vsel %vm3458_vm9, %v7104_v18, 0.0  ;;  %v7107_v56 = vsel %vm3458_vm9, %v7103_v47, 0.0  ;;  %v7116_v41 = vsel %vm3458_vm9, %v7106_v60, 0.0  ;;  %v7113_v13 = vsel %vm3458_vm9, %v7105_v20, 0.0 }
 0xdf1   : > { %7111 = vadd.xlane.f32.xlu1 %v7110_v15  ;;  %7108 = vadd.xlane.f32.xlu0 %v7107_v56  ;;  %v7381_v48 = vadd.f32 %v7380_v30, %v7379_v31  ;;  %v7976_v15 = vld [vmem:[%s10930_s6 + $0x88] sm:$0xff] }
 0xdf3   : > { %v7382_v1 = vrot.slane %v7381_v48, 2 }
 0xdf5   : > { %7033 = vadd.xlane.f32.xlu1 %v7032_v54  ;;  %7030 = vadd.xlane.f32.xlu0 %v7029_v36  ;;  %v7383_v2 = vadd.f32 %v7382_v1, %v7381_v48  ;;  %v7988_v48 = vld [vmem:[%s10930_s6 + $0xa0] sm:$0xff]  ;;  %v7989_v54 = vld [vmem:[%s10930_s6 + $0xa8] sm:$0xff] }
 0xdf7   : > { %v7384_v50 = vrot.slane %v7383_v2, 1 }
 0xdf9   : > { %7117 = vadd.xlane.f32.xlu1 %v7116_v41  ;;  %7114 = vadd.xlane.f32.xlu0 %v7113_v13  ;;  %v7385_v26 = vadd.f32 %v7384_v50, %v7383_v2 }
 0xdfb   : > { %v7388_v11 = vadd.f32 %v8009_v22, %v7385_v26  ;;  %v7991_v22 = vld [vmem:[%s10930_s6 + $0xb8] sm:$0xff] }
 0xdfd   : > { %7323 = vadd.xlane.f32.xlu1 %v7322_v9  ;;  %7320 = vadd.xlane.f32.xlu0 %v7319_v12  ;;  %v7389_v25 = vmax.f32 %v7388_v11, 0.0 }
 0xdff   : > { %v7398_v57 = vrot.slane %v7389_v25, %v9616_v43  ;;  %v8001_v25 = vld [vmem:[%s10930_s6 + $0xc0] sm:$0xff] }
 0xe01   : > { %7329 = vadd.xlane.f32.xlu1 %v7328_v52  ;;  %7326 = vadd.xlane.f32.xlu0 %v7325_v42  ;;  %v7400_v29 = vmul.f32 %v8011_v55, %v7398_v57  ;;  %v7399_v28 = vmul.f32 %v8010_v8, %v7398_v57  ;;  %v7402_v21 = vmul.f32 %v8013_v4, %v7398_v57  ;;  %v8002_v55 = vld [vmem:[%s10930_s6 + $0xc8] sm:$0xff] }
 0xe02   : > { %v7401_v31 = vmul.f32 %v8012_v45, %v7398_v57 }
 0xe03   : > { %v7406_v61 = vsel %vm3458_vm9, %v7400_v29, 0.0  ;;  %v7403_v43 = vsel %vm3458_vm9, %v7399_v28, 0.0  ;;  %v7412_v18 = vsel %vm3458_vm9, %v7402_v21, 0.0 }
 0xe04   : > { %v7409_v47 = vsel %vm3458_vm9, %v7401_v31, 0.0  ;;  %vm7538_vm9 = vcmask 523264  }
 0xe05   : > { %7407 = vadd.xlane.f32.xlu1 %v7406_v61  ;;  %7404 = vadd.xlane.f32.xlu0 %v7403_v43  ;;  %v8003_v61 = vld [vmem:[%s10930_s6 + $0xd0] sm:$0xff]  ;;  %v8004_v43 = vld [vmem:[%s10930_s6 + $0xd8] sm:$0xff] }
 0xe09   : > { %7413 = vadd.xlane.f32.xlu1 %v7412_v18  ;;  %7410 = vadd.xlane.f32.xlu0 %v7409_v47 }
 0xe6a   : > { %v7025_v30 = vpop.xlane.xlu0 %7024  ;;  %v7028_v56 = vpop.xlane.xlu1 %7027 }
 0xe6b   : > { %v7040_v51 = vadd.f32 %v7975_v10, %v7025_v30  ;;  %v7041_v24 = vadd.f32 %v7976_v15, %v7028_v56 }
 0xe6d   : > { %v7979_v33 = vmul.f32 -1.442695, %v7040_v51  ;;  %v7980_v27 = vmul.f32 -1.442695, %v7041_v24 }
 0xe6f   : > { %8583 = vpow2.f32 %v7979_v33  ;;  %v8014_v33 = vld [vmem:[%s10930_s6 + $0xe0] sm:$0xff] }
 0xe70   : > { %8585 = vpow2.f32 %v7980_v27  ;;  %v8015_v27 = vld [vmem:[%s10930_s6 + $0xe8] sm:$0xff] }
 0xe79   : > { %v8584_v26 = vpop.eup %8583 }
 0xe7a   : > { %v8586_v12 = vpop.eup %8585  ;;  %v7056_v8 = vadd.f32 1.0, %v8584_v26 }
 0xe7b   : > { %v7057_v42 = vadd.f32 1.0, %v8586_v12 }
 0xe7e   : > { %v7109_v1 = vpop.xlane.xlu0 %7108  ;;  %v7112_v36 = vpop.xlane.xlu1 %7111 }
 0xe7f   : > { %v7124_v60 = vadd.f32 %v7988_v48, %v7109_v1  ;;  %v7125_v20 = vadd.f32 %v7989_v54, %v7112_v36 }
 0xe81   : > { %v7992_v63 = vmul.f32 -1.442695, %v7124_v60  ;;  %v7993_v2 = vmul.f32 -1.442695, %v7125_v20 }
 0xe82   : > { %v7031_v50 = vpop.xlane.xlu0 %7030  ;;  %v7034_v41 = vpop.xlane.xlu1 %7033 }
 0xe83   : > { %8587 = vpow2.f32 %v7992_v63  ;;  %v7042_v13 = vadd.f32 %v7977_v6, %v7031_v50  ;;  %v7043_v46 = vadd.f32 %v7978_v53, %v7034_v41  ;;  %v8016_v50 = vld [vmem:[%s10930_s6 + $0xf0] sm:$0xff]  ;;  %v8017_v41 = vld [vmem:[%s10930_s6 + $0xf8] sm:$0xff] }
 0xe84   : > { %8589 = vpow2.f32 %v7993_v2 }
 0xe85   : > { %v7981_v14 = vmul.f32 -1.442695, %v7042_v13  ;;  %v7982_v34 = vmul.f32 -1.442695, %v7043_v46 }
 0xe86   : > { %v7115_v11 = vpop.xlane.xlu0 %7114  ;;  %v7118_v9 = vpop.xlane.xlu1 %7117 }
 0xe87   : > { %8591 = vpow2.f32 %v7981_v14  ;;  %v7126_v44 = vadd.f32 %v7990_v7, %v7115_v11  ;;  %v7127_v19 = vadd.f32 %v7991_v22, %v7118_v9 }
 0xe88   : > { %8593 = vpow2.f32 %v7982_v34 }
 0xe89   : > { %v7994_v57 = vmul.f32 -1.442695, %v7126_v44  ;;  %v7995_v52 = vmul.f32 -1.442695, %v7127_v19 }
 0xe8a   : > { %v7321_v29 = vpop.xlane.xlu0 %7320  ;;  %v7324_v28 = vpop.xlane.xlu1 %7323 }
 0xe8b   : > { %8595 = vpow2.f32 %v7994_v57  ;;  %v7336_v4 = vadd.f32 %v8001_v25, %v7321_v29  ;;  %v7337_v45 = vadd.f32 %v8002_v55, %v7324_v28 }
 0xe8c   : > { %8597 = vpow2.f32 %v7995_v52 }
 0xe8d   : > { %v8588_v21 = vpop.eup %8587  ;;  %8599 = vrcp.f32 %v7056_v8  ;;  %v8005_v31 = vmul.f32 -1.442695, %v7336_v4  ;;  %v8006_v10 = vmul.f32 -1.442695, %v7337_v45 }
 0xe8e   : > { %v8590_v18 = vpop.eup %8589  ;;  %8601 = vrcp.f32 %v7057_v42  ;;  %v7140_v47 = vadd.f32 1.0, %v8588_v21  ;;  %v7327_v30 = vpop.xlane.xlu0 %7326 }
 0xe8f   : > { %v7330_v15 = vpop.xlane.xlu1 %7329  ;;  %v7141_v56 = vadd.f32 1.0, %v8590_v18  ;;  %8603 = vpow2.f32 %v8005_v31  ;;  %v7338_v51 = vadd.f32 %v8003_v61, %v7327_v30 }
 0xe90   : > { %v7339_v24 = vadd.f32 %v8004_v43, %v7330_v15  ;;  %8605 = vrcp.f32 %v7140_v47 }
 0xe91   : > { %v8592_v48 = vpop.eup %8591  ;;  %8607 = vrcp.f32 %v7141_v56  ;;  %v8007_v54 = vmul.f32 -1.442695, %v7338_v51 }
 0xe92   : > { %v8594_v1 = vpop.eup %8593  ;;  %v7058_v36 = vadd.f32 1.0, %v8592_v48  ;;  %8609 = vpow2.f32 %v8006_v10  ;;  %v8008_v60 = vmul.f32 -1.442695, %v7339_v24  ;;  %v7405_v20 = vpop.xlane.xlu0 %7404 }
 0xe93   : > { %v7408_v6 = vpop.xlane.xlu1 %7407  ;;  %v7059_v53 = vadd.f32 1.0, %v8594_v1  ;;  %8611 = vpow2.f32 %v8007_v54  ;;  %v7420_v63 = vadd.f32 %v8014_v33, %v7405_v20 }
 0xe94   : > { %v7421_v2 = vadd.f32 %v8015_v27, %v7408_v6  ;;  %8613 = vrcp.f32 %v7058_v36 }
 0xe95   : > { %v8596_v13 = vpop.eup %8595  ;;  %8615 = vrcp.f32 %v7059_v53  ;;  %v8018_v46 = vmul.f32 -1.442695, %v7420_v63 }
 0xe96   : > { %v8598_v7 = vpop.eup %8597  ;;  %v7142_v22 = vadd.f32 1.0, %v8596_v13  ;;  %8617 = vpow2.f32 %v8008_v60  ;;  %v8019_v14 = vmul.f32 -1.442695, %v7421_v2  ;;  %v7411_v34 = vpop.xlane.xlu0 %7410 }
 0xe97   : > { %v7414_v26 = vpop.xlane.xlu1 %7413  ;;  %v8600_v11 = vpop.eup %8599  ;;  %v7143_v9 = vadd.f32 1.0, %v8598_v7  ;;  %8619 = vpow2.f32 %v8018_v46  ;;  %v7422_v12 = vadd.f32 %v8016_v50, %v7411_v34 }
 0xe98   : > { %v7423_v44 = vadd.f32 %v8017_v41, %v7414_v26  ;;  %v8602_v19 = vpop.eup %8601  ;;  %8621 = vrcp.f32 %v7142_v22 }
 0xe99   : > { %v8604_v25 = vpop.eup %8603  ;;  %8623 = vrcp.f32 %v7143_v9  ;;  %v8020_v55 = vmul.f32 -1.442695, %v7422_v12 }
 0xe9a   : > { %v8021_v8 = vmul.f32 -1.442695, %v7423_v44  ;;  %v8606_v57 = vpop.eup %8605  ;;  %8625 = vpow2.f32 %v8019_v14  ;;  %v7352_v31 = vadd.f32 1.0, %v8604_v25  ;;  %v7504_v25 = vld [vmem:[%s10932_s8] sm:$0xff] }
 0xe9b   : > { %v8608_v52 = vpop.eup %8607  ;;  %8627 = vpow2.f32 %v8020_v55  ;;  %v7152_v42 = vadd.f32 %v8606_v57, %v8600_v11  ;;  %v7505_v55 = vld [vmem:[%s10932_s8 + $0x8] sm:$0xff]  ;;  %v7507_v57 = vld [vmem:[%s10932_s8 + $0x18] sm:$0xff] }
 0xe9c   : > { %v8610_v29 = vpop.eup %8609  ;;  %v7153_v28 = vadd.f32 %v8608_v52, %v8602_v19  ;;  %8629 = vpow2.f32 %v8021_v8  ;;  %v7506_v8 = vld [vmem:[%s10932_s8 + $0x10] sm:$0xff] }
 0xe9d   : > { %v8612_v4 = vpop.eup %8611  ;;  %v7156_v45 = vmul.f32 0.5, %v7152_v42  ;;  %v7353_v10 = vadd.f32 1.0, %v8610_v29  ;;  %8631 = vrcp.f32 %v7352_v31 }
 0xe9e   : > { %v8614_v61 = vpop.eup %8613  ;;  %v7157_v43 = vmul.f32 0.5, %v7153_v28  ;;  %v7354_v15 = vadd.f32 1.0, %v8612_v4 }
 0xe9f   : > { %v8616_v21 = vpop.eup %8615  ;;  %7162 = vperm.xlu0 %8375, %v7156_v45  }
 0xea0   : > { %v8618_v18 = vpop.eup %8617  ;;  %7167 = vperm.xlu1 %8376, %v7157_v43  }
 0xea1   : > { %v8620_v47 = vpop.eup %8619  ;;  %v7355_v54 = vadd.f32 1.0, %v8618_v18 }
 0xea2   : > { %v8622_v30 = vpop.eup %8621  ;;  %v7436_v56 = vadd.f32 1.0, %v8620_v47 }
 0xea3   : > { %v8624_v51 = vpop.eup %8623  ;;  %v7154_v24 = vadd.f32 %v8622_v30, %v8614_v61 }
 0xea4   : > { %v8626_v33 = vpop.eup %8625  ;;  %8633 = vrcp.f32 %v7436_v56  ;;  %v7155_v27 = vadd.f32 %v8624_v51, %v8616_v21 }
 0xea5   : > { %v8628_v48 = vpop.eup %8627  ;;  %8635 = vrcp.f32 %v7353_v10  ;;  %v7437_v1 = vadd.f32 1.0, %v8626_v33  ;;  %v7158_v36 = vmul.f32 0.5, %v7154_v24 }
 0xea6   : > { %8637 = vrcp.f32 %v7354_v15  ;;  %v7438_v60 = vadd.f32 1.0, %v8628_v48  ;;  %v7159_v20 = vmul.f32 0.5, %v7155_v27  ;;  %v8630_v6 = vpop.eup %8629 }
 0xea7   : > { %8639 = vrcp.f32 %v7437_v1  ;;  %7172 = vperm.xlu1 %8376, %v7158_v36   ;;  %v7439_v53 = vadd.f32 1.0, %v8630_v6  ;;  %v8632_v63 = vpop.eup %8631 }
 0xea8   : > { %8641 = vrcp.f32 %v7438_v60  ;;  %7177 = vperm.xlu0 %8375, %v7159_v20  }
 0xea9   : > { %8643 = vrcp.f32 %v7355_v54 }
 0xeaa   : > { %8645 = vrcp.f32 %v7439_v53 }
 0xeae   : > { %v8634_v2 = vpop.eup %8633 }
 0xeaf   : > { %v8636_v50 = vpop.eup %8635  ;;  %v7448_v41 = vadd.f32 %v8634_v2, %v8632_v63 }
 0xeb0   : > { %v8638_v13 = vpop.eup %8637 }
 0xeb1   : > { %v8640_v46 = vpop.eup %8639  ;;  %v7452_v7 = vmul.f32 0.5, %v7448_v41 }
 0xeb2   : > { %v8642_v22 = vpop.eup %8641  ;;  %v7449_v14 = vadd.f32 %v8640_v46, %v8636_v50 }
 0xeb3   : > { %v8644_v34 = vpop.eup %8643  ;;  %7458 = vperm.xlu1 %8376, %v7452_v7   ;;  %v7450_v26 = vadd.f32 %v8642_v22, %v8638_v13 }
 0xeb4   : > { %v8646_v11 = vpop.eup %8645  ;;  %v7453_v9 = vmul.f32 0.5, %v7449_v14 }
 0xeb5   : > { %v7454_v12 = vmul.f32 0.5, %v7450_v26  ;;  %v7451_v44 = vadd.f32 %v8646_v11, %v8644_v34 }
 0xeb6   : > { %7463 = vperm.xlu0 %8375, %v7453_v9  }
 0xeb7   : > { %7468 = vperm.xlu1 %8376, %v7454_v12   ;;  %v7455_v19 = vmul.f32 0.5, %v7451_v44 }
 0xeba   : > { %7473 = vperm.xlu0 %8375, %v7455_v19  }
 0xebb   : > { %7510 = vperm.xlu1 %8376, %v7504_v25  }
 0xebe   : > { %7515 = vperm.xlu0 %8375, %v7505_v55  }
 0xebf   : > { %7520 = vperm.xlu1 %8376, %v7506_v8  }
 0xec2   : > { %7525 = vperm.xlu0 %8375, %v7507_v57  }
 0xf1e   : > { %v7163_v52 = vpop.permute.xlu0 %7162 }
 0xf1f   : > { %v7180_v42 = vmul.f32 %v7163_v52, %v10548_v3  ;;  %v7181_v29 = vmul.f32 %v7163_v52, %v10550_v62  ;;  %v7168_v28 = vpop.permute.xlu1 %7167 }
 0xf20   : > { %v7182_v4 = vmul.f32 %v7168_v28, %v10552_v17  ;;  %v7183_v45 = vmul.f32 %v7168_v28, %v10554_v58 }
 0xf21   : > { %v7188_v61 = vadd.f32 %v7180_v42, %v10605_v23  ;;  %v7189_v43 = vadd.f32 %v7181_v29, %v10608_v38 }
 0xf22   : > { %v7190_v21 = vadd.f32 %v7182_v4, %v10610_v40  ;;  %v7191_v31 = vadd.f32 %v7183_v45, %v10612_v59 }
 0xf24   : > { %v7492_v18 = vpack.c.bf16 %v7190_v21, %v7188_v61  ;;  %v7493_v47 = vpack.c.bf16 %v7191_v31, %v7189_v43 }
 0xf26   : > { %7545 = vmatprep.subr.bf16.mxu0 %v7493_v47  ;;  %v7173_v10 = vpop.permute.xlu1 %7172 }
 0xf27   : > { %v7178_v30 = vpop.permute.xlu0 %7177  ;;  %7546 = vmatpush1.bf16.msra.mxu0 %v7492_v18  ;;  %v7184_v15 = vmul.f32 %v7173_v10, %v10568_v32  ;;  %v7185_v56 = vmul.f32 %v7173_v10, %v10570_v5 }
 0xf28   : > { %v7186_v51 = vmul.f32 %v7178_v30, %v10572_v0  ;;  %v7187_v24 = vmul.f32 %v7178_v30, %v10574_v37 }
 0xf29   : > { %v7192_v33 = vadd.f32 %v7184_v15, %v10618_v35  ;;  %v7193_v27 = vadd.f32 %v7185_v56, %v10620_v49 }
 0xf2a   : > { %v7194_v48 = vadd.f32 %v7186_v51, %v10614_v16  ;;  %v7195_v54 = vadd.f32 %v7187_v24, %v10616_v39 }
 0xf2c   : > { %v7494_v1 = vpack.c.bf16 %v7194_v48, %v7192_v33  ;;  %v7495_v36 = vpack.c.bf16 %v7195_v54, %v7193_v27 }
 0xf2e   : > { %7547 = vmatprep.subr.bf16.mxu0 %v7495_v36 }
 0xf2f   : > { %7548 = vmatpush1.bf16.msra.mxu0 %v7494_v1 }
 0xf32   : > { %v7459_v60 = vpop.permute.xlu1 %7458 }
 0xf33   : > { %v7476_v20 = vmul.f32 %v7459_v60, %v10605_v23  ;;  %v7477_v6 = vmul.f32 %v7459_v60, %v10608_v38 }
 0xf35   : > { %v7464_v53 = vpop.permute.xlu0 %7463  ;;  %v7484_v50 = vadd.f32 %v7476_v20, %v10548_v3  ;;  %v7485_v41 = vadd.f32 %v7477_v6, %v10550_v62 }
 0xf36   : > { %v7478_v63 = vmul.f32 %v7464_v53, %v10610_v40  ;;  %v7479_v2 = vmul.f32 %v7464_v53, %v10612_v59  ;;  %v7469_v13 = vpop.permute.xlu1 %7468 }
 0xf37   : > { %v7480_v46 = vmul.f32 %v7469_v13, %v10618_v35  ;;  %v7481_v7 = vmul.f32 %v7469_v13, %v10620_v49 }
 0xf38   : > { %v7486_v22 = vadd.f32 %v7478_v63, %v10552_v17  ;;  %v7487_v23 = vadd.f32 %v7479_v2, %v10554_v58 }
 0xf39   : > { %v7474_v14 = vpop.permute.xlu0 %7473  ;;  %v7488_v38 = vadd.f32 %v7480_v46, %v10568_v32  ;;  %v7489_v40 = vadd.f32 %v7481_v7, %v10570_v5  ;;  %v8485_v32 = vld [vmem:[%s10931_s7] sm:$0xff]  }
 0xf3a   : > { %v7496_v34 = vpack.c.bf16 %v7486_v22, %v7484_v50  ;;  %v7482_v59 = vmul.f32 %v7474_v14, %v10614_v16  ;;  %v7483_v3 = vmul.f32 %v7474_v14, %v10616_v39  ;;  %v7497_v62 = vpack.c.bf16 %v7487_v23, %v7485_v41  ;;  %v8665_v5 = vld [vmem:[#allocation2] sm:$0xff] }
 0xf3c   : > { %v7490_v26 = vadd.f32 %v7482_v59, %v10572_v0  ;;  %v7491_v35 = vadd.f32 %v7483_v3, %v10574_v37  ;;  %7549 = vmatprep.subr.bf16.mxu0 %v7497_v62  ;;  %v8486_v0 = vld [vmem:[%s10931_s7 + $0x8] sm:$0xff]   ;;  %v7511_v37 = vpop.permute.xlu1 %7510 }
 0xf3d   : > { %7550 = vmatpush1.bf16.msra.mxu0 %v7496_v34  ;;  %v7516_v11 = vpop.permute.xlu0 %7515 }
 0xf3e   : > { %v7498_v17 = vpack.c.bf16 %v7490_v26, %v7488_v38  ;;  %v7499_v58 = vpack.c.bf16 %v7491_v35, %v7489_v40 }
 0xf40   : > { %7551 = vmatprep.subr.bf16.mxu0 %v7499_v58  ;;  %v7521_v55 = vpop.permute.xlu1 %7520 }
 0xf41   : > { %7552 = vmatpush1.bf16.msra.mxu0 %v7498_v17  ;;  %v7526_v42 = vpop.permute.xlu0 %7525 }
 0xf44   : > { %8024 = vmatmul.mubr.msk.bf16.vlgmr.msra.gmra.mrb[72].mxu0 %vm7538_vm9, %v8485_v32 }
 0xf45   : > { %7587 = vmatprep.mubr.bf16.mxu0 %v8665_v5 }
 0xf4c   : > { %8025 = vmatmul.mubr.msk.bf16.gmra.mrb[76].mxu0 %vm7538_vm9, %v8486_v0 }
0x1017   : > { %v7579_v16 = vpop.f32.mrb[72].mxu0 }
0x1018   : > { %v7580_v39 = vadd.f32 %v7579_v16, %v7511_v37  ;;  %v7581_v49 = vpop.f32.mrb[73].mxu0 }
0x1019   : > { %v7582_v9 = vadd.f32 %v7581_v49, %v7511_v37  ;;  %v7583_v12 = vpop.f32.mrb[74].mxu0 }
0x101a   : > { %7598 = vst [vmem:[%s376_s18] sm:$0xff] %v7580_v39  ;;  %v7584_v44 = vadd.f32 %v7583_v12, %v7516_v11  ;;  %v7585_v19 = vpop.f32.mrb[75].mxu0 }
0x101b   : > { %7599 = vst [vmem:[%s376_s18 + $0x8] sm:$0xff] %v7582_v9  ;;  %v7586_v25 = vadd.f32 %v7585_v19, %v7516_v11 }
0x101c   : > { %7600 = vst [vmem:[%s376_s18 + $0x10] sm:$0xff] %v7584_v44 }
0x101d   : > { %7601 = vst [vmem:[%s376_s18 + $0x18] sm:$0xff] %v7586_v25 }
0x101f   : > { %v7589_v8 = vpop.f32.mrb[76].mxu0 }
0x1020   : > { %v7590_v57 = vadd.f32 %v7589_v8, %v7521_v55  ;;  %v7591_v52 = vpop.f32.mrb[77].mxu0 }
0x1021   : > { %v7592_v29 = vadd.f32 %v7591_v52, %v7521_v55  ;;  %v7593_v28 = vpop.f32.mrb[78].mxu0 }
0x1022   : > { %7602 = vst [vmem:[%s376_s18 + $0x20] sm:$0xff] %v7590_v57  ;;  %v7594_v4 = vadd.f32 %v7593_v28, %v7526_v42  ;;  %v7595_v45 = vpop.f32.mrb[79].mxu0 }
0x1023   : > { %7603 = vst [vmem:[%s376_s18 + $0x28] sm:$0xff] %v7592_v29  ;;  %v7596_v61 = vadd.f32 %v7595_v45, %v7526_v42 }
0x1024   : > { %7604 = vst [vmem:[%s376_s18 + $0x30] sm:$0xff] %v7594_v4 }
0x1025   : > { %7605 = vst [vmem:[%s376_s18 + $0x38] sm:$0xff] %v7596_v61 }
0x1026 PF: > { %s21_s30 = sadd.s32 1, %s8764_s30  }
0x1027   : > { %p18_p5 = scmp.ge.s32.totalorder %s21_s30, 4  }
0x1029   :  { %20 = sbr.rel (!%p18_p5) target bundleno = 2 (0x2), region = 185 }
0x1030   :  { %7627 = vsyncpa [#allocation6], 1 }
0x1031   :  { %7629 = vsyncpa [#allocation6 + $0x1], 1 }
0x1032   :  { %7630 = vsyncpa [#allocation8], 1 }

</bundles_post_ra>
